<compile_context>
chip_gen: v5e
topology: v5e:2x2
jax: 0.10.0
libtpu: 0.0.40
codegen_flags: <defaults>
</compile_context>

<pallas_src>
import functools

import numpy as np
import jax
import jax.numpy as jnp
from jax import lax
from jax.experimental import pallas as pl
from jax.experimental.pallas import tpu as pltpu


def _round_up(v, m):
    return (v + m - 1) // m * m


def _pick_batch_tile(n):
    """Largest divisor of n that still leaves >= 2 grid steps (v7x has 2 TCs)."""
    cap = min(8, max(1, n // 2))
    bt = 1
    for c in range(1, cap + 1):
        if n % c == 0:
            bt = c
    return bt


# ----------------------------------------------------------------------------
# Fused forward: one pallas_call for the whole RefinementBlock
# ----------------------------------------------------------------------------
def refinement_block_forward(x_nchw, w_first, b_first, w_body, b_body,
                             w_last, b_last, num_blocks, batch_tile=None):
    N, C_in, H, W = x_nchw.shape
    F = w_first.shape[0]
    C_out = w_last.shape[0]
    assert C_in == C_out, "residual add requires in_channels == out_channels"
    assert len(w_body) == 2 * num_blocks and len(b_body) == 2 * num_blocks

    # channel padding: multiples of 16 -> bf16 sublane-pack-aligned slab stores
    CP = _round_up(max(C_in, C_out), 16)
    FP = _round_up(F, 16)
    H_pad, W_pad = H + 2, W + 2
    M_pad = H_pad * W_pad                      # flattened padded spatial size
    BT = _pick_batch_tile(N) if batch_tile is None else batch_tile
    assert N % BT == 0
    G = N // BT                                # grid size
    L = BT * M_pad                             # lane extent per grid step
    K_MAX = 9 * max(CP, FP)
    in_dtype = x_nchw.dtype

    # ---- wrapper layout: NO transpose (NCHW already has channels before
    #      spatial == channels-in-sublanes layout); just pad + reshape ---------
    x_pad = jnp.pad(x_nchw.astype(jnp.float32),
                    ((0, 0), (0, CP - C_in), (1, 1), (1, 1)))
    x_flat = x_pad.reshape(N, CP, M_pad)
    # fold BT images onto the lane axis (trivial when BT == 1)
    x_fold = (x_flat.reshape(G, BT, CP, M_pad)
              .transpose(0, 2, 1, 3)
              .reshape(G, CP, L))

    # interior mask (compile-time numpy constant; 1.0 at valid output centers)
    idx = np.arange(M_pad)
    rr, cc = idx // W_pad, idx % W_pad
    m_np = ((rr >= 1) & (rr <= H) & (cc >= 1) & (cc <= W)).astype(np.float32)
    mask_host = jnp.asarray(np.tile(m_np, BT).reshape(1, L))

    # weights: OIHW -> (C_out_p, 9*C_in_p) bf16, K index = (ky*3+kx)*C_in_p + ci
    def w_mat(w, cop, cip):
        o, i, kh, kw = w.shape
        wt = jnp.transpose(w, (0, 2, 3, 1)).reshape(o, kh * kw, i)
        full = jnp.zeros((cop, kh * kw, cip), jnp.float32).at[:o, :, :i].set(wt)
        return full.reshape(cop, kh * kw * cip).astype(jnp.bfloat16)

    def b_col(b, cop):
        return jnp.zeros((cop, 1), jnp.float32).at[:b.shape[0], 0].set(
            b.astype(jnp.float32))

    wf = w_mat(w_first, FP, CP)                              # (FP, 9*CP)
    bf = b_col(b_first, FP)                                  # (FP, 1)
    wb = jnp.stack([w_mat(w, FP, FP) for w in w_body])       # (2nb, FP, 9*FP)
    bb = jnp.stack([b_col(b, FP) for b in b_body])           # (2nb, FP, 1)
    wl = w_mat(w_last, CP, FP)                               # (CP, 9*FP)
    bl = b_col(b_last, CP)                                   # (CP, 1)

    # flat-index shift of each tap (ky, kx); t = ky*3 + kx
    TAP_SHIFTS = tuple((ky - 1) * W_pad + (kx - 1)
                       for ky in range(3) for kx in range(3))

    def shift_lanes(v, d):
        """out[:, p] = v[:, (p + d) % L].

        Cyclic wrap / cross-image bleed only lands on pad-ring output lanes,
        which are re-zeroed by the interior mask after every conv.  Lowered as
        two lane slices + a lane concat (same ops jnp.roll lowers to; an XLU
        lane rotation in practice).
        """
        s = d % L
        if s == 0:
            return v
        return jnp.concatenate([v[:, s:], v[:, :s]], axis=1)

    # -------------------------- the fused kernel ------------------------------
    def kernel(x_ref, mask_ref, wf_ref, bf_ref, wb_ref, bb_ref, wl_ref, bl_ref,
               out_ref, slab_ref):
        mask = mask_ref[...]                       # (1, L)   f32
        x = x_ref[0]                               # (CP, L)  f32, pad ring == 0

        def conv3x3(act_bf16, cin, w_bf16, bias_f32, relu):
            # Build the (9*cin, L) im2col slab in VMEM (sublane-aligned writes:
            # cin is a multiple of 16), then ONE deep-K MXU matmul.
            for t, d in enumerate(TAP_SHIFTS):
                slab_ref[t * cin:(t + 1) * cin, :] = shift_lanes(act_bf16, d)
            acc = jnp.dot(w_bf16, slab_ref[0:9 * cin, :],
                          preferred_element_type=jnp.float32)
            acc = (acc + bias_f32) * mask          # re-zero the pad ring
            if relu:
                acc = jnp.maximum(acc, 0.0)
            return acc                             # (cout, L) f32

        # conv_first (no activation in the PyTorch forward)
        feat = conv3x3(x.astype(jnp.bfloat16), CP, wf_ref[...], bf_ref[...],
                       False).astype(jnp.bfloat16)

        # body: num_blocks x ResidualBlockNoBN  (identity + conv2(relu(conv1)))
        # kept as a static Python loop (num_blocks <= 4); see TODO for fori_loop
        for i in range(num_blocks):
            identity = feat
            h = conv3x3(feat, FP, wb_ref[2 * i], bb_ref[2 * i],
                        True).astype(jnp.bfloat16)
            h2 = conv3x3(h, FP, wb_ref[2 * i + 1], bb_ref[2 * i + 1], False)
            feat = (identity.astype(jnp.float32) + h2).astype(jnp.bfloat16)

        # conv_last + global skip connection (skip path stays f32)
        res = conv3x3(feat, FP, wl_ref[...], bl_ref[...], False)
        out_ref[0] = (x + res).astype(out_ref.dtype)

    out_fold = pl.pallas_call(
        kernel,
        out_shape=jax.ShapeDtypeStruct((G, CP, L), jnp.float32),
        grid_spec=pltpu.PrefetchScalarGridSpec(
            num_scalar_prefetch=0,
            grid=(G,),
            in_specs=[
                pl.BlockSpec((1, CP, L), lambda g: (g, 0, 0)),   # x (folded)
                pl.BlockSpec((1, L), lambda g: (0, 0)),          # interior mask
                pl.BlockSpec(wf.shape, lambda g: (0, 0)),        # w_first
                pl.BlockSpec(bf.shape, lambda g: (0, 0)),        # b_first
                pl.BlockSpec(wb.shape, lambda g: (0, 0, 0)),     # w_body
                pl.BlockSpec(bb.shape, lambda g: (0, 0, 0)),     # b_body
                pl.BlockSpec(wl.shape, lambda g: (0, 0)),        # w_last
                pl.BlockSpec(bl.shape, lambda g: (0, 0)),        # b_last
            ],
            out_specs=pl.BlockSpec((1, CP, L), lambda g: (g, 0, 0)),
            scratch_shapes=[pltpu.VMEM((K_MAX, L), jnp.bfloat16)],  # im2col slab
        ),
        compiler_params=pltpu.CompilerParams(
            dimension_semantics=("parallel",),
        ),
    )(x_fold, mask_host, wf, bf, wb, bb, wl, bl)

    # unfold batch, drop pad ring + channel padding, back to NCHW
    out = (out_fold.reshape(G, CP, BT, M_pad)
           .transpose(0, 2, 1, 3)
           .reshape(N, CP, H_pad, W_pad)[:, :C_out, 1:-1, 1:-1])
    return out.astype(in_dtype)


# ----------------------------------------------------------------------------
# Module wrapper holding parameters (PyTorch OIHW layout, PyTorch-style init)
# ----------------------------------------------------------------------------
class RefinementBlockPallas:
    def __init__(self, in_channels, out_channels, n_features, num_blocks=3, *,
                 key):
        self.num_blocks = num_blocks

        def conv_init(k, o, i):
            k1, k2 = jax.random.split(k)
            bound = 1.0 / np.sqrt(i * 9)            # ~ PyTorch Conv2d default
            w = jax.random.uniform(k1, (o, i, 3, 3), jnp.float32, -bound, bound)
            b = jax.random.uniform(k2, (o,), jnp.float32, -bound, bound)
            return w, b

        keys = jax.random.split(key, 2 + 2 * num_blocks)
        self.w_first, self.b_first = conv_init(keys[0], n_features, in_channels)
        self.w_body, self.b_body = [], []
        for i in range(num_blocks):
            w1, b1 = conv_init(keys[1 + 2 * i], n_features, n_features)
            w2, b2 = conv_init(keys[2 + 2 * i], n_features, n_features)
            self.w_body += [w1, w2]
            self.b_body += [b1, b2]
        self.w_last, self.b_last = conv_init(keys[1 + 2 * num_blocks],
                                             out_channels, n_features)

        self._fwd = jax.jit(functools.partial(refinement_block_forward,
                                              num_blocks=num_blocks))

    def __call__(self, x_nchw):
        return self._fwd(x_nchw, self.w_first, self.b_first, self.w_body,
                         self.b_body, self.w_last, self.b_last)


# ----------------------------------------------------------------------------
# Pure-JAX f32 reference (matches PyTorch semantics) for verification
# ----------------------------------------------------------------------------
def _ref_conv(x, w, b):
    y = lax.conv_general_dilated(
        x, w, window_strides=(1, 1), padding=((1, 1), (1, 1)),
        dimension_numbers=('NCHW', 'OIHW', 'NCHW'))
    return y + b[None, :, None, None]


def _ref_forward(m, x):
    y = _ref_conv(x, m.w_first, m.b_first)
    for i in range(m.num_blocks):
        identity = y
        h = jnp.maximum(_ref_conv(y, m.w_body[2 * i], m.b_body[2 * i]), 0.0)
        y = identity + _ref_conv(h, m.w_body[2 * i + 1], m.b_body[2 * i + 1])
    return x + _ref_conv(y, m.w_last, m.b_last)


if __name__ == "__main__":
    key = jax.random.PRNGKey(0)
    k_x, k_p = jax.random.split(key)

    N, C, H, W = 2, 4, 16, 16          # in_channels == out_channels == 4
    n_features = 32
    x = jax.random.normal(k_x, (N, C, H, W), jnp.float32)

    block = RefinementBlockPallas(C, C, n_features, num_blocks=3, key=k_p)

    out = jax.block_until_ready(block(x))
    assert out.shape == (N, C, H, W), out.shape

    ref = jax.block_until_ready(_ref_forward(block, x))
    err = float(jnp.max(jnp.abs(out - ref)))
    # bf16 MXU inputs with f32 accumulation: expected max error ~1e-3 .. 1e-2.
    assert jnp.allclose(out, ref, atol=2e-2, rtol=2e-2), err

    print("KERNEL_OK")
</pallas_src>

<mosaic_0001>
module attributes {stable_mosaic.version = 11 : i64} {
  func.func @kernel(%arg0: i32, %arg1: memref<1x16x324xf32, #tpu.memory_space<vmem>>, %arg2: memref<1x324xf32, #tpu.memory_space<vmem>>, %arg3: memref<32x144xbf16, #tpu.memory_space<vmem>>, %arg4: memref<32x1xf32, #tpu.memory_space<vmem>>, %arg5: memref<6x32x288xbf16, #tpu.memory_space<vmem>>, %arg6: memref<6x32x1xf32, #tpu.memory_space<vmem>>, %arg7: memref<16x288xbf16, #tpu.memory_space<vmem>>, %arg8: memref<16x1xf32, #tpu.memory_space<vmem>>, %arg9: memref<1x16x324xf32, #tpu.memory_space<vmem>>, %arg10: memref<288x324xbf16, #tpu.memory_space<vmem>>) attributes {dimension_semantics = [#tpu.dimension_semantics<parallel>], iteration_bounds = array<i64: 2>, scalar_prefetch = 0 : i64, scratch_operands = 1 : i64, tpu.core_type = #tpu.core_type<tc>, window_params = [{transform_indices = @transform_0, window_bounds = array<i64: 1, 16, 324>}, {pipeline_mode = #tpu.pipeline_mode<synchronous>, transform_indices = @transform_1, window_bounds = array<i64: 1, 324>}, {pipeline_mode = #tpu.pipeline_mode<synchronous>, transform_indices = @transform_2, window_bounds = array<i64: 32, 144>}, {pipeline_mode = #tpu.pipeline_mode<synchronous>, transform_indices = @transform_3, window_bounds = array<i64: 32, 1>}, {pipeline_mode = #tpu.pipeline_mode<synchronous>, transform_indices = @transform_4, window_bounds = array<i64: 6, 32, 288>}, {pipeline_mode = #tpu.pipeline_mode<synchronous>, transform_indices = @transform_5, window_bounds = array<i64: 6, 32, 1>}, {pipeline_mode = #tpu.pipeline_mode<synchronous>, transform_indices = @transform_6, window_bounds = array<i64: 16, 288>}, {pipeline_mode = #tpu.pipeline_mode<synchronous>, transform_indices = @transform_7, window_bounds = array<i64: 16, 1>}, {transform_indices = @transform_8, window_bounds = array<i64: 1, 16, 324>}]} {
    %c0 = arith.constant 0 : index
    %c0_0 = arith.constant 0 : index
    %0 = vector.load %arg2[%c0, %c0_0] : memref<1x324xf32, #tpu.memory_space<vmem>>, vector<1x324xf32>
    %c0_1 = arith.constant 0 : index
    %c0_2 = arith.constant 0 : index
    %c0_3 = arith.constant 0 : index
    %1 = vector.load %arg1[%c0_1, %c0_2, %c0_3] : memref<1x16x324xf32, #tpu.memory_space<vmem>>, vector<1x16x324xf32>
    %2 = vector.shape_cast %1 : vector<1x16x324xf32> to vector<16x324xf32>
    %3 = arith.truncf %2 : vector<16x324xf32> to vector<16x324xbf16>
    %c0_4 = arith.constant 0 : index
    %c0_5 = arith.constant 0 : index
    %4 = vector.load %arg3[%c0_4, %c0_5] : memref<32x144xbf16, #tpu.memory_space<vmem>>, vector<32x144xbf16>
    %c0_6 = arith.constant 0 : index
    %c0_7 = arith.constant 0 : index
    %5 = vector.load %arg4[%c0_6, %c0_7] : memref<32x1xf32, #tpu.memory_space<vmem>>, vector<32x1xf32>
    %6 = vector.extract_strided_slice %3 {offsets = [0, 305], sizes = [16, 19], strides = [1, 1]} : vector<16x324xbf16> to vector<16x19xbf16>
    %7 = vector.extract_strided_slice %3 {offsets = [0, 0], sizes = [16, 305], strides = [1, 1]} : vector<16x324xbf16> to vector<16x305xbf16>
    %8 = tpu.concatenate %6, %7 in 1 : vector<16x19xbf16>, vector<16x305xbf16> -> vector<16x324xbf16>
    %c0_8 = arith.constant 0 : index
    %c0_9 = arith.constant 0 : index
    %9 = vector.load %arg10[%c0_8, %c0_9] : memref<288x324xbf16, #tpu.memory_space<vmem>>, vector<16x324xbf16>
    tpu.vector_store %arg10[%c0_8, %c0_9], %8 {strides = array<i32>} : memref<288x324xbf16, #tpu.memory_space<vmem>>, vector<16x324xbf16>,
    %10 = vector.extract_strided_slice %3 {offsets = [0, 306], sizes = [16, 18], strides = [1, 1]} : vector<16x324xbf16> to vector<16x18xbf16>
    %11 = vector.extract_strided_slice %3 {offsets = [0, 0], sizes = [16, 306], strides = [1, 1]} : vector<16x324xbf16> to vector<16x306xbf16>
    %12 = tpu.concatenate %10, %11 in 1 : vector<16x18xbf16>, vector<16x306xbf16> -> vector<16x324xbf16>
    %c16 = arith.constant 16 : index
    %c0_10 = arith.constant 0 : index
    %13 = vector.load %arg10[%c16, %c0_10] : memref<288x324xbf16, #tpu.memory_space<vmem>>, vector<16x324xbf16>
    tpu.vector_store %arg10[%c16, %c0_10], %12 {strides = array<i32>} : memref<288x324xbf16, #tpu.memory_space<vmem>>, vector<16x324xbf16>,
    %14 = vector.extract_strided_slice %3 {offsets = [0, 307], sizes = [16, 17], strides = [1, 1]} : vector<16x324xbf16> to vector<16x17xbf16>
    %15 = vector.extract_strided_slice %3 {offsets = [0, 0], sizes = [16, 307], strides = [1, 1]} : vector<16x324xbf16> to vector<16x307xbf16>
    %16 = tpu.concatenate %14, %15 in 1 : vector<16x17xbf16>, vector<16x307xbf16> -> vector<16x324xbf16>
    %c32 = arith.constant 32 : index
    %c0_11 = arith.constant 0 : index
    %17 = vector.load %arg10[%c32, %c0_11] : memref<288x324xbf16, #tpu.memory_space<vmem>>, vector<16x324xbf16>
    tpu.vector_store %arg10[%c32, %c0_11], %16 {strides = array<i32>} : memref<288x324xbf16, #tpu.memory_space<vmem>>, vector<16x324xbf16>,
    %18 = vector.extract_strided_slice %3 {offsets = [0, 323], sizes = [16, 1], strides = [1, 1]} : vector<16x324xbf16> to vector<16x1xbf16>
    %19 = vector.extract_strided_slice %3 {offsets = [0, 0], sizes = [16, 323], strides = [1, 1]} : vector<16x324xbf16> to vector<16x323xbf16>
    %20 = tpu.concatenate %18, %19 in 1 : vector<16x1xbf16>, vector<16x323xbf16> -> vector<16x324xbf16>
    %c48 = arith.constant 48 : index
    %c0_12 = arith.constant 0 : index
    %21 = vector.load %arg10[%c48, %c0_12] : memref<288x324xbf16, #tpu.memory_space<vmem>>, vector<16x324xbf16>
    tpu.vector_store %arg10[%c48, %c0_12], %20 {strides = array<i32>} : memref<288x324xbf16, #tpu.memory_space<vmem>>, vector<16x324xbf16>,
    %c64 = arith.constant 64 : index
    %c0_13 = arith.constant 0 : index
    %22 = vector.load %arg10[%c64, %c0_13] : memref<288x324xbf16, #tpu.memory_space<vmem>>, vector<16x324xbf16>
    tpu.vector_store %arg10[%c64, %c0_13], %3 {strides = array<i32>} : memref<288x324xbf16, #tpu.memory_space<vmem>>, vector<16x324xbf16>,
    %23 = vector.extract_strided_slice %3 {offsets = [0, 1], sizes = [16, 323], strides = [1, 1]} : vector<16x324xbf16> to vector<16x323xbf16>
    %24 = vector.extract_strided_slice %3 {offsets = [0, 0], sizes = [16, 1], strides = [1, 1]} : vector<16x324xbf16> to vector<16x1xbf16>
    %25 = tpu.concatenate %23, %24 in 1 : vector<16x323xbf16>, vector<16x1xbf16> -> vector<16x324xbf16>
    %c80 = arith.constant 80 : index
    %c0_14 = arith.constant 0 : index
    %26 = vector.load %arg10[%c80, %c0_14] : memref<288x324xbf16, #tpu.memory_space<vmem>>, vector<16x324xbf16>
    tpu.vector_store %arg10[%c80, %c0_14], %25 {strides = array<i32>} : memref<288x324xbf16, #tpu.memory_space<vmem>>, vector<16x324xbf16>,
    %27 = vector.extract_strided_slice %3 {offsets = [0, 17], sizes = [16, 307], strides = [1, 1]} : vector<16x324xbf16> to vector<16x307xbf16>
    %28 = vector.extract_strided_slice %3 {offsets = [0, 0], sizes = [16, 17], strides = [1, 1]} : vector<16x324xbf16> to vector<16x17xbf16>
    %29 = tpu.concatenate %27, %28 in 1 : vector<16x307xbf16>, vector<16x17xbf16> -> vector<16x324xbf16>
    %c96 = arith.constant 96 : index
    %c0_15 = arith.constant 0 : index
    %30 = vector.load %arg10[%c96, %c0_15] : memref<288x324xbf16, #tpu.memory_space<vmem>>, vector<16x324xbf16>
    tpu.vector_store %arg10[%c96, %c0_15], %29 {strides = array<i32>} : memref<288x324xbf16, #tpu.memory_space<vmem>>, vector<16x324xbf16>,
    %31 = vector.extract_strided_slice %3 {offsets = [0, 18], sizes = [16, 306], strides = [1, 1]} : vector<16x324xbf16> to vector<16x306xbf16>
    %32 = vector.extract_strided_slice %3 {offsets = [0, 0], sizes = [16, 18], strides = [1, 1]} : vector<16x324xbf16> to vector<16x18xbf16>
    %33 = tpu.concatenate %31, %32 in 1 : vector<16x306xbf16>, vector<16x18xbf16> -> vector<16x324xbf16>
    %c112 = arith.constant 112 : index
    %c0_16 = arith.constant 0 : index
    %34 = vector.load %arg10[%c112, %c0_16] : memref<288x324xbf16, #tpu.memory_space<vmem>>, vector<16x324xbf16>
    tpu.vector_store %arg10[%c112, %c0_16], %33 {strides = array<i32>} : memref<288x324xbf16, #tpu.memory_space<vmem>>, vector<16x324xbf16>,
    %35 = vector.extract_strided_slice %3 {offsets = [0, 19], sizes = [16, 305], strides = [1, 1]} : vector<16x324xbf16> to vector<16x305xbf16>
    %36 = vector.extract_strided_slice %3 {offsets = [0, 0], sizes = [16, 19], strides = [1, 1]} : vector<16x324xbf16> to vector<16x19xbf16>
    %37 = tpu.concatenate %35, %36 in 1 : vector<16x305xbf16>, vector<16x19xbf16> -> vector<16x324xbf16>
    %c128 = arith.constant 128 : index
    %c0_17 = arith.constant 0 : index
    %38 = vector.load %arg10[%c128, %c0_17] : memref<288x324xbf16, #tpu.memory_space<vmem>>, vector<16x324xbf16>
    tpu.vector_store %arg10[%c128, %c0_17], %37 {strides = array<i32>} : memref<288x324xbf16, #tpu.memory_space<vmem>>, vector<16x324xbf16>,
    %c0_18 = arith.constant 0 : index
    %c0_19 = arith.constant 0 : index
    %39 = vector.load %arg10[%c0_18, %c0_19] : memref<288x324xbf16, #tpu.memory_space<vmem>>, vector<144x324xbf16>
    %cst = arith.constant dense<0.000000e+00> : vector<32x324xf32>
    %40 = tpu.matmul %4, %39, %cst {dimension_numbers = #tpu.dot_dimension_numbers<[1], [0], [0], [1], [0, 0, 1, 1], [], []>} : vector<32x144xbf16>, vector<144x324xbf16>, vector<32x324xf32> -> vector<32x324xf32>
    %41 = vector.broadcast %5 : vector<32x1xf32> to vector<32x324xf32>
    %42 = arith.addf %40, %41 : vector<32x324xf32>
    %43 = vector.broadcast %0 : vector<1x324xf32> to vector<32x324xf32>
    %44 = arith.mulf %42, %43 : vector<32x324xf32>
    %45 = arith.truncf %44 : vector<32x324xf32> to vector<32x324xbf16>
    %c0_20 = arith.constant 0 : index
    %c0_21 = arith.constant 0 : index
    %c0_22 = arith.constant 0 : index
    %46 = vector.load %arg5[%c0_20, %c0_21, %c0_22] : memref<6x32x288xbf16, #tpu.memory_space<vmem>>, vector<1x32x288xbf16>
    %47 = vector.shape_cast %46 : vector<1x32x288xbf16> to vector<32x288xbf16>
    %c0_23 = arith.constant 0 : index
    %c0_24 = arith.constant 0 : index
    %c0_25 = arith.constant 0 : index
    %48 = vector.load %arg6[%c0_23, %c0_24, %c0_25] : memref<6x32x1xf32, #tpu.memory_space<vmem>>, vector<1x32x1xf32>
    %49 = vector.shape_cast %48 : vector<1x32x1xf32> to vector<32x1xf32>
    %50 = vector.extract_strided_slice %45 {offsets = [0, 305], sizes = [32, 19], strides = [1, 1]} : vector<32x324xbf16> to vector<32x19xbf16>
    %51 = vector.extract_strided_slice %45 {offsets = [0, 0], sizes = [32, 305], strides = [1, 1]} : vector<32x324xbf16> to vector<32x305xbf16>
    %52 = tpu.concatenate %50, %51 in 1 : vector<32x19xbf16>, vector<32x305xbf16> -> vector<32x324xbf16>
    %c0_26 = arith.constant 0 : index
    %c0_27 = arith.constant 0 : index
    %53 = vector.load %arg10[%c0_26, %c0_27] : memref<288x324xbf16, #tpu.memory_space<vmem>>, vector<32x324xbf16>
    tpu.vector_store %arg10[%c0_26, %c0_27], %52 {strides = array<i32>} : memref<288x324xbf16, #tpu.memory_space<vmem>>, vector<32x324xbf16>,
    %54 = vector.extract_strided_slice %45 {offsets = [0, 306], sizes = [32, 18], strides = [1, 1]} : vector<32x324xbf16> to vector<32x18xbf16>
    %55 = vector.extract_strided_slice %45 {offsets = [0, 0], sizes = [32, 306], strides = [1, 1]} : vector<32x324xbf16> to vector<32x306xbf16>
    %56 = tpu.concatenate %54, %55 in 1 : vector<32x18xbf16>, vector<32x306xbf16> -> vector<32x324xbf16>
    %c32_28 = arith.constant 32 : index
    %c0_29 = arith.constant 0 : index
    %57 = vector.load %arg10[%c32_28, %c0_29] : memref<288x324xbf16, #tpu.memory_space<vmem>>, vector<32x324xbf16>
    tpu.vector_store %arg10[%c32_28, %c0_29], %56 {strides = array<i32>} : memref<288x324xbf16, #tpu.memory_space<vmem>>, vector<32x324xbf16>,
    %58 = vector.extract_strided_slice %45 {offsets = [0, 307], sizes = [32, 17], strides = [1, 1]} : vector<32x324xbf16> to vector<32x17xbf16>
    %59 = vector.extract_strided_slice %45 {offsets = [0, 0], sizes = [32, 307], strides = [1, 1]} : vector<32x324xbf16> to vector<32x307xbf16>
    %60 = tpu.concatenate %58, %59 in 1 : vector<32x17xbf16>, vector<32x307xbf16> -> vector<32x324xbf16>
    %c64_30 = arith.constant 64 : index
    %c0_31 = arith.constant 0 : index
    %61 = vector.load %arg10[%c64_30, %c0_31] : memref<288x324xbf16, #tpu.memory_space<vmem>>, vector<32x324xbf16>
    tpu.vector_store %arg10[%c64_30, %c0_31], %60 {strides = array<i32>} : memref<288x324xbf16, #tpu.memory_space<vmem>>, vector<32x324xbf16>,
    %62 = vector.extract_strided_slice %45 {offsets = [0, 323], sizes = [32, 1], strides = [1, 1]} : vector<32x324xbf16> to vector<32x1xbf16>
    %63 = vector.extract_strided_slice %45 {offsets = [0, 0], sizes = [32, 323], strides = [1, 1]} : vector<32x324xbf16> to vector<32x323xbf16>
    %64 = tpu.concatenate %62, %63 in 1 : vector<32x1xbf16>, vector<32x323xbf16> -> vector<32x324xbf16>
    %c96_32 = arith.constant 96 : index
    %c0_33 = arith.constant 0 : index
    %65 = vector.load %arg10[%c96_32, %c0_33] : memref<288x324xbf16, #tpu.memory_space<vmem>>, vector<32x324xbf16>
    tpu.vector_store %arg10[%c96_32, %c0_33], %64 {strides = array<i32>} : memref<288x324xbf16, #tpu.memory_space<vmem>>, vector<32x324xbf16>,
    %c128_34 = arith.constant 128 : index
    %c0_35 = arith.constant 0 : index
    %66 = vector.load %arg10[%c128_34, %c0_35] : memref<288x324xbf16, #tpu.memory_space<vmem>>, vector<32x324xbf16>
    tpu.vector_store %arg10[%c128_34, %c0_35], %45 {strides = array<i32>} : memref<288x324xbf16, #tpu.memory_space<vmem>>, vector<32x324xbf16>,
    %67 = vector.extract_strided_slice %45 {offsets = [0, 1], sizes = [32, 323], strides = [1, 1]} : vector<32x324xbf16> to vector<32x323xbf16>
    %68 = vector.extract_strided_slice %45 {offsets = [0, 0], sizes = [32, 1], strides = [1, 1]} : vector<32x324xbf16> to vector<32x1xbf16>
    %69 = tpu.concatenate %67, %68 in 1 : vector<32x323xbf16>, vector<32x1xbf16> -> vector<32x324xbf16>
    %c160 = arith.constant 160 : index
    %c0_36 = arith.constant 0 : index
    %70 = vector.load %arg10[%c160, %c0_36] : memref<288x324xbf16, #tpu.memory_space<vmem>>, vector<32x324xbf16>
    tpu.vector_store %arg10[%c160, %c0_36], %69 {strides = array<i32>} : memref<288x324xbf16, #tpu.memory_space<vmem>>, vector<32x324xbf16>,
    %71 = vector.extract_strided_slice %45 {offsets = [0, 17], sizes = [32, 307], strides = [1, 1]} : vector<32x324xbf16> to vector<32x307xbf16>
    %72 = vector.extract_strided_slice %45 {offsets = [0, 0], sizes = [32, 17], strides = [1, 1]} : vector<32x324xbf16> to vector<32x17xbf16>
    %73 = tpu.concatenate %71, %72 in 1 : vector<32x307xbf16>, vector<32x17xbf16> -> vector<32x324xbf16>
    %c192 = arith.constant 192 : index
    %c0_37 = arith.constant 0 : index
    %74 = vector.load %arg10[%c192, %c0_37] : memref<288x324xbf16, #tpu.memory_space<vmem>>, vector<32x324xbf16>
    tpu.vector_store %arg10[%c192, %c0_37], %73 {strides = array<i32>} : memref<288x324xbf16, #tpu.memory_space<vmem>>, vector<32x324xbf16>,
    %75 = vector.extract_strided_slice %45 {offsets = [0, 18], sizes = [32, 306], strides = [1, 1]} : vector<32x324xbf16> to vector<32x306xbf16>
    %76 = vector.extract_strided_slice %45 {offsets = [0, 0], sizes = [32, 18], strides = [1, 1]} : vector<32x324xbf16> to vector<32x18xbf16>
    %77 = tpu.concatenate %75, %76 in 1 : vector<32x306xbf16>, vector<32x18xbf16> -> vector<32x324xbf16>
    %c224 = arith.constant 224 : index
    %c0_38 = arith.constant 0 : index
    %78 = vector.load %arg10[%c224, %c0_38] : memref<288x324xbf16, #tpu.memory_space<vmem>>, vector<32x324xbf16>
    tpu.vector_store %arg10[%c224, %c0_38], %77 {strides = array<i32>} : memref<288x324xbf16, #tpu.memory_space<vmem>>, vector<32x324xbf16>,
    %79 = vector.extract_strided_slice %45 {offsets = [0, 19], sizes = [32, 305], strides = [1, 1]} : vector<32x324xbf16> to vector<32x305xbf16>
    %80 = vector.extract_strided_slice %45 {offsets = [0, 0], sizes = [32, 19], strides = [1, 1]} : vector<32x324xbf16> to vector<32x19xbf16>
    %81 = tpu.concatenate %79, %80 in 1 : vector<32x305xbf16>, vector<32x19xbf16> -> vector<32x324xbf16>
    %c256 = arith.constant 256 : index
    %c0_39 = arith.constant 0 : index
    %82 = vector.load %arg10[%c256, %c0_39] : memref<288x324xbf16, #tpu.memory_space<vmem>>, vector<32x324xbf16>
    tpu.vector_store %arg10[%c256, %c0_39], %81 {strides = array<i32>} : memref<288x324xbf16, #tpu.memory_space<vmem>>, vector<32x324xbf16>,
    %c0_40 = arith.constant 0 : index
    %c0_41 = arith.constant 0 : index
    %83 = vector.load %arg10[%c0_40, %c0_41] : memref<288x324xbf16, #tpu.memory_space<vmem>>, vector<288x324xbf16>
    %cst_42 = arith.constant dense<0.000000e+00> : vector<32x324xf32>
    %84 = tpu.matmul %47, %83, %cst_42 {dimension_numbers = #tpu.dot_dimension_numbers<[1], [0], [0], [1], [0, 0, 1, 1], [], []>} : vector<32x288xbf16>, vector<288x324xbf16>, vector<32x324xf32> -> vector<32x324xf32>
    %85 = vector.broadcast %49 : vector<32x1xf32> to vector<32x324xf32>
    %86 = arith.addf %84, %85 : vector<32x324xf32>
    %87 = vector.broadcast %0 : vector<1x324xf32> to vector<32x324xf32>
    %88 = arith.mulf %86, %87 : vector<32x324xf32>
    %cst_43 = arith.constant 0.000000e+00 : f32
    %89 = vector.broadcast %cst_43 : f32 to vector<32x324xf32>
    %90 = arith.maximumf %88, %89 : vector<32x324xf32>
    %91 = arith.truncf %90 : vector<32x324xf32> to vector<32x324xbf16>
    %c1 = arith.constant 1 : index
    %c0_44 = arith.constant 0 : index
    %c0_45 = arith.constant 0 : index
    %92 = vector.load %arg5[%c1, %c0_44, %c0_45] : memref<6x32x288xbf16, #tpu.memory_space<vmem>>, vector<1x32x288xbf16>
    %93 = vector.shape_cast %92 : vector<1x32x288xbf16> to vector<32x288xbf16>
    %c1_46 = arith.constant 1 : index
    %c0_47 = arith.constant 0 : index
    %c0_48 = arith.constant 0 : index
    %94 = vector.load %arg6[%c1_46, %c0_47, %c0_48] : memref<6x32x1xf32, #tpu.memory_space<vmem>>, vector<1x32x1xf32>
    %95 = vector.shape_cast %94 : vector<1x32x1xf32> to vector<32x1xf32>
    %96 = vector.extract_strided_slice %91 {offsets = [0, 305], sizes = [32, 19], strides = [1, 1]} : vector<32x324xbf16> to vector<32x19xbf16>
    %97 = vector.extract_strided_slice %91 {offsets = [0, 0], sizes = [32, 305], strides = [1, 1]} : vector<32x324xbf16> to vector<32x305xbf16>
    %98 = tpu.concatenate %96, %97 in 1 : vector<32x19xbf16>, vector<32x305xbf16> -> vector<32x324xbf16>
    %c0_49 = arith.constant 0 : index
    %c0_50 = arith.constant 0 : index
    %99 = vector.load %arg10[%c0_49, %c0_50] : memref<288x324xbf16, #tpu.memory_space<vmem>>, vector<32x324xbf16>
    tpu.vector_store %arg10[%c0_49, %c0_50], %98 {strides = array<i32>} : memref<288x324xbf16, #tpu.memory_space<vmem>>, vector<32x324xbf16>,
    %100 = vector.extract_strided_slice %91 {offsets = [0, 306], sizes = [32, 18], strides = [1, 1]} : vector<32x324xbf16> to vector<32x18xbf16>
    %101 = vector.extract_strided_slice %91 {offsets = [0, 0], sizes = [32, 306], strides = [1, 1]} : vector<32x324xbf16> to vector<32x306xbf16>
    %102 = tpu.concatenate %100, %101 in 1 : vector<32x18xbf16>, vector<32x306xbf16> -> vector<32x324xbf16>
    %c32_51 = arith.constant 32 : index
    %c0_52 = arith.constant 0 : index
    %103 = vector.load %arg10[%c32_51, %c0_52] : memref<288x324xbf16, #tpu.memory_space<vmem>>, vector<32x324xbf16>
    tpu.vector_store %arg10[%c32_51, %c0_52], %102 {strides = array<i32>} : memref<288x324xbf16, #tpu.memory_space<vmem>>, vector<32x324xbf16>,
    %104 = vector.extract_strided_slice %91 {offsets = [0, 307], sizes = [32, 17], strides = [1, 1]} : vector<32x324xbf16> to vector<32x17xbf16>
    %105 = vector.extract_strided_slice %91 {offsets = [0, 0], sizes = [32, 307], strides = [1, 1]} : vector<32x324xbf16> to vector<32x307xbf16>
    %106 = tpu.concatenate %104, %105 in 1 : vector<32x17xbf16>, vector<32x307xbf16> -> vector<32x324xbf16>
    %c64_53 = arith.constant 64 : index
    %c0_54 = arith.constant 0 : index
    %107 = vector.load %arg10[%c64_53, %c0_54] : memref<288x324xbf16, #tpu.memory_space<vmem>>, vector<32x324xbf16>
    tpu.vector_store %arg10[%c64_53, %c0_54], %106 {strides = array<i32>} : memref<288x324xbf16, #tpu.memory_space<vmem>>, vector<32x324xbf16>,
    %108 = vector.extract_strided_slice %91 {offsets = [0, 323], sizes = [32, 1], strides = [1, 1]} : vector<32x324xbf16> to vector<32x1xbf16>
    %109 = vector.extract_strided_slice %91 {offsets = [0, 0], sizes = [32, 323], strides = [1, 1]} : vector<32x324xbf16> to vector<32x323xbf16>
    %110 = tpu.concatenate %108, %109 in 1 : vector<32x1xbf16>, vector<32x323xbf16> -> vector<32x324xbf16>
    %c96_55 = arith.constant 96 : index
    %c0_56 = arith.constant 0 : index
    %111 = vector.load %arg10[%c96_55, %c0_56] : memref<288x324xbf16, #tpu.memory_space<vmem>>, vector<32x324xbf16>
    tpu.vector_store %arg10[%c96_55, %c0_56], %110 {strides = array<i32>} : memref<288x324xbf16, #tpu.memory_space<vmem>>, vector<32x324xbf16>,
    %c128_57 = arith.constant 128 : index
    %c0_58 = arith.constant 0 : index
    %112 = vector.load %arg10[%c128_57, %c0_58] : memref<288x324xbf16, #tpu.memory_space<vmem>>, vector<32x324xbf16>
    tpu.vector_store %arg10[%c128_57, %c0_58], %91 {strides = array<i32>} : memref<288x324xbf16, #tpu.memory_space<vmem>>, vector<32x324xbf16>,
    %113 = vector.extract_strided_slice %91 {offsets = [0, 1], sizes = [32, 323], strides = [1, 1]} : vector<32x324xbf16> to vector<32x323xbf16>
    %114 = vector.extract_strided_slice %91 {offsets = [0, 0], sizes = [32, 1], strides = [1, 1]} : vector<32x324xbf16> to vector<32x1xbf16>
    %115 = tpu.concatenate %113, %114 in 1 : vector<32x323xbf16>, vector<32x1xbf16> -> vector<32x324xbf16>
    %c160_59 = arith.constant 160 : index
    %c0_60 = arith.constant 0 : index
    %116 = vector.load %arg10[%c160_59, %c0_60] : memref<288x324xbf16, #tpu.memory_space<vmem>>, vector<32x324xbf16>
    tpu.vector_store %arg10[%c160_59, %c0_60], %115 {strides = array<i32>} : memref<288x324xbf16, #tpu.memory_space<vmem>>, vector<32x324xbf16>,
    %117 = vector.extract_strided_slice %91 {offsets = [0, 17], sizes = [32, 307], strides = [1, 1]} : vector<32x324xbf16> to vector<32x307xbf16>
    %118 = vector.extract_strided_slice %91 {offsets = [0, 0], sizes = [32, 17], strides = [1, 1]} : vector<32x324xbf16> to vector<32x17xbf16>
    %119 = tpu.concatenate %117, %118 in 1 : vector<32x307xbf16>, vector<32x17xbf16> -> vector<32x324xbf16>
    %c192_61 = arith.constant 192 : index
    %c0_62 = arith.constant 0 : index
    %120 = vector.load %arg10[%c192_61, %c0_62] : memref<288x324xbf16, #tpu.memory_space<vmem>>, vector<32x324xbf16>
    tpu.vector_store %arg10[%c192_61, %c0_62], %119 {strides = array<i32>} : memref<288x324xbf16, #tpu.memory_space<vmem>>, vector<32x324xbf16>,
    %121 = vector.extract_strided_slice %91 {offsets = [0, 18], sizes = [32, 306], strides = [1, 1]} : vector<32x324xbf16> to vector<32x306xbf16>
    %122 = vector.extract_strided_slice %91 {offsets = [0, 0], sizes = [32, 18], strides = [1, 1]} : vector<32x324xbf16> to vector<32x18xbf16>
    %123 = tpu.concatenate %121, %122 in 1 : vector<32x306xbf16>, vector<32x18xbf16> -> vector<32x324xbf16>
    %c224_63 = arith.constant 224 : index
    %c0_64 = arith.constant 0 : index
    %124 = vector.load %arg10[%c224_63, %c0_64] : memref<288x324xbf16, #tpu.memory_space<vmem>>, vector<32x324xbf16>
    tpu.vector_store %arg10[%c224_63, %c0_64], %123 {strides = array<i32>} : memref<288x324xbf16, #tpu.memory_space<vmem>>, vector<32x324xbf16>,
    %125 = vector.extract_strided_slice %91 {offsets = [0, 19], sizes = [32, 305], strides = [1, 1]} : vector<32x324xbf16> to vector<32x305xbf16>
    %126 = vector.extract_strided_slice %91 {offsets = [0, 0], sizes = [32, 19], strides = [1, 1]} : vector<32x324xbf16> to vector<32x19xbf16>
    %127 = tpu.concatenate %125, %126 in 1 : vector<32x305xbf16>, vector<32x19xbf16> -> vector<32x324xbf16>
    %c256_65 = arith.constant 256 : index
    %c0_66 = arith.constant 0 : index
    %128 = vector.load %arg10[%c256_65, %c0_66] : memref<288x324xbf16, #tpu.memory_space<vmem>>, vector<32x324xbf16>
    tpu.vector_store %arg10[%c256_65, %c0_66], %127 {strides = array<i32>} : memref<288x324xbf16, #tpu.memory_space<vmem>>, vector<32x324xbf16>,
    %c0_67 = arith.constant 0 : index
    %c0_68 = arith.constant 0 : index
    %129 = vector.load %arg10[%c0_67, %c0_68] : memref<288x324xbf16, #tpu.memory_space<vmem>>, vector<288x324xbf16>
    %cst_69 = arith.constant dense<0.000000e+00> : vector<32x324xf32>
    %130 = tpu.matmul %93, %129, %cst_69 {dimension_numbers = #tpu.dot_dimension_numbers<[1], [0], [0], [1], [0, 0, 1, 1], [], []>} : vector<32x288xbf16>, vector<288x324xbf16>, vector<32x324xf32> -> vector<32x324xf32>
    %131 = vector.broadcast %95 : vector<32x1xf32> to vector<32x324xf32>
    %132 = arith.addf %130, %131 : vector<32x324xf32>
    %133 = vector.broadcast %0 : vector<1x324xf32> to vector<32x324xf32>
    %134 = arith.mulf %132, %133 : vector<32x324xf32>
    %135 = arith.extf %45 : vector<32x324xbf16> to vector<32x324xf32>
    %136 = arith.addf %135, %134 : vector<32x324xf32>
    %137 = arith.truncf %136 : vector<32x324xf32> to vector<32x324xbf16>
    %c2 = arith.constant 2 : index
    %c0_70 = arith.constant 0 : index
    %c0_71 = arith.constant 0 : index
    %138 = vector.load %arg5[%c2, %c0_70, %c0_71] : memref<6x32x288xbf16, #tpu.memory_space<vmem>>, vector<1x32x288xbf16>
    %139 = vector.shape_cast %138 : vector<1x32x288xbf16> to vector<32x288xbf16>
    %c2_72 = arith.constant 2 : index
    %c0_73 = arith.constant 0 : index
    %c0_74 = arith.constant 0 : index
    %140 = vector.load %arg6[%c2_72, %c0_73, %c0_74] : memref<6x32x1xf32, #tpu.memory_space<vmem>>, vector<1x32x1xf32>
    %141 = vector.shape_cast %140 : vector<1x32x1xf32> to vector<32x1xf32>
    %142 = vector.extract_strided_slice %137 {offsets = [0, 305], sizes = [32, 19], strides = [1, 1]} : vector<32x324xbf16> to vector<32x19xbf16>
    %143 = vector.extract_strided_slice %137 {offsets = [0, 0], sizes = [32, 305], strides = [1, 1]} : vector<32x324xbf16> to vector<32x305xbf16>
    %144 = tpu.concatenate %142, %143 in 1 : vector<32x19xbf16>, vector<32x305xbf16> -> vector<32x324xbf16>
    %c0_75 = arith.constant 0 : index
    %c0_76 = arith.constant 0 : index
    %145 = vector.load %arg10[%c0_75, %c0_76] : memref<288x324xbf16, #tpu.memory_space<vmem>>, vector<32x324xbf16>
    tpu.vector_store %arg10[%c0_75, %c0_76], %144 {strides = array<i32>} : memref<288x324xbf16, #tpu.memory_space<vmem>>, vector<32x324xbf16>,
    %146 = vector.extract_strided_slice %137 {offsets = [0, 306], sizes = [32, 18], strides = [1, 1]} : vector<32x324xbf16> to vector<32x18xbf16>
    %147 = vector.extract_strided_slice %137 {offsets = [0, 0], sizes = [32, 306], strides = [1, 1]} : vector<32x324xbf16> to vector<32x306xbf16>
    %148 = tpu.concatenate %146, %147 in 1 : vector<32x18xbf16>, vector<32x306xbf16> -> vector<32x324xbf16>
    %c32_77 = arith.constant 32 : index
    %c0_78 = arith.constant 0 : index
    %149 = vector.load %arg10[%c32_77, %c0_78] : memref<288x324xbf16, #tpu.memory_space<vmem>>, vector<32x324xbf16>
    tpu.vector_store %arg10[%c32_77, %c0_78], %148 {strides = array<i32>} : memref<288x324xbf16, #tpu.memory_space<vmem>>, vector<32x324xbf16>,
    %150 = vector.extract_strided_slice %137 {offsets = [0, 307], sizes = [32, 17], strides = [1, 1]} : vector<32x324xbf16> to vector<32x17xbf16>
    %151 = vector.extract_strided_slice %137 {offsets = [0, 0], sizes = [32, 307], strides = [1, 1]} : vector<32x324xbf16> to vector<32x307xbf16>
    %152 = tpu.concatenate %150, %151 in 1 : vector<32x17xbf16>, vector<32x307xbf16> -> vector<32x324xbf16>
    %c64_79 = arith.constant 64 : index
    %c0_80 = arith.constant 0 : index
    %153 = vector.load %arg10[%c64_79, %c0_80] : memref<288x324xbf16, #tpu.memory_space<vmem>>, vector<32x324xbf16>
    tpu.vector_store %arg10[%c64_79, %c0_80], %152 {strides = array<i32>} : memref<288x324xbf16, #tpu.memory_space<vmem>>, vector<32x324xbf16>,
    %154 = vector.extract_strided_slice %137 {offsets = [0, 323], sizes = [32, 1], strides = [1, 1]} : vector<32x324xbf16> to vector<32x1xbf16>
    %155 = vector.extract_strided_slice %137 {offsets = [0, 0], sizes = [32, 323], strides = [1, 1]} : vector<32x324xbf16> to vector<32x323xbf16>
    %156 = tpu.concatenate %154, %155 in 1 : vector<32x1xbf16>, vector<32x323xbf16> -> vector<32x324xbf16>
    %c96_81 = arith.constant 96 : index
    %c0_82 = arith.constant 0 : index
    %157 = vector.load %arg10[%c96_81, %c0_82] : memref<288x324xbf16, #tpu.memory_space<vmem>>, vector<32x324xbf16>
    tpu.vector_store %arg10[%c96_81, %c0_82], %156 {strides = array<i32>} : memref<288x324xbf16, #tpu.memory_space<vmem>>, vector<32x324xbf16>,
    %c128_83 = arith.constant 128 : index
    %c0_84 = arith.constant 0 : index
    %158 = vector.load %arg10[%c128_83, %c0_84] : memref<288x324xbf16, #tpu.memory_space<vmem>>, vector<32x324xbf16>
    tpu.vector_store %arg10[%c128_83, %c0_84], %137 {strides = array<i32>} : memref<288x324xbf16, #tpu.memory_space<vmem>>, vector<32x324xbf16>,
    %159 = vector.extract_strided_slice %137 {offsets = [0, 1], sizes = [32, 323], strides = [1, 1]} : vector<32x324xbf16> to vector<32x323xbf16>
    %160 = vector.extract_strided_slice %137 {offsets = [0, 0], sizes = [32, 1], strides = [1, 1]} : vector<32x324xbf16> to vector<32x1xbf16>
    %161 = tpu.concatenate %159, %160 in 1 : vector<32x323xbf16>, vector<32x1xbf16> -> vector<32x324xbf16>
    %c160_85 = arith.constant 160 : index
    %c0_86 = arith.constant 0 : index
    %162 = vector.load %arg10[%c160_85, %c0_86] : memref<288x324xbf16, #tpu.memory_space<vmem>>, vector<32x324xbf16>
    tpu.vector_store %arg10[%c160_85, %c0_86], %161 {strides = array<i32>} : memref<288x324xbf16, #tpu.memory_space<vmem>>, vector<32x324xbf16>,
    %163 = vector.extract_strided_slice %137 {offsets = [0, 17], sizes = [32, 307], strides = [1, 1]} : vector<32x324xbf16> to vector<32x307xbf16>
    %164 = vector.extract_strided_slice %137 {offsets = [0, 0], sizes = [32, 17], strides = [1, 1]} : vector<32x324xbf16> to vector<32x17xbf16>
    %165 = tpu.concatenate %163, %164 in 1 : vector<32x307xbf16>, vector<32x17xbf16> -> vector<32x324xbf16>
    %c192_87 = arith.constant 192 : index
    %c0_88 = arith.constant 0 : index
    %166 = vector.load %arg10[%c192_87, %c0_88] : memref<288x324xbf16, #tpu.memory_space<vmem>>, vector<32x324xbf16>
    tpu.vector_store %arg10[%c192_87, %c0_88], %165 {strides = array<i32>} : memref<288x324xbf16, #tpu.memory_space<vmem>>, vector<32x324xbf16>,
    %167 = vector.extract_strided_slice %137 {offsets = [0, 18], sizes = [32, 306], strides = [1, 1]} : vector<32x324xbf16> to vector<32x306xbf16>
    %168 = vector.extract_strided_slice %137 {offsets = [0, 0], sizes = [32, 18], strides = [1, 1]} : vector<32x324xbf16> to vector<32x18xbf16>
    %169 = tpu.concatenate %167, %168 in 1 : vector<32x306xbf16>, vector<32x18xbf16> -> vector<32x324xbf16>
    %c224_89 = arith.constant 224 : index
    %c0_90 = arith.constant 0 : index
    %170 = vector.load %arg10[%c224_89, %c0_90] : memref<288x324xbf16, #tpu.memory_space<vmem>>, vector<32x324xbf16>
    tpu.vector_store %arg10[%c224_89, %c0_90], %169 {strides = array<i32>} : memref<288x324xbf16, #tpu.memory_space<vmem>>, vector<32x324xbf16>,
    %171 = vector.extract_strided_slice %137 {offsets = [0, 19], sizes = [32, 305], strides = [1, 1]} : vector<32x324xbf16> to vector<32x305xbf16>
    %172 = vector.extract_strided_slice %137 {offsets = [0, 0], sizes = [32, 19], strides = [1, 1]} : vector<32x324xbf16> to vector<32x19xbf16>
    %173 = tpu.concatenate %171, %172 in 1 : vector<32x305xbf16>, vector<32x19xbf16> -> vector<32x324xbf16>
    %c256_91 = arith.constant 256 : index
    %c0_92 = arith.constant 0 : index
    %174 = vector.load %arg10[%c256_91, %c0_92] : memref<288x324xbf16, #tpu.memory_space<vmem>>, vector<32x324xbf16>
    tpu.vector_store %arg10[%c256_91, %c0_92], %173 {strides = array<i32>} : memref<288x324xbf16, #tpu.memory_space<vmem>>, vector<32x324xbf16>,
    %c0_93 = arith.constant 0 : index
    %c0_94 = arith.constant 0 : index
    %175 = vector.load %arg10[%c0_93, %c0_94] : memref<288x324xbf16, #tpu.memory_space<vmem>>, vector<288x324xbf16>
    %cst_95 = arith.constant dense<0.000000e+00> : vector<32x324xf32>
    %176 = tpu.matmul %139, %175, %cst_95 {dimension_numbers = #tpu.dot_dimension_numbers<[1], [0], [0], [1], [0, 0, 1, 1], [], []>} : vector<32x288xbf16>, vector<288x324xbf16>, vector<32x324xf32> -> vector<32x324xf32>
    %177 = vector.broadcast %141 : vector<32x1xf32> to vector<32x324xf32>
    %178 = arith.addf %176, %177 : vector<32x324xf32>
    %179 = vector.broadcast %0 : vector<1x324xf32> to vector<32x324xf32>
    %180 = arith.mulf %178, %179 : vector<32x324xf32>
    %cst_96 = arith.constant 0.000000e+00 : f32
    %181 = vector.broadcast %cst_96 : f32 to vector<32x324xf32>
    %182 = arith.maximumf %180, %181 : vector<32x324xf32>
    %183 = arith.truncf %182 : vector<32x324xf32> to vector<32x324xbf16>
    %c3 = arith.constant 3 : index
    %c0_97 = arith.constant 0 : index
    %c0_98 = arith.constant 0 : index
    %184 = vector.load %arg5[%c3, %c0_97, %c0_98] : memref<6x32x288xbf16, #tpu.memory_space<vmem>>, vector<1x32x288xbf16>
    %185 = vector.shape_cast %184 : vector<1x32x288xbf16> to vector<32x288xbf16>
    %c3_99 = arith.constant 3 : index
    %c0_100 = arith.constant 0 : index
    %c0_101 = arith.constant 0 : index
    %186 = vector.load %arg6[%c3_99, %c0_100, %c0_101] : memref<6x32x1xf32, #tpu.memory_space<vmem>>, vector<1x32x1xf32>
    %187 = vector.shape_cast %186 : vector<1x32x1xf32> to vector<32x1xf32>
    %188 = vector.extract_strided_slice %183 {offsets = [0, 305], sizes = [32, 19], strides = [1, 1]} : vector<32x324xbf16> to vector<32x19xbf16>
    %189 = vector.extract_strided_slice %183 {offsets = [0, 0], sizes = [32, 305], strides = [1, 1]} : vector<32x324xbf16> to vector<32x305xbf16>
    %190 = tpu.concatenate %188, %189 in 1 : vector<32x19xbf16>, vector<32x305xbf16> -> vector<32x324xbf16>
    %c0_102 = arith.constant 0 : index
    %c0_103 = arith.constant 0 : index
    %191 = vector.load %arg10[%c0_102, %c0_103] : memref<288x324xbf16, #tpu.memory_space<vmem>>, vector<32x324xbf16>
    tpu.vector_store %arg10[%c0_102, %c0_103], %190 {strides = array<i32>} : memref<288x324xbf16, #tpu.memory_space<vmem>>, vector<32x324xbf16>,
    %192 = vector.extract_strided_slice %183 {offsets = [0, 306], sizes = [32, 18], strides = [1, 1]} : vector<32x324xbf16> to vector<32x18xbf16>
    %193 = vector.extract_strided_slice %183 {offsets = [0, 0], sizes = [32, 306], strides = [1, 1]} : vector<32x324xbf16> to vector<32x306xbf16>
    %194 = tpu.concatenate %192, %193 in 1 : vector<32x18xbf16>, vector<32x306xbf16> -> vector<32x324xbf16>
    %c32_104 = arith.constant 32 : index
    %c0_105 = arith.constant 0 : index
    %195 = vector.load %arg10[%c32_104, %c0_105] : memref<288x324xbf16, #tpu.memory_space<vmem>>, vector<32x324xbf16>
    tpu.vector_store %arg10[%c32_104, %c0_105], %194 {strides = array<i32>} : memref<288x324xbf16, #tpu.memory_space<vmem>>, vector<32x324xbf16>,
    %196 = vector.extract_strided_slice %183 {offsets = [0, 307], sizes = [32, 17], strides = [1, 1]} : vector<32x324xbf16> to vector<32x17xbf16>
    %197 = vector.extract_strided_slice %183 {offsets = [0, 0], sizes = [32, 307], strides = [1, 1]} : vector<32x324xbf16> to vector<32x307xbf16>
    %198 = tpu.concatenate %196, %197 in 1 : vector<32x17xbf16>, vector<32x307xbf16> -> vector<32x324xbf16>
    %c64_106 = arith.constant 64 : index
    %c0_107 = arith.constant 0 : index
    %199 = vector.load %arg10[%c64_106, %c0_107] : memref<288x324xbf16, #tpu.memory_space<vmem>>, vector<32x324xbf16>
    tpu.vector_store %arg10[%c64_106, %c0_107], %198 {strides = array<i32>} : memref<288x324xbf16, #tpu.memory_space<vmem>>, vector<32x324xbf16>,
    %200 = vector.extract_strided_slice %183 {offsets = [0, 323], sizes = [32, 1], strides = [1, 1]} : vector<32x324xbf16> to vector<32x1xbf16>
    %201 = vector.extract_strided_slice %183 {offsets = [0, 0], sizes = [32, 323], strides = [1, 1]} : vector<32x324xbf16> to vector<32x323xbf16>
    %202 = tpu.concatenate %200, %201 in 1 : vector<32x1xbf16>, vector<32x323xbf16> -> vector<32x324xbf16>
    %c96_108 = arith.constant 96 : index
    %c0_109 = arith.constant 0 : index
    %203 = vector.load %arg10[%c96_108, %c0_109] : memref<288x324xbf16, #tpu.memory_space<vmem>>, vector<32x324xbf16>
    tpu.vector_store %arg10[%c96_108, %c0_109], %202 {strides = array<i32>} : memref<288x324xbf16, #tpu.memory_space<vmem>>, vector<32x324xbf16>,
    %c128_110 = arith.constant 128 : index
    %c0_111 = arith.constant 0 : index
    %204 = vector.load %arg10[%c128_110, %c0_111] : memref<288x324xbf16, #tpu.memory_space<vmem>>, vector<32x324xbf16>
    tpu.vector_store %arg10[%c128_110, %c0_111], %183 {strides = array<i32>} : memref<288x324xbf16, #tpu.memory_space<vmem>>, vector<32x324xbf16>,
    %205 = vector.extract_strided_slice %183 {offsets = [0, 1], sizes = [32, 323], strides = [1, 1]} : vector<32x324xbf16> to vector<32x323xbf16>
    %206 = vector.extract_strided_slice %183 {offsets = [0, 0], sizes = [32, 1], strides = [1, 1]} : vector<32x324xbf16> to vector<32x1xbf16>
    %207 = tpu.concatenate %205, %206 in 1 : vector<32x323xbf16>, vector<32x1xbf16> -> vector<32x324xbf16>
    %c160_112 = arith.constant 160 : index
    %c0_113 = arith.constant 0 : index
    %208 = vector.load %arg10[%c160_112, %c0_113] : memref<288x324xbf16, #tpu.memory_space<vmem>>, vector<32x324xbf16>
    tpu.vector_store %arg10[%c160_112, %c0_113], %207 {strides = array<i32>} : memref<288x324xbf16, #tpu.memory_space<vmem>>, vector<32x324xbf16>,
    %209 = vector.extract_strided_slice %183 {offsets = [0, 17], sizes = [32, 307], strides = [1, 1]} : vector<32x324xbf16> to vector<32x307xbf16>
    %210 = vector.extract_strided_slice %183 {offsets = [0, 0], sizes = [32, 17], strides = [1, 1]} : vector<32x324xbf16> to vector<32x17xbf16>
    %211 = tpu.concatenate %209, %210 in 1 : vector<32x307xbf16>, vector<32x17xbf16> -> vector<32x324xbf16>
    %c192_114 = arith.constant 192 : index
    %c0_115 = arith.constant 0 : index
    %212 = vector.load %arg10[%c192_114, %c0_115] : memref<288x324xbf16, #tpu.memory_space<vmem>>, vector<32x324xbf16>
    tpu.vector_store %arg10[%c192_114, %c0_115], %211 {strides = array<i32>} : memref<288x324xbf16, #tpu.memory_space<vmem>>, vector<32x324xbf16>,
    %213 = vector.extract_strided_slice %183 {offsets = [0, 18], sizes = [32, 306], strides = [1, 1]} : vector<32x324xbf16> to vector<32x306xbf16>
    %214 = vector.extract_strided_slice %183 {offsets = [0, 0], sizes = [32, 18], strides = [1, 1]} : vector<32x324xbf16> to vector<32x18xbf16>
    %215 = tpu.concatenate %213, %214 in 1 : vector<32x306xbf16>, vector<32x18xbf16> -> vector<32x324xbf16>
    %c224_116 = arith.constant 224 : index
    %c0_117 = arith.constant 0 : index
    %216 = vector.load %arg10[%c224_116, %c0_117] : memref<288x324xbf16, #tpu.memory_space<vmem>>, vector<32x324xbf16>
    tpu.vector_store %arg10[%c224_116, %c0_117], %215 {strides = array<i32>} : memref<288x324xbf16, #tpu.memory_space<vmem>>, vector<32x324xbf16>,
    %217 = vector.extract_strided_slice %183 {offsets = [0, 19], sizes = [32, 305], strides = [1, 1]} : vector<32x324xbf16> to vector<32x305xbf16>
    %218 = vector.extract_strided_slice %183 {offsets = [0, 0], sizes = [32, 19], strides = [1, 1]} : vector<32x324xbf16> to vector<32x19xbf16>
    %219 = tpu.concatenate %217, %218 in 1 : vector<32x305xbf16>, vector<32x19xbf16> -> vector<32x324xbf16>
    %c256_118 = arith.constant 256 : index
    %c0_119 = arith.constant 0 : index
    %220 = vector.load %arg10[%c256_118, %c0_119] : memref<288x324xbf16, #tpu.memory_space<vmem>>, vector<32x324xbf16>
    tpu.vector_store %arg10[%c256_118, %c0_119], %219 {strides = array<i32>} : memref<288x324xbf16, #tpu.memory_space<vmem>>, vector<32x324xbf16>,
    %c0_120 = arith.constant 0 : index
    %c0_121 = arith.constant 0 : index
    %221 = vector.load %arg10[%c0_120, %c0_121] : memref<288x324xbf16, #tpu.memory_space<vmem>>, vector<288x324xbf16>
    %cst_122 = arith.constant dense<0.000000e+00> : vector<32x324xf32>
    %222 = tpu.matmul %185, %221, %cst_122 {dimension_numbers = #tpu.dot_dimension_numbers<[1], [0], [0], [1], [0, 0, 1, 1], [], []>} : vector<32x288xbf16>, vector<288x324xbf16>, vector<32x324xf32> -> vector<32x324xf32>
    %223 = vector.broadcast %187 : vector<32x1xf32> to vector<32x324xf32>
    %224 = arith.addf %222, %223 : vector<32x324xf32>
    %225 = vector.broadcast %0 : vector<1x324xf32> to vector<32x324xf32>
    %226 = arith.mulf %224, %225 : vector<32x324xf32>
    %227 = arith.extf %137 : vector<32x324xbf16> to vector<32x324xf32>
    %228 = arith.addf %227, %226 : vector<32x324xf32>
    %229 = arith.truncf %228 : vector<32x324xf32> to vector<32x324xbf16>
    %c4 = arith.constant 4 : index
    %c0_123 = arith.constant 0 : index
    %c0_124 = arith.constant 0 : index
    %230 = vector.load %arg5[%c4, %c0_123, %c0_124] : memref<6x32x288xbf16, #tpu.memory_space<vmem>>, vector<1x32x288xbf16>
    %231 = vector.shape_cast %230 : vector<1x32x288xbf16> to vector<32x288xbf16>
    %c4_125 = arith.constant 4 : index
    %c0_126 = arith.constant 0 : index
    %c0_127 = arith.constant 0 : index
    %232 = vector.load %arg6[%c4_125, %c0_126, %c0_127] : memref<6x32x1xf32, #tpu.memory_space<vmem>>, vector<1x32x1xf32>
    %233 = vector.shape_cast %232 : vector<1x32x1xf32> to vector<32x1xf32>
    %234 = vector.extract_strided_slice %229 {offsets = [0, 305], sizes = [32, 19], strides = [1, 1]} : vector<32x324xbf16> to vector<32x19xbf16>
    %235 = vector.extract_strided_slice %229 {offsets = [0, 0], sizes = [32, 305], strides = [1, 1]} : vector<32x324xbf16> to vector<32x305xbf16>
    %236 = tpu.concatenate %234, %235 in 1 : vector<32x19xbf16>, vector<32x305xbf16> -> vector<32x324xbf16>
    %c0_128 = arith.constant 0 : index
    %c0_129 = arith.constant 0 : index
    %237 = vector.load %arg10[%c0_128, %c0_129] : memref<288x324xbf16, #tpu.memory_space<vmem>>, vector<32x324xbf16>
    tpu.vector_store %arg10[%c0_128, %c0_129], %236 {strides = array<i32>} : memref<288x324xbf16, #tpu.memory_space<vmem>>, vector<32x324xbf16>,
    %238 = vector.extract_strided_slice %229 {offsets = [0, 306], sizes = [32, 18], strides = [1, 1]} : vector<32x324xbf16> to vector<32x18xbf16>
    %239 = vector.extract_strided_slice %229 {offsets = [0, 0], sizes = [32, 306], strides = [1, 1]} : vector<32x324xbf16> to vector<32x306xbf16>
    %240 = tpu.concatenate %238, %239 in 1 : vector<32x18xbf16>, vector<32x306xbf16> -> vector<32x324xbf16>
    %c32_130 = arith.constant 32 : index
    %c0_131 = arith.constant 0 : index
    %241 = vector.load %arg10[%c32_130, %c0_131] : memref<288x324xbf16, #tpu.memory_space<vmem>>, vector<32x324xbf16>
    tpu.vector_store %arg10[%c32_130, %c0_131], %240 {strides = array<i32>} : memref<288x324xbf16, #tpu.memory_space<vmem>>, vector<32x324xbf16>,
    %242 = vector.extract_strided_slice %229 {offsets = [0, 307], sizes = [32, 17], strides = [1, 1]} : vector<32x324xbf16> to vector<32x17xbf16>
    %243 = vector.extract_strided_slice %229 {offsets = [0, 0], sizes = [32, 307], strides = [1, 1]} : vector<32x324xbf16> to vector<32x307xbf16>
    %244 = tpu.concatenate %242, %243 in 1 : vector<32x17xbf16>, vector<32x307xbf16> -> vector<32x324xbf16>
    %c64_132 = arith.constant 64 : index
    %c0_133 = arith.constant 0 : index
    %245 = vector.load %arg10[%c64_132, %c0_133] : memref<288x324xbf16, #tpu.memory_space<vmem>>, vector<32x324xbf16>
    tpu.vector_store %arg10[%c64_132, %c0_133], %244 {strides = array<i32>} : memref<288x324xbf16, #tpu.memory_space<vmem>>, vector<32x324xbf16>,
    %246 = vector.extract_strided_slice %229 {offsets = [0, 323], sizes = [32, 1], strides = [1, 1]} : vector<32x324xbf16> to vector<32x1xbf16>
    %247 = vector.extract_strided_slice %229 {offsets = [0, 0], sizes = [32, 323], strides = [1, 1]} : vector<32x324xbf16> to vector<32x323xbf16>
    %248 = tpu.concatenate %246, %247 in 1 : vector<32x1xbf16>, vector<32x323xbf16> -> vector<32x324xbf16>
    %c96_134 = arith.constant 96 : index
    %c0_135 = arith.constant 0 : index
    %249 = vector.load %arg10[%c96_134, %c0_135] : memref<288x324xbf16, #tpu.memory_space<vmem>>, vector<32x324xbf16>
    tpu.vector_store %arg10[%c96_134, %c0_135], %248 {strides = array<i32>} : memref<288x324xbf16, #tpu.memory_space<vmem>>, vector<32x324xbf16>,
    %c128_136 = arith.constant 128 : index
    %c0_137 = arith.constant 0 : index
    %250 = vector.load %arg10[%c128_136, %c0_137] : memref<288x324xbf16, #tpu.memory_space<vmem>>, vector<32x324xbf16>
    tpu.vector_store %arg10[%c128_136, %c0_137], %229 {strides = array<i32>} : memref<288x324xbf16, #tpu.memory_space<vmem>>, vector<32x324xbf16>,
    %251 = vector.extract_strided_slice %229 {offsets = [0, 1], sizes = [32, 323], strides = [1, 1]} : vector<32x324xbf16> to vector<32x323xbf16>
    %252 = vector.extract_strided_slice %229 {offsets = [0, 0], sizes = [32, 1], strides = [1, 1]} : vector<32x324xbf16> to vector<32x1xbf16>
    %253 = tpu.concatenate %251, %252 in 1 : vector<32x323xbf16>, vector<32x1xbf16> -> vector<32x324xbf16>
    %c160_138 = arith.constant 160 : index
    %c0_139 = arith.constant 0 : index
    %254 = vector.load %arg10[%c160_138, %c0_139] : memref<288x324xbf16, #tpu.memory_space<vmem>>, vector<32x324xbf16>
    tpu.vector_store %arg10[%c160_138, %c0_139], %253 {strides = array<i32>} : memref<288x324xbf16, #tpu.memory_space<vmem>>, vector<32x324xbf16>,
    %255 = vector.extract_strided_slice %229 {offsets = [0, 17], sizes = [32, 307], strides = [1, 1]} : vector<32x324xbf16> to vector<32x307xbf16>
    %256 = vector.extract_strided_slice %229 {offsets = [0, 0], sizes = [32, 17], strides = [1, 1]} : vector<32x324xbf16> to vector<32x17xbf16>
    %257 = tpu.concatenate %255, %256 in 1 : vector<32x307xbf16>, vector<32x17xbf16> -> vector<32x324xbf16>
    %c192_140 = arith.constant 192 : index
    %c0_141 = arith.constant 0 : index
    %258 = vector.load %arg10[%c192_140, %c0_141] : memref<288x324xbf16, #tpu.memory_space<vmem>>, vector<32x324xbf16>
    tpu.vector_store %arg10[%c192_140, %c0_141], %257 {strides = array<i32>} : memref<288x324xbf16, #tpu.memory_space<vmem>>, vector<32x324xbf16>,
    %259 = vector.extract_strided_slice %229 {offsets = [0, 18], sizes = [32, 306], strides = [1, 1]} : vector<32x324xbf16> to vector<32x306xbf16>
    %260 = vector.extract_strided_slice %229 {offsets = [0, 0], sizes = [32, 18], strides = [1, 1]} : vector<32x324xbf16> to vector<32x18xbf16>
    %261 = tpu.concatenate %259, %260 in 1 : vector<32x306xbf16>, vector<32x18xbf16> -> vector<32x324xbf16>
    %c224_142 = arith.constant 224 : index
    %c0_143 = arith.constant 0 : index
    %262 = vector.load %arg10[%c224_142, %c0_143] : memref<288x324xbf16, #tpu.memory_space<vmem>>, vector<32x324xbf16>
    tpu.vector_store %arg10[%c224_142, %c0_143], %261 {strides = array<i32>} : memref<288x324xbf16, #tpu.memory_space<vmem>>, vector<32x324xbf16>,
    %263 = vector.extract_strided_slice %229 {offsets = [0, 19], sizes = [32, 305], strides = [1, 1]} : vector<32x324xbf16> to vector<32x305xbf16>
    %264 = vector.extract_strided_slice %229 {offsets = [0, 0], sizes = [32, 19], strides = [1, 1]} : vector<32x324xbf16> to vector<32x19xbf16>
    %265 = tpu.concatenate %263, %264 in 1 : vector<32x305xbf16>, vector<32x19xbf16> -> vector<32x324xbf16>
    %c256_144 = arith.constant 256 : index
    %c0_145 = arith.constant 0 : index
    %266 = vector.load %arg10[%c256_144, %c0_145] : memref<288x324xbf16, #tpu.memory_space<vmem>>, vector<32x324xbf16>
    tpu.vector_store %arg10[%c256_144, %c0_145], %265 {strides = array<i32>} : memref<288x324xbf16, #tpu.memory_space<vmem>>, vector<32x324xbf16>,
    %c0_146 = arith.constant 0 : index
    %c0_147 = arith.constant 0 : index
    %267 = vector.load %arg10[%c0_146, %c0_147] : memref<288x324xbf16, #tpu.memory_space<vmem>>, vector<288x324xbf16>
    %cst_148 = arith.constant dense<0.000000e+00> : vector<32x324xf32>
    %268 = tpu.matmul %231, %267, %cst_148 {dimension_numbers = #tpu.dot_dimension_numbers<[1], [0], [0], [1], [0, 0, 1, 1], [], []>} : vector<32x288xbf16>, vector<288x324xbf16>, vector<32x324xf32> -> vector<32x324xf32>
    %269 = vector.broadcast %233 : vector<32x1xf32> to vector<32x324xf32>
    %270 = arith.addf %268, %269 : vector<32x324xf32>
    %271 = vector.broadcast %0 : vector<1x324xf32> to vector<32x324xf32>
    %272 = arith.mulf %270, %271 : vector<32x324xf32>
    %cst_149 = arith.constant 0.000000e+00 : f32
    %273 = vector.broadcast %cst_149 : f32 to vector<32x324xf32>
    %274 = arith.maximumf %272, %273 : vector<32x324xf32>
    %275 = arith.truncf %274 : vector<32x324xf32> to vector<32x324xbf16>
    %c5 = arith.constant 5 : index
    %c0_150 = arith.constant 0 : index
    %c0_151 = arith.constant 0 : index
    %276 = vector.load %arg5[%c5, %c0_150, %c0_151] : memref<6x32x288xbf16, #tpu.memory_space<vmem>>, vector<1x32x288xbf16>
    %277 = vector.shape_cast %276 : vector<1x32x288xbf16> to vector<32x288xbf16>
    %c5_152 = arith.constant 5 : index
    %c0_153 = arith.constant 0 : index
    %c0_154 = arith.constant 0 : index
    %278 = vector.load %arg6[%c5_152, %c0_153, %c0_154] : memref<6x32x1xf32, #tpu.memory_space<vmem>>, vector<1x32x1xf32>
    %279 = vector.shape_cast %278 : vector<1x32x1xf32> to vector<32x1xf32>
    %280 = vector.extract_strided_slice %275 {offsets = [0, 305], sizes = [32, 19], strides = [1, 1]} : vector<32x324xbf16> to vector<32x19xbf16>
    %281 = vector.extract_strided_slice %275 {offsets = [0, 0], sizes = [32, 305], strides = [1, 1]} : vector<32x324xbf16> to vector<32x305xbf16>
    %282 = tpu.concatenate %280, %281 in 1 : vector<32x19xbf16>, vector<32x305xbf16> -> vector<32x324xbf16>
    %c0_155 = arith.constant 0 : index
    %c0_156 = arith.constant 0 : index
    %283 = vector.load %arg10[%c0_155, %c0_156] : memref<288x324xbf16, #tpu.memory_space<vmem>>, vector<32x324xbf16>
    tpu.vector_store %arg10[%c0_155, %c0_156], %282 {strides = array<i32>} : memref<288x324xbf16, #tpu.memory_space<vmem>>, vector<32x324xbf16>,
    %284 = vector.extract_strided_slice %275 {offsets = [0, 306], sizes = [32, 18], strides = [1, 1]} : vector<32x324xbf16> to vector<32x18xbf16>
    %285 = vector.extract_strided_slice %275 {offsets = [0, 0], sizes = [32, 306], strides = [1, 1]} : vector<32x324xbf16> to vector<32x306xbf16>
    %286 = tpu.concatenate %284, %285 in 1 : vector<32x18xbf16>, vector<32x306xbf16> -> vector<32x324xbf16>
    %c32_157 = arith.constant 32 : index
    %c0_158 = arith.constant 0 : index
    %287 = vector.load %arg10[%c32_157, %c0_158] : memref<288x324xbf16, #tpu.memory_space<vmem>>, vector<32x324xbf16>
    tpu.vector_store %arg10[%c32_157, %c0_158], %286 {strides = array<i32>} : memref<288x324xbf16, #tpu.memory_space<vmem>>, vector<32x324xbf16>,
    %288 = vector.extract_strided_slice %275 {offsets = [0, 307], sizes = [32, 17], strides = [1, 1]} : vector<32x324xbf16> to vector<32x17xbf16>
    %289 = vector.extract_strided_slice %275 {offsets = [0, 0], sizes = [32, 307], strides = [1, 1]} : vector<32x324xbf16> to vector<32x307xbf16>
    %290 = tpu.concatenate %288, %289 in 1 : vector<32x17xbf16>, vector<32x307xbf16> -> vector<32x324xbf16>
    %c64_159 = arith.constant 64 : index
    %c0_160 = arith.constant 0 : index
    %291 = vector.load %arg10[%c64_159, %c0_160] : memref<288x324xbf16, #tpu.memory_space<vmem>>, vector<32x324xbf16>
    tpu.vector_store %arg10[%c64_159, %c0_160], %290 {strides = array<i32>} : memref<288x324xbf16, #tpu.memory_space<vmem>>, vector<32x324xbf16>,
    %292 = vector.extract_strided_slice %275 {offsets = [0, 323], sizes = [32, 1], strides = [1, 1]} : vector<32x324xbf16> to vector<32x1xbf16>
    %293 = vector.extract_strided_slice %275 {offsets = [0, 0], sizes = [32, 323], strides = [1, 1]} : vector<32x324xbf16> to vector<32x323xbf16>
    %294 = tpu.concatenate %292, %293 in 1 : vector<32x1xbf16>, vector<32x323xbf16> -> vector<32x324xbf16>
    %c96_161 = arith.constant 96 : index
    %c0_162 = arith.constant 0 : index
    %295 = vector.load %arg10[%c96_161, %c0_162] : memref<288x324xbf16, #tpu.memory_space<vmem>>, vector<32x324xbf16>
    tpu.vector_store %arg10[%c96_161, %c0_162], %294 {strides = array<i32>} : memref<288x324xbf16, #tpu.memory_space<vmem>>, vector<32x324xbf16>,
    %c128_163 = arith.constant 128 : index
    %c0_164 = arith.constant 0 : index
    %296 = vector.load %arg10[%c128_163, %c0_164] : memref<288x324xbf16, #tpu.memory_space<vmem>>, vector<32x324xbf16>
    tpu.vector_store %arg10[%c128_163, %c0_164], %275 {strides = array<i32>} : memref<288x324xbf16, #tpu.memory_space<vmem>>, vector<32x324xbf16>,
    %297 = vector.extract_strided_slice %275 {offsets = [0, 1], sizes = [32, 323], strides = [1, 1]} : vector<32x324xbf16> to vector<32x323xbf16>
    %298 = vector.extract_strided_slice %275 {offsets = [0, 0], sizes = [32, 1], strides = [1, 1]} : vector<32x324xbf16> to vector<32x1xbf16>
    %299 = tpu.concatenate %297, %298 in 1 : vector<32x323xbf16>, vector<32x1xbf16> -> vector<32x324xbf16>
    %c160_165 = arith.constant 160 : index
    %c0_166 = arith.constant 0 : index
    %300 = vector.load %arg10[%c160_165, %c0_166] : memref<288x324xbf16, #tpu.memory_space<vmem>>, vector<32x324xbf16>
    tpu.vector_store %arg10[%c160_165, %c0_166], %299 {strides = array<i32>} : memref<288x324xbf16, #tpu.memory_space<vmem>>, vector<32x324xbf16>,
    %301 = vector.extract_strided_slice %275 {offsets = [0, 17], sizes = [32, 307], strides = [1, 1]} : vector<32x324xbf16> to vector<32x307xbf16>
    %302 = vector.extract_strided_slice %275 {offsets = [0, 0], sizes = [32, 17], strides = [1, 1]} : vector<32x324xbf16> to vector<32x17xbf16>
    %303 = tpu.concatenate %301, %302 in 1 : vector<32x307xbf16>, vector<32x17xbf16> -> vector<32x324xbf16>
    %c192_167 = arith.constant 192 : index
    %c0_168 = arith.constant 0 : index
    %304 = vector.load %arg10[%c192_167, %c0_168] : memref<288x324xbf16, #tpu.memory_space<vmem>>, vector<32x324xbf16>
    tpu.vector_store %arg10[%c192_167, %c0_168], %303 {strides = array<i32>} : memref<288x324xbf16, #tpu.memory_space<vmem>>, vector<32x324xbf16>,
    %305 = vector.extract_strided_slice %275 {offsets = [0, 18], sizes = [32, 306], strides = [1, 1]} : vector<32x324xbf16> to vector<32x306xbf16>
    %306 = vector.extract_strided_slice %275 {offsets = [0, 0], sizes = [32, 18], strides = [1, 1]} : vector<32x324xbf16> to vector<32x18xbf16>
    %307 = tpu.concatenate %305, %306 in 1 : vector<32x306xbf16>, vector<32x18xbf16> -> vector<32x324xbf16>
    %c224_169 = arith.constant 224 : index
    %c0_170 = arith.constant 0 : index
    %308 = vector.load %arg10[%c224_169, %c0_170] : memref<288x324xbf16, #tpu.memory_space<vmem>>, vector<32x324xbf16>
    tpu.vector_store %arg10[%c224_169, %c0_170], %307 {strides = array<i32>} : memref<288x324xbf16, #tpu.memory_space<vmem>>, vector<32x324xbf16>,
    %309 = vector.extract_strided_slice %275 {offsets = [0, 19], sizes = [32, 305], strides = [1, 1]} : vector<32x324xbf16> to vector<32x305xbf16>
    %310 = vector.extract_strided_slice %275 {offsets = [0, 0], sizes = [32, 19], strides = [1, 1]} : vector<32x324xbf16> to vector<32x19xbf16>
    %311 = tpu.concatenate %309, %310 in 1 : vector<32x305xbf16>, vector<32x19xbf16> -> vector<32x324xbf16>
    %c256_171 = arith.constant 256 : index
    %c0_172 = arith.constant 0 : index
    %312 = vector.load %arg10[%c256_171, %c0_172] : memref<288x324xbf16, #tpu.memory_space<vmem>>, vector<32x324xbf16>
    tpu.vector_store %arg10[%c256_171, %c0_172], %311 {strides = array<i32>} : memref<288x324xbf16, #tpu.memory_space<vmem>>, vector<32x324xbf16>,
    %c0_173 = arith.constant 0 : index
    %c0_174 = arith.constant 0 : index
    %313 = vector.load %arg10[%c0_173, %c0_174] : memref<288x324xbf16, #tpu.memory_space<vmem>>, vector<288x324xbf16>
    %cst_175 = arith.constant dense<0.000000e+00> : vector<32x324xf32>
    %314 = tpu.matmul %277, %313, %cst_175 {dimension_numbers = #tpu.dot_dimension_numbers<[1], [0], [0], [1], [0, 0, 1, 1], [], []>} : vector<32x288xbf16>, vector<288x324xbf16>, vector<32x324xf32> -> vector<32x324xf32>
    %315 = vector.broadcast %279 : vector<32x1xf32> to vector<32x324xf32>
    %316 = arith.addf %314, %315 : vector<32x324xf32>
    %317 = vector.broadcast %0 : vector<1x324xf32> to vector<32x324xf32>
    %318 = arith.mulf %316, %317 : vector<32x324xf32>
    %319 = arith.extf %229 : vector<32x324xbf16> to vector<32x324xf32>
    %320 = arith.addf %319, %318 : vector<32x324xf32>
    %321 = arith.truncf %320 : vector<32x324xf32> to vector<32x324xbf16>
    %c0_176 = arith.constant 0 : index
    %c0_177 = arith.constant 0 : index
    %322 = vector.load %arg7[%c0_176, %c0_177] : memref<16x288xbf16, #tpu.memory_space<vmem>>, vector<16x288xbf16>
    %c0_178 = arith.constant 0 : index
    %c0_179 = arith.constant 0 : index
    %323 = vector.load %arg8[%c0_178, %c0_179] : memref<16x1xf32, #tpu.memory_space<vmem>>, vector<16x1xf32>
    %324 = vector.extract_strided_slice %321 {offsets = [0, 305], sizes = [32, 19], strides = [1, 1]} : vector<32x324xbf16> to vector<32x19xbf16>
    %325 = vector.extract_strided_slice %321 {offsets = [0, 0], sizes = [32, 305], strides = [1, 1]} : vector<32x324xbf16> to vector<32x305xbf16>
    %326 = tpu.concatenate %324, %325 in 1 : vector<32x19xbf16>, vector<32x305xbf16> -> vector<32x324xbf16>
    %c0_180 = arith.constant 0 : index
    %c0_181 = arith.constant 0 : index
    %327 = vector.load %arg10[%c0_180, %c0_181] : memref<288x324xbf16, #tpu.memory_space<vmem>>, vector<32x324xbf16>
    tpu.vector_store %arg10[%c0_180, %c0_181], %326 {strides = array<i32>} : memref<288x324xbf16, #tpu.memory_space<vmem>>, vector<32x324xbf16>,
    %328 = vector.extract_strided_slice %321 {offsets = [0, 306], sizes = [32, 18], strides = [1, 1]} : vector<32x324xbf16> to vector<32x18xbf16>
    %329 = vector.extract_strided_slice %321 {offsets = [0, 0], sizes = [32, 306], strides = [1, 1]} : vector<32x324xbf16> to vector<32x306xbf16>
    %330 = tpu.concatenate %328, %329 in 1 : vector<32x18xbf16>, vector<32x306xbf16> -> vector<32x324xbf16>
    %c32_182 = arith.constant 32 : index
    %c0_183 = arith.constant 0 : index
    %331 = vector.load %arg10[%c32_182, %c0_183] : memref<288x324xbf16, #tpu.memory_space<vmem>>, vector<32x324xbf16>
    tpu.vector_store %arg10[%c32_182, %c0_183], %330 {strides = array<i32>} : memref<288x324xbf16, #tpu.memory_space<vmem>>, vector<32x324xbf16>,
    %332 = vector.extract_strided_slice %321 {offsets = [0, 307], sizes = [32, 17], strides = [1, 1]} : vector<32x324xbf16> to vector<32x17xbf16>
    %333 = vector.extract_strided_slice %321 {offsets = [0, 0], sizes = [32, 307], strides = [1, 1]} : vector<32x324xbf16> to vector<32x307xbf16>
    %334 = tpu.concatenate %332, %333 in 1 : vector<32x17xbf16>, vector<32x307xbf16> -> vector<32x324xbf16>
    %c64_184 = arith.constant 64 : index
    %c0_185 = arith.constant 0 : index
    %335 = vector.load %arg10[%c64_184, %c0_185] : memref<288x324xbf16, #tpu.memory_space<vmem>>, vector<32x324xbf16>
    tpu.vector_store %arg10[%c64_184, %c0_185], %334 {strides = array<i32>} : memref<288x324xbf16, #tpu.memory_space<vmem>>, vector<32x324xbf16>,
    %336 = vector.extract_strided_slice %321 {offsets = [0, 323], sizes = [32, 1], strides = [1, 1]} : vector<32x324xbf16> to vector<32x1xbf16>
    %337 = vector.extract_strided_slice %321 {offsets = [0, 0], sizes = [32, 323], strides = [1, 1]} : vector<32x324xbf16> to vector<32x323xbf16>
    %338 = tpu.concatenate %336, %337 in 1 : vector<32x1xbf16>, vector<32x323xbf16> -> vector<32x324xbf16>
    %c96_186 = arith.constant 96 : index
    %c0_187 = arith.constant 0 : index
    %339 = vector.load %arg10[%c96_186, %c0_187] : memref<288x324xbf16, #tpu.memory_space<vmem>>, vector<32x324xbf16>
    tpu.vector_store %arg10[%c96_186, %c0_187], %338 {strides = array<i32>} : memref<288x324xbf16, #tpu.memory_space<vmem>>, vector<32x324xbf16>,
    %c128_188 = arith.constant 128 : index
    %c0_189 = arith.constant 0 : index
    %340 = vector.load %arg10[%c128_188, %c0_189] : memref<288x324xbf16, #tpu.memory_space<vmem>>, vector<32x324xbf16>
    tpu.vector_store %arg10[%c128_188, %c0_189], %321 {strides = array<i32>} : memref<288x324xbf16, #tpu.memory_space<vmem>>, vector<32x324xbf16>,
    %341 = vector.extract_strided_slice %321 {offsets = [0, 1], sizes = [32, 323], strides = [1, 1]} : vector<32x324xbf16> to vector<32x323xbf16>
    %342 = vector.extract_strided_slice %321 {offsets = [0, 0], sizes = [32, 1], strides = [1, 1]} : vector<32x324xbf16> to vector<32x1xbf16>
    %343 = tpu.concatenate %341, %342 in 1 : vector<32x323xbf16>, vector<32x1xbf16> -> vector<32x324xbf16>
    %c160_190 = arith.constant 160 : index
    %c0_191 = arith.constant 0 : index
    %344 = vector.load %arg10[%c160_190, %c0_191] : memref<288x324xbf16, #tpu.memory_space<vmem>>, vector<32x324xbf16>
    tpu.vector_store %arg10[%c160_190, %c0_191], %343 {strides = array<i32>} : memref<288x324xbf16, #tpu.memory_space<vmem>>, vector<32x324xbf16>,
    %345 = vector.extract_strided_slice %321 {offsets = [0, 17], sizes = [32, 307], strides = [1, 1]} : vector<32x324xbf16> to vector<32x307xbf16>
    %346 = vector.extract_strided_slice %321 {offsets = [0, 0], sizes = [32, 17], strides = [1, 1]} : vector<32x324xbf16> to vector<32x17xbf16>
    %347 = tpu.concatenate %345, %346 in 1 : vector<32x307xbf16>, vector<32x17xbf16> -> vector<32x324xbf16>
    %c192_192 = arith.constant 192 : index
    %c0_193 = arith.constant 0 : index
    %348 = vector.load %arg10[%c192_192, %c0_193] : memref<288x324xbf16, #tpu.memory_space<vmem>>, vector<32x324xbf16>
    tpu.vector_store %arg10[%c192_192, %c0_193], %347 {strides = array<i32>} : memref<288x324xbf16, #tpu.memory_space<vmem>>, vector<32x324xbf16>,
    %349 = vector.extract_strided_slice %321 {offsets = [0, 18], sizes = [32, 306], strides = [1, 1]} : vector<32x324xbf16> to vector<32x306xbf16>
    %350 = vector.extract_strided_slice %321 {offsets = [0, 0], sizes = [32, 18], strides = [1, 1]} : vector<32x324xbf16> to vector<32x18xbf16>
    %351 = tpu.concatenate %349, %350 in 1 : vector<32x306xbf16>, vector<32x18xbf16> -> vector<32x324xbf16>
    %c224_194 = arith.constant 224 : index
    %c0_195 = arith.constant 0 : index
    %352 = vector.load %arg10[%c224_194, %c0_195] : memref<288x324xbf16, #tpu.memory_space<vmem>>, vector<32x324xbf16>
    tpu.vector_store %arg10[%c224_194, %c0_195], %351 {strides = array<i32>} : memref<288x324xbf16, #tpu.memory_space<vmem>>, vector<32x324xbf16>,
    %353 = vector.extract_strided_slice %321 {offsets = [0, 19], sizes = [32, 305], strides = [1, 1]} : vector<32x324xbf16> to vector<32x305xbf16>
    %354 = vector.extract_strided_slice %321 {offsets = [0, 0], sizes = [32, 19], strides = [1, 1]} : vector<32x324xbf16> to vector<32x19xbf16>
    %355 = tpu.concatenate %353, %354 in 1 : vector<32x305xbf16>, vector<32x19xbf16> -> vector<32x324xbf16>
    %c256_196 = arith.constant 256 : index
    %c0_197 = arith.constant 0 : index
    %356 = vector.load %arg10[%c256_196, %c0_197] : memref<288x324xbf16, #tpu.memory_space<vmem>>, vector<32x324xbf16>
    tpu.vector_store %arg10[%c256_196, %c0_197], %355 {strides = array<i32>} : memref<288x324xbf16, #tpu.memory_space<vmem>>, vector<32x324xbf16>,
    %c0_198 = arith.constant 0 : index
    %c0_199 = arith.constant 0 : index
    %357 = vector.load %arg10[%c0_198, %c0_199] : memref<288x324xbf16, #tpu.memory_space<vmem>>, vector<288x324xbf16>
    %cst_200 = arith.constant dense<0.000000e+00> : vector<16x324xf32>
    %358 = tpu.matmul %322, %357, %cst_200 {dimension_numbers = #tpu.dot_dimension_numbers<[1], [0], [0], [1], [0, 0, 1, 1], [], []>} : vector<16x288xbf16>, vector<288x324xbf16>, vector<16x324xf32> -> vector<16x324xf32>
    %359 = vector.broadcast %323 : vector<16x1xf32> to vector<16x324xf32>
    %360 = arith.addf %358, %359 : vector<16x324xf32>
    %361 = vector.broadcast %0 : vector<1x324xf32> to vector<16x324xf32>
    %362 = arith.mulf %360, %361 : vector<16x324xf32>
    %363 = arith.addf %2, %362 : vector<16x324xf32>
    %c0_201 = arith.constant 0 : index
    %c0_202 = arith.constant 0 : index
    %c0_203 = arith.constant 0 : index
    %364 = vector.load %arg9[%c0_201, %c0_202, %c0_203] : memref<1x16x324xf32, #tpu.memory_space<vmem>>, vector<1x16x324xf32>
    %365 = vector.shape_cast %364 : vector<1x16x324xf32> to vector<16x324xf32>
    %366 = vector.shape_cast %363 : vector<16x324xf32> to vector<1x16x324xf32>
    tpu.vector_store %arg9[%c0_201, %c0_202, %c0_203], %366 {strides = array<i32>} : memref<1x16x324xf32, #tpu.memory_space<vmem>>, vector<1x16x324xf32>,
    return
  }
  func.func @transform_0(%arg0: i32) -> (i32, i32, i32) {
    %c0_i32 = arith.constant 0 : i32
    %c0_i32_0 = arith.constant 0 : i32
    %c0_i32_1 = arith.constant 0 : i32
    return %arg0, %c0_i32, %c0_i32_0 : i32, i32, i32
  }
  func.func @transform_1(%arg0: i32) -> (i32, i32) {
    %c0_i32 = arith.constant 0 : i32
    %c0_i32_0 = arith.constant 0 : i32
    %c0_i32_1 = arith.constant 0 : i32
    return %c0_i32, %c0_i32_0 : i32, i32
  }
  func.func @transform_2(%arg0: i32) -> (i32, i32) {
    %c0_i32 = arith.constant 0 : i32
    %c0_i32_0 = arith.constant 0 : i32
    %c0_i32_1 = arith.constant 0 : i32
    return %c0_i32, %c0_i32_0 : i32, i32
  }
  func.func @transform_3(%arg0: i32) -> (i32, i32) {
    %c0_i32 = arith.constant 0 : i32
    %c0_i32_0 = arith.constant 0 : i32
    %c0_i32_1 = arith.constant 0 : i32
    return %c0_i32, %c0_i32_0 : i32, i32
  }
  func.func @transform_4(%arg0: i32) -> (i32, i32, i32) {
    %c0_i32 = arith.constant 0 : i32
    %c0_i32_0 = arith.constant 0 : i32
    %c0_i32_1 = arith.constant 0 : i32
    %c0_i32_2 = arith.constant 0 : i32
    return %c0_i32, %c0_i32_0, %c0_i32_1 : i32, i32, i32
  }
  func.func @transform_5(%arg0: i32) -> (i32, i32, i32) {
    %c0_i32 = arith.constant 0 : i32
    %c0_i32_0 = arith.constant 0 : i32
    %c0_i32_1 = arith.constant 0 : i32
    %c0_i32_2 = arith.constant 0 : i32
    return %c0_i32, %c0_i32_0, %c0_i32_1 : i32, i32, i32
  }
  func.func @transform_6(%arg0: i32) -> (i32, i32) {
    %c0_i32 = arith.constant 0 : i32
    %c0_i32_0 = arith.constant 0 : i32
    %c0_i32_1 = arith.constant 0 : i32
    return %c0_i32, %c0_i32_0 : i32, i32
  }
  func.func @transform_7(%arg0: i32) -> (i32, i32) {
    %c0_i32 = arith.constant 0 : i32
    %c0_i32_0 = arith.constant 0 : i32
    %c0_i32_1 = arith.constant 0 : i32
    return %c0_i32, %c0_i32_0 : i32, i32
  }
  func.func @transform_8(%arg0: i32) -> (i32, i32, i32) {
    %c0_i32 = arith.constant 0 : i32
    %c0_i32_0 = arith.constant 0 : i32
    %c0_i32_1 = arith.constant 0 : i32
    return %arg0, %c0_i32, %c0_i32_0 : i32, i32, i32
  }
}

</mosaic_0001>

<bundles_post_ra>
// kernel: refinement_block_forward.1
= control target key start
LH: loop header
LB: loop body
LE: loop exit
PB: predicated region body
PF: predicated region fallthrough
CT: control target
= control target key end

     0   :  { %s11690_s27 = smov 0   ;;  %s15022_s0 = inlined_call_operand.vmem [shape: f32[2,16,324], index: 0, kind: input, shape index: {}]   ;;  %s15023_s1 = inlined_call_operand.vmem [shape: f32[1,324], index: 1, kind: input, shape index: {}]   ;;  %s15024_s2 = inlined_call_operand.vmem [shape: bf16[32,144], index: 2, kind: input, shape index: {}]   ;;  %s15025_s3 = inlined_call_operand.vmem [shape: f32[32,1], index: 3, kind: input, shape index: {}]   ;;  %s15026_s4 = inlined_call_operand.vmem [shape: bf16[6,32,288], index: 4, kind: input, shape index: {}]   ;;  %s15027_s5 = inlined_call_operand.vmem [shape: f32[6,32,1], index: 5, kind: input, shape index: {}]   ;;  %s15028_s6 = inlined_call_operand.vmem [shape: bf16[16,288], index: 6, kind: input, shape index: {}]   ;;  %s15029_s7 = inlined_call_operand.vmem [shape: f32[16,1], index: 7, kind: input, shape index: {}]   ;;  %s15030_s8 = inlined_call_operand.vmem [shape: f32[2,16,324], index: 8, kind: output, shape index: {}]  }
   0x1   :  { %15065 = sst [smem:[#allocation4_spill]] %s15022_s0 }
   0x2   :  { %15066 = sst [smem:[#allocation5_spill]] %s15023_s1 }
   0x3   :  { %15067 = sst [smem:[#allocation6_spill]] %s15024_s2 }
   0x4   :  { %15068 = sst [smem:[#allocation7_spill]] %s15025_s3 }
   0x5 LB: > { %15069 = sst [smem:[#allocation3_spill]] %s11626_s27  ;;  %s9231_s28 = sadd.s32 4294967295, %s11626_s27   ;;  %s11626_s27 = sphi %s11690_s27, %s18_s27  }
   0x6   : > { %p9235_p0 = scmp.ge.s32.totalorder %s11626_s27, 1  ;;  %p262_p1 = scmp.lt.s32.totalorder %s11626_s27, 3 }
   0x8   : > { %p263_p2 = pnand %p9235_p0, %p262_p1 }
   0x9   : > { %p296_p3 = scmp.lt.s32.totalorder (!%p263_p2), %s9231_s28, 1  ;;  %s15070_s0 = sld [smem:[#allocation4_spill]] (!%p263_p2) }
   0xa   : > { %266 = sbr.rel (%p263_p2) target bundleno = 3467 (0xd8b), region = 52  ;;  %s15040_s11 = smov (!%p263_p2), 109  }
   0xb   : > { %s15060_s12 = smov (!%p263_p2), 110   ;;  %s15056_s13 = smov (!%p263_p2), 111  }
   0xc   : > { %s15050_s14 = smov (!%p263_p2), 127   ;;  %s15038_s15 = smov (!%p263_p2), 50  }
   0xd   : > { %s15036_s16 = smov (!%p263_p2), 51   ;;  %s15034_s17 = smov (!%p263_p2), 67  }
   0xe   : > { %s15062_s18 = smov (!%p263_p2), 1   ;;  %s15048_s19 = smov (!%p263_p2), 61  }
   0xf   : > { %s15093_s28 = smov (!%p296_p3, %s9231_s28), 1  ;;  %s15058_s20 = smov 17   ;;  %vm370_vm0 = vcmask 551936   ;;  %vm554_vm1 = vcmask 900096   ;;  %vm588_vm2 = vcmask 891904   ;;  %vm520_vm3 = vcmask 908288  }
  0x10   : > { %s15031_s29 = smul.u32 48, %s15093_s28  ;;  %s15046_s21 = smov 77   ;;  %vm559_vm4 = vcmask 408576   ;;  %vm486_vm5 = vcmask 1039360   ;;  %vm525_vm6 = vcmask 416768   ;;  %vm491_vm7 = vcmask 547840  }
  0x11   : > { %s15044_s22 = smov 78   ;;  %s15054_s23 = smov 18   ;;  %vm834_vm8 = vcmask 130048   ;;  %vm450_vm9 = vcmask 7168   ;;  %vm416_vm10 = vcmask 138240   ;;  %vm382_vm11 = vcmask 146432  }
  0x12   : > { %s11706_s10 = scalar_lea.vmem %s15070_s0, %s15031_s29  ;;  %s15042_s24 = smov 79   ;;  %vm347_vm12 = vcmask 154624   ;;  %vm593_vm13 = vcmask 400384   ;;  %vm1950_vm14 = vcmask 261120   ;;  %vm9171_vm15 = vcmask 556032  }
  0x13   : > { %v310_v0 = vld [vmem:[%s11706_s10 + $0x10] sm:$0xff]  ;;  %v313_v1 = vld [vmem:[%s11706_s10 + $0x28] sm:$0xff]  ;;  %v308_v2 = vld [vmem:[%s11706_s10] sm:$0xff]  ;;  %s15052_s25 = smov 19   ;;  %s15032_s26 = smov 49  }
  0x14   : > { %v11711_v3 = vpack.c.bf16 %v310_v0, %v310_v0  ;;  %v11713_v4 = vpack.c.bf16 %v313_v1, %v313_v1  ;;  %v309_v5 = vld [vmem:[%s11706_s10 + $0x8] sm:$0xff]  ;;  %v311_v6 = vld [vmem:[%s11706_s10 + $0x18] sm:$0xff]  ;;  %v312_v7 = vld [vmem:[%s11706_s10 + $0x20] sm:$0xff]  ;;  %s15071_s2 = sld [smem:[#allocation6_spill]]  ;;  %s15076_s29 = smov 49  }
  0x15   : > { %v314_v8 = vpack.c.bf16 %v309_v5, %v308_v2  ;;  %v316_v9 = vpack.c.bf16 %v312_v7, %v311_v6  ;;  %s15072_s3 = sld [smem:[#allocation7_spill]]  ;;  %s15079_s30 = smov 79  }
  0x16   : > { %v328_v10 = vunpack.c.l.b16 %v11711_v3  ;;  %v329_v11 = vunpack.c.l.b16 %v11713_v4  ;;  %477 = vst.msk [vmem:[#allocation2 + $0x68] sm:$0xf] %vm370_vm0, %v11711_v3  ;;  %s15073_s1 = sld [smem:[#allocation5_spill]]  ;;  %s15080_s9 = smov 109  }
  0x17   : > { %v335_v12 = vunpack.c.l.b16 %v314_v8  ;;  %v337_v13 = vunpack.c.l.b16 %v316_v9  ;;  %476 = vst [vmem:[#allocation2 + $0x60] sm:$0xff] %v314_v8  ;;  %v336_v14 = vunpack.c.h.b16 %v314_v8  ;;  %v338_v15 = vunpack.c.h.b16 %v316_v9  ;;  %s15088_s0 = smov 1  }
  0x18   : > { %v330_v16 = vpack.c.b16 %v329_v11, %v328_v10  ;;  %478 = vst [vmem:[#allocation2 + $0x6c] sm:$0xff] %v316_v9 }
  0x19   : > { %v339_v17 = vpack.c.b16 %v337_v13, %v335_v12  ;;  %v340_v18 = vpack.c.b16 %v338_v15, %v336_v14  ;;  %479 = vst.msk [vmem:[#allocation2 + $0x74] sm:$0xf] %vm370_vm0, %v11713_v4 }
  0x1a   : > { %586 = vrot.lane.b32.xlu1 %v330_v16, %s15040_s11  ;;  %v11137_v10 = vld [vmem:[%s15071_s2 + $0x4] sm:$0xf]  ;;  %v9242_v11 = vld [vmem:[%s15071_s2 + $0x8] sm:$0xf0] }
  0x1b   : > { %582 = vrot.lane.b32.xlu0 %v339_v17, %s15040_s11  ;;  %550 = vrot.lane.b32.xlu2 %v340_v18, %s15060_s12  ;;  %v11787_v15 = vor.u32 %v11137_v10, %v9242_v11 }
  0x22   : > { %548 = vrot.lane.b32.xlu1 %v339_v17, %s15060_s12 }
  0x23   : > { %584 = vrot.lane.b32.xlu0 %v340_v18, %s15040_s11  ;;  %552 = vrot.lane.b32.xlu2 %v330_v16, %s15060_s12 }
  0x2a   : > { %516 = vrot.lane.b32.xlu1 %v340_v18, %s15056_s13 }
  0x2b   : > { %514 = vrot.lane.b32.xlu0 %v339_v17, %s15056_s13  ;;  %518 = vrot.lane.b32.xlu2 %v330_v16, %s15056_s13 }
  0x32   : > { %480 = vrot.lane.b32.xlu1 %v339_v17, %s15050_s14 }
  0x33   : > { %557 = vrot.lane.b32.xlu0 %v339_v17, %s15038_s15  ;;  %482 = vrot.lane.b32.xlu2 %v340_v18, %s15050_s14 }
  0x3a   : > { %523 = vrot.lane.b32.xlu1 %v339_v17, %s15036_s16  ;;  %s15074_s16 = smov 51  }
  0x3b   : > { %484 = vrot.lane.b32.xlu0 %v330_v16, %s15050_s14  ;;  %489 = vrot.lane.b32.xlu2 %v339_v17, %s15034_s17  ;;  %s15075_s17 = smov 67  }
  0x42   : > { %444 = vrot.lane.b32.xlu1 %v339_v17, %s15062_s18 }
  0x43   : > { %442 = vrot.lane.b32.xlu0 %v330_v16, %s15048_s19  ;;  %446 = vrot.lane.b32.xlu2 %v340_v18, %s15062_s18 }
  0x4a   : > { %410 = vrot.lane.b32.xlu1 %v339_v17, %s15058_s20 }
  0x4b   : > { %408 = vrot.lane.b32.xlu0 %v330_v16, %s15046_s21  ;;  %412 = vrot.lane.b32.xlu2 %v340_v18, %s15058_s20 }
  0x52   : > { %374 = vrot.lane.b32.xlu1 %v330_v16, %s15044_s22 }
  0x53   : > { %448 = vrot.lane.b32.xlu0 %v330_v16, %s15062_s18  ;;  %376 = vrot.lane.b32.xlu2 %v339_v17, %s15054_s23 }
  0x5a   : > { %414 = vrot.lane.b32.xlu1 %v330_v16, %s15058_s20 }
  0x5b   : > { %378 = vrot.lane.b32.xlu0 %v340_v18, %s15054_s23  ;;  %331 = vrot.lane.b32.xlu2 %v330_v16, %s15042_s24 }
  0x62   : > { %343 = vrot.lane.b32.xlu1 %v340_v18, %s15052_s25 }
  0x63   : > { %341 = vrot.lane.b32.xlu0 %v339_v17, %s15052_s25  ;;  %380 = vrot.lane.b32.xlu2 %v330_v16, %s15054_s23 }
  0x6a   : > { %345 = vrot.lane.b32.xlu1 %v330_v16, %s15052_s25 }
  0x6b   : > { %591 = vrot.lane.b32.xlu0 %v339_v17, %s15032_s26  ;;  %s15083_s26 = smov 127  }
  0x75   : > { %v551_v19 = vpop.permute.xlu2 %550 }
  0x7d   : > { %v11752_v20 = vpop.permute.xlu2 %552 }
  0x7e   : > { %v556_v25 = vsel %vm554_vm1, %v551_v19, %v11752_v20 }
  0x7f   : > { %v565_v26 = vunpack.c.l.b16 %v556_v25  ;;  %v568_v27 = vunpack.c.h.b16 %v556_v25 }
  0x85   : > { %v11754_v21 = vpop.permute.xlu2 %518 }
  0x8c   : > { %v11760_v22 = vpop.permute.xlu1 %586 }
  0x8d   : > { %v583_v23 = vpop.permute.xlu0 %582  ;;  %v11762_v24 = vpop.permute.xlu2 %482 }
  0x94   : > { %v549_v28 = vpop.permute.xlu1 %548 }
  0x95   : > { %v555_v29 = vsel %vm554_vm1, %v549_v28, %v551_v19  ;;  %v585_v30 = vpop.permute.xlu0 %584  ;;  %v11770_v43 = vpop.permute.xlu2 %489 }
  0x96   : > { %v564_v31 = vunpack.c.l.b16 %v555_v29  ;;  %v567_v32 = vunpack.c.h.b16 %v555_v29  ;;  %v589_v33 = vsel %vm588_vm2, %v583_v23, %v585_v30  ;;  %v590_v34 = vsel %vm588_vm2, %v585_v30, %v11760_v22 }
  0x97   : > { %v598_v35 = vunpack.c.l.b16 %v589_v33  ;;  %v599_v36 = vunpack.c.l.b16 %v590_v34  ;;  %v601_v37 = vunpack.c.h.b16 %v589_v33  ;;  %v602_v38 = vunpack.c.h.b16 %v590_v34 }
  0x98   : > { %v570_v39 = vpack.c.b16 %v565_v26, %v564_v31  ;;  %v572_v40 = vpack.c.b16 %v568_v27, %v567_v32 }
  0x99   : > { %v604_v41 = vpack.c.b16 %v599_v36, %v598_v35  ;;  %v606_v42 = vpack.c.b16 %v602_v38, %v601_v37 }
  0x9a   : > { %578 = vst [vmem:[#allocation2 + $0xa8] sm:$0xff] %v570_v39 }
  0x9b   : > { %580 = vst [vmem:[#allocation2 + $0xb4] sm:$0xff] %v572_v40 }
  0x9c   : > { %612 = vst [vmem:[#allocation2 + $0xc0] sm:$0xff] %v604_v41  ;;  %v517_v44 = vpop.permute.xlu1 %516 }
  0x9d   : > { %614 = vst [vmem:[#allocation2 + $0xcc] sm:$0xff] %v606_v42  ;;  %v522_v45 = vsel %vm520_vm3, %v517_v44, %v11754_v21  ;;  %v515_v46 = vpop.permute.xlu0 %514  ;;  %v11775_v61 = vpop.permute.xlu2 %446 }
  0x9e   : > { %v531_v47 = vunpack.c.l.b16 %v522_v45  ;;  %v534_v48 = vunpack.c.h.b16 %v522_v45  ;;  %v521_v49 = vsel %vm520_vm3, %v515_v46, %v517_v44 }
  0x9f   : > { %v530_v50 = vunpack.c.l.b16 %v521_v49  ;;  %v533_v51 = vunpack.c.h.b16 %v521_v49 }
  0xa1   : > { %v536_v52 = vpack.c.b16 %v531_v47, %v530_v50  ;;  %v538_v53 = vpack.c.b16 %v534_v48, %v533_v51  ;;  %v9340_v54 = vld [vmem:[#allocation2 + $0xa8] sm:$0xf]  ;;  %v11162_v55 = vld [vmem:[#allocation2 + $0xac] sm:$0xf] }
  0xa2   : > { %v11163_v56 = vld [vmem:[#allocation2 + $0xb0] sm:$0xf0]  ;;  %v9342_v57 = vld [vmem:[#allocation2 + $0xb4] sm:$0xf0] }
  0xa3   : > { %544 = vst [vmem:[#allocation2 + $0x90] sm:$0xff] %v536_v52  ;;  %v9352_v58 = vld [vmem:[#allocation2 + $0xc0] sm:$0xf]  ;;  %v11165_v59 = vld [vmem:[#allocation2 + $0xc4] sm:$0xf]  ;;  %v9341_v60 = vor.u32 %v11163_v56, %v9340_v54  ;;  %v9345_v1 = vor.u32 %v11162_v55, %v9342_v57 }
  0xa4   : > { %546 = vst [vmem:[#allocation2 + $0x9c] sm:$0xff] %v538_v53  ;;  %v481_v62 = vpop.permute.xlu1 %480  ;;  %v11166_v63 = vld [vmem:[#allocation2 + $0xc8] sm:$0xf0]  ;;  %v9354_v0 = vld [vmem:[#allocation2 + $0xcc] sm:$0xf0] }
  0xa5   : > { %v9353_v2 = vor.u32 %v11166_v63, %v9352_v58  ;;  %v9357_v3 = vor.u32 %v11165_v59, %v9354_v0  ;;  %v558_v4 = vpop.permute.xlu0 %557  ;;  %841 = vmatpush.bf16.msra.mxu0 %v9341_v60  ;;  %v487_v12 = vsel %vm486_vm5, %v481_v62, %v11762_v24  ;;  %v11793_v27 = vpop.permute.xlu2 %412  ;;  %v11139_v56 = vld [vmem:[%s15071_s2 + $0x14] sm:$0xf]  ;;  %v9250_v57 = vld [vmem:[%s15071_s2 + $0x18] sm:$0xf0]  ;;  %v9304_v0 = vld [vmem:[#allocation2 + $0x60] sm:$0xf] }
  0xa6   : > { %v562_v5 = vsel %vm559_vm4, %v11752_v20, %v558_v4  ;;  %v496_v23 = vunpack.c.l.b16 %v487_v12  ;;  %v499_v35 = vunpack.c.h.b16 %v487_v12  ;;  %v11818_v59 = vor.u32 %v11139_v56, %v9250_v57 }
  0xa7   : > { %867 = vmatpush.bf16.msra.mxu2 %v9353_v2  ;;  %905 = vmatpush.bf16.msra.mxu3 %v9357_v3  ;;  %v566_v6 = vunpack.c.l.b16 %v562_v5  ;;  %v569_v7 = vunpack.c.h.b16 %v562_v5  ;;  %v11153_v3 = vld [vmem:[#allocation2 + $0x64] sm:$0xf] }
  0xa9   : > { %v571_v8 = vpack.c.b16 %v566_v6, %v566_v6  ;;  %v573_v9 = vpack.c.b16 %v569_v7, %v569_v7 }
  0xaa   : > { %v9328_v13 = vld [vmem:[#allocation2 + $0x90] sm:$0xf]  ;;  %v11159_v14 = vld [vmem:[#allocation2 + $0x94] sm:$0xf]  ;;  %9362 = vmatmul.msk.bf16.vlgmr.msra.gmra.mxu2 %vm834_vm8, %v11787_v15  ;;  %9364 = vmatmul.msk.bf16.vlgmr.msra.gmra.mxu3 %vm834_vm8, %v11787_v15 }
  0xab   : > { %879 = vmatpush.bf16.msrb.mxu2 %v9345_v1  ;;  %579 = vst.msk [vmem:[#allocation2 + $0xb0] sm:$0xf] %vm370_vm0, %v571_v8  ;;  %v11160_v16 = vld [vmem:[#allocation2 + $0x98] sm:$0xf0]  ;;  %v9330_v17 = vld [vmem:[#allocation2 + $0x9c] sm:$0xf0] }
  0xac   : > { %581 = vst.msk [vmem:[#allocation2 + $0xbc] sm:$0xf] %vm370_vm0, %v573_v9  ;;  %v524_v18 = vpop.permute.xlu1 %523  ;;  %v9329_v19 = vor.u32 %v11160_v16, %v9328_v13  ;;  %v9333_v20 = vor.u32 %v11159_v14, %v9330_v17  ;;  %v11154_v1 = vld [vmem:[#allocation2 + $0x68] sm:$0xf0]  ;;  %v9306_v9 = vld [vmem:[#allocation2 + $0x6c] sm:$0xf0] }
  0xad   : > { %v528_v25 = vsel %vm525_vm6, %v11754_v21, %v524_v18  ;;  %v485_v26 = vpop.permute.xlu0 %484  ;;  %v11810_v52 = vpop.permute.xlu2 %376  ;;  %v9312_v16 = vld [vmem:[#allocation2 + $0x68] sm:$0xf]  ;;  %v11155_v17 = vld [vmem:[#allocation2 + $0x70] sm:$0xf0] }
  0xae   : > { %v532_v28 = vunpack.c.l.b16 %v528_v25  ;;  %v535_v29 = vunpack.c.h.b16 %v528_v25  ;;  %842 = vmatpush.bf16.msra.mxu0 %v9329_v19  ;;  %v488_v30 = vsel %vm486_vm5, %v11762_v24, %v485_v26  ;;  %v494_v31 = vsel %vm491_vm7, %v485_v26, %v11770_v43 }
  0xaf   : > { %880 = vmatpush.bf16.msrb.mxu2 %v9333_v20  ;;  %v497_v21 = vunpack.c.l.b16 %v488_v30  ;;  %v498_v32 = vunpack.c.l.b16 %v494_v31  ;;  %v500_v33 = vunpack.c.h.b16 %v488_v30  ;;  %v501_v34 = vunpack.c.h.b16 %v494_v31 }
  0xb0   : > { %v537_v36 = vpack.c.b16 %v532_v28, %v532_v28  ;;  %v539_v37 = vpack.c.b16 %v535_v29, %v535_v29  ;;  %v9305_v25 = vor.u32 %v11154_v1, %v9304_v0  ;;  %v9309_v26 = vor.u32 %v11153_v3, %v9306_v9 }
  0xb1   : > { %v502_v38 = vpack.c.b16 %v497_v21, %v496_v23  ;;  %v503_v39 = vpack.c.b16 %v498_v32, %v498_v32  ;;  %v504_v40 = vpack.c.b16 %v500_v33, %v499_v35  ;;  %v505_v24 = vpack.c.b16 %v501_v34, %v501_v34 }
  0xb2   : > { %545 = vst.msk [vmem:[#allocation2 + $0x98] sm:$0xf] %vm370_vm0, %v537_v36  ;;  %v9348_v41 = vld [vmem:[#allocation2 + $0xb0] sm:$0xf]  ;;  %v9313_v29 = vor.u32 %v11155_v17, %v9312_v16 }
  0xb3   : > { %547 = vst.msk [vmem:[#allocation2 + $0xa4] sm:$0xf] %vm370_vm0, %v539_v37  ;;  %v11164_v42 = vld [vmem:[#allocation2 + $0xb8] sm:$0xf0] }
  0xb4   : > { %510 = vst [vmem:[#allocation2 + $0x78] sm:$0xff] %v502_v38  ;;  %v445_v43 = vpop.permute.xlu1 %444  ;;  %v9349_v44 = vor.u32 %v11164_v42, %v9348_v41 }
  0xb5   : > { %511 = vst.msk [vmem:[#allocation2 + $0x80] sm:$0xf] %vm370_vm0, %v503_v39  ;;  %v451_v45 = vsel %vm450_vm9, %v445_v43, %v11775_v61  ;;  %v443_v46 = vpop.permute.xlu0 %442  ;;  %v11827_v28 = vpop.permute.xlu2 %331 }
  0xb6   : > { %512 = vst [vmem:[#allocation2 + $0x84] sm:$0xff] %v504_v40  ;;  %v459_v47 = vunpack.c.l.b16 %v451_v45  ;;  %v462_v48 = vunpack.c.h.b16 %v451_v45  ;;  %917 = vmatpush.bf16.msra.mxu1 %v9349_v44  ;;  %v456_v49 = vsel %vm450_vm9, %v443_v46, %v445_v43 }
  0xb7   : > { %513 = vst.msk [vmem:[#allocation2 + $0x8c] sm:$0xf] %vm370_vm0, %v505_v24  ;;  %v458_v50 = vunpack.c.l.b16 %v456_v49  ;;  %v461_v51 = vunpack.c.h.b16 %v456_v49 }
  0xb9   : > { %v464_v53 = vpack.c.b16 %v459_v47, %v458_v50  ;;  %v466_v54 = vpack.c.b16 %v462_v48, %v461_v51  ;;  %v9336_v55 = vld [vmem:[#allocation2 + $0x98] sm:$0xf] }
  0xba   : > { %v11161_v58 = vld [vmem:[#allocation2 + $0xa0] sm:$0xf0]  ;;  %9363 = vmatmul.msk.bf16.gmra.mxu2 %vm834_vm8, %v11818_v59  ;;  %9365 = vmatmul.msk.bf16.gmra.mxu3 %vm834_vm8, %v11818_v59 }
  0xbb   : > { %472 = vst [vmem:[#allocation2 + $0x48] sm:$0xff] %v464_v53  ;;  %v9316_v60 = vld [vmem:[#allocation2 + $0x78] sm:$0xf]  ;;  %v11156_v62 = vld [vmem:[#allocation2 + $0x7c] sm:$0xf]  ;;  %v9337_v63 = vor.u32 %v11161_v58, %v9336_v55 }
  0xbc   : > { %474 = vst [vmem:[#allocation2 + $0x54] sm:$0xff] %v466_v54  ;;  %v411_v2 = vpop.permute.xlu1 %410  ;;  %v9324_v4 = vld [vmem:[#allocation2 + $0x80] sm:$0xf] }
  0xbd   : > { %v417_v5 = vsel %vm416_vm10, %v411_v2, %v11793_v27  ;;  %v11157_v6 = vld [vmem:[#allocation2 + $0x80] sm:$0xf0]  ;;  %v9318_v7 = vld [vmem:[#allocation2 + $0x84] sm:$0xf0]  ;;  %918 = vmatpush.bf16.msra.mxu1 %v9337_v63  ;;  %v409_v8 = vpop.permute.xlu0 %408  ;;  %v381_v44 = vpop.permute.xlu2 %380 }
  0xbe   : > { %v425_v10 = vunpack.c.l.b16 %v417_v5  ;;  %v428_v11 = vunpack.c.h.b16 %v417_v5  ;;  %v9317_v12 = vor.u32 %v11157_v6, %v9316_v60  ;;  %v9321_v13 = vor.u32 %v11156_v62, %v9318_v7  ;;  %v11158_v14 = vld [vmem:[#allocation2 + $0x88] sm:$0xf0] }
  0xbf   : > { %v422_v18 = vsel %vm416_vm10, %v409_v8, %v411_v2  ;;  %v9325_v19 = vor.u32 %v11158_v14, %v9324_v4  ;;  %v11644_v8 = vmov 0  }
  0xc0   : > { %843 = vmatpush.bf16.msra.mxu0 %v9317_v12  ;;  %881 = vmatpush.bf16.msrb.mxu2 %v9321_v13  ;;  %v424_v20 = vunpack.c.l.b16 %v422_v18  ;;  %v427_v23 = vunpack.c.h.b16 %v422_v18 }
  0xc1   : > { %919 = vmatpush.bf16.msra.mxu1 %v9325_v19  ;;  %11613 = vset.pattern.permute.xlu1 %v11644_v8  ;;  %v322_v19 = vld [vmem:[%s15072_s3] sm:$0xff] }
  0xc2   : > { %v430_v30 = vpack.c.b16 %v425_v10, %v424_v20  ;;  %v432_v31 = vpack.c.b16 %v428_v11, %v427_v23  ;;  %v9292_v21 = vld [vmem:[#allocation2 + $0x48] sm:$0xf]  ;;  %v11150_v32 = vld [vmem:[#allocation2 + $0x4c] sm:$0xf]  ;;  %11612 = vset.pattern.permute.xlu0 %v11644_v8  ;;  %11611 = vset.pattern.permute.xlu2 %v11644_v8 }
  0xc3   : > { %v11151_v33 = vld [vmem:[#allocation2 + $0x50] sm:$0xf0]  ;;  %v9294_v34 = vld [vmem:[#allocation2 + $0x54] sm:$0xf0]  ;;  %654 = vperm.xlu1 %11613, %v322_v19  }
  0xc4   : > { %438 = vst [vmem:[#allocation2 + $0x30] sm:$0xff] %v430_v30  ;;  %844 = vmatpush.bf16.msra.mxu0 %v9305_v25  ;;  %882 = vmatpush.bf16.msrb.mxu2 %v9309_v26  ;;  %v375_v35 = vpop.permute.xlu1 %374  ;;  %v9293_v36 = vor.u32 %v11151_v33, %v9292_v21  ;;  %v9297_v37 = vor.u32 %v11150_v32, %v9294_v34 }
  0xc5   : > { %440 = vst [vmem:[#allocation2 + $0x3c] sm:$0xff] %v432_v31  ;;  %v449_v38 = vpop.permute.xlu0 %448  ;;  %920 = vmatpush.bf16.msra.mxu1 %v9313_v29  ;;  %v388_v43 = vsel %vm382_vm11, %v375_v35, %v11810_v52 }
  0xc6   : > { %v452_v39 = vsel %vm450_vm9, %v11775_v61, %v449_v38  ;;  %v390_v49 = vunpack.c.l.b16 %v388_v43  ;;  %v393_v1 = vunpack.c.h.b16 %v388_v43 }
  0xc7   : > { %v460_v40 = vunpack.c.l.b16 %v452_v39  ;;  %v463_v41 = vunpack.c.h.b16 %v452_v39 }
  0xc8   : > { %845 = vmatpush.bf16.msra.mxu0 %v9293_v36  ;;  %883 = vmatpush.bf16.msrb.mxu2 %v9297_v37 }
  0xc9   : > { %v465_v24 = vpack.c.b16 %v460_v40, %v460_v40  ;;  %v467_v42 = vpack.c.b16 %v463_v41, %v463_v41 }
  0xcb   : > { %473 = vst.msk [vmem:[#allocation2 + $0x50] sm:$0xf] %vm370_vm0, %v465_v24  ;;  %v9280_v45 = vld [vmem:[#allocation2 + $0x30] sm:$0xf]  ;;  %v11147_v46 = vld [vmem:[#allocation2 + $0x34] sm:$0xf] }
  0xcc   : > { %475 = vst.msk [vmem:[#allocation2 + $0x5c] sm:$0xf] %vm370_vm0, %v467_v42  ;;  %v415_v47 = vpop.permute.xlu1 %414  ;;  %v11148_v48 = vld [vmem:[#allocation2 + $0x38] sm:$0xf0]  ;;  %v9282_v61 = vld [vmem:[#allocation2 + $0x3c] sm:$0xf0] }
  0xcd   : > { %v418_v50 = vsel %vm416_vm10, %v11793_v27, %v415_v47  ;;  %v9281_v51 = vor.u32 %v11148_v48, %v9280_v45  ;;  %v9285_v53 = vor.u32 %v11147_v46, %v9282_v61  ;;  %v379_v54 = vpop.permute.xlu0 %378  ;;  %v9240_v48 = vld [vmem:[%s15071_s2] sm:$0xf] }
  0xce   : > { %v426_v55 = vunpack.c.l.b16 %v418_v50  ;;  %v429_v56 = vunpack.c.h.b16 %v418_v50  ;;  %v383_v57 = vsel %vm382_vm11, %v11810_v52, %v379_v54  ;;  %v384_v58 = vsel %vm382_vm11, %v379_v54, %v381_v44 }
  0xcf   : > { %846 = vmatpush.bf16.msra.mxu0 %v9281_v51  ;;  %884 = vmatpush.bf16.msrb.mxu2 %v9285_v53  ;;  %v391_v60 = vunpack.c.l.b16 %v383_v57  ;;  %v392_v62 = vunpack.c.l.b16 %v384_v58  ;;  %v394_v63 = vunpack.c.h.b16 %v383_v57  ;;  %v395_v0 = vunpack.c.h.b16 %v384_v58 }
  0xd0   : > { %v431_v2 = vpack.c.b16 %v426_v55, %v426_v55  ;;  %v433_v3 = vpack.c.b16 %v429_v56, %v429_v56  ;;  %v324_v55 = vld [vmem:[%s15072_s3 + $0x10] sm:$0xff]  ;;  %v325_v56 = vld [vmem:[%s15072_s3 + $0x18] sm:$0xff] }
  0xd1   : > { %v396_v27 = vpack.c.b16 %v391_v60, %v390_v49  ;;  %v397_v4 = vpack.c.b16 %v392_v62, %v392_v62  ;;  %v398_v5 = vpack.c.b16 %v394_v63, %v393_v1  ;;  %v399_v52 = vpack.c.b16 %v395_v0, %v395_v0  ;;  %664 = vperm.xlu2 %11611, %v324_v55   ;;  %v323_v62 = vld [vmem:[%s15072_s3 + $0x8] sm:$0xff] }
  0xd2   : > { %439 = vst.msk [vmem:[#allocation2 + $0x38] sm:$0xf] %vm370_vm0, %v431_v2  ;;  %v9300_v6 = vld [vmem:[#allocation2 + $0x50] sm:$0xf]  ;;  %669 = vperm.xlu0 %11612, %v325_v56  }
  0xd3   : > { %441 = vst.msk [vmem:[#allocation2 + $0x44] sm:$0xf] %vm370_vm0, %v433_v3  ;;  %v11152_v7 = vld [vmem:[#allocation2 + $0x58] sm:$0xf0]  ;;  %v9248_v3 = vld [vmem:[%s15071_s2 + $0x10] sm:$0xf] }
  0xd4   : > { %404 = vst [vmem:[#allocation2 + $0x18] sm:$0xff] %v396_v27  ;;  %v344_v9 = vpop.permute.xlu1 %343  ;;  %v9301_v10 = vor.u32 %v11152_v7, %v9300_v6  ;;  %v11140_v27 = vld [vmem:[%s15071_s2 + $0x14] sm:$0xf0] }
  0xd5   : > { %405 = vst.msk [vmem:[#allocation2 + $0x20] sm:$0xf] %vm370_vm0, %v397_v4  ;;  %v342_v11 = vpop.permute.xlu0 %341  ;;  %v9249_v4 = vor.u32 %v11140_v27, %v9248_v3 }
  0xd6   : > { %406 = vst [vmem:[#allocation2 + $0x24] sm:$0xff] %v398_v5  ;;  %921 = vmatpush.bf16.msra.mxu1 %v9301_v10  ;;  %v348_v12 = vsel %vm347_vm12, %v342_v11, %v344_v9  ;;  %v353_v13 = vsel %vm347_vm12, %v11827_v28, %v342_v11 }
  0xd7   : > { %407 = vst.msk [vmem:[#allocation2 + $0x2c] sm:$0xf] %vm370_vm0, %v399_v52  ;;  %v355_v14 = vunpack.c.l.b16 %v353_v13  ;;  %v356_v16 = vunpack.c.l.b16 %v348_v12  ;;  %v358_v17 = vunpack.c.h.b16 %v353_v13  ;;  %v359_v18 = vunpack.c.h.b16 %v348_v12 }
  0xd9   : > { %v361_v20 = vpack.c.b16 %v356_v16, %v355_v14  ;;  %v363_v23 = vpack.c.b16 %v359_v18, %v358_v17  ;;  %v9288_v25 = vld [vmem:[#allocation2 + $0x38] sm:$0xf]  ;;  %659 = vperm.xlu2 %11611, %v323_v62   ;;  %v307_v14 = vld [vmem:[%s15073_s1] sm:$0x7]  ;;  %s15089_s1 = smov 110  }
  0xda   : > { %v11149_v26 = vld [vmem:[#allocation2 + $0x40] sm:$0xf0]  ;;  %v11889_v18 = vperm.slane %v307_v14, 0 }
  0xdb   : > { %369 = vst [vmem:[#allocation2] sm:$0xff] %v361_v20  ;;  %v9268_v29 = vld [vmem:[#allocation2 + $0x18] sm:$0xf]  ;;  %v11144_v30 = vld [vmem:[#allocation2 + $0x1c] sm:$0xf]  ;;  %v9289_v31 = vor.u32 %v11149_v26, %v9288_v25  ;;  %v11891_v20 = vperm.slane %v307_v14, 1 }
  0xdc   : > { %372 = vst [vmem:[#allocation2 + $0xc] sm:$0xff] %v363_v23  ;;  %v346_v28 = vpop.permute.xlu1 %345  ;;  %v9276_v21 = vld [vmem:[#allocation2 + $0x20] sm:$0xf] }
  0xdd   : > { %v11145_v32 = vld [vmem:[#allocation2 + $0x20] sm:$0xf0]  ;;  %v9270_v33 = vld [vmem:[#allocation2 + $0x24] sm:$0xf0]  ;;  %922 = vmatpush.bf16.msra.mxu1 %v9289_v31  ;;  %v592_v34 = vpop.permute.xlu0 %591  ;;  %v349_v35 = vsel %vm347_vm12, %v344_v9, %v346_v28 }
  0xde   : > { %v9269_v36 = vor.u32 %v11145_v32, %v9268_v29  ;;  %v9273_v37 = vor.u32 %v11144_v30, %v9270_v33  ;;  %v596_v38 = vsel %vm593_vm13, %v11760_v22, %v592_v34  ;;  %v357_v39 = vunpack.c.l.b16 %v349_v35  ;;  %v11146_v40 = vld [vmem:[#allocation2 + $0x28] sm:$0xf0]  ;;  %v11138_v22 = vld [vmem:[%s15071_s2 + $0x4] sm:$0xf0] }
  0xdf   : > { %v600_v41 = vunpack.c.l.b16 %v596_v38  ;;  %v603_v24 = vunpack.c.h.b16 %v596_v38  ;;  %v360_v42 = vunpack.c.h.b16 %v349_v35  ;;  %v9277_v43 = vor.u32 %v11146_v40, %v9276_v21 }
  0xe0   : > { %847 = vmatpush.bf16.msra.mxu0 %v9269_v36  ;;  %885 = vmatpush.bf16.msrb.mxu2 %v9273_v37  ;;  %v362_v44 = vpack.c.b16 %v357_v39, %v357_v39  ;;  %v9241_v57 = vor.u32 %v11138_v22, %v9240_v48  ;;  %v11897_v33 = vperm.slane %v307_v14, 2 }
  0xe1   : > { %v605_v45 = vpack.c.b16 %v600_v41, %v600_v41  ;;  %v607_v46 = vpack.c.b16 %v603_v24, %v603_v24  ;;  %v364_v47 = vpack.c.b16 %v360_v42, %v360_v42  ;;  %923 = vmatpush.bf16.msra.mxu1 %v9277_v43 }
  0xe2   : > { %371 = vst.msk [vmem:[#allocation2 + $0x8] sm:$0xf] %vm370_vm0, %v362_v44  ;;  %v9256_v61 = vld [vmem:[#allocation2] sm:$0xf]  ;;  %v11141_v49 = vld [vmem:[#allocation2 + $0x4] sm:$0xf] }
  0xe3   : > { %613 = vst.msk [vmem:[#allocation2 + $0xc8] sm:$0xf] %vm370_vm0, %v605_v45  ;;  %v11142_v50 = vld [vmem:[#allocation2 + $0x8] sm:$0xf0]  ;;  %v9258_v51 = vld [vmem:[#allocation2 + $0xc] sm:$0xf0] }
  0xe4   : > { %615 = vst.msk [vmem:[#allocation2 + $0xd4] sm:$0xf] %vm370_vm0, %v607_v46  ;;  %v9257_v53 = vor.u32 %v11142_v50, %v9256_v61  ;;  %v9261_v54 = vor.u32 %v11141_v49, %v9258_v51 }
  0xe5   : > { %373 = vst.msk [vmem:[#allocation2 + $0x14] sm:$0xf] %vm370_vm0, %v364_v47 }
  0xe6   : > { %848 = vmatpush.bf16.msra.mxu0 %v9257_v53  ;;  %886 = vmatpush.bf16.msrb.mxu2 %v9261_v54 }
  0xe9   : > { %887 = vmatmul.bf16.vlgmr.msrb.gmra.mxu2 %v9241_v57  ;;  %849 = vmatmul.bf16.vlgmr.msra.gmra.mxu0 %v9241_v57  ;;  %v9264_v60 = vld [vmem:[#allocation2 + $0x8] sm:$0xf] }
  0xea   : > { %v9360_v58 = vld [vmem:[#allocation2 + $0xc8] sm:$0xf] }
  0xeb   : > { %v11167_v63 = vld [vmem:[#allocation2 + $0xd0] sm:$0xf0] }
  0xec   : > { %v9361_v0 = vor.u32 %v11167_v63, %v9360_v58  ;;  %v11143_v1 = vld [vmem:[#allocation2 + $0x10] sm:$0xf0] }
  0xed   : > { %v9265_v2 = vor.u32 %v11143_v1, %v9264_v60 }
  0xee   : > { %943 = vmatpush.bf16.msrb.mxu3 %v9361_v0 }
  0xef   : > { %924 = vmatpush.bf16.msra.mxu1 %v9265_v2 }
  0xf1   : > { %9366 = vmatmul.msk.bf16.vlgmr.msrb.gmra.mxu3 %vm834_vm8, %v11787_v15 }
  0xf2   : > { %925 = vmatmul.bf16.vlgmr.msra.gmra.mxu1 %v9241_v57 }
  0xf9   : > { %892 = vmatmul.bf16.gmra.mxu2 %v9249_v4  ;;  %854 = vmatmul.bf16.gmra.mxu0 %v9249_v4 }
 0x101   : > { %9367 = vmatmul.msk.bf16.gmra.mxu3 %vm834_vm8, %v11818_v59 }
 0x102   : > { %930 = vmatmul.bf16.gmra.mxu1 %v9249_v4 }
 0x12b   : > { %v665_v10 = vpop.permute.xlu2 %664 }
 0x12d   : > { %v869_v5 = vpop.f32.mrf.mxu2  ;;  %v907_v52 = vpop.f32.mrf.mxu3 }
 0x133   : > { %v660_v23 = vpop.permute.xlu2 %659 }
 0x135   : > { %v871_v6 = vpop.f32.mrf.mxu2  ;;  %v909_v7 = vpop.f32.mrf.mxu3 }
 0x136   : > { %v655_v11 = vpop.permute.xlu1 %654 }
 0x13d   : > { %v874_v15 = vpop.f32.mrf.mxu2  ;;  %v912_v9 = vpop.f32.mrf.mxu3 }
 0x144   : > { %v670_v54 = vpop.permute.xlu0 %669 }
 0x145   : > { %v11882_v8 = vpop.f32.mrf.mxu2  ;;  %v11887_v17 = vpop.f32.mrf.mxu3 }
 0x166   : > { %v850_v12 = vpop.f32.mrf.mxu0 }
 0x167   : > { %v851_v13 = vadd.f32 %v850_v12, %v655_v11 }
 0x169   : > { %v870_v59 = vadd.f32 %v869_v5, %v851_v13 }
 0x16b   : > { %v962_v30 = vmul.f32 %v11889_v18, %v870_v59 }
 0x16c   : > { %v888_v16 = vpop.f32.mrf.mxu2 }
 0x16d   : > { %v889_v19 = vadd.f32 %v888_v16, %v655_v11 }
 0x16e   : > { %v852_v25 = vpop.f32.mrf.mxu0 }
 0x16f   : > { %v908_v26 = vadd.f32 %v907_v52, %v889_v19  ;;  %v926_v29 = vpop.f32.mrf.mxu1  ;;  %v853_v21 = vadd.f32 %v852_v25, %v660_v23 }
 0x170   : > { %v927_v28 = vadd.f32 %v926_v29, %v655_v11 }
 0x171   : > { %v963_v31 = vmul.f32 %v11891_v20, %v908_v26  ;;  %v872_v36 = vadd.f32 %v871_v6, %v853_v21 }
 0x173   : > { %v11895_v32 = vpack.c.bf16 %v963_v31, %v962_v30  ;;  %v965_v42 = vmul.f32 %v11889_v18, %v872_v36 }
 0x174   : > { %v890_v34 = vpop.f32.mrf.mxu2  ;;  %v945_v35 = vpop.f32.mrf.mxu3 }
 0x175   : > { %1276 = vst [vmem:[#allocation2 + $0xc0] sm:$0xff] %v11895_v32  ;;  %v891_v37 = vadd.f32 %v890_v34, %v660_v23  ;;  %v946_v38 = vadd.f32 %v945_v35, %v927_v28  ;;  %v1012_v48 = vunpack.c.l.b16 %v11895_v32  ;;  %v1013_v29 = vunpack.c.h.b16 %v11895_v32 }
 0x176   : > { %v855_v39 = vpop.f32.mrf.mxu0 }
 0x177   : > { %v910_v40 = vadd.f32 %v909_v7, %v891_v37  ;;  %v964_v41 = vmul.f32 %v11897_v33, %v946_v38  ;;  %v928_v24 = vpop.f32.mrf.mxu1  ;;  %v856_v45 = vadd.f32 %v855_v39, %v665_v10 }
 0x178   : > { %v929_v47 = vadd.f32 %v928_v24, %v660_v23 }
 0x179   : > { %v966_v43 = vmul.f32 %v11891_v20, %v910_v40  ;;  %v11903_v44 = vpack.c.bf16 %v964_v41, %v964_v41  ;;  %v875_v50 = vadd.f32 %v874_v15, %v856_v45 }
 0x17b   : > { %v11905_v46 = vpack.c.bf16 %v966_v43, %v965_v42  ;;  %1277 = vst.msk [vmem:[#allocation2 + $0xc8] sm:$0xf] %vm370_vm0, %v11903_v44  ;;  %v968_v62 = vmul.f32 %v11889_v18, %v875_v50  ;;  %v998_v2 = vunpack.c.l.b16 %v11903_v44 }
 0x17c   : > { %v893_v22 = vpop.f32.mrf.mxu2  ;;  %v947_v61 = vpop.f32.mrf.mxu3 }
 0x17d   : > { %v1014_v49 = vunpack.c.l.b16 %v11905_v46  ;;  %1278 = vst [vmem:[#allocation2 + $0xcc] sm:$0xff] %v11905_v46  ;;  %v894_v51 = vadd.f32 %v893_v22, %v665_v10  ;;  %v948_v53 = vadd.f32 %v947_v61, %v929_v47  ;;  %v1015_v25 = vunpack.c.h.b16 %v11905_v46 }
 0x17e   : > { %v857_v60 = vpop.f32.mrf.mxu0 }
 0x17f   : > { %v11912_v55 = vpack.c.b16 %v1014_v49, %v1012_v48  ;;  %v913_v56 = vadd.f32 %v912_v9, %v894_v51  ;;  %v967_v57 = vmul.f32 %v11897_v33, %v948_v53  ;;  %v931_v58 = vpop.f32.mrf.mxu1  ;;  %v858_v1 = vadd.f32 %v857_v60, %v670_v54 }
 0x180   : > { %v932_v4 = vadd.f32 %v931_v58, %v665_v10  ;;  %v1021_v30 = vpack.c.b16 %v1015_v25, %v1013_v29 }
 0x181   : > { %v969_v63 = vmul.f32 %v11891_v20, %v913_v56  ;;  %v11917_v0 = vpack.c.bf16 %v967_v57, %v967_v57  ;;  %1216 = vrot.lane.b32.xlu2 %v11912_v55, %s15062_s18  ;;  %v877_v7 = vadd.f32 %v11882_v8, %v858_v1 }
 0x183   : > { %v11922_v3 = vpack.c.bf16 %v969_v63, %v968_v62  ;;  %v999_v27 = vunpack.c.l.b16 %v11917_v0  ;;  %1279 = vst.msk [vmem:[#allocation2 + $0xd4] sm:$0xf] %vm370_vm0, %v11917_v0  ;;  %v971_v8 = vmul.f32 %v11889_v18, %v877_v7 }
 0x184   : > { %v895_v5 = vpop.f32.mrf.mxu2  ;;  %v950_v6 = vpop.f32.mrf.mxu3 }
 0x185   : > { %1280 = vst [vmem:[#allocation2 + $0xd8] sm:$0xff] %v11922_v3  ;;  %v11928_v52 = vpack.c.b16 %v999_v27, %v998_v2  ;;  %v951_v15 = vadd.f32 %v950_v6, %v932_v4  ;;  %v896_v9 = vadd.f32 %v895_v5, %v670_v54  ;;  %v1016_v34 = vunpack.c.l.b16 %v11922_v3 }
 0x186   : > { %v1017_v38 = vunpack.c.h.b16 %v11922_v3 }
 0x187   : > { %v970_v11 = vmul.f32 %v11897_v33, %v951_v15  ;;  %1416 = vrot.lane.b32.xlu0 %v11928_v52, %s15060_s12  ;;  %1212 = vrot.lane.b32.xlu1 %v11928_v52, %s15048_s19  ;;  %v933_v12 = vpop.f32.mrf.mxu1  ;;  %v915_v10 = vadd.f32 %v11887_v17, %v896_v9 }
 0x188   : > { %v934_v14 = vadd.f32 %v933_v12, %v670_v54 }
 0x189   : > { %v11937_v13 = vpack.c.bf16 %v970_v11, %v970_v11  ;;  %1152 = vrot.lane.b32.xlu2 %v11912_v55, %s15058_s20  ;;  %v972_v16 = vmul.f32 %v11891_v20, %v915_v10 }
 0x18b   : > { %1281 = vst.msk [vmem:[#allocation2 + $0xe0] sm:$0xf] %vm370_vm0, %v11937_v13  ;;  %v11945_v59 = vpack.c.bf16 %v972_v16, %v971_v8  ;;  %v1000_v28 = vunpack.c.l.b16 %v11937_v13 }
 0x18c   : > { %v952_v19 = vpop.f32.mrf.mxu3 }
 0x18d   : > { %v953_v23 = vadd.f32 %v952_v19, %v934_v14  ;;  %1282 = vst [vmem:[#allocation2 + $0xe4] sm:$0xff] %v11945_v59  ;;  %v1018_v21 = vunpack.c.l.b16 %v11945_v59  ;;  %v1019_v37 = vunpack.c.h.b16 %v11945_v59 }
 0x18f   : > { %v973_v17 = vmul.f32 %v11897_v33, %v953_v23  ;;  %1352 = vrot.lane.b32.xlu0 %v11928_v52, %s15056_s13  ;;  %1148 = vrot.lane.b32.xlu1 %v11928_v52, %s15046_s21  ;;  %v11984_v36 = vpack.c.b16 %v1018_v21, %v1016_v34  ;;  %v1023_v39 = vpack.c.b16 %v1019_v37, %v1017_v38 }
 0x191   : > { %v11954_v26 = vpack.c.bf16 %v973_v17, %v973_v17  ;;  %1088 = vrot.lane.b32.xlu2 %v11912_v55, %s15054_s23 }
 0x193   : > { %1283 = vst.msk [vmem:[#allocation2 + $0xec] sm:$0xf] %vm370_vm0, %v11954_v26  ;;  %v1001_v31 = vunpack.c.l.b16 %v11954_v26 }
 0x195   : > { %v11982_v35 = vpack.c.b16 %v1001_v31, %v1000_v28 }
 0x197   : > { %1218 = vrot.lane.b32.xlu0 %v1021_v30, %s15062_s18  ;;  %1084 = vrot.lane.b32.xlu1 %v11928_v52, %s15044_s22 }
 0x199   : > { %1024 = vrot.lane.b32.xlu2 %v11912_v55, %s15052_s25 }
 0x19f   : > { %1154 = vrot.lane.b32.xlu0 %v1021_v30, %s15058_s20  ;;  %1004 = vrot.lane.b32.xlu1 %v11928_v52, %s15042_s24 }
 0x1a1   : > { %1414 = vrot.lane.b32.xlu2 %v1021_v30, %s15060_s12 }
 0x1a7   : > { %1090 = vrot.lane.b32.xlu0 %v1021_v30, %s15054_s23  ;;  %1412 = vrot.lane.b32.xlu1 %v11912_v55, %s15060_s12 }
 0x1a9   : > { %1350 = vrot.lane.b32.xlu2 %v1021_v30, %s15056_s13 }
 0x1af   : > { %1026 = vrot.lane.b32.xlu0 %v1021_v30, %s15052_s25  ;;  %1348 = vrot.lane.b32.xlu1 %v11912_v55, %s15056_s13 }
 0x1b1   : > { %1286 = vrot.lane.b32.xlu2 %v1021_v30, %s15050_s14 }
 0x1b7   : > { %1284 = vrot.lane.b32.xlu1 %v11912_v55, %s15050_s14  ;;  %1422 = vrot.lane.b32.xlu0 %v11982_v35, %s15060_s12 }
 0x1b9   : > { %1222 = vrot.lane.b32.xlu2 %v11984_v36, %s15062_s18 }
 0x1bf   : > { %1358 = vrot.lane.b32.xlu0 %v11982_v35, %s15056_s13  ;;  %1214 = vrot.lane.b32.xlu1 %v11982_v35, %s15048_s19 }
 0x1c1   : > { %1158 = vrot.lane.b32.xlu2 %v11984_v36, %s15058_s20 }
 0x1c7   : > { %1294 = vrot.lane.b32.xlu0 %v11982_v35, %s15050_s14  ;;  %1150 = vrot.lane.b32.xlu1 %v11982_v35, %s15046_s21  ;;  %s15077_s21 = smov 77  }
 0x1c9   : > { %1094 = vrot.lane.b32.xlu2 %v11984_v36, %s15054_s23 }
 0x1cf   : > { %1086 = vrot.lane.b32.xlu1 %v11982_v35, %s15044_s22  ;;  %1224 = vrot.lane.b32.xlu0 %v1023_v39, %s15062_s18  ;;  %s15078_s22 = smov 78  }
 0x1d1   : > { %1030 = vrot.lane.b32.xlu2 %v11984_v36, %s15052_s25 }
 0x1d7   : > { %1006 = vrot.lane.b32.xlu1 %v11982_v35, %s15042_s24  ;;  %1160 = vrot.lane.b32.xlu0 %v1023_v39, %s15058_s20  ;;  %s15082_s24 = smov 19  }
 0x1d9   : > { %1476 = vrot.lane.b32.xlu2 %v11912_v55, %s15040_s11 }
 0x1db   : > { %v1217_v40 = vpop.permute.xlu2 %1216 }
 0x1df   : > { %1480 = vrot.lane.b32.xlu1 %v11928_v52, %s15040_s11  ;;  %1096 = vrot.lane.b32.xlu0 %v1023_v39, %s15054_s23 }
 0x1e1   : > { %1420 = vrot.lane.b32.xlu2 %v1023_v39, %s15060_s12 }
 0x1e3   : > { %v1153_v41 = vpop.permute.xlu2 %1152 }
 0x1e7   : > { %1032 = vrot.lane.b32.xlu0 %v1023_v39, %s15052_s25  ;;  %1418 = vrot.lane.b32.xlu1 %v11984_v36, %s15060_s12 }
 0x1e9   : > { %1356 = vrot.lane.b32.xlu2 %v1023_v39, %s15056_s13 }
 0x1eb   : > { %v1089_v24 = vpop.permute.xlu2 %1088 }
 0x1ef   : > { %1288 = vrot.lane.b32.xlu0 %v11928_v52, %s15050_s14  ;;  %1354 = vrot.lane.b32.xlu1 %v11984_v36, %s15056_s13 }
 0x1f1   : > { %1292 = vrot.lane.b32.xlu2 %v1023_v39, %s15050_s14 }
 0x1f3   : > { %v12029_v42 = vpop.permute.xlu2 %1024 }
 0x1f7   : > { %1486 = vrot.lane.b32.xlu0 %v11982_v35, %s15040_s11  ;;  %1290 = vrot.lane.b32.xlu1 %v11984_v36, %s15050_s14 }
 0x1f9   : > { %v1213_v43 = vpop.permute.xlu1 %1212  ;;  %1226 = vrot.lane.b32.xlu2 %v11982_v35, %s15062_s18  ;;  %v12037_v45 = vpop.permute.xlu0 %1416 }
 0x1fa   : > { %v1234_v49 = vsel %vm450_vm9, %v1213_v43, %v1217_v40 }
 0x1fb   : > { %v1415_v47 = vpop.permute.xlu2 %1414  ;;  %v1240_v54 = vunpack.c.l.b16 %v1234_v49  ;;  %v1243_v56 = vunpack.c.h.b16 %v1234_v49 }
 0x1fc   : > { %v1425_v10 = vsel %vm554_vm1, %v1415_v47, %v12037_v45 }
 0x1fd   : > { %v1441_v8 = vunpack.c.l.b16 %v1425_v10  ;;  %v1444_v23 = vunpack.c.h.b16 %v1425_v10 }
 0x1ff   : > { %1478 = vrot.lane.b32.xlu0 %v1021_v30, %s15040_s11  ;;  %1482 = vrot.lane.b32.xlu1 %v11984_v36, %s15040_s11 }
 0x201   : > { %v1149_v48 = vpop.permute.xlu1 %1148  ;;  %1484 = vrot.lane.b32.xlu2 %v1023_v39, %s15040_s11  ;;  %v12043_v22 = vpop.permute.xlu0 %1352  ;;  %s15081_s11 = smov 50  }
 0x202   : > { %v1170_v1 = vsel %vm416_vm10, %v1149_v48, %v1153_v41 }
 0x203   : > { %v12045_v61 = vpop.permute.xlu2 %1350  ;;  %v1176_v5 = vunpack.c.l.b16 %v1170_v1  ;;  %v1179_v6 = vunpack.c.h.b16 %v1170_v1 }
 0x207   : > { %1428 = vrot.lane.b32.xlu0 %v11912_v55, %s15038_s15  ;;  %1430 = vrot.lane.b32.xlu1 %v11984_v36, %s15038_s15 }
 0x209   : > { %v1085_v50 = vpop.permute.xlu1 %1084  ;;  %1366 = vrot.lane.b32.xlu2 %v11984_v36, %s15074_s16  ;;  %v12054_v51 = vpop.permute.xlu0 %1218 }
 0x20a   : > { %v1228_v53 = vsel %vm450_vm9, %v1217_v40, %v12054_v51  ;;  %v1106_v14 = vsel %vm382_vm11, %v1085_v50, %v1089_v24 }
 0x20b   : > { %v1241_v57 = vunpack.c.l.b16 %v1228_v53  ;;  %v1244_v58 = vunpack.c.h.b16 %v1228_v53  ;;  %v12058_v60 = vpop.permute.xlu2 %1286  ;;  %v1112_v17 = vunpack.c.l.b16 %v1106_v14  ;;  %v1115_v37 = vunpack.c.h.b16 %v1106_v14  ;;  %v990_v14 = vld [vmem:[%s15027_s5] sm:$0xff] }
 0x20d   : > { %v1252_v62 = vpack.c.b16 %v1241_v57, %v1240_v54  ;;  %v1254_v63 = vpack.c.b16 %v1244_v58, %v1243_v56 }
 0x20f   : > { %1268 = vst [vmem:[#allocation2 + $0x90] sm:$0xff] %v1252_v62  ;;  %1162 = vrot.lane.b32.xlu0 %v11982_v35, %s15058_s20  ;;  %1220 = vrot.lane.b32.xlu1 %v11928_v52, %s15062_s18 }
 0x210   : > { %1270 = vst [vmem:[#allocation2 + $0x9c] sm:$0xff] %v1254_v63 }
 0x211   : > { %v1005_v2 = vpop.permute.xlu1 %1004  ;;  %1156 = vrot.lane.b32.xlu2 %v11928_v52, %s15058_s20  ;;  %v12067_v27 = vpop.permute.xlu0 %1154 }
 0x212   : > { %v1164_v4 = vsel %vm416_vm10, %v1153_v41, %v12067_v27  ;;  %v1361_v41 = vsel %vm520_vm3, %v12045_v61, %v12043_v22 }
 0x213   : > { %v1177_v15 = vunpack.c.l.b16 %v1164_v4  ;;  %v1180_v7 = vunpack.c.h.b16 %v1164_v4  ;;  %v12071_v9 = vpop.permute.xlu2 %1222  ;;  %v1380_v50 = vunpack.c.h.b16 %v1361_v41 }
 0x215   : > { %v1188_v11 = vpack.c.b16 %v1177_v15, %v1176_v5  ;;  %v1190_v12 = vpack.c.b16 %v1180_v7, %v1179_v6  ;;  %v992_v15 = vld [vmem:[%s15027_s5 + $0x10] sm:$0xff] }
 0x217   : > { %1204 = vst [vmem:[#allocation2 + $0x60] sm:$0xff] %v1188_v11  ;;  %1302 = vrot.lane.b32.xlu0 %v11984_v36, %s15075_s17  ;;  %1364 = vrot.lane.b32.xlu1 %v11912_v55, %s15074_s16  ;;  %v993_v11 = vld [vmem:[%s15027_s5 + $0x18] sm:$0xff] }
 0x218   : > { %1206 = vst [vmem:[#allocation2 + $0x6c] sm:$0xff] %v1190_v12 }
 0x219   : > { %v1413_v16 = vpop.permute.xlu1 %1412  ;;  %1300 = vrot.lane.b32.xlu2 %v11912_v55, %s15075_s17  ;;  %v12082_v19 = vpop.permute.xlu0 %1090 }
 0x21a   : > { %v1424_v25 = vsel %vm554_vm1, %v1413_v16, %v1415_v47  ;;  %v1100_v29 = vsel %vm382_vm11, %v1089_v24, %v12082_v19  ;;  %v1042_v47 = vsel %vm347_vm12, %v1005_v2, %v12029_v42  ;;  %v1377_v24 = vunpack.c.l.b16 %v1361_v41 }
 0x21b   : > { %v1440_v30 = vunpack.c.l.b16 %v1424_v25  ;;  %v1443_v31 = vunpack.c.h.b16 %v1424_v25  ;;  %v1113_v28 = vunpack.c.l.b16 %v1100_v29  ;;  %v1116_v21 = vunpack.c.h.b16 %v1100_v29  ;;  %v12087_v34 = vpop.permute.xlu2 %1158 }
 0x21c   : > { %v1048_v53 = vunpack.c.l.b16 %v1042_v47  ;;  %v1051_v2 = vunpack.c.h.b16 %v1042_v47 }
 0x21d   : > { %v1452_v38 = vpack.c.b16 %v1441_v8, %v1440_v30  ;;  %v1454_v39 = vpack.c.b16 %v1444_v23, %v1443_v31  ;;  %v1124_v40 = vpack.c.b16 %v1113_v28, %v1112_v17  ;;  %v1126_v43 = vpack.c.b16 %v1116_v21, %v1115_v37 }
 0x21f   : > { %1468 = vst [vmem:[#allocation2 + $0x150] sm:$0xff] %v1452_v38  ;;  %1092 = vrot.lane.b32.xlu0 %v11928_v52, %s15054_s23  ;;  %1098 = vrot.lane.b32.xlu1 %v11982_v35, %s15054_s23 }
 0x220   : > { %1470 = vst [vmem:[#allocation2 + $0x15c] sm:$0xff] %v1454_v39 }
 0x221   : > { %1140 = vst [vmem:[#allocation2 + $0x30] sm:$0xff] %v1124_v40  ;;  %v1349_v48 = vpop.permute.xlu1 %1348  ;;  %1028 = vrot.lane.b32.xlu2 %v11928_v52, %s15052_s25  ;;  %v12100_v49 = vpop.permute.xlu0 %1026 }
 0x222   : > { %1142 = vst [vmem:[#allocation2 + $0x3c] sm:$0xff] %v1126_v43  ;;  %v1360_v54 = vsel %vm520_vm3, %v1349_v48, %v12045_v61  ;;  %v1036_v56 = vsel %vm347_vm12, %v12029_v42, %v12100_v49 }
 0x223   : > { %v1376_v57 = vunpack.c.l.b16 %v1360_v54  ;;  %v1379_v58 = vunpack.c.h.b16 %v1360_v54  ;;  %v1049_v62 = vunpack.c.l.b16 %v1036_v56  ;;  %v1052_v63 = vunpack.c.h.b16 %v1036_v56  ;;  %v12107_v1 = vpop.permute.xlu2 %1094 }
 0x225   : > { %v1388_v52 = vpack.c.b16 %v1377_v24, %v1376_v57  ;;  %v1390_v4 = vpack.c.b16 %v1380_v50, %v1379_v58  ;;  %v1060_v5 = vpack.c.b16 %v1049_v62, %v1048_v53  ;;  %v1062_v6 = vpack.c.b16 %v1052_v63, %v1051_v2 }
 0x227   : > { %1404 = vst [vmem:[#allocation2 + $0x120] sm:$0xff] %v1388_v52  ;;  %1494 = vrot.lane.b32.xlu0 %v11984_v36, %s15076_s29  ;;  %1034 = vrot.lane.b32.xlu1 %v11982_v35, %s15052_s25  ;;  %v991_v36 = vld [vmem:[%s15027_s5 + $0x8] sm:$0xff] }
 0x228   : > { %1406 = vst [vmem:[#allocation2 + $0x12c] sm:$0xff] %v1390_v4 }
 0x229   : > { %1076 = vst [vmem:[#allocation2] sm:$0xff] %v1060_v5  ;;  %v12116_v42 = vpop.permute.xlu1 %1284  ;;  %1624 = vperm.xlu2 %11611, %v992_v15   ;;  %v12118_v61 = vpop.permute.xlu0 %1422  ;;  %v11193_v15 = vld [vmem:[#allocation2 + $0x98] sm:$0xf0] }
 0x22a   : > { %1078 = vst [vmem:[#allocation2 + $0xc] sm:$0xff] %v1062_v6 }
 0x22b   : > { %v12120_v7 = vpop.permute.xlu2 %1030 }
 0x22f   : > { %1629 = vperm.xlu0 %11612, %v993_v11   ;;  %1492 = vrot.lane.b32.xlu1 %v11912_v55, %s15076_s29  ;;  %v11192_v11 = vld [vmem:[#allocation2 + $0x94] sm:$0xf] }
 0x231   : > { %v1215_v35 = vpop.permute.xlu1 %1214  ;;  %1619 = vperm.xlu2 %11611, %v991_v36   ;;  %v12130_v12 = vpop.permute.xlu0 %1358  ;;  %v9468_v36 = vld [vmem:[#allocation2 + $0x9c] sm:$0xf0] }
 0x232   : > { %v1237_v17 = vsel %vm450_vm9, %v1215_v35, %v12071_v9 }
 0x233   : > { %v12132_v10 = vpop.permute.xlu2 %1476  ;;  %v1246_v30 = vunpack.c.l.b16 %v1237_v17  ;;  %v1249_v31 = vunpack.c.h.b16 %v1237_v17 }
 0x237   : > { %1614 = vperm.xlu1 %11613, %v990_v14  }
 0x239   : > { %v1151_v8 = vpop.permute.xlu1 %1150  ;;  %v12137_v16 = vpop.permute.xlu0 %1294 }
 0x23a   : > { %v1173_v40 = vsel %vm416_vm10, %v1151_v8, %v12087_v34 }
 0x23b   : > { %v12139_v23 = vpop.permute.xlu2 %1420  ;;  %v1182_v47 = vunpack.c.l.b16 %v1173_v40  ;;  %v1185_v24 = vunpack.c.h.b16 %v1173_v40 }
 0x241   : > { %v1087_v55 = vpop.permute.xlu1 %1086  ;;  %v1225_v25 = vpop.permute.xlu0 %1224 }
 0x242   : > { %v1230_v29 = vsel %vm450_vm9, %v12071_v9, %v1225_v25  ;;  %v1109_v2 = vsel %vm382_vm11, %v1087_v55, %v12107_v1 }
 0x243   : > { %v1247_v28 = vunpack.c.l.b16 %v1230_v29  ;;  %v1250_v21 = vunpack.c.h.b16 %v1230_v29  ;;  %v12145_v37 = vpop.permute.xlu2 %1356  ;;  %v1118_v14 = vunpack.c.l.b16 %v1109_v2  ;;  %v1121_v8 = vunpack.c.h.b16 %v1109_v2 }
 0x245   : > { %v1256_v38 = vpack.c.b16 %v1247_v28, %v1246_v30  ;;  %v1258_v39 = vpack.c.b16 %v1250_v21, %v1249_v31  ;;  %v9471_v28 = vor.u32 %v11192_v11, %v9468_v36 }
 0x247   : > { %1272 = vst [vmem:[#allocation2 + $0xa8] sm:$0xff] %v1256_v38 }
 0x248   : > { %1274 = vst [vmem:[#allocation2 + $0xb4] sm:$0xff] %v1258_v39 }
 0x249   : > { %v1007_v41 = vpop.permute.xlu1 %1006  ;;  %v12149_v43 = vpop.permute.xlu0 %1160 }
 0x24a   : > { %v1166_v9 = vsel %vm416_vm10, %v12087_v34, %v12149_v43  ;;  %v9466_v34 = vld [vmem:[#allocation2 + $0x90] sm:$0xf] }
 0x24b   : > { %v1183_v48 = vunpack.c.l.b16 %v1166_v9  ;;  %v1186_v50 = vunpack.c.h.b16 %v1166_v9  ;;  %v12154_v53 = vpop.permute.xlu2 %1292  ;;  %v9467_v31 = vor.u32 %v11193_v15, %v9466_v34  ;;  %v1427_v9 = vsel %vm554_vm1, %v12139_v23, %v12118_v61  ;;  %v9444_v34 = vld [vmem:[#allocation2 + $0x6c] sm:$0xf0] }
 0x24c   : > { %v1450_v15 = vunpack.c.h.b16 %v1427_v9 }
 0x24d   : > { %v1192_v54 = vpack.c.b16 %v1183_v48, %v1182_v47  ;;  %v1194_v56 = vpack.c.b16 %v1186_v50, %v1185_v24  ;;  %v1045_v24 = vsel %vm347_vm12, %v1007_v41, %v12120_v7 }
 0x24e   : > { %v9478_v57 = vld [vmem:[#allocation2 + $0xa8] sm:$0xf]  ;;  %v11195_v58 = vld [vmem:[#allocation2 + $0xac] sm:$0xf]  ;;  %v1054_v41 = vunpack.c.l.b16 %v1045_v24 }
 0x24f   : > { %1208 = vst [vmem:[#allocation2 + $0x78] sm:$0xff] %v1192_v54  ;;  %v11196_v62 = vld [vmem:[#allocation2 + $0xb0] sm:$0xf0]  ;;  %v9480_v63 = vld [vmem:[#allocation2 + $0xb4] sm:$0xf0] }
 0x250   : > { %1210 = vst [vmem:[#allocation2 + $0x84] sm:$0xff] %v1194_v56  ;;  %v9479_v52 = vor.u32 %v11196_v62, %v9478_v57  ;;  %v9483_v4 = vor.u32 %v11195_v58, %v9480_v63  ;;  %v9442_v58 = vld [vmem:[#allocation2 + $0x60] sm:$0xf]  ;;  %v11186_v62 = vld [vmem:[#allocation2 + $0x64] sm:$0xf]  ;;  %v1447_v63 = vunpack.c.l.b16 %v1427_v9  ;;  %v1363_v9 = vsel %vm520_vm3, %v12145_v37, %v12130_v12 }
 0x251   : > { %v12158_v5 = vpop.permute.xlu1 %1480  ;;  %v12160_v6 = vpop.permute.xlu0 %1096 }
 0x252   : > { %1957 = vmatpush.bf16.msrb.mxu0 %v9479_v52  ;;  %2014 = vmatpush.bf16.msra.mxu3 %v9483_v4  ;;  %v1102_v35 = vsel %vm382_vm11, %v12107_v1, %v12160_v6  ;;  %v11187_v4 = vld [vmem:[#allocation2 + $0x68] sm:$0xf0] }
 0x253   : > { %v1119_v17 = vunpack.c.l.b16 %v1102_v35  ;;  %v1122_v55 = vunpack.c.h.b16 %v1102_v35  ;;  %v1227_v29 = vpop.permute.xlu2 %1226 }
 0x254   : > { %v1231_v30 = vsel %vm450_vm9, %v1225_v25, %v1227_v29  ;;  %v1057_v29 = vunpack.c.h.b16 %v1045_v24 }
 0x255   : > { %v1128_v21 = vpack.c.b16 %v1119_v17, %v1118_v14  ;;  %v1130_v38 = vpack.c.b16 %v1122_v55, %v1121_v8  ;;  %v1248_v39 = vunpack.c.l.b16 %v1231_v30  ;;  %v1251_v40 = vunpack.c.h.b16 %v1231_v30 }
 0x256   : > { %1958 = vmatpush.bf16.msrb.mxu0 %v9467_v31  ;;  %2015 = vmatpush.bf16.msra.mxu3 %v9471_v28  ;;  %v9454_v1 = vld [vmem:[#allocation2 + $0x78] sm:$0xf]  ;;  %v11189_v47 = vld [vmem:[#allocation2 + $0x7c] sm:$0xf]  ;;  %v9443_v30 = vor.u32 %v11187_v4, %v9442_v58  ;;  %v9447_v31 = vor.u32 %v11186_v62, %v9444_v34  ;;  %v9420_v58 = vld [vmem:[#allocation2 + $0x3c] sm:$0xf0]  ;;  %v1383_v62 = vunpack.c.l.b16 %v1363_v9 }
 0x257   : > { %1144 = vst [vmem:[#allocation2 + $0x48] sm:$0xff] %v1128_v21  ;;  %v1257_v48 = vpack.c.b16 %v1248_v39, %v1248_v39  ;;  %v1259_v25 = vpack.c.b16 %v1251_v40, %v1251_v40  ;;  %v11190_v50 = vld [vmem:[#allocation2 + $0x80] sm:$0xf0]  ;;  %v9456_v54 = vld [vmem:[#allocation2 + $0x84] sm:$0xf0] }
 0x258   : > { %1146 = vst [vmem:[#allocation2 + $0x54] sm:$0xff] %v1130_v38  ;;  %v9455_v56 = vor.u32 %v11190_v50, %v9454_v1  ;;  %v9459_v57 = vor.u32 %v11189_v47, %v9456_v54  ;;  %v11180_v50 = vld [vmem:[#allocation2 + $0x34] sm:$0xf] }
 0x259   : > { %1273 = vst.msk [vmem:[#allocation2 + $0xb0] sm:$0xf] %vm370_vm0, %v1257_v48  ;;  %v1419_v2 = vpop.permute.xlu1 %1418  ;;  %v12172_v52 = vpop.permute.xlu0 %1032 }
 0x25a   : > { %1275 = vst.msk [vmem:[#allocation2 + $0xbc] sm:$0xf] %vm370_vm0, %v1259_v25  ;;  %v1426_v11 = vsel %vm554_vm1, %v1419_v2, %v12139_v23  ;;  %1959 = vmatpush.bf16.msrb.mxu0 %v9455_v56  ;;  %2016 = vmatpush.bf16.msra.mxu3 %v9459_v57  ;;  %v1038_v36 = vsel %vm347_vm12, %v12120_v7, %v12172_v52  ;;  %v9418_v25 = vld [vmem:[#allocation2 + $0x30] sm:$0xf]  ;;  %v11181_v57 = vld [vmem:[#allocation2 + $0x38] sm:$0xf0] }
 0x25b   : > { %v1446_v35 = vunpack.c.l.b16 %v1426_v11  ;;  %v1449_v14 = vunpack.c.h.b16 %v1426_v11  ;;  %v1055_v8 = vunpack.c.l.b16 %v1038_v36  ;;  %v1058_v17 = vunpack.c.h.b16 %v1038_v36  ;;  %v12180_v55 = vpop.permute.xlu2 %1484 }
 0x25c   : > { %v1296_v23 = vsel %vm486_vm5, %v12116_v42, %v12058_v60 }
 0x25d   : > { %v1456_v28 = vpack.c.b16 %v1447_v63, %v1446_v35  ;;  %v1458_v21 = vpack.c.b16 %v1450_v15, %v1449_v14  ;;  %v1064_v38 = vpack.c.b16 %v1055_v8, %v1054_v41  ;;  %v1066_v39 = vpack.c.b16 %v1058_v17, %v1057_v29 }
 0x25e   : > { %1960 = vmatpush.bf16.msrb.mxu0 %v9443_v30  ;;  %2017 = vmatpush.bf16.msra.mxu3 %v9447_v31  ;;  %v9430_v7 = vld [vmem:[#allocation2 + $0x48] sm:$0xf]  ;;  %v11183_v40 = vld [vmem:[#allocation2 + $0x4c] sm:$0xf]  ;;  %v1312_v54 = vunpack.c.l.b16 %v1296_v23  ;;  %v1386_v63 = vunpack.c.h.b16 %v1363_v9  ;;  %v1315_v35 = vunpack.c.h.b16 %v1296_v23  ;;  %v9419_v8 = vor.u32 %v11181_v57, %v9418_v25 }
 0x25f   : > { %1472 = vst [vmem:[#allocation2 + $0x168] sm:$0xff] %v1456_v28  ;;  %v11184_v1 = vld [vmem:[#allocation2 + $0x50] sm:$0xf0]  ;;  %v9432_v47 = vld [vmem:[#allocation2 + $0x54] sm:$0xf0]  ;;  %v9423_v17 = vor.u32 %v11180_v50, %v9420_v58  ;;  %v1299_v23 = vsel %vm486_vm5, %v12154_v53, %v12137_v16 }
 0x260   : > { %1474 = vst [vmem:[#allocation2 + $0x174] sm:$0xff] %v1458_v21  ;;  %v9431_v24 = vor.u32 %v11184_v1, %v9430_v7  ;;  %v9435_v48 = vor.u32 %v11183_v40, %v9432_v47  ;;  %v11217_v7 = vld [vmem:[#allocation2 + $0x158] sm:$0xf0] }
 0x261   : > { %1080 = vst [vmem:[#allocation2 + $0x18] sm:$0xff] %v1064_v38  ;;  %v1355_v42 = vpop.permute.xlu1 %1354  ;;  %v12188_v56 = vpop.permute.xlu0 %1288 }
 0x262   : > { %1082 = vst [vmem:[#allocation2 + $0x24] sm:$0xff] %v1066_v39  ;;  %v1362_v2 = vsel %vm520_vm3, %v1355_v42, %v12145_v37  ;;  %1961 = vmatpush.bf16.msrb.mxu0 %v9431_v24  ;;  %2018 = vmatpush.bf16.msra.mxu3 %v9435_v48  ;;  %v1297_v4 = vsel %vm486_vm5, %v12058_v60, %v12188_v56  ;;  %v9562_v39 = vld [vmem:[#allocation2 + $0x150] sm:$0xf]  ;;  %v11174_v42 = vld [vmem:[#allocation2 + $0x4] sm:$0xf] }
 0x263   : > { %v1382_v34 = vunpack.c.l.b16 %v1362_v2  ;;  %v1385_v15 = vunpack.c.h.b16 %v1362_v2  ;;  %v1313_v41 = vunpack.c.l.b16 %v1297_v4  ;;  %v1316_v11 = vunpack.c.h.b16 %v1297_v4  ;;  %v1367_v36 = vpop.permute.xlu2 %1366  ;;  %v9396_v2 = vld [vmem:[#allocation2 + $0xc] sm:$0xf0] }
 0x264   : > { %v1373_v14 = vsel %vm525_vm6, %v12130_v12, %v1367_v36  ;;  %v1319_v4 = vunpack.c.l.b16 %v1299_v23  ;;  %v9370_v36 = vld [vmem:[%s15026_s4] sm:$0xf] }
 0x265   : > { %v1392_v29 = vpack.c.b16 %v1383_v62, %v1382_v34  ;;  %v1394_v30 = vpack.c.b16 %v1386_v63, %v1385_v15  ;;  %v1324_v37 = vpack.c.b16 %v1313_v41, %v1312_v54  ;;  %v1326_v31 = vpack.c.b16 %v1316_v11, %v1315_v35  ;;  %v9394_v54 = vld [vmem:[#allocation2] sm:$0xf]  ;;  %v11175_v63 = vld [vmem:[#allocation2 + $0x8] sm:$0xf0] }
 0x266   : > { %v1384_v28 = vunpack.c.l.b16 %v1373_v14  ;;  %v1387_v21 = vunpack.c.h.b16 %v1373_v14  ;;  %1962 = vmatpush.bf16.msrb.mxu0 %v9419_v8  ;;  %2019 = vmatpush.bf16.msra.mxu3 %v9423_v17  ;;  %v9574_v60 = vld [vmem:[#allocation2 + $0x168] sm:$0xf]  ;;  %v1322_v34 = vunpack.c.h.b16 %v1299_v23  ;;  %v9563_v14 = vor.u32 %v11217_v7, %v9562_v39  ;;  %v11219_v8 = vld [vmem:[#allocation2 + $0x16c] sm:$0xf]  ;;  %v11216_v23 = vld [vmem:[#allocation2 + $0x154] sm:$0xf] }
 0x267   : > { %1408 = vst [vmem:[#allocation2 + $0x138] sm:$0xff] %v1392_v29  ;;  %v11220_v38 = vld [vmem:[#allocation2 + $0x170] sm:$0xf0]  ;;  %v9576_v17 = vld [vmem:[#allocation2 + $0x174] sm:$0xf0] }
 0x268   : > { %1410 = vst [vmem:[#allocation2 + $0x144] sm:$0xff] %v1394_v30  ;;  %v1393_v12 = vpack.c.b16 %v1384_v28, %v1384_v28  ;;  %v1395_v40 = vpack.c.b16 %v1387_v21, %v1387_v21  ;;  %v9406_v9 = vld [vmem:[#allocation2 + $0x18] sm:$0xf]  ;;  %v9575_v1 = vor.u32 %v11220_v38, %v9574_v60  ;;  %v11177_v47 = vld [vmem:[#allocation2 + $0x1c] sm:$0xf]  ;;  %v9395_v21 = vor.u32 %v11175_v63, %v9394_v54 }
 0x269   : > { %1340 = vst [vmem:[#allocation2 + $0xf0] sm:$0xff] %v1324_v37  ;;  %v1291_v24 = vpop.permute.xlu1 %1290  ;;  %v11178_v48 = vld [vmem:[#allocation2 + $0x20] sm:$0xf0]  ;;  %v9408_v25 = vld [vmem:[#allocation2 + $0x24] sm:$0xf0]  ;;  %v12200_v50 = vpop.permute.xlu0 %1486  ;;  %v9399_v60 = vor.u32 %v11174_v42, %v9396_v2  ;;  %v9579_v39 = vor.u32 %v11219_v8, %v9576_v17 }
 0x26a   : > { %1342 = vst [vmem:[#allocation2 + $0xfc] sm:$0xff] %v1326_v31  ;;  %v1298_v57 = vsel %vm486_vm5, %v1291_v24, %v12154_v53  ;;  %v9407_v58 = vor.u32 %v11178_v48, %v9406_v9  ;;  %1976 = vmatpush.bf16.msra.mxu2 %v9575_v1  ;;  %v9411_v62 = vor.u32 %v11177_v47, %v9408_v25  ;;  %v11169_v53 = vld [vmem:[%s15026_s4 + $0x8] sm:$0xf0]  ;;  %v9538_v54 = vld [vmem:[#allocation2 + $0x120] sm:$0xf] }
 0x26b   : > { %1409 = vst.msk [vmem:[#allocation2 + $0x140] sm:$0xf] %vm370_vm0, %v1393_v12  ;;  %v1318_v15 = vunpack.c.l.b16 %v1298_v57  ;;  %v1321_v41 = vunpack.c.h.b16 %v1298_v57  ;;  %v1157_v11 = vpop.permute.xlu2 %1156  ;;  %v1491_v28 = vsel %vm588_vm2, %v12180_v55, %v12200_v50  ;;  %v9564_v12 = vld [vmem:[#allocation2 + $0x15c] sm:$0xf0]  ;;  %v12217_v7 = vor.u32 %v11169_v53, %v9370_v36  ;;  %v11211_v42 = vld [vmem:[#allocation2 + $0x128] sm:$0xf0] }
 0x26c   : > { %1411 = vst.msk [vmem:[#allocation2 + $0x14c] sm:$0xf] %vm370_vm0, %v1395_v40  ;;  %1963 = vmatpush.bf16.msrb.mxu0 %v9407_v58  ;;  %2020 = vmatpush.bf16.msra.mxu3 %v9411_v62  ;;  %v1165_v35 = vsel %vm416_vm10, %v12067_v27, %v1157_v11  ;;  %v1511_v47 = vunpack.c.l.b16 %v1491_v28  ;;  %v9567_v25 = vor.u32 %v11216_v23, %v9564_v12  ;;  %v1514_v57 = vunpack.c.h.b16 %v1491_v28  ;;  %v11210_v28 = vld [vmem:[#allocation2 + $0x124] sm:$0xf]  ;;  %v9540_v23 = vld [vmem:[#allocation2 + $0x12c] sm:$0xf0] }
 0x26d   : > { %v1328_v29 = vpack.c.b16 %v1319_v4, %v1318_v15  ;;  %v1330_v30 = vpack.c.b16 %v1322_v34, %v1321_v41  ;;  %v1178_v37 = vunpack.c.l.b16 %v1165_v35  ;;  %v1181_v31 = vunpack.c.h.b16 %v1165_v35 }
 0x26e   : > { %1977 = vmatpush.bf16.msra.mxu2 %v9563_v14  ;;  %v9550_v38 = vld [vmem:[#allocation2 + $0x138] sm:$0xf]  ;;  %v9539_v53 = vor.u32 %v11211_v42, %v9538_v54  ;;  %v11213_v35 = vld [vmem:[#allocation2 + $0x13c] sm:$0xf] }
 0x26f   : > { %1344 = vst [vmem:[#allocation2 + $0x108] sm:$0xff] %v1328_v29  ;;  %v1189_v40 = vpack.c.b16 %v1178_v37, %v1178_v37  ;;  %v1191_v27 = vpack.c.b16 %v1181_v31, %v1181_v31  ;;  %v11214_v9 = vld [vmem:[#allocation2 + $0x140] sm:$0xf0] }
 0x270   : > { %1346 = vst [vmem:[#allocation2 + $0x114] sm:$0xff] %v1330_v30  ;;  %1964 = vmatpush.bf16.msrb.mxu0 %v9395_v21  ;;  %2021 = vmatpush.bf16.msra.mxu3 %v9399_v60  ;;  %v9551_v1 = vor.u32 %v11214_v9, %v9550_v38 }
 0x271   : > { %1205 = vst.msk [vmem:[#allocation2 + $0x68] sm:$0xf] %vm370_vm0, %v1189_v40  ;;  %v1483_v24 = vpop.permute.xlu1 %1482  ;;  %v1479_v48 = vpop.permute.xlu0 %1478  ;;  %v11205_v9 = vld [vmem:[#allocation2 + $0xf8] sm:$0xf0] }
 0x272   : > { %1207 = vst.msk [vmem:[#allocation2 + $0x74] sm:$0xf] %vm370_vm0, %v1191_v27  ;;  %v1490_v58 = vsel %vm588_vm2, %v1483_v24, %v12180_v55  ;;  %1978 = vmatpush.bf16.msra.mxu2 %v9551_v1  ;;  %v1488_v62 = vsel %vm588_vm2, %v12132_v10, %v1479_v48  ;;  %v1489_v63 = vsel %vm588_vm2, %v1479_v48, %v12158_v5  ;;  %v9552_v10 = vld [vmem:[#allocation2 + $0x144] sm:$0xf0] }
 0x273   : > { %1965 = vmatmul.bf16.vlgmr.msrb.gmra.mxu0 %v12217_v7  ;;  %2022 = vmatmul.bf16.vlgmr.msra.gmra.mxu3 %v12217_v7  ;;  %v1510_v2 = vunpack.c.l.b16 %v1490_v58  ;;  %v1513_v4 = vunpack.c.h.b16 %v1490_v58  ;;  %v1504_v34 = vunpack.c.l.b16 %v1488_v62  ;;  %v1505_v15 = vunpack.c.l.b16 %v1489_v63  ;;  %v1301_v41 = vpop.permute.xlu2 %1300  ;;  %v9382_v58 = vld [vmem:[%s15026_s4 + $0x18] sm:$0xf] }
 0x274   : > { %2033 = vmatpush.bf16.msra.mxu0 %v9579_v39  ;;  %v1507_v11 = vunpack.c.h.b16 %v1488_v62  ;;  %v1508_v36 = vunpack.c.h.b16 %v1489_v63  ;;  %v1306_v55 = vsel %vm491_vm7, %v12188_v56, %v1301_v41  ;;  %v9555_v60 = vor.u32 %v11213_v35, %v9552_v10  ;;  %v9514_v39 = vld [vmem:[#allocation2 + $0xf0] sm:$0xf]  ;;  %v11202_v41 = vld [vmem:[#allocation2 + $0xe0] sm:$0xf0]  ;;  %v11204_v10 = vld [vmem:[#allocation2 + $0xf4] sm:$0xf] }
 0x275   : > { %v1520_v14 = vpack.c.b16 %v1511_v47, %v1510_v2  ;;  %v1522_v8 = vpack.c.b16 %v1514_v57, %v1513_v4  ;;  %v1516_v17 = vpack.c.b16 %v1505_v15, %v1504_v34  ;;  %v1314_v29 = vunpack.c.l.b16 %v1306_v55 }
 0x276   : > { %v1518_v30 = vpack.c.b16 %v1508_v36, %v1507_v11  ;;  %v1317_v37 = vunpack.c.h.b16 %v1306_v55  ;;  %1979 = vmatpush.bf16.msra.mxu2 %v9539_v53  ;;  %v9526_v31 = vld [vmem:[#allocation2 + $0x108] sm:$0xf]  ;;  %v9543_v24 = vor.u32 %v11210_v28, %v9540_v23  ;;  %v9515_v62 = vor.u32 %v11205_v9, %v9514_v39  ;;  %v11207_v63 = vld [vmem:[#allocation2 + $0x10c] sm:$0xf]  ;;  %v9502_v53 = vld [vmem:[#allocation2 + $0xd8] sm:$0xf] }
 0x277   : > { %1536 = vst [vmem:[#allocation2 + $0x198] sm:$0xff] %v1520_v14  ;;  %v1325_v21 = vpack.c.b16 %v1314_v29, %v1314_v29  ;;  %v11208_v38 = vld [vmem:[#allocation2 + $0x110] sm:$0xf0]  ;;  %v9528_v2 = vld [vmem:[#allocation2 + $0x114] sm:$0xf0] }
 0x278   : > { %2034 = vmatpush.bf16.msra.mxu0 %v9567_v25  ;;  %1538 = vst [vmem:[#allocation2 + $0x1a4] sm:$0xff] %v1522_v8  ;;  %v1327_v56 = vpack.c.b16 %v1317_v37, %v1317_v37  ;;  %v9527_v12 = vor.u32 %v11208_v38, %v9526_v31  ;;  %v9531_v14 = vor.u32 %v11207_v63, %v9528_v2  ;;  %v11199_v29 = vld [vmem:[#allocation2 + $0xc8] sm:$0xf0]  ;;  %v11197_v37 = vld [vmem:[#allocation2 + $0xb8] sm:$0xf0] }
 0x279   : > { %1532 = vst [vmem:[#allocation2 + $0x180] sm:$0xff] %v1516_v17  ;;  %v1431_v40 = vpop.permute.xlu1 %1430  ;;  %v1429_v27 = vpop.permute.xlu0 %1428  ;;  %v9516_v17 = vld [vmem:[#allocation2 + $0xfc] sm:$0xf0]  ;;  %v11168_v38 = vld [vmem:[%s15026_s4 + $0x4] sm:$0xf] }
 0x27a   : > { %1534 = vst [vmem:[#allocation2 + $0x18c] sm:$0xff] %v1518_v30  ;;  %v1437_v1 = vsel %vm559_vm4, %v12118_v61, %v1431_v40  ;;  %1980 = vmatpush.bf16.msra.mxu2 %v9527_v12  ;;  %v1434_v47 = vsel %vm559_vm4, %v12037_v45, %v1429_v27  ;;  %v11172_v61 = vld [vmem:[%s15026_s4 + $0x20] sm:$0xf0]  ;;  %v9486_v30 = vld [vmem:[#allocation2 + $0xb0] sm:$0xf] }
 0x27b   : > { %1341 = vst.msk [vmem:[#allocation2 + $0xf8] sm:$0xf] %vm370_vm0, %v1325_v21  ;;  %v1448_v48 = vunpack.c.l.b16 %v1437_v1  ;;  %v1451_v25 = vunpack.c.h.b16 %v1437_v1  ;;  %v1442_v54 = vunpack.c.l.b16 %v1434_v47  ;;  %v1445_v42 = vunpack.c.h.b16 %v1434_v47  ;;  %v1029_v57 = vpop.permute.xlu2 %1028  ;;  %v9372_v23 = vld [vmem:[%s15026_s4 + $0xc] sm:$0xf0]  ;;  %v9490_v40 = vld [vmem:[#allocation2 + $0xc0] sm:$0xf] }
 0x27c   : > { %2035 = vmatpush.bf16.msra.mxu0 %v9555_v60  ;;  %1343 = vst.msk [vmem:[#allocation2 + $0x104] sm:$0xf] %vm370_vm0, %v1327_v56  ;;  %v1037_v45 = vsel %vm347_vm12, %v12100_v49, %v1029_v57  ;;  %v12246_v8 = vor.u32 %v11172_v61, %v9382_v58  ;;  %v9503_v21 = vor.u32 %v11202_v41, %v9502_v53 }
 0x27d   : > { %v1457_v4 = vpack.c.b16 %v1448_v48, %v1448_v48  ;;  %v1459_v34 = vpack.c.b16 %v1451_v25, %v1451_v25  ;;  %v1453_v15 = vpack.c.b16 %v1442_v54, %v1442_v54  ;;  %v1455_v11 = vpack.c.b16 %v1445_v42, %v1445_v42 }
 0x27e   : > { %v1050_v36 = vunpack.c.l.b16 %v1037_v45  ;;  %v1053_v55 = vunpack.c.h.b16 %v1037_v45  ;;  %1981 = vmatpush.bf16.msra.mxu2 %v9515_v62  ;;  %v9598_v35 = vld [vmem:[#allocation2 + $0x198] sm:$0xf]  ;;  %v9519_v47 = vor.u32 %v11204_v10, %v9516_v17  ;;  %v9491_v58 = vor.u32 %v11199_v29, %v9490_v40  ;;  %v9504_v45 = vld [vmem:[#allocation2 + $0xe4] sm:$0xf0]  ;;  %v11198_v29 = vld [vmem:[#allocation2 + $0xc4] sm:$0xf] }
 0x27f   : > { %1473 = vst.msk [vmem:[#allocation2 + $0x170] sm:$0xf] %vm370_vm0, %v1457_v4  ;;  %v11226_v49 = vld [vmem:[#allocation2 + $0x1a0] sm:$0xf0]  ;;  %v9600_v48 = vld [vmem:[#allocation2 + $0x1a4] sm:$0xf0]  ;;  %v9487_v62 = vor.u32 %v11197_v37, %v9486_v30  ;;  %v12271_v63 = vor.u32 %v11168_v38, %v9372_v23 }
 0x280   : > { %2036 = vmatpush.bf16.msra.mxu0 %v9543_v24  ;;  %1475 = vst.msk [vmem:[#allocation2 + $0x17c] sm:$0xf] %vm370_vm0, %v1459_v34  ;;  %v1061_v31 = vpack.c.b16 %v1050_v36, %v1050_v36  ;;  %v1063_v28 = vpack.c.b16 %v1053_v55, %v1053_v55  ;;  %v9599_v60 = vor.u32 %v11226_v49, %v9598_v35  ;;  %v9586_v27 = vld [vmem:[#allocation2 + $0x180] sm:$0xf]  ;;  %v11225_v24 = vld [vmem:[#allocation2 + $0x19c] sm:$0xf] }
 0x281   : > { %1469 = vst.msk [vmem:[#allocation2 + $0x158] sm:$0xf] %vm370_vm0, %v1453_v15  ;;  %v1221_v56 = vpop.permute.xlu1 %1220  ;;  %v1163_v12 = vpop.permute.xlu0 %1162  ;;  %v11223_v39 = vld [vmem:[#allocation2 + $0x188] sm:$0xf0]  ;;  %v11201_v15 = vld [vmem:[#allocation2 + $0xdc] sm:$0xf]  ;;  %v9603_v41 = vor.u32 %v11225_v24, %v9600_v48 }
 0x282   : > { %1471 = vst.msk [vmem:[#allocation2 + $0x164] sm:$0xf] %vm370_vm0, %v1455_v11  ;;  %v1229_v9 = vsel %vm450_vm9, %v12054_v51, %v1221_v56  ;;  %1982 = vmatpush.bf16.msra.mxu2 %v9503_v21  ;;  %2001 = vmatpush.bf16.msrb.mxu1 %v9599_v60  ;;  %v1167_v1 = vsel %vm416_vm10, %v12149_v43, %v1163_v12  ;;  %v9378_v51 = vld [vmem:[%s15026_s4 + $0x8] sm:$0xf]  ;;  %v11170_v43 = vld [vmem:[%s15026_s4 + $0x10] sm:$0xf0] }
 0x283   : > { %1077 = vst.msk [vmem:[#allocation2 + $0x8] sm:$0xf] %vm370_vm0, %v1061_v31  ;;  %1970 = vmatmul.bf16.gmra.mxu0 %v12246_v8  ;;  %2027 = vmatmul.bf16.gmra.mxu3 %v12246_v8  ;;  %v1242_v25 = vunpack.c.l.b16 %v1229_v9  ;;  %v1245_v54 = vunpack.c.h.b16 %v1229_v9  ;;  %v1184_v42 = vunpack.c.l.b16 %v1167_v1  ;;  %v1187_v57 = vunpack.c.h.b16 %v1167_v1  ;;  %v9492_v11 = vld [vmem:[#allocation2 + $0xcc] sm:$0xf0]  ;;  %v11222_v53 = vld [vmem:[#allocation2 + $0x184] sm:$0xf] }
 0x284   : > { %2037 = vmatpush.bf16.msra.mxu0 %v9531_v14  ;;  %1079 = vst.msk [vmem:[#allocation2 + $0x14] sm:$0xf] %vm370_vm0, %v1063_v28  ;;  %v9587_v61 = vor.u32 %v11223_v39, %v9586_v27  ;;  %v9588_v35 = vld [vmem:[#allocation2 + $0x18c] sm:$0xf0]  ;;  %v12273_v10 = vor.u32 %v11170_v43, %v9378_v51  ;;  %v9507_v14 = vor.u32 %v11201_v15, %v9504_v45  ;;  %v9558_v24 = vld [vmem:[#allocation2 + $0x140] sm:$0xf] }
 0x285   : > { %v1253_v2 = vpack.c.b16 %v1242_v25, %v1242_v25  ;;  %v1255_v4 = vpack.c.b16 %v1245_v54, %v1245_v54  ;;  %v1193_v34 = vpack.c.b16 %v1184_v42, %v1184_v42  ;;  %v1195_v36 = vpack.c.b16 %v1187_v57, %v1187_v57 }
 0x286   : > { %1983 = vmatpush.bf16.msra.mxu2 %v9491_v58  ;;  %2002 = vmatpush.bf16.msrb.mxu1 %v9587_v61  ;;  %v9582_v55 = vld [vmem:[#allocation2 + $0x170] sm:$0xf]  ;;  %v9591_v31 = vor.u32 %v11222_v53, %v9588_v35  ;;  %v9495_v23 = vor.u32 %v11198_v29, %v9492_v11  ;;  %v9390_v11 = vld [vmem:[%s15026_s4 + $0x20] sm:$0xf] }
 0x287   : > { %1269 = vst.msk [vmem:[#allocation2 + $0x98] sm:$0xf] %vm370_vm0, %v1253_v2  ;;  %v11221_v49 = vld [vmem:[#allocation2 + $0x178] sm:$0xf0]  ;;  %v9384_v2 = vld [vmem:[%s15026_s4 + $0x24] sm:$0xf0] }
 0x288   : > { %2038 = vmatpush.bf16.msra.mxu0 %v9519_v47  ;;  %1271 = vst.msk [vmem:[#allocation2 + $0xa4] sm:$0xf] %vm370_vm0, %v1255_v4  ;;  %v9583_v17 = vor.u32 %v11221_v49, %v9582_v55  ;;  %v9570_v28 = vld [vmem:[#allocation2 + $0x158] sm:$0xf]  ;;  %v11188_v49 = vld [vmem:[#allocation2 + $0x70] sm:$0xf0] }
 0x289   : > { %1209 = vst.msk [vmem:[#allocation2 + $0x80] sm:$0xf] %vm370_vm0, %v1193_v34  ;;  %1984 = vmatmul.bf16.vlgmr.msra.gmra.mxu2 %v12271_v63  ;;  %v1365_v30 = vpop.permute.xlu1 %1364  ;;  %v1303_v37 = vpop.permute.xlu0 %1302  ;;  %v11218_v21 = vld [vmem:[#allocation2 + $0x160] sm:$0xf0]  ;;  %9608 = vmatmul.msk.bf16.vlgmr.msrb.gmra.mxu1 %vm1950_vm14, %v12273_v10 }
 0x28a   : > { %2058 = vmatpush.bf16.msrb.mxu2 %v9603_v41  ;;  %2071 = vmatpush.bf16.msra.mxu1 %v9487_v62  ;;  %1211 = vst.msk [vmem:[#allocation2 + $0x8c] sm:$0xf] %vm370_vm0, %v1195_v36  ;;  %v1370_v60 = vsel %vm525_vm6, %v12043_v22, %v1365_v30  ;;  %v1309_v38 = vsel %vm491_vm7, %v12137_v16, %v1303_v37  ;;  %v11215_v22 = vld [vmem:[#allocation2 + $0x148] sm:$0xf0]  ;;  %v11171_v62 = vld [vmem:[%s15026_s4 + $0x1c] sm:$0xf] }
 0x28b   : > { %2090 = vmatpush.bf16.msrb.mxu3 %v9583_v17  ;;  %v1378_v56 = vunpack.c.l.b16 %v1370_v60  ;;  %v1381_v12 = vunpack.c.h.b16 %v1370_v60  ;;  %v1320_v40 = vunpack.c.l.b16 %v1309_v38  ;;  %v1323_v27 = vunpack.c.h.b16 %v1309_v38 }
 0x28c   : > { %2039 = vmatpush.bf16.msra.mxu0 %v9507_v14  ;;  %v9571_v39 = vor.u32 %v11218_v21, %v9570_v28  ;;  %v9559_v42 = vor.u32 %v11215_v22, %v9558_v24  ;;  %v12307_v35 = vor.u32 %v11171_v62, %v9384_v2  ;;  %v9450_v14 = vld [vmem:[#allocation2 + $0x68] sm:$0xf]  ;;  %v9510_v2 = vld [vmem:[#allocation2 + $0xe0] sm:$0xf] }
 0x28d   : > { %v1389_v9 = vpack.c.b16 %v1378_v56, %v1378_v56  ;;  %v1391_v1 = vpack.c.b16 %v1381_v12, %v1381_v12  ;;  %v1329_v47 = vpack.c.b16 %v1320_v40, %v1320_v40  ;;  %v1331_v48 = vpack.c.b16 %v1323_v27, %v1323_v27 }
 0x28e   : > { %2059 = vmatpush.bf16.msrb.mxu2 %v9591_v31  ;;  %v9474_v25 = vld [vmem:[#allocation2 + $0x98] sm:$0xf]  ;;  %v9451_v31 = vor.u32 %v11188_v49, %v9450_v14  ;;  %v9402_v49 = vld [vmem:[#allocation2 + $0x8] sm:$0xf] }
 0x28f   : > { %2091 = vmatpush.bf16.msrb.mxu3 %v9571_v39  ;;  %1405 = vst.msk [vmem:[#allocation2 + $0x128] sm:$0xf] %vm370_vm0, %v1389_v9  ;;  %v11194_v16 = vld [vmem:[#allocation2 + $0xa0] sm:$0xf0] }
 0x290   : > { %2040 = vmatpush.bf16.msra.mxu0 %v9495_v23  ;;  %1407 = vst.msk [vmem:[#allocation2 + $0x134] sm:$0xf] %vm370_vm0, %v1391_v1  ;;  %v9475_v54 = vor.u32 %v11194_v16, %v9474_v25  ;;  %v9462_v43 = vld [vmem:[#allocation2 + $0x80] sm:$0xf]  ;;  %v11206_v25 = vld [vmem:[#allocation2 + $0x100] sm:$0xf0] }
 0x291   : > { %1345 = vst.msk [vmem:[#allocation2 + $0x110] sm:$0xf] %vm370_vm0, %v1329_v47  ;;  %v1099_v57 = vpop.permute.xlu1 %1098  ;;  %v1093_v51 = vpop.permute.xlu0 %1092  ;;  %v11191_v58 = vld [vmem:[#allocation2 + $0x88] sm:$0xf0] }
 0x292   : > { %1347 = vst.msk [vmem:[#allocation2 + $0x11c] sm:$0xf] %vm370_vm0, %v1331_v48  ;;  %v1103_v61 = vsel %vm382_vm11, %v12160_v6, %v1099_v57  ;;  %2072 = vmatpush.bf16.msra.mxu1 %v9475_v54  ;;  %v1101_v45 = vsel %vm382_vm11, %v12082_v19, %v1093_v51  ;;  %v9463_v6 = vor.u32 %v11191_v58, %v9462_v43  ;;  %v11173_v19 = vld [vmem:[%s15026_s4 + $0x28] sm:$0xf0]  ;;  %v9522_v48 = vld [vmem:[#allocation2 + $0xf8] sm:$0xf] }
 0x293   : > { %2092 = vmatpush.bf16.msrb.mxu3 %v9559_v42  ;;  %2041 = vmatmul.bf16.vlgmr.msra.gmra.mxu0 %v12271_v63  ;;  %v1120_v4 = vunpack.c.l.b16 %v1103_v61  ;;  %v1123_v34 = vunpack.c.h.b16 %v1103_v61  ;;  %v1114_v15 = vunpack.c.l.b16 %v1101_v45  ;;  %v1117_v41 = vunpack.c.h.b16 %v1101_v45  ;;  %v11203_v57 = vld [vmem:[#allocation2 + $0xe8] sm:$0xf0] }
 0x294   : > { %v12310_v37 = vor.u32 %v11173_v19, %v9390_v11  ;;  %v9523_v42 = vor.u32 %v11206_v25, %v9522_v48 }
 0x295   : > { %v1129_v36 = vpack.c.b16 %v1120_v4, %v1120_v4  ;;  %v1131_v55 = vpack.c.b16 %v1123_v34, %v1123_v34  ;;  %v1125_v53 = vpack.c.b16 %v1114_v15, %v1114_v15  ;;  %v1127_v17 = vpack.c.b16 %v1117_v41, %v1117_v41 }
 0x296   : > { %2073 = vmatpush.bf16.msra.mxu1 %v9463_v6  ;;  %v9546_v29 = vld [vmem:[#allocation2 + $0x128] sm:$0xf]  ;;  %v9511_v34 = vor.u32 %v11203_v57, %v9510_v2  ;;  %v11200_v6 = vld [vmem:[#allocation2 + $0xd0] sm:$0xf0] }
 0x297   : > { %1145 = vst.msk [vmem:[#allocation2 + $0x50] sm:$0xf] %vm370_vm0, %v1129_v36  ;;  %v11212_v30 = vld [vmem:[#allocation2 + $0x130] sm:$0xf0]  ;;  %v9498_v36 = vld [vmem:[#allocation2 + $0xc8] sm:$0xf] }
 0x298   : > { %1147 = vst.msk [vmem:[#allocation2 + $0x5c] sm:$0xf] %vm370_vm0, %v1131_v55  ;;  %v9547_v28 = vor.u32 %v11212_v30, %v9546_v29  ;;  %v9534_v38 = vld [vmem:[#allocation2 + $0x110] sm:$0xf]  ;;  %v9499_v55 = vor.u32 %v11200_v6, %v9498_v36 }
 0x299   : > { %1141 = vst.msk [vmem:[#allocation2 + $0x38] sm:$0xf] %vm370_vm0, %v1125_v53  ;;  %1989 = vmatmul.bf16.gmra.mxu2 %v12307_v35  ;;  %v1035_v21 = vpop.permute.xlu1 %1034  ;;  %v1495_v60 = vpop.permute.xlu0 %1494  ;;  %v11209_v23 = vld [vmem:[#allocation2 + $0x118] sm:$0xf0]  ;;  %9609 = vmatmul.msk.bf16.gmra.mxu1 %vm1950_vm14, %v12310_v37 }
 0x29a   : > { %1143 = vst.msk [vmem:[#allocation2 + $0x44] sm:$0xf] %vm370_vm0, %v1127_v17  ;;  %v1039_v56 = vsel %vm347_vm12, %v12172_v52, %v1035_v21  ;;  %2074 = vmatpush.bf16.msra.mxu1 %v9451_v31  ;;  %2093 = vmatpush.bf16.msrb.mxu3 %v9547_v28  ;;  %v1501_v12 = vsel %vm593_vm13, %v12200_v50, %v1495_v60  ;;  %v11176_v17 = vld [vmem:[#allocation2 + $0x10] sm:$0xf0] }
 0x29b   : > { %v1056_v40 = vunpack.c.l.b16 %v1039_v56  ;;  %v1059_v27 = vunpack.c.h.b16 %v1039_v56  ;;  %v1512_v39 = vunpack.c.l.b16 %v1501_v12  ;;  %v1515_v9 = vunpack.c.h.b16 %v1501_v12 }
 0x29c   : > { %v9535_v1 = vor.u32 %v11209_v23, %v9534_v38  ;;  %v9403_v30 = vor.u32 %v11176_v17, %v9402_v49 }
 0x29d   : > { %v1065_v47 = vpack.c.b16 %v1056_v40, %v1056_v40  ;;  %v1067_v24 = vpack.c.b16 %v1059_v27, %v1059_v27  ;;  %v1521_v22 = vpack.c.b16 %v1512_v39, %v1512_v39  ;;  %v1523_v16 = vpack.c.b16 %v1515_v9, %v1515_v9 }
 0x29e   : > { %2094 = vmatpush.bf16.msrb.mxu3 %v9535_v1  ;;  %v9438_v52 = vld [vmem:[#allocation2 + $0x50] sm:$0xf] }
 0x29f   : > { %1081 = vst.msk [vmem:[#allocation2 + $0x20] sm:$0xf] %vm370_vm0, %v1065_v47  ;;  %v11185_v54 = vld [vmem:[#allocation2 + $0x58] sm:$0xf0] }
 0x2a0   : > { %1083 = vst.msk [vmem:[#allocation2 + $0x2c] sm:$0xf] %vm370_vm0, %v1067_v24  ;;  %v9439_v50 = vor.u32 %v11185_v54, %v9438_v52  ;;  %v9426_v43 = vld [vmem:[#allocation2 + $0x38] sm:$0xf]  ;;  %v12343_v24 = vpop.permute.xlu2 %1624 }
 0x2a1   : > { %1537 = vst.msk [vmem:[#allocation2 + $0x1a0] sm:$0xf] %vm370_vm0, %v1521_v22  ;;  %v1493_v51 = vpop.permute.xlu1 %1492  ;;  %v11182_v58 = vld [vmem:[#allocation2 + $0x40] sm:$0xf0] }
 0x2a2   : > { %1539 = vst.msk [vmem:[#allocation2 + $0x1ac] sm:$0xf] %vm370_vm0, %v1523_v16  ;;  %v1498_v61 = vsel %vm593_vm13, %v12158_v5, %v1493_v51  ;;  %2075 = vmatpush.bf16.msra.mxu1 %v9439_v50  ;;  %2095 = vmatpush.bf16.msrb.mxu3 %v9523_v42  ;;  %v9427_v4 = vor.u32 %v11182_v58, %v9426_v43 }
 0x2a3   : > { %2046 = vmatmul.bf16.gmra.mxu0 %v12307_v35  ;;  %v1506_v45 = vunpack.c.l.b16 %v1498_v61  ;;  %v1509_v62 = vunpack.c.h.b16 %v1498_v61 }
 0x2a5   : > { %v1517_v15 = vpack.c.b16 %v1506_v45, %v1506_v45  ;;  %v1519_v41 = vpack.c.b16 %v1509_v62, %v1509_v62 }
 0x2a6   : > { %2076 = vmatpush.bf16.msra.mxu1 %v9427_v4  ;;  %2096 = vmatpush.bf16.msrb.mxu3 %v9511_v34  ;;  %v9414_v11 = vld [vmem:[#allocation2 + $0x20] sm:$0xf] }
 0x2a7   : > { %1533 = vst.msk [vmem:[#allocation2 + $0x188] sm:$0xf] %vm370_vm0, %v1517_v15  ;;  %v11179_v19 = vld [vmem:[#allocation2 + $0x28] sm:$0xf0] }
 0x2a8   : > { %1535 = vst.msk [vmem:[#allocation2 + $0x194] sm:$0xf] %vm370_vm0, %v1519_v41  ;;  %v9415_v5 = vor.u32 %v11179_v19, %v9414_v11  ;;  %v9606_v53 = vld [vmem:[#allocation2 + $0x1a0] sm:$0xf]  ;;  %v1620_v42 = vpop.permute.xlu2 %1619 }
 0x2a9   : > { %9610 = vmatmul.msk.bf16.vlgmr.msrb.gmra.mxu2 %vm1950_vm14, %v12273_v10  ;;  %v11227_v14 = vld [vmem:[#allocation2 + $0x1a8] sm:$0xf0]  ;;  %v1615_v22 = vpop.permute.xlu1 %1614 }
 0x2aa   : > { %2077 = vmatpush.bf16.msra.mxu1 %v9415_v5  ;;  %2097 = vmatpush.bf16.msrb.mxu3 %v9499_v55  ;;  %v9607_v29 = vor.u32 %v11227_v14, %v9606_v53 }
 0x2ac   : > { %2115 = vmatpush.bf16.msrb.mxu0 %v9607_v29 }
 0x2ad   : > { %2098 = vmatmul.bf16.vlgmr.msrb.gmra.mxu3 %v12271_v63 }
 0x2ae   : > { %2078 = vmatpush.bf16.msra.mxu1 %v9403_v30  ;;  %v9594_v31 = vld [vmem:[#allocation2 + $0x188] sm:$0xf] }
 0x2af   : > { %v11224_v28 = vld [vmem:[#allocation2 + $0x190] sm:$0xf0] }
 0x2b0   : > { %v9595_v21 = vor.u32 %v11224_v28, %v9594_v31 }
 0x2b1   : > { %2079 = vmatmul.bf16.vlgmr.msra.gmra.mxu1 %v12217_v7 }
 0x2b2   : > { %2116 = vmatpush.bf16.msrb.mxu0 %v9595_v21 }
 0x2b5   : > { %9612 = vmatmul.msk.bf16.vlgmr.msrb.gmra.mxu0 %vm1950_vm14, %v12273_v10 }
 0x2b9   : > { %9611 = vmatmul.msk.bf16.gmra.mxu2 %vm1950_vm14, %v12310_v37 }
 0x2bd   : > { %2103 = vmatmul.bf16.gmra.mxu3 %v12307_v35 }
 0x2c1   : > { %2084 = vmatmul.bf16.gmra.mxu1 %v12246_v8 }
 0x2c5   : > { %9613 = vmatmul.msk.bf16.gmra.mxu0 %vm1950_vm14, %v12310_v37 }
 0x2f0   : > { %v1966_v63 = vpop.f32.mrf.mxu0 }
 0x2f1   : > { %v1967_v37 = vadd.f32 %v1966_v63, %v1615_v22 }
 0x2f6   : > { %v2023_v7 = vpop.f32.mrf.mxu3 }
 0x2f7   : > { %v2024_v54 = vadd.f32 %v2023_v7, %v1615_v22 }
 0x2f8   : > { %v1968_v60 = vpop.f32.mrf.mxu0 }
 0x2f9   : > { %v1969_v51 = vadd.f32 %v1968_v60, %v1620_v42 }
 0x2fe   : > { %v2025_v10 = vpop.f32.mrf.mxu3 }
 0x2ff   : > { %v2026_v15 = vadd.f32 %v2025_v10, %v1620_v42 }
 0x300   : > { %v1971_v38 = vpop.f32.mrf.mxu0 }
 0x301   : > { %v1972_v5 = vadd.f32 %v1971_v38, %v12343_v24 }
 0x306   : > { %v2004_v23 = vpop.f32.mrf.mxu1  ;;  %v2028_v35 = vpop.f32.mrf.mxu3 }
 0x307   : > { %v2029_v7 = vadd.f32 %v2028_v35, %v12343_v24 }
 0x308   : > { %v1973_v56 = vpop.f32.mrf.mxu0 }
 0x30c   : > { %v1985_v12 = vpop.f32.mrf.mxu2 }
 0x30d   : > { %v1986_v16 = vadd.f32 %v1985_v12, %v1967_v37 }
 0x30e   : > { %v2006_v27 = vpop.f32.mrf.mxu1  ;;  %v12347_v52 = vpop.f32.mrf.mxu3 }
 0x30f   : > { %v2005_v50 = vadd.f32 %v2004_v23, %v1986_v16 }
 0x310   : > { %v2042_v40 = vpop.f32.mrf.mxu0 }
 0x311   : > { %v2043_v43 = vadd.f32 %v2042_v40, %v2024_v54  ;;  %v2128_v61 = vmul.f32 %v2005_v50, %v11889_v18  ;;  %v1630_v40 = vpop.permute.xlu0 %1629 }
 0x313   : > { %v2140_v6 = vmax.f32 %v2128_v61, 0.0 }
 0x314   : > { %v1987_v39 = vpop.f32.mrf.mxu2 }
 0x315   : > { %v1988_v45 = vadd.f32 %v1987_v39, %v1969_v51 }
 0x316   : > { %v2009_v1 = vpop.f32.mrf.mxu1 }
 0x317   : > { %v2007_v11 = vadd.f32 %v2006_v27, %v1988_v45 }
 0x318   : > { %v2044_v9 = vpop.f32.mrf.mxu0 }
 0x319   : > { %v2045_v53 = vadd.f32 %v2044_v9, %v2026_v15  ;;  %v2131_v30 = vmul.f32 %v2007_v11, %v11889_v18 }
 0x31b   : > { %v2143_v27 = vmax.f32 %v2131_v30, 0.0 }
 0x31c   : > { %v1990_v47 = vpop.f32.mrf.mxu2 }
 0x31d   : > { %v1991_v17 = vadd.f32 %v1990_v47, %v1972_v5  ;;  %v1974_v47 = vadd.f32 %v1973_v56, %v1630_v40 }
 0x31e   : > { %v12345_v25 = vpop.f32.mrf.mxu1 }
 0x31f   : > { %v2010_v38 = vadd.f32 %v2009_v1, %v1991_v17 }
 0x320   : > { %v2047_v8 = vpop.f32.mrf.mxu0 }
 0x321   : > { %v2048_v37 = vadd.f32 %v2047_v8, %v2029_v7  ;;  %v2134_v50 = vmul.f32 %v2010_v38, %v11889_v18 }
 0x324   : > { %v1992_v48 = vpop.f32.mrf.mxu2 }
 0x328   : > { %v12349_v57 = vpop.f32.mrf.mxu0 }
 0x32c   : > { %v2061_v58 = vpop.f32.mrf.mxu2 }
 0x32d   : > { %v2062_v62 = vadd.f32 %v2061_v58, %v2043_v43 }
 0x32e   : > { %v2080_v2 = vpop.f32.mrf.mxu1 }
 0x32f   : > { %v2129_v4 = vmul.f32 %v2062_v62, %v11891_v20  ;;  %v2081_v34 = vadd.f32 %v2080_v2, %v1615_v22 }
 0x330   : > { %v2099_v41 = vpop.f32.mrf.mxu3 }
 0x331   : > { %v2141_v19 = vmax.f32 %v2129_v4, 0.0  ;;  %v2100_v36 = vadd.f32 %v2099_v41, %v2081_v34  ;;  %v2031_v34 = vadd.f32 %v12347_v52, %v1630_v40  ;;  %v2146_v41 = vmax.f32 %v2134_v50, 0.0 }
 0x332   : > { %v2118_v55 = vpop.f32.mrf.mxu0 }
 0x333   : > { %v2152_v14 = vpack.c.bf16 %v2141_v19, %v2140_v6  ;;  %v2119_v49 = vadd.f32 %v2118_v55, %v2100_v36  ;;  %v2050_v52 = vadd.f32 %v12349_v57, %v2031_v34 }
 0x334   : > { %v2063_v29 = vpop.f32.mrf.mxu2 }
 0x335   : > { %2456 = vst [vmem:[#allocation2 + $0xc0] sm:$0xff] %v2152_v14  ;;  %v2130_v31 = vmul.f32 %v2119_v49, %v11897_v33  ;;  %v2064_v28 = vadd.f32 %v2063_v29, %v2045_v53  ;;  %v2192_v35 = vunpack.c.l.b16 %v2152_v14  ;;  %v2193_v1 = vunpack.c.h.b16 %v2152_v14 }
 0x336   : > { %v2082_v21 = vpop.f32.mrf.mxu1 }
 0x337   : > { %v2142_v63 = vmax.f32 %v2130_v31, 0.0  ;;  %v2132_v60 = vmul.f32 %v2064_v28, %v11891_v20  ;;  %v2083_v23 = vadd.f32 %v2082_v21, %v1620_v42  ;;  %v1993_v42 = vadd.f32 %v1992_v48, %v1974_v47 }
 0x338   : > { %v2101_v12 = vpop.f32.mrf.mxu3 }
 0x339   : > { %v12358_v10 = vpack.c.bf16 %v2142_v63, %v2142_v63  ;;  %v2144_v39 = vmax.f32 %v2132_v60, 0.0  ;;  %v2102_v9 = vadd.f32 %v2101_v12, %v2083_v23  ;;  %v2012_v6 = vadd.f32 %v12345_v25, %v1993_v42 }
 0x33a   : > { %v2120_v22 = vpop.f32.mrf.mxu0 }
 0x33b   : > { %2457 = vst.msk [vmem:[#allocation2 + $0xc8] sm:$0xf] %vm370_vm0, %v12358_v10  ;;  %v2154_v16 = vpack.c.bf16 %v2144_v39, %v2143_v27  ;;  %v2121_v54 = vadd.f32 %v2120_v22, %v2102_v9  ;;  %v2137_v53 = vmul.f32 %v2012_v6, %v11889_v18  ;;  %v2178_v50 = vunpack.c.l.b16 %v12358_v10 }
 0x33c   : > { %v2066_v51 = vpop.f32.mrf.mxu2 }
 0x33d   : > { %v2194_v43 = vunpack.c.l.b16 %v2154_v16  ;;  %v2195_v58 = vunpack.c.h.b16 %v2154_v16  ;;  %2458 = vst [vmem:[#allocation2 + $0xcc] sm:$0xff] %v2154_v16  ;;  %v2133_v61 = vmul.f32 %v2121_v54, %v11897_v33  ;;  %v2067_v45 = vadd.f32 %v2066_v51, %v2048_v37 }
 0x33e   : > { %v2085_v56 = vpop.f32.mrf.mxu1  ;;  %v2149_v21 = vmax.f32 %v2137_v53, 0.0 }
 0x33f   : > { %v12364_v62 = vpack.c.b16 %v2194_v43, %v2192_v35  ;;  %v12366_v8 = vpack.c.b16 %v2195_v58, %v2193_v1  ;;  %v2145_v2 = vmax.f32 %v2133_v61, 0.0  ;;  %v2135_v4 = vmul.f32 %v2067_v45, %v11891_v20 }
 0x340   : > { %v2086_v48 = vadd.f32 %v2085_v56, %v12343_v24  ;;  %v2104_v15 = vpop.f32.mrf.mxu3 }
 0x341   : > { %v2155_v11 = vpack.c.bf16 %v2145_v2, %v2145_v2  ;;  %v2147_v19 = vmax.f32 %v2135_v4, 0.0  ;;  %2398 = vrot.lane.b32.xlu2 %v12366_v8, %s15062_s18  ;;  %2592 = vrot.lane.b32.xlu0 %v12364_v62, %s15060_s12 }
 0x342   : > { %v2105_v36 = vadd.f32 %v2104_v15, %v2086_v48  ;;  %2396 = vrot.lane.b32.xlu1 %v12364_v62, %s15062_s18  ;;  %v2123_v5 = vpop.f32.mrf.mxu0 }
 0x343   : > { %2459 = vst.msk [vmem:[#allocation2 + $0xd4] sm:$0xf] %vm370_vm0, %v2155_v11  ;;  %v2156_v24 = vpack.c.bf16 %v2147_v19, %v2146_v41  ;;  %v2179_v54 = vunpack.c.l.b16 %v2155_v11 }
 0x344   : > { %v2124_v55 = vadd.f32 %v2123_v5, %v2105_v36  ;;  %v2068_v25 = vpop.f32.mrf.mxu2 }
 0x345   : > { %2460 = vst [vmem:[#allocation2 + $0xd8] sm:$0xff] %v2156_v24  ;;  %v2069_v14 = vadd.f32 %v2068_v25, %v2050_v52  ;;  %v2196_v12 = vunpack.c.l.b16 %v2156_v24  ;;  %v2197_v37 = vunpack.c.h.b16 %v2156_v24  ;;  %v12412_v42 = vpack.c.b16 %v2179_v54, %v2178_v50 }
 0x346   : > { %v2136_v49 = vmul.f32 %v2124_v55, %v11897_v33  ;;  %v2087_v17 = vpop.f32.mrf.mxu1 }
 0x347   : > { %v2138_v29 = vmul.f32 %v2069_v14, %v11891_v20  ;;  %v2088_v30 = vadd.f32 %v2087_v17, %v1630_v40 }
 0x348   : > { %v2148_v31 = vmax.f32 %v2136_v49, 0.0  ;;  %v2106_v28 = vpop.f32.mrf.mxu3 }
 0x349   : > { %v2150_v63 = vmax.f32 %v2138_v29, 0.0  ;;  %v2107_v57 = vadd.f32 %v2106_v28, %v2088_v30  ;;  %2334 = vrot.lane.b32.xlu2 %v12366_v8, %s15058_s20  ;;  %2528 = vrot.lane.b32.xlu0 %v12364_v62, %s15056_s13 }
 0x34a   : > { %v2157_v60 = vpack.c.bf16 %v2148_v31, %v2148_v31  ;;  %2332 = vrot.lane.b32.xlu1 %v12364_v62, %s15058_s20  ;;  %v2125_v23 = vpop.f32.mrf.mxu0 }
 0x34b   : > { %v2158_v7 = vpack.c.bf16 %v2150_v63, %v2149_v21  ;;  %v2126_v38 = vadd.f32 %v2125_v23, %v2107_v57 }
 0x34c   : > { %2461 = vst.msk [vmem:[#allocation2 + $0xe0] sm:$0xf] %vm370_vm0, %v2157_v60  ;;  %v2180_v35 = vunpack.c.l.b16 %v2157_v60 }
 0x34d   : > { %v2198_v40 = vunpack.c.l.b16 %v2158_v7  ;;  %2462 = vst [vmem:[#allocation2 + $0xe4] sm:$0xff] %v2158_v7  ;;  %v2139_v27 = vmul.f32 %v2126_v38, %v11897_v33  ;;  %v2199_v22 = vunpack.c.h.b16 %v2158_v7 }
 0x34f   : > { %v12391_v39 = vpack.c.b16 %v2198_v40, %v2196_v12  ;;  %v2151_v9 = vmax.f32 %v2139_v27, 0.0  ;;  %v2203_v16 = vpack.c.b16 %v2199_v22, %v2197_v37 }
 0x351   : > { %v2159_v47 = vpack.c.bf16 %v2151_v9, %v2151_v9  ;;  %2270 = vrot.lane.b32.xlu2 %v12366_v8, %s15054_s23  ;;  %2598 = vrot.lane.b32.xlu0 %v12391_v39, %s15060_s12 }
 0x352   : > { %2268 = vrot.lane.b32.xlu1 %v12364_v62, %s15054_s23 }
 0x353   : > { %2463 = vst.msk [vmem:[#allocation2 + $0xec] sm:$0xf] %vm370_vm0, %v2159_v47  ;;  %v2181_v10 = vunpack.c.l.b16 %v2159_v47 }
 0x355   : > { %v2183_v1 = vpack.c.b16 %v2181_v10, %v2180_v35 }
 0x359   : > { %2206 = vrot.lane.b32.xlu2 %v12366_v8, %s15052_s25  ;;  %2534 = vrot.lane.b32.xlu0 %v12391_v39, %s15056_s13 }
 0x35a   : > { %2204 = vrot.lane.b32.xlu1 %v12364_v62, %s15052_s25 }
 0x361   : > { %2404 = vrot.lane.b32.xlu2 %v2203_v16, %s15062_s18  ;;  %2470 = vrot.lane.b32.xlu0 %v12391_v39, %s15050_s14 }
 0x362   : > { %2594 = vrot.lane.b32.xlu1 %v12366_v8, %s15060_s12 }
 0x369   : > { %2340 = vrot.lane.b32.xlu2 %v2203_v16, %s15058_s20  ;;  %2392 = vrot.lane.b32.xlu0 %v12412_v42, %s15048_s19 }
 0x36a   : > { %2530 = vrot.lane.b32.xlu1 %v12366_v8, %s15056_s13 }
 0x371   : > { %2276 = vrot.lane.b32.xlu2 %v2203_v16, %s15054_s23  ;;  %2328 = vrot.lane.b32.xlu0 %v12412_v42, %s15077_s21 }
 0x372   : > { %2402 = vrot.lane.b32.xlu1 %v12391_v39, %s15062_s18 }
 0x379   : > { %2212 = vrot.lane.b32.xlu2 %v2203_v16, %s15052_s25  ;;  %2264 = vrot.lane.b32.xlu0 %v12412_v42, %s15078_s22 }
 0x37a   : > { %2338 = vrot.lane.b32.xlu1 %v12391_v39, %s15058_s20 }
 0x381   : > { %2596 = vrot.lane.b32.xlu2 %v12412_v42, %s15060_s12  ;;  %2184 = vrot.lane.b32.xlu0 %v12412_v42, %s15079_s30 }
 0x382   : > { %2274 = vrot.lane.b32.xlu1 %v12391_v39, %s15054_s23 }
 0x389   : > { %2532 = vrot.lane.b32.xlu2 %v12412_v42, %s15056_s13  ;;  %2394 = vrot.lane.b32.xlu0 %v2183_v1, %s15048_s19  ;;  %s15084_s19 = smov 61  }
 0x38a   : > { %2210 = vrot.lane.b32.xlu1 %v12391_v39, %s15052_s25 }
 0x391   : > { %2468 = vrot.lane.b32.xlu2 %v12412_v42, %s15050_s14  ;;  %2330 = vrot.lane.b32.xlu0 %v2183_v1, %s15077_s21 }
 0x392   : > { %2600 = vrot.lane.b32.xlu1 %v2203_v16, %s15060_s12 }
 0x399   : > { %2660 = vrot.lane.b32.xlu2 %v12412_v42, %s15080_s9  ;;  %2266 = vrot.lane.b32.xlu0 %v2183_v1, %s15078_s22 }
 0x39a   : > { %2536 = vrot.lane.b32.xlu1 %v2203_v16, %s15056_s13 }
 0x39b   : > { %v12448_v51 = vpop.permute.xlu2 %2398 }
 0x3a1   : > { %2602 = vrot.lane.b32.xlu2 %v2183_v1, %s15060_s12  ;;  %2186 = vrot.lane.b32.xlu0 %v2183_v1, %s15079_s30 }
 0x3a2   : > { %2472 = vrot.lane.b32.xlu1 %v2203_v16, %s15050_s14 }
 0x3a3   : > { %v12453_v43 = vpop.permute.xlu2 %2334 }
 0x3a9   : > { %2538 = vrot.lane.b32.xlu2 %v2183_v1, %s15056_s13  ;;  %2464 = vrot.lane.b32.xlu0 %v12364_v62, %s15050_s14 }
 0x3aa   : > { %2466 = vrot.lane.b32.xlu1 %v12366_v8, %s15050_s14 }
 0x3ab   : > { %v12460_v58 = vpop.permute.xlu2 %2270 }
 0x3b1   : > { %2474 = vrot.lane.b32.xlu2 %v2183_v1, %s15050_s14  ;;  %2662 = vrot.lane.b32.xlu0 %v12391_v39, %s15080_s9  ;;  %s15085_s14 = smov 17  }
 0x3b2   : > { %2664 = vrot.lane.b32.xlu1 %v2203_v16, %s15080_s9 }
 0x3b3   : > { %v12466_v61 = vpop.permute.xlu2 %2206  ;;  %v2593_v45 = vpop.permute.xlu0 %2592 }
 0x3b4   : > { %v2397_v56 = vpop.permute.xlu1 %2396 }
 0x3b5   : > { %v2408_v52 = vsel %vm450_vm9, %v2397_v56, %v12448_v51 }
 0x3b6   : > { %v2421_v53 = vunpack.c.l.b16 %v2408_v52  ;;  %v2424_v63 = vunpack.c.h.b16 %v2408_v52  ;;  %v9624_v52 = vld [vmem:[%s15027_s5 + $0x30] sm:$0xff] }
 0x3b9   : > { %2666 = vrot.lane.b32.xlu2 %v2183_v1, %s15080_s9  ;;  %2656 = vrot.lane.b32.xlu0 %v12364_v62, %s15080_s9 }
 0x3ba   : > { %2658 = vrot.lane.b32.xlu1 %v12366_v8, %s15080_s9 }
 0x3bb   : > { %v12473_v2 = vpop.permute.xlu2 %2404  ;;  %v2529_v4 = vpop.permute.xlu0 %2528 }
 0x3bc   : > { %v2333_v34 = vpop.permute.xlu1 %2332 }
 0x3bd   : > { %v2344_v12 = vsel %vm416_vm10, %v2333_v34, %v12453_v43 }
 0x3be   : > { %v2357_v47 = vunpack.c.l.b16 %v2344_v12  ;;  %v2360_v35 = vunpack.c.h.b16 %v2344_v12 }
 0x3c1   : > { %2608 = vrot.lane.b32.xlu2 %v12364_v62, %s15081_s11  ;;  %2610 = vrot.lane.b32.xlu0 %v12391_v39, %s15081_s11 }
 0x3c2   : > { %2400 = vrot.lane.b32.xlu1 %v12412_v42, %s15062_s18 }
 0x3c3   : > { %v12481_v48 = vpop.permute.xlu2 %2340  ;;  %v12483_v15 = vpop.permute.xlu0 %2598 }
 0x3c4   : > { %v12485_v41 = vpop.permute.xlu1 %2268 }
 0x3c9   : > { %2342 = vrot.lane.b32.xlu2 %v2183_v1, %s15058_s20  ;;  %2406 = vrot.lane.b32.xlu0 %v2183_v1, %s15062_s18 }
 0x3ca   : > { %2336 = vrot.lane.b32.xlu1 %v12412_v42, %s15058_s20 }
 0x3cb   : > { %v12491_v8 = vpop.permute.xlu2 %2276  ;;  %v12493_v6 = vpop.permute.xlu0 %2534 }
 0x3cc   : > { %v12495_v11 = vpop.permute.xlu1 %2204 }
 0x3d1   : > { %2272 = vrot.lane.b32.xlu2 %v12412_v42, %s15054_s23  ;;  %2544 = vrot.lane.b32.xlu0 %v12364_v62, %s15074_s16 }
 0x3d2   : > { %2546 = vrot.lane.b32.xlu1 %v12391_v39, %s15074_s16 }
 0x3d3   : > { %v12503_v19 = vpop.permute.xlu2 %2212  ;;  %v12505_v36 = vpop.permute.xlu0 %2470 }
 0x3d4   : > { %v2595_v5 = vpop.permute.xlu1 %2594 }
 0x3d5   : > { %v2604_v24 = vsel %vm554_vm1, %v2593_v45, %v2595_v5  ;;  %v9625_v45 = vld [vmem:[%s15027_s5 + $0x38] sm:$0xff] }
 0x3d6   : > { %v2620_v14 = vunpack.c.l.b16 %v2604_v24  ;;  %v2623_v30 = vunpack.c.h.b16 %v2604_v24 }
 0x3d9   : > { %2482 = vrot.lane.b32.xlu2 %v12391_v39, %s15075_s17  ;;  %2278 = vrot.lane.b32.xlu0 %v2183_v1, %s15054_s23 }
 0x3da   : > { %2214 = vrot.lane.b32.xlu1 %v2183_v1, %s15052_s25 }
 0x3db   : > { %v12514_v55 = vpop.permute.xlu2 %2596  ;;  %v2393_v25 = vpop.permute.xlu0 %2392 }
 0x3dc   : > { %v2531_v49 = vpop.permute.xlu1 %2530  ;;  %v2605_v17 = vsel %vm554_vm1, %v2595_v5, %v12514_v55  ;;  %v2414_v29 = vsel %vm450_vm9, %v2393_v25, %v2397_v56 }
 0x3dd   : > { %v2621_v31 = vunpack.c.l.b16 %v2605_v17  ;;  %v2624_v28 = vunpack.c.h.b16 %v2605_v17  ;;  %v2420_v21 = vunpack.c.l.b16 %v2414_v29  ;;  %v2423_v57 = vunpack.c.h.b16 %v2414_v29 }
 0x3de   : > { %v2540_v40 = vsel %vm520_vm3, %v2529_v4, %v2531_v49 }
 0x3df   : > { %v2632_v60 = vpack.c.b16 %v2621_v31, %v2620_v14  ;;  %v2634_v23 = vpack.c.b16 %v2624_v28, %v2623_v30  ;;  %v2432_v7 = vpack.c.b16 %v2421_v53, %v2420_v21  ;;  %v2434_v38 = vpack.c.b16 %v2424_v63, %v2423_v57  ;;  %v9623_v63 = vld [vmem:[%s15027_s5 + $0x28] sm:$0xff] }
 0x3e0   : > { %v2556_v22 = vunpack.c.l.b16 %v2540_v40  ;;  %v2559_v54 = vunpack.c.h.b16 %v2540_v40 }
 0x3e1   : > { %2648 = vst [vmem:[#allocation2 + $0x150] sm:$0xff] %v2632_v60  ;;  %2674 = vrot.lane.b32.xlu2 %v12391_v39, %s15076_s29  ;;  %2208 = vrot.lane.b32.xlu0 %v12412_v42, %s15052_s25  ;;  %s15086_s25 = smov 111  }
 0x3e2   : > { %2650 = vst [vmem:[#allocation2 + $0x15c] sm:$0xff] %v2634_v23  ;;  %2480 = vrot.lane.b32.xlu1 %v12364_v62, %s15075_s17 }
 0x3e3   : > { %2448 = vst [vmem:[#allocation2 + $0x90] sm:$0xff] %v2432_v7  ;;  %v12528_v27 = vpop.permute.xlu2 %2532  ;;  %v2329_v9 = vpop.permute.xlu0 %2328 }
 0x3e4   : > { %2450 = vst [vmem:[#allocation2 + $0x9c] sm:$0xff] %v2434_v38  ;;  %v2541_v37 = vsel %vm520_vm3, %v2531_v49, %v12528_v27  ;;  %v2403_v16 = vpop.permute.xlu1 %2402  ;;  %v2350_v39 = vsel %vm416_vm10, %v2329_v9, %v2333_v34  ;;  %v2280_v34 = vsel %vm382_vm11, %v12485_v41, %v12460_v58 }
 0x3e5   : > { %v2557_v50 = vunpack.c.l.b16 %v2541_v37  ;;  %v2560_v42 = vunpack.c.h.b16 %v2541_v37  ;;  %v2356_v10 = vunpack.c.l.b16 %v2350_v39  ;;  %v2359_v1 = vunpack.c.h.b16 %v2350_v39 }
 0x3e6   : > { %v2293_v17 = vunpack.c.l.b16 %v2280_v34  ;;  %v2296_v29 = vunpack.c.h.b16 %v2280_v34  ;;  %v2410_v37 = vsel %vm450_vm9, %v2403_v16, %v12473_v2 }
 0x3e7   : > { %v2568_v56 = vpack.c.b16 %v2557_v50, %v2556_v22  ;;  %v2570_v4 = vpack.c.b16 %v2560_v42, %v2559_v54  ;;  %v2368_v5 = vpack.c.b16 %v2357_v47, %v2356_v10  ;;  %v2370_v24 = vpack.c.b16 %v2360_v35, %v2359_v1 }
 0x3e8   : > { %v2427_v10 = vunpack.c.l.b16 %v2410_v37 }
 0x3e9   : > { %2584 = vst [vmem:[#allocation2 + $0x120] sm:$0xff] %v2568_v56  ;;  %2809 = vperm.xlu2 %11611, %v9625_v45   ;;  %2672 = vrot.lane.b32.xlu0 %v12364_v62, %s15076_s29  ;;  %v9622_v62 = vld [vmem:[%s15027_s5 + $0x20] sm:$0xff] }
 0x3ea   : > { %2586 = vst [vmem:[#allocation2 + $0x12c] sm:$0xff] %v2570_v4  ;;  %2804 = vperm.xlu1 %11613, %v9624_v52  }
 0x3eb   : > { %2384 = vst [vmem:[#allocation2 + $0x60] sm:$0xff] %v2368_v5  ;;  %v12544_v25 = vpop.permute.xlu2 %2468  ;;  %v2265_v53 = vpop.permute.xlu0 %2264 }
 0x3ec   : > { %2386 = vst [vmem:[#allocation2 + $0x6c] sm:$0xff] %v2370_v24  ;;  %v2339_v14 = vpop.permute.xlu1 %2338  ;;  %v2286_v49 = vsel %vm382_vm11, %v2265_v53, %v12485_v41  ;;  %v2216_v41 = vsel %vm347_vm12, %v12495_v11, %v12466_v61 }
 0x3ed   : > { %v2292_v30 = vunpack.c.l.b16 %v2286_v49  ;;  %v2295_v31 = vunpack.c.h.b16 %v2286_v49  ;;  %v2229_v38 = vunpack.c.l.b16 %v2216_v41  ;;  %v2232_v12 = vunpack.c.h.b16 %v2216_v41  ;;  %v9724_v41 = vld [vmem:[#allocation2 + $0x90] sm:$0xf] }
 0x3ee   : > { %v2346_v4 = vsel %vm416_vm10, %v2339_v14, %v12481_v48 }
 0x3ef   : > { %v2304_v28 = vpack.c.b16 %v2293_v17, %v2292_v30  ;;  %v2306_v21 = vpack.c.b16 %v2296_v29, %v2295_v31  ;;  %v2363_v24 = vunpack.c.l.b16 %v2346_v4  ;;  %v2366_v34 = vunpack.c.h.b16 %v2346_v4 }
 0x3f1   : > { %2320 = vst [vmem:[#allocation2 + $0x30] sm:$0xff] %v2304_v28  ;;  %2794 = vperm.xlu0 %11612, %v9622_v62  }
 0x3f2   : > { %2322 = vst [vmem:[#allocation2 + $0x3c] sm:$0xff] %v2306_v21  ;;  %2799 = vperm.xlu1 %11613, %v9623_v63  }
 0x3f3   : > { %v12557_v57 = vpop.permute.xlu2 %2660  ;;  %v2185_v60 = vpop.permute.xlu0 %2184 }
 0x3f4   : > { %v12559_v23 = vpop.permute.xlu1 %2274  ;;  %v2222_v7 = vsel %vm347_vm12, %v2185_v60, %v12495_v11  ;;  %v2430_v11 = vunpack.c.h.b16 %v2410_v37  ;;  %v11253_v60 = vld [vmem:[#allocation2 + $0x98] sm:$0xf0] }
 0x3f5   : > { %v2228_v40 = vunpack.c.l.b16 %v2222_v7  ;;  %v2231_v9 = vunpack.c.h.b16 %v2222_v7  ;;  %v11252_v7 = vld [vmem:[#allocation2 + $0x94] sm:$0xf] }
 0x3f7   : > { %v2240_v47 = vpack.c.b16 %v2229_v38, %v2228_v40  ;;  %v2242_v22 = vpack.c.b16 %v2232_v12, %v2231_v9 }
 0x3f9   : > { %2256 = vst [vmem:[#allocation2] sm:$0xff] %v2240_v47  ;;  %v9726_v47 = vld [vmem:[#allocation2 + $0x9c] sm:$0xf0] }
 0x3fa   : > { %2258 = vst [vmem:[#allocation2 + $0xc] sm:$0xff] %v2242_v22 }
 0x3fb   : > { %v12565_v39 = vpop.permute.xlu2 %2602  ;;  %v2395_v54 = vpop.permute.xlu0 %2394 }
 0x3fc   : > { %v12567_v50 = vpop.permute.xlu1 %2210  ;;  %v2417_v42 = vsel %vm450_vm9, %v2395_v54, %v2403_v16 }
 0x3fd   : > { %v2426_v35 = vunpack.c.l.b16 %v2417_v42  ;;  %v2429_v1 = vunpack.c.h.b16 %v2417_v42 }
 0x3ff   : > { %v2436_v45 = vpack.c.b16 %v2427_v10, %v2426_v35  ;;  %v2438_v56 = vpack.c.b16 %v2430_v11, %v2429_v1  ;;  %v9725_v35 = vor.u32 %v11253_v60, %v9724_v41 }
 0x401   : > { %2452 = vst [vmem:[#allocation2 + $0xa8] sm:$0xff] %v2436_v45 }
 0x402   : > { %2454 = vst [vmem:[#allocation2 + $0xb4] sm:$0xff] %v2438_v56 }
 0x403   : > { %v12572_v5 = vpop.permute.xlu2 %2538  ;;  %v2331_v52 = vpop.permute.xlu0 %2330 }
 0x404   : > { %v2601_v53 = vpop.permute.xlu1 %2600  ;;  %v2353_v49 = vsel %vm416_vm10, %v2331_v52, %v2339_v14  ;;  %v9729_v52 = vor.u32 %v11252_v7, %v9726_v47  ;;  %v9820_v7 = vld [vmem:[#allocation2 + $0x150] sm:$0xf] }
 0x405   : > { %v2606_v16 = vsel %vm554_vm1, %v12483_v15, %v2601_v53  ;;  %v2607_v17 = vsel %vm554_vm1, %v2601_v53, %v12565_v39  ;;  %v2362_v29 = vunpack.c.l.b16 %v2353_v49  ;;  %v2365_v30 = vunpack.c.h.b16 %v2353_v49 }
 0x406   : > { %v2626_v31 = vunpack.c.l.b16 %v2606_v16  ;;  %v2627_v62 = vunpack.c.l.b16 %v2607_v17  ;;  %v2629_v28 = vunpack.c.h.b16 %v2606_v16  ;;  %v2630_v21 = vunpack.c.h.b16 %v2607_v17 }
 0x407   : > { %v2372_v63 = vpack.c.b16 %v2363_v24, %v2362_v29  ;;  %v2374_v40 = vpack.c.b16 %v2366_v34, %v2365_v30  ;;  %v2282_v15 = vsel %vm382_vm11, %v12559_v23, %v12491_v8 }
 0x408   : > { %v2636_v38 = vpack.c.b16 %v2627_v62, %v2626_v31  ;;  %v2638_v12 = vpack.c.b16 %v2630_v21, %v2629_v28  ;;  %v9736_v14 = vld [vmem:[#allocation2 + $0xa8] sm:$0xf]  ;;  %v11255_v9 = vld [vmem:[#allocation2 + $0xac] sm:$0xf]  ;;  %v2299_v1 = vunpack.c.l.b16 %v2282_v15  ;;  %v2302_v45 = vunpack.c.h.b16 %v2282_v15 }
 0x409   : > { %2388 = vst [vmem:[#allocation2 + $0x78] sm:$0xff] %v2372_v63  ;;  %v11256_v22 = vld [vmem:[#allocation2 + $0xb0] sm:$0xf0]  ;;  %v9738_v37 = vld [vmem:[#allocation2 + $0xb4] sm:$0xf0]  ;;  %v2218_v31 = vsel %vm347_vm12, %v12567_v50, %v12503_v19 }
 0x40a   : > { %2652 = vst [vmem:[#allocation2 + $0x168] sm:$0xff] %v2636_v38  ;;  %v9737_v54 = vor.u32 %v11256_v22, %v9736_v14  ;;  %v9741_v42 = vor.u32 %v11255_v9, %v9738_v37  ;;  %v11277_v38 = vld [vmem:[#allocation2 + $0x158] sm:$0xf0]  ;;  %v2238_v22 = vunpack.c.h.b16 %v2218_v31 }
 0x40b   : > { %2654 = vst [vmem:[#allocation2 + $0x174] sm:$0xff] %v2638_v12  ;;  %v12582_v10 = vpop.permute.xlu2 %2474  ;;  %v2267_v11 = vpop.permute.xlu0 %2266  ;;  %v2235_v12 = vunpack.c.l.b16 %v2218_v31 }
 0x40c   : > { %2390 = vst [vmem:[#allocation2 + $0x84] sm:$0xff] %v2374_v40  ;;  %v2537_v56 = vpop.permute.xlu1 %2536  ;;  %3136 = vmatpush.bf16.msra.mxu2 %v9737_v54  ;;  %3193 = vmatpush.bf16.msra.mxu0 %v9741_v42  ;;  %v2289_v4 = vsel %vm382_vm11, %v2267_v11, %v12559_v23 }
 0x40d   : > { %v2542_v24 = vsel %vm520_vm3, %v12493_v6, %v2537_v56  ;;  %v2543_v34 = vsel %vm520_vm3, %v2537_v56, %v12572_v5  ;;  %v2298_v53 = vunpack.c.l.b16 %v2289_v4  ;;  %v2301_v49 = vunpack.c.h.b16 %v2289_v4 }
 0x40e   : > { %v2562_v16 = vunpack.c.l.b16 %v2542_v24  ;;  %v2563_v17 = vunpack.c.l.b16 %v2543_v34  ;;  %v2565_v29 = vunpack.c.h.b16 %v2542_v24  ;;  %v2566_v30 = vunpack.c.h.b16 %v2543_v34  ;;  %v11246_v24 = vld [vmem:[#allocation2 + $0x64] sm:$0xf]  ;;  %v9702_v34 = vld [vmem:[#allocation2 + $0x6c] sm:$0xf0] }
 0x40f   : > { %v2308_v62 = vpack.c.b16 %v2299_v1, %v2298_v53  ;;  %v2310_v21 = vpack.c.b16 %v2302_v45, %v2301_v49  ;;  %v11247_v1 = vld [vmem:[#allocation2 + $0x68] sm:$0xf0] }
 0x410   : > { %v2572_v28 = vpack.c.b16 %v2563_v17, %v2562_v16  ;;  %v2574_v23 = vpack.c.b16 %v2566_v30, %v2565_v29  ;;  %3137 = vmatpush.bf16.msra.mxu2 %v9725_v35  ;;  %3194 = vmatpush.bf16.msra.mxu0 %v9729_v52  ;;  %v9712_v6 = vld [vmem:[#allocation2 + $0x78] sm:$0xf]  ;;  %v11249_v41 = vld [vmem:[#allocation2 + $0x7c] sm:$0xf]  ;;  %v9700_v35 = vld [vmem:[#allocation2 + $0x60] sm:$0xf]  ;;  %v9821_v30 = vor.u32 %v11277_v38, %v9820_v7 }
 0x411   : > { %2324 = vst [vmem:[#allocation2 + $0x48] sm:$0xff] %v2308_v62  ;;  %v9832_v63 = vld [vmem:[#allocation2 + $0x168] sm:$0xf]  ;;  %v9701_v29 = vor.u32 %v11247_v1, %v9700_v35 }
 0x412   : > { %2588 = vst [vmem:[#allocation2 + $0x138] sm:$0xff] %v2572_v28  ;;  %v11280_v60 = vld [vmem:[#allocation2 + $0x170] sm:$0xf0]  ;;  %v9705_v28 = vor.u32 %v11246_v24, %v9702_v34 }
 0x413   : > { %2590 = vst [vmem:[#allocation2 + $0x144] sm:$0xff] %v2574_v23  ;;  %v12593_v40 = vpop.permute.xlu2 %2666  ;;  %v11250_v14 = vld [vmem:[#allocation2 + $0x80] sm:$0xf0]  ;;  %v9833_v9 = vor.u32 %v11280_v60, %v9832_v63  ;;  %v9714_v47 = vld [vmem:[#allocation2 + $0x84] sm:$0xf0]  ;;  %v2187_v15 = vpop.permute.xlu0 %2186 }
 0x414   : > { %2326 = vst [vmem:[#allocation2 + $0x54] sm:$0xff] %v2310_v21  ;;  %v2473_v37 = vpop.permute.xlu1 %2472  ;;  %v9713_v54 = vor.u32 %v11250_v14, %v9712_v6  ;;  %v9717_v42 = vor.u32 %v11249_v41, %v9714_v47  ;;  %v2225_v11 = vsel %vm347_vm12, %v2187_v15, %v12567_v50  ;;  %v9796_v41 = vld [vmem:[#allocation2 + $0x120] sm:$0xf] }
 0x415   : > { %v2478_v45 = vsel %vm486_vm5, %v12505_v36, %v2473_v37  ;;  %v2479_v56 = vsel %vm486_vm5, %v2473_v37, %v12582_v10  ;;  %3155 = vmatpush.bf16.msrb.mxu1 %v9833_v9  ;;  %v2234_v4 = vunpack.c.l.b16 %v2225_v11  ;;  %v2237_v52 = vunpack.c.h.b16 %v2225_v11  ;;  %v9676_v37 = vld [vmem:[#allocation2 + $0x30] sm:$0xf] }
 0x416   : > { %v2498_v53 = vunpack.c.l.b16 %v2478_v45  ;;  %v2499_v49 = vunpack.c.l.b16 %v2479_v56  ;;  %v2501_v16 = vunpack.c.h.b16 %v2478_v45  ;;  %v2502_v17 = vunpack.c.h.b16 %v2479_v56  ;;  %3138 = vmatpush.bf16.msra.mxu2 %v9713_v54  ;;  %3195 = vmatpush.bf16.msra.mxu0 %v9717_v42  ;;  %v11271_v54 = vld [vmem:[#allocation2 + $0x128] sm:$0xf0]  ;;  %v11241_v45 = vld [vmem:[#allocation2 + $0x38] sm:$0xf0]  ;;  %v11240_v56 = vld [vmem:[#allocation2 + $0x34] sm:$0xf] }
 0x417   : > { %v2244_v50 = vpack.c.b16 %v2235_v12, %v2234_v4  ;;  %v2246_v36 = vpack.c.b16 %v2238_v22, %v2237_v52  ;;  %v9678_v4 = vld [vmem:[#allocation2 + $0x3c] sm:$0xf0] }
 0x418   : > { %v2508_v31 = vpack.c.b16 %v2499_v49, %v2498_v53  ;;  %v2510_v62 = vpack.c.b16 %v2502_v17, %v2501_v16  ;;  %v9688_v23 = vld [vmem:[#allocation2 + $0x48] sm:$0xf]  ;;  %v11243_v6 = vld [vmem:[#allocation2 + $0x4c] sm:$0xf]  ;;  %v9797_v16 = vor.u32 %v11271_v54, %v9796_v41 }
 0x419   : > { %2260 = vst [vmem:[#allocation2 + $0x18] sm:$0xff] %v2244_v50  ;;  %3156 = vmatpush.bf16.msrb.mxu1 %v9821_v30  ;;  %v9808_v21 = vld [vmem:[#allocation2 + $0x138] sm:$0xf]  ;;  %v9681_v30 = vor.u32 %v11240_v56, %v9678_v4  ;;  %v11235_v54 = vld [vmem:[#allocation2 + $0x8] sm:$0xf0] }
 0x41a   : > { %2524 = vst [vmem:[#allocation2 + $0x108] sm:$0xff] %v2508_v31  ;;  %3139 = vmatpush.bf16.msra.mxu2 %v9701_v29  ;;  %3196 = vmatpush.bf16.msra.mxu0 %v9705_v28  ;;  %v11274_v63 = vld [vmem:[#allocation2 + $0x140] sm:$0xf0]  ;;  %v9677_v29 = vor.u32 %v11241_v45, %v9676_v37  ;;  %v11279_v56 = vld [vmem:[#allocation2 + $0x16c] sm:$0xf] }
 0x41b   : > { %2526 = vst [vmem:[#allocation2 + $0x114] sm:$0xff] %v2510_v62  ;;  %v2609_v60 = vpop.permute.xlu2 %2608  ;;  %v11244_v14 = vld [vmem:[#allocation2 + $0x50] sm:$0xf0]  ;;  %v9809_v12 = vor.u32 %v11274_v63, %v9808_v21  ;;  %v9690_v9 = vld [vmem:[#allocation2 + $0x54] sm:$0xf0]  ;;  %v2465_v7 = vpop.permute.xlu0 %2464 }
 0x41c   : > { %2262 = vst [vmem:[#allocation2 + $0x24] sm:$0xff] %v2246_v36  ;;  %v2614_v38 = vsel %vm559_vm4, %v12514_v55, %v2609_v60  ;;  %v2467_v47 = vpop.permute.xlu1 %2466  ;;  %v9689_v15 = vor.u32 %v11244_v14, %v9688_v23  ;;  %v9693_v22 = vor.u32 %v11243_v6, %v9690_v9  ;;  %v9834_v4 = vld [vmem:[#allocation2 + $0x174] sm:$0xf0] }
 0x41d   : > { %v2622_v42 = vunpack.c.l.b16 %v2614_v38  ;;  %v2625_v11 = vunpack.c.h.b16 %v2614_v38  ;;  %v2477_v35 = vsel %vm486_vm5, %v2467_v47, %v12544_v25  ;;  %3157 = vmatpush.bf16.msrb.mxu1 %v9809_v12  ;;  %v2476_v1 = vsel %vm486_vm5, %v2465_v7, %v2467_v47  ;;  %v9652_v7 = vld [vmem:[#allocation2] sm:$0xf]  ;;  %v11234_v38 = vld [vmem:[#allocation2 + $0x4] sm:$0xf] }
 0x41e   : > { %v2493_v52 = vunpack.c.l.b16 %v2477_v35  ;;  %v2496_v24 = vunpack.c.h.b16 %v2477_v35  ;;  %3140 = vmatpush.bf16.msra.mxu2 %v9689_v15  ;;  %3197 = vmatpush.bf16.msra.mxu0 %v9693_v22  ;;  %v2492_v55 = vunpack.c.l.b16 %v2476_v1  ;;  %v2495_v34 = vunpack.c.h.b16 %v2476_v1 }
 0x41f   : > { %v2633_v53 = vpack.c.b16 %v2622_v42, %v2622_v42  ;;  %v2635_v49 = vpack.c.b16 %v2625_v11, %v2625_v11  ;;  %v9654_v42 = vld [vmem:[#allocation2 + $0xc] sm:$0xf0] }
 0x420   : > { %v2504_v17 = vpack.c.b16 %v2493_v52, %v2492_v55  ;;  %v2506_v50 = vpack.c.b16 %v2496_v24, %v2495_v34  ;;  %v9664_v31 = vld [vmem:[#allocation2 + $0x18] sm:$0xf]  ;;  %v11237_v36 = vld [vmem:[#allocation2 + $0x1c] sm:$0xf]  ;;  %v9628_v11 = vld [vmem:[%s15026_s4 + $0x30] sm:$0xf] }
 0x421   : > { %2649 = vst.msk [vmem:[#allocation2 + $0x158] sm:$0xf] %vm370_vm0, %v2633_v53  ;;  %3158 = vmatpush.bf16.msrb.mxu1 %v9797_v16  ;;  %v9784_v62 = vld [vmem:[#allocation2 + $0x108] sm:$0xf]  ;;  %v11229_v52 = vld [vmem:[%s15026_s4 + $0x38] sm:$0xf0]  ;;  %v9657_v16 = vor.u32 %v11234_v38, %v9654_v42 }
 0x422   : > { %2651 = vst.msk [vmem:[#allocation2 + $0x164] sm:$0xf] %vm370_vm0, %v2635_v49  ;;  %3141 = vmatpush.bf16.msra.mxu2 %v9677_v29  ;;  %3198 = vmatpush.bf16.msra.mxu0 %v9681_v30  ;;  %v11268_v28 = vld [vmem:[#allocation2 + $0x110] sm:$0xf0]  ;;  %v9653_v49 = vor.u32 %v11235_v54, %v9652_v7  ;;  %v9822_v30 = vld [vmem:[#allocation2 + $0x15c] sm:$0xf0] }
 0x423   : > { %2520 = vst [vmem:[#allocation2 + $0xf0] sm:$0xff] %v2504_v17  ;;  %v2343_v23 = vpop.permute.xlu2 %2342  ;;  %v11238_v21 = vld [vmem:[#allocation2 + $0x20] sm:$0xf0]  ;;  %v9785_v6 = vor.u32 %v11268_v28, %v9784_v62  ;;  %v9666_v63 = vld [vmem:[#allocation2 + $0x24] sm:$0xf0]  ;;  %v2663_v41 = vpop.permute.xlu0 %2662  ;;  %v9837_v17 = vor.u32 %v11279_v56, %v9834_v4 }
 0x424   : > { %2522 = vst [vmem:[#allocation2 + $0xfc] sm:$0xff] %v2506_v50  ;;  %v2347_v60 = vsel %vm416_vm10, %v12481_v48, %v2343_v23  ;;  %v2665_v14 = vpop.permute.xlu1 %2664  ;;  %v9665_v12 = vor.u32 %v11238_v21, %v9664_v31  ;;  %v9669_v9 = vor.u32 %v11237_v36, %v9666_v63  ;;  %v12620_v50 = vor.u32 %v11229_v52, %v9628_v11  ;;  %v11276_v29 = vld [vmem:[#allocation2 + $0x154] sm:$0xf]  ;;  %v9760_v42 = vld [vmem:[#allocation2 + $0xd8] sm:$0xf] }
 0x425   : > { %v2364_v47 = vunpack.c.l.b16 %v2347_v60  ;;  %v2367_v15 = vunpack.c.h.b16 %v2347_v60  ;;  %v2671_v22 = vsel %vm588_vm2, %v2665_v14, %v12593_v40  ;;  %3159 = vmatpush.bf16.msrb.mxu1 %v9785_v6  ;;  %v2670_v37 = vsel %vm588_vm2, %v2663_v41, %v2665_v14  ;;  %v11259_v11 = vld [vmem:[#allocation2 + $0xc8] sm:$0xf0]  ;;  %v9798_v56 = vld [vmem:[#allocation2 + $0x12c] sm:$0xf0]  ;;  %v11228_v4 = vld [vmem:[%s15026_s4 + $0x34] sm:$0xf] }
 0x426   : > { %v2691_v48 = vunpack.c.l.b16 %v2671_v22  ;;  %v2694_v35 = vunpack.c.h.b16 %v2671_v22  ;;  %3142 = vmatpush.bf16.msra.mxu2 %v9665_v12  ;;  %3199 = vmatpush.bf16.msra.mxu0 %v9669_v9  ;;  %v2690_v1 = vunpack.c.l.b16 %v2670_v37  ;;  %v2693_v45 = vunpack.c.h.b16 %v2670_v37  ;;  %v11262_v9 = vld [vmem:[#allocation2 + $0xe0] sm:$0xf0]  ;;  %v9810_v22 = vld [vmem:[#allocation2 + $0x144] sm:$0xf0]  ;;  %v9630_v52 = vld [vmem:[%s15026_s4 + $0x3c] sm:$0xf0] }
 0x427   : > { %v2373_v24 = vpack.c.b16 %v2364_v47, %v2364_v47  ;;  %v2375_v55 = vpack.c.b16 %v2367_v15, %v2367_v15  ;;  %v9825_v63 = vor.u32 %v11276_v29, %v9822_v30  ;;  %v11273_v15 = vld [vmem:[#allocation2 + $0x13c] sm:$0xf] }
 0x428   : > { %v2700_v34 = vpack.c.b16 %v2691_v48, %v2690_v1  ;;  %v2702_v53 = vpack.c.b16 %v2694_v35, %v2693_v45  ;;  %v11270_v48 = vld [vmem:[#allocation2 + $0x124] sm:$0xf]  ;;  %v9761_v45 = vor.u32 %v11262_v9, %v9760_v42 }
 0x429   : > { %2389 = vst.msk [vmem:[#allocation2 + $0x80] sm:$0xf] %vm370_vm0, %v2373_v24  ;;  %v9813_v24 = vor.u32 %v11273_v15, %v9810_v22  ;;  %v9801_v30 = vor.u32 %v11270_v48, %v9798_v56 }
 0x42a   : > { %2391 = vst.msk [vmem:[#allocation2 + $0x8c] sm:$0xf] %vm370_vm0, %v2375_v55  ;;  %3143 = vmatpush.bf16.msra.mxu2 %v9653_v49  ;;  %3200 = vmatpush.bf16.msra.mxu0 %v9657_v16  ;;  %v9772_v31 = vld [vmem:[#allocation2 + $0xf0] sm:$0xf]  ;;  %v9748_v55 = vld [vmem:[#allocation2 + $0xc0] sm:$0xf] }
 0x42b   : > { %2716 = vst [vmem:[#allocation2 + $0x198] sm:$0xff] %v2700_v34  ;;  %v2273_v62 = vpop.permute.xlu2 %2272  ;;  %v11265_v36 = vld [vmem:[#allocation2 + $0xf8] sm:$0xf0]  ;;  %v2657_v28 = vpop.permute.xlu0 %2656  ;;  %v9749_v16 = vor.u32 %v11259_v11, %v9748_v55  ;;  %v9774_v42 = vld [vmem:[#allocation2 + $0xfc] sm:$0xf0] }
 0x42c   : > { %2718 = vst [vmem:[#allocation2 + $0x1a4] sm:$0xff] %v2702_v53  ;;  %v2281_v23 = vsel %vm382_vm11, %v12460_v58, %v2273_v62  ;;  %v2659_v21 = vpop.permute.xlu1 %2658  ;;  %v9773_v6 = vor.u32 %v11265_v36, %v9772_v31  ;;  %v12638_v62 = vor.u32 %v11228_v4, %v9630_v52  ;;  %v11230_v11 = vld [vmem:[%s15026_s4 + $0x40] sm:$0xf0] }
 0x42d   : > { %3144 = vmatmul.bf16.vlgmr.msra.gmra.mxu2 %v12620_v50  ;;  %3201 = vmatmul.bf16.vlgmr.msra.gmra.mxu0 %v12620_v50  ;;  %v2294_v41 = vunpack.c.l.b16 %v2281_v23  ;;  %v2297_v60 = vunpack.c.h.b16 %v2281_v23  ;;  %v2669_v14 = vsel %vm588_vm2, %v2659_v21, %v12557_v57  ;;  %v2668_v12 = vsel %vm588_vm2, %v2657_v28, %v2659_v21 }
 0x42e   : > { %3212 = vmatpush.bf16.msrb.mxu2 %v9837_v17  ;;  %v2685_v7 = vunpack.c.l.b16 %v2669_v14  ;;  %v2688_v38 = vunpack.c.h.b16 %v2669_v14  ;;  %3160 = vmatpush.bf16.msrb.mxu1 %v9773_v6  ;;  %v2684_v47 = vunpack.c.l.b16 %v2668_v12  ;;  %v2687_v58 = vunpack.c.h.b16 %v2668_v12  ;;  %v9640_v12 = vld [vmem:[%s15026_s4 + $0x48] sm:$0xf] }
 0x42f   : > { %v2305_v37 = vpack.c.b16 %v2294_v41, %v2294_v41  ;;  %v2307_v54 = vpack.c.b16 %v2297_v60, %v2297_v60 }
 0x430   : > { %v2696_v35 = vpack.c.b16 %v2685_v7, %v2684_v47  ;;  %v2698_v1 = vpack.c.b16 %v2688_v38, %v2687_v58  ;;  %v11267_v38 = vld [vmem:[#allocation2 + $0x10c] sm:$0xf]  ;;  %v9786_v47 = vld [vmem:[#allocation2 + $0x114] sm:$0xf0] }
 0x431   : > { %2321 = vst.msk [vmem:[#allocation2 + $0x38] sm:$0xf] %vm370_vm0, %v2305_v37 }
 0x432   : > { %3213 = vmatpush.bf16.msrb.mxu2 %v9825_v63  ;;  %2323 = vst.msk [vmem:[#allocation2 + $0x44] sm:$0xf] %vm370_vm0, %v2307_v54  ;;  %3161 = vmatpush.bf16.msrb.mxu1 %v9761_v45  ;;  %v9856_v34 = vld [vmem:[#allocation2 + $0x198] sm:$0xf]  ;;  %v11285_v53 = vld [vmem:[#allocation2 + $0x19c] sm:$0xf] }
 0x433   : > { %2712 = vst [vmem:[#allocation2 + $0x180] sm:$0xff] %v2696_v35  ;;  %v2483_v49 = vpop.permute.xlu2 %2482  ;;  %v11286_v17 = vld [vmem:[#allocation2 + $0x1a0] sm:$0xf0]  ;;  %v2611_v29 = vpop.permute.xlu0 %2610  ;;  %v9858_v31 = vld [vmem:[#allocation2 + $0x1a4] sm:$0xf0]  ;;  %v9789_v35 = vor.u32 %v11267_v38, %v9786_v47 }
 0x434   : > { %2714 = vst [vmem:[#allocation2 + $0x18c] sm:$0xff] %v2698_v1  ;;  %v2489_v36 = vsel %vm491_vm7, %v12582_v10, %v2483_v49  ;;  %v2401_v28 = vpop.permute.xlu1 %2400  ;;  %v9857_v23 = vor.u32 %v11286_v17, %v9856_v34  ;;  %v2617_v21 = vsel %vm559_vm4, %v12565_v39, %v2611_v29  ;;  %v9861_v6 = vor.u32 %v11285_v53, %v9858_v31  ;;  %v11232_v39 = vld [vmem:[%s15026_s4 + $0x50] sm:$0xf0]  ;;  %v11231_v47 = vld [vmem:[%s15026_s4 + $0x4c] sm:$0xf] }
 0x435   : > { %v2500_v63 = vunpack.c.l.b16 %v2489_v36  ;;  %v2503_v41 = vunpack.c.h.b16 %v2489_v36  ;;  %v2409_v60 = vsel %vm450_vm9, %v12448_v51, %v2401_v28  ;;  %v2628_v14 = vunpack.c.l.b16 %v2617_v21  ;;  %v9636_v51 = vld [vmem:[%s15026_s4 + $0x38] sm:$0xf]  ;;  %v11264_v54 = vld [vmem:[#allocation2 + $0xf4] sm:$0xf] }
 0x436   : > { %3214 = vmatpush.bf16.msrb.mxu2 %v9813_v24  ;;  %v2422_v9 = vunpack.c.l.b16 %v2409_v60  ;;  %v2425_v7 = vunpack.c.h.b16 %v2409_v60  ;;  %3162 = vmatpush.bf16.msrb.mxu1 %v9749_v16  ;;  %v2631_v10 = vunpack.c.h.b16 %v2617_v21  ;;  %v12660_v1 = vor.u32 %v11232_v39, %v9640_v12  ;;  %v9642_v39 = vld [vmem:[%s15026_s4 + $0x54] sm:$0xf0] }
 0x437   : > { %3180 = vmatpush.bf16.msra.mxu3 %v9857_v23  ;;  %v2509_v58 = vpack.c.b16 %v2500_v63, %v2500_v63  ;;  %v2511_v15 = vpack.c.b16 %v2503_v41, %v2503_v41  ;;  %v2637_v48 = vpack.c.b16 %v2628_v14, %v2628_v14  ;;  %v9777_v53 = vor.u32 %v11264_v54, %v9774_v42 }
 0x438   : > { %v2433_v22 = vpack.c.b16 %v2422_v9, %v2422_v9  ;;  %v2435_v37 = vpack.c.b16 %v2425_v7, %v2425_v7  ;;  %v2639_v45 = vpack.c.b16 %v2631_v10, %v2631_v10  ;;  %v12664_v49 = vor.u32 %v11230_v11, %v9636_v51  ;;  %v11261_v9 = vld [vmem:[#allocation2 + $0xdc] sm:$0xf]  ;;  %v9750_v10 = vld [vmem:[#allocation2 + $0xcc] sm:$0xf0] }
 0x439   : > { %2525 = vst.msk [vmem:[#allocation2 + $0x110] sm:$0xf] %vm370_vm0, %v2509_v58  ;;  %3163 = vmatmul.bf16.vlgmr.msrb.gmra.mxu1 %v12638_v62 }
 0x43a   : > { %3215 = vmatpush.bf16.msrb.mxu2 %v9801_v30  ;;  %3237 = vmatpush.bf16.msra.mxu1 %v9861_v6  ;;  %2527 = vst.msk [vmem:[#allocation2 + $0x11c] sm:$0xf] %vm370_vm0, %v2511_v15  ;;  %v9844_v56 = vld [vmem:[#allocation2 + $0x180] sm:$0xf]  ;;  %v11282_v4 = vld [vmem:[#allocation2 + $0x184] sm:$0xf] }
 0x43b   : > { %2449 = vst.msk [vmem:[#allocation2 + $0x98] sm:$0xf] %vm370_vm0, %v2433_v22  ;;  %v2675_v52 = vpop.permute.xlu2 %2674  ;;  %v11283_v24 = vld [vmem:[#allocation2 + $0x188] sm:$0xf0]  ;;  %v9846_v55 = vld [vmem:[#allocation2 + $0x18c] sm:$0xf0]  ;;  %v2407_v34 = vpop.permute.xlu0 %2406 }
 0x43c   : > { %2451 = vst.msk [vmem:[#allocation2 + $0xa4] sm:$0xf] %vm370_vm0, %v2435_v37  ;;  %v2681_v16 = vsel %vm593_vm13, %v12593_v40, %v2675_v52  ;;  %v2337_v17 = vpop.permute.xlu1 %2336  ;;  %v9845_v29 = vor.u32 %v11283_v24, %v9844_v56  ;;  %v9849_v30 = vor.u32 %v11282_v4, %v9846_v55  ;;  %v2411_v31 = vsel %vm450_vm9, %v12473_v2, %v2407_v34  ;;  %v9762_v2 = vld [vmem:[#allocation2 + $0xe4] sm:$0xf0]  ;;  %v11258_v15 = vld [vmem:[#allocation2 + $0xc4] sm:$0xf] }
 0x43d   : > { %2653 = vst.msk [vmem:[#allocation2 + $0x170] sm:$0xf] %vm370_vm0, %v2637_v48  ;;  %3149 = vmatmul.bf16.gmra.mxu2 %v12660_v1  ;;  %3206 = vmatmul.bf16.gmra.mxu0 %v12660_v1  ;;  %v2692_v36 = vunpack.c.l.b16 %v2681_v16  ;;  %v2695_v28 = vunpack.c.h.b16 %v2681_v16  ;;  %v2345_v23 = vsel %vm416_vm10, %v12453_v43, %v2337_v17  ;;  %v2428_v21 = vunpack.c.l.b16 %v2411_v31  ;;  %v9828_v55 = vld [vmem:[#allocation2 + $0x158] sm:$0xf] }
 0x43e   : > { %3216 = vmatpush.bf16.msrb.mxu2 %v9789_v35  ;;  %2655 = vst.msk [vmem:[#allocation2 + $0x17c] sm:$0xf] %vm370_vm0, %v2639_v45  ;;  %v2358_v40 = vunpack.c.l.b16 %v2345_v23  ;;  %v2361_v6 = vunpack.c.h.b16 %v2345_v23  ;;  %3181 = vmatpush.bf16.msra.mxu3 %v9845_v29  ;;  %v2431_v63 = vunpack.c.h.b16 %v2411_v31  ;;  %v9765_v43 = vor.u32 %v11261_v9, %v9762_v2  ;;  %v9648_v31 = vld [vmem:[%s15026_s4 + $0x50] sm:$0xf] }
 0x43f   : > { %3238 = vmatpush.bf16.msra.mxu1 %v9849_v30  ;;  %v2701_v41 = vpack.c.b16 %v2692_v36, %v2692_v36  ;;  %v2703_v60 = vpack.c.b16 %v2695_v28, %v2695_v28  ;;  %v2437_v7 = vpack.c.b16 %v2428_v21, %v2428_v21  ;;  %v9753_v54 = vor.u32 %v11258_v15, %v9750_v10  ;;  %v11233_v36 = vld [vmem:[%s15026_s4 + $0x58] sm:$0xf0]  ;;  %v9720_v15 = vld [vmem:[#allocation2 + $0x80] sm:$0xf] }
 0x440   : > { %v2369_v14 = vpack.c.b16 %v2358_v40, %v2358_v40  ;;  %v2371_v12 = vpack.c.b16 %v2361_v6, %v2361_v6  ;;  %v2439_v38 = vpack.c.b16 %v2431_v63, %v2431_v63  ;;  %v12694_v45 = vor.u32 %v11231_v47, %v9642_v39 }
 0x441   : > { %2717 = vst.msk [vmem:[#allocation2 + $0x1a0] sm:$0xf] %vm370_vm0, %v2701_v41  ;;  %9866 = vmatmul.msk.bf16.vlgmr.msra.gmra.mxu3 %vm1950_vm14, %v12664_v49 }
 0x442   : > { %3217 = vmatpush.bf16.msrb.mxu2 %v9777_v53  ;;  %2719 = vst.msk [vmem:[#allocation2 + $0x1ac] sm:$0xf] %vm370_vm0, %v2703_v60  ;;  %v12713_v60 = vor.u32 %v11233_v36, %v9648_v31 }
 0x443   : > { %2385 = vst.msk [vmem:[#allocation2 + $0x68] sm:$0xf] %vm370_vm0, %v2369_v14  ;;  %v2545_v58 = vpop.permute.xlu0 %2544  ;;  %v11254_v10 = vld [vmem:[#allocation2 + $0xa0] sm:$0xf0] }
 0x444   : > { %2387 = vst.msk [vmem:[#allocation2 + $0x74] sm:$0xf] %vm370_vm0, %v2371_v12  ;;  %v2547_v51 = vpop.permute.xlu1 %2546  ;;  %v9840_v22 = vld [vmem:[#allocation2 + $0x170] sm:$0xf]  ;;  %v2550_v37 = vsel %vm525_vm6, %v12528_v27, %v2545_v58  ;;  %v11278_v27 = vld [vmem:[#allocation2 + $0x160] sm:$0xf0] }
 0x445   : > { %2453 = vst.msk [vmem:[#allocation2 + $0xb0] sm:$0xf] %vm370_vm0, %v2437_v7  ;;  %v2553_v42 = vsel %vm525_vm6, %v12572_v5, %v2547_v51  ;;  %v11281_v11 = vld [vmem:[#allocation2 + $0x178] sm:$0xf0]  ;;  %v2558_v48 = vunpack.c.l.b16 %v2550_v37  ;;  %v2561_v35 = vunpack.c.h.b16 %v2550_v37  ;;  %v9829_v29 = vor.u32 %v11278_v27, %v9828_v55  ;;  %v11251_v51 = vld [vmem:[#allocation2 + $0x88] sm:$0xf0] }
 0x446   : > { %3218 = vmatpush.bf16.msrb.mxu2 %v9765_v43  ;;  %2455 = vst.msk [vmem:[#allocation2 + $0xbc] sm:$0xf] %vm370_vm0, %v2439_v38  ;;  %v2564_v56 = vunpack.c.l.b16 %v2553_v42  ;;  %v2567_v4 = vunpack.c.h.b16 %v2553_v42  ;;  %v9841_v52 = vor.u32 %v11281_v11, %v9840_v22  ;;  %v9732_v43 = vld [vmem:[#allocation2 + $0x98] sm:$0xf]  ;;  %v9721_v55 = vor.u32 %v11251_v51, %v9720_v15  ;;  %v11260_v51 = vld [vmem:[#allocation2 + $0xd0] sm:$0xf0] }
 0x447   : > { %v2569_v24 = vpack.c.b16 %v2558_v48, %v2558_v48  ;;  %v2571_v16 = vpack.c.b16 %v2561_v35, %v2561_v35  ;;  %v9733_v39 = vor.u32 %v11254_v10, %v9732_v43 }
 0x448   : > { %v2573_v34 = vpack.c.b16 %v2564_v56, %v2564_v56  ;;  %v2575_v53 = vpack.c.b16 %v2567_v4, %v2567_v4  ;;  %3269 = vmatpush.bf16.msrb.mxu0 %v9841_v52  ;;  %v9864_v17 = vld [vmem:[#allocation2 + $0x1a0] sm:$0xf] }
 0x449   : > { %2585 = vst.msk [vmem:[#allocation2 + $0x128] sm:$0xf] %vm370_vm0, %v2569_v24  ;;  %3168 = vmatmul.bf16.gmra.mxu1 %v12694_v45  ;;  %v11287_v5 = vld [vmem:[#allocation2 + $0x1a8] sm:$0xf0] }
 0x44a   : > { %3219 = vmatpush.bf16.msrb.mxu2 %v9753_v54  ;;  %2589 = vst.msk [vmem:[#allocation2 + $0x140] sm:$0xf] %vm370_vm0, %v2573_v34  ;;  %v9865_v30 = vor.u32 %v11287_v5, %v9864_v17  ;;  %v9708_v34 = vld [vmem:[#allocation2 + $0x68] sm:$0xf] }
 0x44b   : > { %2591 = vst.msk [vmem:[#allocation2 + $0x14c] sm:$0xf] %vm370_vm0, %v2575_v53  ;;  %v2279_v28 = vpop.permute.xlu0 %2278  ;;  %v11248_v53 = vld [vmem:[#allocation2 + $0x70] sm:$0xf0] }
 0x44c   : > { %2587 = vst.msk [vmem:[#allocation2 + $0x134] sm:$0xf] %vm370_vm0, %v2571_v16  ;;  %3270 = vmatpush.bf16.msrb.mxu0 %v9829_v29  ;;  %v2215_v23 = vpop.permute.xlu1 %2214  ;;  %v9744_v21 = vld [vmem:[#allocation2 + $0xb0] sm:$0xf]  ;;  %v2283_v40 = vsel %vm382_vm11, %v12491_v8, %v2279_v28  ;;  %v9709_v31 = vor.u32 %v11248_v53, %v9708_v34 }
 0x44d   : > { %3220 = vmatmul.bf16.vlgmr.msrb.gmra.mxu2 %v12638_v62  ;;  %v2219_v6 = vsel %vm347_vm12, %v12503_v19, %v2215_v23  ;;  %v11257_v63 = vld [vmem:[#allocation2 + $0xb8] sm:$0xf0]  ;;  %v2300_v2 = vunpack.c.l.b16 %v2283_v40  ;;  %v2303_v41 = vunpack.c.h.b16 %v2283_v40 }
 0x44e   : > { %3294 = vmatpush.bf16.msra.mxu2 %v9865_v30  ;;  %v2236_v14 = vunpack.c.l.b16 %v2219_v6  ;;  %v2239_v12 = vunpack.c.h.b16 %v2219_v6  ;;  %v9745_v9 = vor.u32 %v11257_v63, %v9744_v21  ;;  %v11269_v30 = vld [vmem:[#allocation2 + $0x118] sm:$0xf0] }
 0x44f   : > { %v2309_v7 = vpack.c.b16 %v2300_v2, %v2300_v2  ;;  %v2311_v8 = vpack.c.b16 %v2303_v41, %v2303_v41 }
 0x450   : > { %v2245_v38 = vpack.c.b16 %v2236_v14, %v2236_v14  ;;  %v2247_v47 = vpack.c.b16 %v2239_v12, %v2239_v12  ;;  %3250 = vmatpush.bf16.msrb.mxu3 %v9745_v9  ;;  %v9804_v11 = vld [vmem:[#allocation2 + $0x128] sm:$0xf]  ;;  %v9684_v14 = vld [vmem:[#allocation2 + $0x38] sm:$0xf]  ;;  %v11242_v12 = vld [vmem:[#allocation2 + $0x40] sm:$0xf0] }
 0x451   : > { %2325 = vst.msk [vmem:[#allocation2 + $0x50] sm:$0xf] %vm370_vm0, %v2309_v7  ;;  %9867 = vmatmul.msk.bf16.gmra.mxu3 %vm1950_vm14, %v12713_v60  ;;  %v9816_v19 = vld [vmem:[#allocation2 + $0x140] sm:$0xf]  ;;  %v9685_v7 = vor.u32 %v11242_v12, %v9684_v14 }
 0x452   : > { %2261 = vst.msk [vmem:[#allocation2 + $0x20] sm:$0xf] %vm370_vm0, %v2245_v38  ;;  %v11275_v58 = vld [vmem:[#allocation2 + $0x148] sm:$0xf0] }
 0x453   : > { %2263 = vst.msk [vmem:[#allocation2 + $0x2c] sm:$0xf] %vm370_vm0, %v2247_v47  ;;  %v9817_v22 = vor.u32 %v11275_v58, %v9816_v19  ;;  %v2209_v37 = vpop.permute.xlu0 %2208  ;;  %v11272_v48 = vld [vmem:[#allocation2 + $0x130] sm:$0xf0]  ;;  %v11263_v47 = vld [vmem:[#allocation2 + $0xe8] sm:$0xf0] }
 0x454   : > { %2327 = vst.msk [vmem:[#allocation2 + $0x5c] sm:$0xf] %vm370_vm0, %v2311_v8  ;;  %3251 = vmatpush.bf16.msrb.mxu3 %v9733_v39  ;;  %v2481_v54 = vpop.permute.xlu1 %2480  ;;  %v2217_v42 = vsel %vm347_vm12, %v12466_v61, %v2209_v37  ;;  %v9805_v16 = vor.u32 %v11272_v48, %v9804_v11  ;;  %v9792_v61 = vld [vmem:[#allocation2 + $0x110] sm:$0xf]  ;;  %v9768_v19 = vld [vmem:[#allocation2 + $0xe0] sm:$0xf] }
 0x455   : > { %v2486_v35 = vsel %vm491_vm7, %v12544_v25, %v2481_v54  ;;  %3271 = vmatpush.bf16.msrb.mxu0 %v9817_v22  ;;  %v2230_v56 = vunpack.c.l.b16 %v2217_v42  ;;  %v2233_v4 = vunpack.c.h.b16 %v2217_v42  ;;  %v9793_v28 = vor.u32 %v11269_v30, %v9792_v61  ;;  %v9756_v42 = vld [vmem:[#allocation2 + $0xc8] sm:$0xf] }
 0x456   : > { %v2494_v52 = vunpack.c.l.b16 %v2486_v35  ;;  %v2497_v24 = vunpack.c.h.b16 %v2486_v35  ;;  %v9769_v15 = vor.u32 %v11263_v47, %v9768_v19  ;;  %v9757_v48 = vor.u32 %v11260_v51, %v9756_v42  ;;  %v12769_v42 = vpop.permute.xlu2 %2809 }
 0x457   : > { %v2241_v27 = vpack.c.b16 %v2230_v56, %v2230_v56  ;;  %v2243_v29 = vpack.c.b16 %v2233_v4, %v2233_v4 }
 0x458   : > { %v2505_v17 = vpack.c.b16 %v2494_v52, %v2494_v52  ;;  %v2507_v5 = vpack.c.b16 %v2497_v24, %v2497_v24  ;;  %3252 = vmatpush.bf16.msrb.mxu3 %v9721_v55  ;;  %v9696_v25 = vld [vmem:[#allocation2 + $0x50] sm:$0xf] }
 0x459   : > { %2257 = vst.msk [vmem:[#allocation2 + $0x8] sm:$0xf] %vm370_vm0, %v2241_v27  ;;  %9868 = vmatmul.msk.bf16.vlgmr.msra.gmra.mxu1 %vm1950_vm14, %v12664_v49  ;;  %3272 = vmatpush.bf16.msrb.mxu0 %v9805_v16  ;;  %v9672_v10 = vld [vmem:[#allocation2 + $0x20] sm:$0xf] }
 0x45a   : > { %2521 = vst.msk [vmem:[#allocation2 + $0xf8] sm:$0xf] %vm370_vm0, %v2505_v17  ;;  %v11239_v38 = vld [vmem:[#allocation2 + $0x28] sm:$0xf0] }
 0x45b   : > { %2523 = vst.msk [vmem:[#allocation2 + $0x104] sm:$0xf] %vm370_vm0, %v2507_v5  ;;  %v11245_v36 = vld [vmem:[#allocation2 + $0x58] sm:$0xf0]  ;;  %v2673_v23 = vpop.permute.xlu0 %2672  ;;  %v9673_v8 = vor.u32 %v11239_v38, %v9672_v10 }
 0x45c   : > { %2259 = vst.msk [vmem:[#allocation2 + $0x14] sm:$0xf] %vm370_vm0, %v2243_v29  ;;  %3253 = vmatpush.bf16.msrb.mxu3 %v9709_v31  ;;  %v9697_v21 = vor.u32 %v11245_v36, %v9696_v25  ;;  %v2678_v40 = vsel %vm593_vm13, %v12557_v57, %v2673_v23  ;;  %v12746_v53 = vpop.permute.xlu1 %2804 }
 0x45d   : > { %3225 = vmatmul.bf16.gmra.mxu2 %v12694_v45  ;;  %3273 = vmatpush.bf16.msrb.mxu0 %v9793_v28  ;;  %v2686_v6 = vunpack.c.l.b16 %v2678_v40  ;;  %v2689_v63 = vunpack.c.h.b16 %v2678_v40  ;;  %v3319_v40 = vunpack.c.l.bf16 %v11895_v32 }
 0x45f   : > { %v2697_v2 = vpack.c.b16 %v2686_v6, %v2686_v6  ;;  %v2699_v41 = vpack.c.b16 %v2689_v63, %v2689_v63  ;;  %v3320_v63 = vunpack.c.h.bf16 %v11895_v32 }
 0x460   : > { %3254 = vmatpush.bf16.msrb.mxu3 %v9697_v21  ;;  %v9660_v39 = vld [vmem:[#allocation2 + $0x8] sm:$0xf] }
 0x461   : > { %2713 = vst.msk [vmem:[#allocation2 + $0x188] sm:$0xf] %vm370_vm0, %v2697_v2  ;;  %v9780_v9 = vld [vmem:[#allocation2 + $0xf8] sm:$0xf] }
 0x462   : > { %2715 = vst.msk [vmem:[#allocation2 + $0x194] sm:$0xf] %vm370_vm0, %v2699_v41  ;;  %v11266_v43 = vld [vmem:[#allocation2 + $0x100] sm:$0xf0] }
 0x463   : > { %v9781_v57 = vor.u32 %v11266_v43, %v9780_v9  ;;  %v11236_v58 = vld [vmem:[#allocation2 + $0x10] sm:$0xf0] }
 0x464   : > { %3255 = vmatpush.bf16.msrb.mxu3 %v9685_v7  ;;  %v9661_v54 = vor.u32 %v11236_v58, %v9660_v39  ;;  %v12752_v30 = vpop.permute.xlu1 %2799  ;;  %v3322_v39 = vunpack.c.l.bf16 %v11905_v46 }
 0x465   : > { %3274 = vmatpush.bf16.msrb.mxu0 %v9781_v57 }
 0x468   : > { %3256 = vmatpush.bf16.msrb.mxu3 %v9673_v8  ;;  %v9852_v22 = vld [vmem:[#allocation2 + $0x188] sm:$0xf] }
 0x469   : > { %9869 = vmatmul.msk.bf16.gmra.mxu1 %vm1950_vm14, %v12713_v60  ;;  %3275 = vmatpush.bf16.msrb.mxu0 %v9769_v15  ;;  %v11284_v37 = vld [vmem:[#allocation2 + $0x190] sm:$0xf0]  ;;  %v3323_v15 = vunpack.c.h.bf16 %v11905_v46 }
 0x46a   : > { %v9853_v11 = vor.u32 %v11284_v37, %v9852_v22 }
 0x46c   : > { %3257 = vmatpush.bf16.msrb.mxu3 %v9661_v54  ;;  %3295 = vmatpush.bf16.msra.mxu2 %v9853_v11 }
 0x46d   : > { %3276 = vmatpush.bf16.msrb.mxu0 %v9757_v48 }
 0x46f   : > { %3258 = vmatmul.bf16.vlgmr.msrb.gmra.mxu3 %v12620_v50  ;;  %9870 = vmatmul.msk.bf16.vlgmr.msra.gmra.mxu2 %vm1950_vm14, %v12664_v49  ;;  %v12748_v49 = vpop.permute.xlu0 %2794 }
 0x470   : > { %3277 = vmatmul.bf16.vlgmr.msrb.gmra.mxu0 %v12638_v62 }
 0x47f   : > { %3263 = vmatmul.bf16.gmra.mxu3 %v12660_v1  ;;  %9871 = vmatmul.msk.bf16.gmra.mxu2 %vm1950_vm14, %v12713_v60 }
 0x480   : > { %3282 = vmatmul.bf16.gmra.mxu0 %v12694_v45 }
 0x4aa   : > { %v3202_v27 = vpop.f32.mrf.mxu0 }
 0x4ab   : > { %v3203_v45 = vadd.f32 %v3202_v27, %v12748_v49 }
 0x4b0   : > { %v3145_v35 = vpop.f32.mrf.mxu2 }
 0x4b1   : > { %v3146_v1 = vadd.f32 %v3145_v35, %v12748_v49 }
 0x4b2   : > { %v3204_v60 = vpop.f32.mrf.mxu0 }
 0x4b3   : > { %v3205_v2 = vadd.f32 %v3204_v60, %v12752_v30  ;;  %v3326_v60 = vunpack.c.h.bf16 %v11922_v3 }
 0x4b6   : > { %v3164_v56 = vpop.f32.mrf.mxu1 }
 0x4b7   : > { %v3165_v17 = vadd.f32 %v3164_v56, %v3146_v1  ;;  %v3325_v1 = vunpack.c.l.bf16 %v11922_v3 }
 0x4b8   : > { %v3147_v4 = vpop.f32.mrf.mxu2 }
 0x4b9   : > { %v3148_v31 = vadd.f32 %v3147_v4, %v12752_v30 }
 0x4ba   : > { %v3207_v41 = vpop.f32.mrf.mxu0 }
 0x4bb   : > { %v3208_v22 = vadd.f32 %v3207_v41, %v12746_v53 }
 0x4be   : > { %v3166_v52 = vpop.f32.mrf.mxu1 }
 0x4bf   : > { %v3167_v21 = vadd.f32 %v3166_v52, %v3148_v31 }
 0x4c0   : > { %v3150_v24 = vpop.f32.mrf.mxu2 }
 0x4c1   : > { %v3151_v10 = vadd.f32 %v3150_v24, %v12746_v53 }
 0x4c2   : > { %v3209_v11 = vpop.f32.mrf.mxu0 }
 0x4c4   : > { %v3183_v34 = vpop.f32.mrf.mxu3 }
 0x4c5   : > { %v3184_v5 = vadd.f32 %v3183_v34, %v3165_v17 }
 0x4c6   : > { %v3169_v55 = vpop.f32.mrf.mxu1 }
 0x4c7   : > { %v3307_v36 = vmul.f32 %v3184_v5, %v11889_v18  ;;  %v3170_v19 = vadd.f32 %v3169_v55, %v3151_v10 }
 0x4c8   : > { %v3152_v50 = vpop.f32.mrf.mxu2 }
 0x4c9   : > { %v3331_v14 = vadd.f32 %v3319_v40, %v3307_v36  ;;  %v3153_v56 = vadd.f32 %v3152_v50, %v12769_v42 }
 0x4cc   : > { %v3185_v29 = vpop.f32.mrf.mxu3 }
 0x4cd   : > { %v3186_v12 = vadd.f32 %v3185_v29, %v3167_v21  ;;  %v3210_v29 = vadd.f32 %v3209_v11, %v12769_v42 }
 0x4ce   : > { %v3171_v62 = vpop.f32.mrf.mxu1 }
 0x4cf   : > { %v3310_v47 = vmul.f32 %v3186_v12, %v11889_v18  ;;  %v3172_v50 = vadd.f32 %v3171_v62, %v3153_v56 }
 0x4d0   : > { %v3221_v16 = vpop.f32.mrf.mxu2 }
 0x4d1   : > { %v3222_v61 = vadd.f32 %v3221_v16, %v3203_v45  ;;  %v3334_v37 = vadd.f32 %v3322_v39, %v3310_v47 }
 0x4d4   : > { %v3188_v38 = vpop.f32.mrf.mxu3 }
 0x4d5   : > { %v3189_v51 = vadd.f32 %v3188_v38, %v3170_v19 }
 0x4d6   : > { %v3240_v25 = vpop.f32.mrf.mxu1 }
 0x4d7   : > { %v3241_v28 = vadd.f32 %v3240_v25, %v3222_v61  ;;  %v3313_v4 = vmul.f32 %v3189_v51, %v11889_v18 }
 0x4d8   : > { %v3223_v23 = vpop.f32.mrf.mxu2 }
 0x4d9   : > { %v3308_v6 = vmul.f32 %v3241_v28, %v11891_v20  ;;  %v3224_v43 = vadd.f32 %v3223_v23, %v3205_v2  ;;  %v3337_v25 = vadd.f32 %v3325_v1, %v3313_v4  ;;  %v3329_v2 = vunpack.c.h.bf16 %v11945_v59 }
 0x4db   : > { %v3332_v9 = vadd.f32 %v3320_v63, %v3308_v6  ;;  %v3328_v6 = vunpack.c.l.bf16 %v11945_v59 }
 0x4dc   : > { %v3190_v16 = vpop.f32.mrf.mxu3 }
 0x4dd   : > { %v12760_v7 = vpack.c.bf16 %v3332_v9, %v3331_v14  ;;  %v3191_v31 = vadd.f32 %v3190_v16, %v3172_v50  ;;  %v3327_v50 = vunpack.c.l.bf16 %v11937_v13 }
 0x4de   : > { %v3242_v57 = vpop.f32.mrf.mxu1 }
 0x4df   : > { %3647 = vst [vmem:[#allocation2 + $0xc0] sm:$0xff] %v12760_v7  ;;  %v3243_v8 = vadd.f32 %v3242_v57, %v3224_v43  ;;  %v3383_v52 = vunpack.c.l.b16 %v12760_v7  ;;  %v3384_v46 = vunpack.c.h.b16 %v12760_v7  ;;  %v3316_v21 = vmul.f32 %v3191_v31, %v11889_v18 }
 0x4e0   : > { %v3226_v32 = vpop.f32.mrf.mxu2 }
 0x4e1   : > { %v3311_v58 = vmul.f32 %v3243_v8, %v11891_v20  ;;  %v3227_v35 = vadd.f32 %v3226_v32, %v3208_v22  ;;  %v3340_v12 = vadd.f32 %v3328_v6, %v3316_v21 }
 0x4e3   : > { %v3335_v54 = vadd.f32 %v3323_v15, %v3311_v58  ;;  %v3321_v15 = vunpack.c.l.bf16 %v11903_v44 }
 0x4e5   : > { %v12771_v48 = vpack.c.bf16 %v3335_v54, %v3334_v37 }
 0x4e6   : > { %v3245_v24 = vpop.f32.mrf.mxu1 }
 0x4e7   : > { %v3385_v55 = vunpack.c.l.b16 %v12771_v48  ;;  %v3386_v27 = vunpack.c.h.b16 %v12771_v48  ;;  %3649 = vst [vmem:[#allocation2 + $0xcc] sm:$0xff] %v12771_v48  ;;  %v3246_v34 = vadd.f32 %v3245_v24, %v3227_v35 }
 0x4e8   : > { %v3228_v61 = vpop.f32.mrf.mxu2 }
 0x4e9   : > { %v12782_v17 = vpack.c.b16 %v3385_v55, %v3383_v52  ;;  %v12784_v45 = vpack.c.b16 %v3386_v27, %v3384_v46  ;;  %v3314_v5 = vmul.f32 %v3246_v34, %v11891_v20  ;;  %v3229_v62 = vadd.f32 %v3228_v61, %v3210_v29 }
 0x4eb   : > { %v3338_v36 = vadd.f32 %v3326_v60, %v3314_v5  ;;  %3589 = vrot.lane.b32.xlu1 %v12784_v45, %s15062_s18  ;;  %3783 = vrot.lane.b32.xlu2 %v12782_v17, %s15060_s12 }
 0x4ec   : > { %3587 = vrot.lane.b32.xlu0 %v12782_v17, %s15062_s18 }
 0x4ed   : > { %v12794_v3 = vpack.c.bf16 %v3338_v36, %v3337_v25  ;;  %v3278_v28 = vpop.f32.mrf.mxu0 }
 0x4ee   : > { %v3247_v23 = vpop.f32.mrf.mxu1 }
 0x4ef   : > { %3651 = vst [vmem:[#allocation2 + $0xd8] sm:$0xff] %v12794_v3  ;;  %v3248_v40 = vadd.f32 %v3247_v23, %v3229_v62  ;;  %v3387_v59 = vunpack.c.l.b16 %v12794_v3  ;;  %v3388_v47 = vunpack.c.h.b16 %v12794_v3 }
 0x4f1   : > { %v3317_v63 = vmul.f32 %v3248_v40, %v11891_v20 }
 0x4f2   : > { %v3259_v41 = vpop.f32.mrf.mxu3  ;;  %v3297_v14 = vpop.f32.mrf.mxu2 }
 0x4f3   : > { %v3341_v9 = vadd.f32 %v3329_v2, %v3317_v63  ;;  %v3260_v43 = vadd.f32 %v3259_v41, %v12748_v49  ;;  %3525 = vrot.lane.b32.xlu1 %v12784_v45, %s15058_s20  ;;  %3719 = vrot.lane.b32.xlu2 %v12782_v17, %s15056_s13 }
 0x4f4   : > { %3523 = vrot.lane.b32.xlu0 %v12782_v17, %s15058_s20 }
 0x4f5   : > { %v12808_v10 = vpack.c.bf16 %v3341_v9, %v3340_v12  ;;  %v3279_v38 = vadd.f32 %v3278_v28, %v3260_v43  ;;  %v3280_v57 = vpop.f32.mrf.mxu0 }
 0x4f7   : > { %v3389_v8 = vunpack.c.l.b16 %v12808_v10  ;;  %v3390_v49 = vunpack.c.h.b16 %v12808_v10  ;;  %3653 = vst [vmem:[#allocation2 + $0xe4] sm:$0xff] %v12808_v10  ;;  %v3298_v19 = vadd.f32 %v3297_v14, %v3279_v38 }
 0x4f9   : > { %v12815_v32 = vpack.c.b16 %v3389_v8, %v3387_v59  ;;  %v12817_v39 = vpack.c.b16 %v3390_v49, %v3388_v47  ;;  %v3309_v58 = vmul.f32 %v3298_v19, %v11897_v33 }
 0x4fa   : > { %v3261_v51 = vpop.f32.mrf.mxu3  ;;  %v3299_v22 = vpop.f32.mrf.mxu2 }
 0x4fb   : > { %v3333_v37 = vadd.f32 %v3321_v15, %v3309_v58  ;;  %v3262_v54 = vadd.f32 %v3261_v51, %v12752_v30  ;;  %3461 = vrot.lane.b32.xlu1 %v12784_v45, %s15054_s23  ;;  %3789 = vrot.lane.b32.xlu2 %v12815_v32, %s15060_s12  ;;  %v3324_v30 = vunpack.c.l.bf16 %v11917_v0 }
 0x4fc   : > { %3459 = vrot.lane.b32.xlu0 %v12782_v17, %s15054_s23 }
 0x4fd   : > { %v12828_v11 = vpack.c.bf16 %v3333_v37, %v3333_v37  ;;  %v3281_v35 = vadd.f32 %v3280_v57, %v3262_v54  ;;  %v3283_v56 = vpop.f32.mrf.mxu0 }
 0x4ff   : > { %3648 = vst.msk [vmem:[#allocation2 + $0xc8] sm:$0xf] %vm370_vm0, %v12828_v11  ;;  %v3300_v44 = vadd.f32 %v3299_v22, %v3281_v35  ;;  %v3369_v1 = vunpack.c.l.b16 %v12828_v11 }
 0x501   : > { %v3312_v4 = vmul.f32 %v3300_v44, %v11897_v33 }
 0x502   : > { %v3264_v52 = vpop.f32.mrf.mxu3  ;;  %v3302_v24 = vpop.f32.mrf.mxu2 }
 0x503   : > { %v3336_v46 = vadd.f32 %v3324_v30, %v3312_v4  ;;  %v3265_v55 = vadd.f32 %v3264_v52, %v12746_v53  ;;  %3397 = vrot.lane.b32.xlu1 %v12784_v45, %s15082_s24  ;;  %3725 = vrot.lane.b32.xlu2 %v12815_v32, %s15056_s13 }
 0x504   : > { %3395 = vrot.lane.b32.xlu0 %v12782_v17, %s15082_s24 }
 0x505   : > { %v12841_v27 = vpack.c.bf16 %v3336_v46, %v3336_v46  ;;  %v3284_v34 = vadd.f32 %v3283_v56, %v3265_v55  ;;  %v3285_v29 = vpop.f32.mrf.mxu0 }
 0x507   : > { %v3370_v0 = vunpack.c.l.b16 %v12841_v27  ;;  %3650 = vst.msk [vmem:[#allocation2 + $0xd4] sm:$0xf] %vm370_vm0, %v12841_v27  ;;  %v3303_v53 = vadd.f32 %v3302_v24, %v3284_v34 }
 0x509   : > { %v12847_v16 = vpack.c.b16 %v3370_v0, %v3369_v1  ;;  %v3315_v60 = vmul.f32 %v3303_v53, %v11897_v33 }
 0x50a   : > { %v3266_v5 = vpop.f32.mrf.mxu3  ;;  %v3304_v31 = vpop.f32.mrf.mxu2 }
 0x50b   : > { %v3339_v61 = vadd.f32 %v3327_v50, %v3315_v60  ;;  %v3267_v25 = vadd.f32 %v3266_v5, %v12769_v42  ;;  %3595 = vrot.lane.b32.xlu1 %v12817_v39, %s15062_s18  ;;  %3661 = vrot.lane.b32.xlu2 %v12815_v32, %s15083_s26  ;;  %v3330_v42 = vunpack.c.l.bf16 %v11954_v26 }
 0x50c   : > { %3785 = vrot.lane.b32.xlu0 %v12784_v45, %s15060_s12 }
 0x50d   : > { %v12858_v36 = vpack.c.bf16 %v3339_v61, %v3339_v61  ;;  %v3286_v62 = vadd.f32 %v3285_v29, %v3267_v25 }
 0x50f   : > { %3652 = vst.msk [vmem:[#allocation2 + $0xe0] sm:$0xf] %vm370_vm0, %v12858_v36  ;;  %v3305_v13 = vadd.f32 %v3304_v31, %v3286_v62  ;;  %v3371_v40 = vunpack.c.l.b16 %v12858_v36 }
 0x511   : > { %v3318_v28 = vmul.f32 %v3305_v13, %v11897_v33 }
 0x513   : > { %v3342_v23 = vadd.f32 %v3330_v42, %v3318_v28  ;;  %3531 = vrot.lane.b32.xlu1 %v12817_v39, %s15058_s20  ;;  %3583 = vrot.lane.b32.xlu2 %v12847_v16, %s15084_s19 }
 0x514   : > { %3721 = vrot.lane.b32.xlu0 %v12784_v45, %s15056_s13 }
 0x515   : > { %v12870_v21 = vpack.c.bf16 %v3342_v23, %v3342_v23 }
 0x517   : > { %v3372_v6 = vunpack.c.l.b16 %v12870_v21  ;;  %3654 = vst.msk [vmem:[#allocation2 + $0xec] sm:$0xf] %vm370_vm0, %v12870_v21 }
 0x519   : > { %v12876_v26 = vpack.c.b16 %v3372_v6, %v3371_v40 }
 0x51b   : > { %3467 = vrot.lane.b32.xlu1 %v12817_v39, %s15054_s23  ;;  %3519 = vrot.lane.b32.xlu2 %v12847_v16, %s15077_s21 }
 0x51c   : > { %3593 = vrot.lane.b32.xlu0 %v12815_v32, %s15062_s18 }
 0x523   : > { %3403 = vrot.lane.b32.xlu1 %v12817_v39, %s15082_s24  ;;  %3455 = vrot.lane.b32.xlu2 %v12847_v16, %s15078_s22 }
 0x524   : > { %3529 = vrot.lane.b32.xlu0 %v12815_v32, %s15058_s20 }
 0x52b   : > { %3787 = vrot.lane.b32.xlu1 %v12847_v16, %s15060_s12  ;;  %3375 = vrot.lane.b32.xlu2 %v12847_v16, %s15079_s30 }
 0x52c   : > { %3465 = vrot.lane.b32.xlu0 %v12815_v32, %s15054_s23 }
 0x533   : > { %3723 = vrot.lane.b32.xlu1 %v12847_v16, %s15056_s13  ;;  %3585 = vrot.lane.b32.xlu2 %v12876_v26, %s15084_s19 }
 0x534   : > { %3401 = vrot.lane.b32.xlu0 %v12815_v32, %s15082_s24 }
 0x53b   : > { %3659 = vrot.lane.b32.xlu1 %v12847_v16, %s15083_s26  ;;  %3521 = vrot.lane.b32.xlu2 %v12876_v26, %s15077_s21 }
 0x53c   : > { %3791 = vrot.lane.b32.xlu0 %v12817_v39, %s15060_s12 }
 0x543   : > { %3849 = vrot.lane.b32.xlu1 %v12784_v45, %s15080_s9  ;;  %3457 = vrot.lane.b32.xlu2 %v12876_v26, %s15078_s22 }
 0x544   : > { %3727 = vrot.lane.b32.xlu0 %v12817_v39, %s15056_s13 }
 0x545   : > { %v12914_v63 = vpop.permute.xlu2 %3783 }
 0x54b   : > { %3793 = vrot.lane.b32.xlu1 %v12876_v26, %s15060_s12  ;;  %3377 = vrot.lane.b32.xlu2 %v12876_v26, %s15079_s30 }
 0x54c   : > { %3663 = vrot.lane.b32.xlu0 %v12817_v39, %s15083_s26 }
 0x54d   : > { %v12922_v2 = vpop.permute.xlu2 %3719 }
 0x553   : > { %3729 = vrot.lane.b32.xlu1 %v12876_v26, %s15056_s13  ;;  %3655 = vrot.lane.b32.xlu2 %v12782_v17, %s15083_s26  ;;  %s15090_s13 = smul.u32 48, %s15093_s28 }
 0x554   : > { %3657 = vrot.lane.b32.xlu0 %v12784_v45, %s15083_s26 }
 0x555   : > { %v12930_v41 = vpop.permute.xlu2 %3789 }
 0x55b   : > { %3665 = vrot.lane.b32.xlu1 %v12876_v26, %s15083_s26  ;;  %3853 = vrot.lane.b32.xlu2 %v12815_v32, %s15080_s9 }
 0x55c   : > { %3855 = vrot.lane.b32.xlu0 %v12817_v39, %s15080_s9 }
 0x55d   : > { %v12938_v14 = vpop.permute.xlu1 %3589  ;;  %v12940_v12 = vpop.permute.xlu2 %3725 }
 0x55e   : > { %v3588_v9 = vpop.permute.xlu0 %3587 }
 0x55f   : > { %v3599_v59 = vsel %vm450_vm9, %v3588_v9, %v12938_v14 }
 0x560   : > { %v3612_v19 = vunpack.c.l.b16 %v3599_v59  ;;  %v3615_v39 = vunpack.c.h.b16 %v3599_v59 }
 0x563   : > { %3857 = vrot.lane.b32.xlu1 %v12876_v26, %s15080_s9  ;;  %3801 = vrot.lane.b32.xlu2 %v12815_v32, %s15081_s11 }
 0x564   : > { %3847 = vrot.lane.b32.xlu0 %v12782_v17, %s15080_s9 }
 0x565   : > { %v12948_v45 = vpop.permute.xlu1 %3525  ;;  %v12950_v43 = vpop.permute.xlu2 %3661 }
 0x566   : > { %v3524_v38 = vpop.permute.xlu0 %3523 }
 0x567   : > { %v3535_v37 = vsel %vm416_vm10, %v3524_v38, %v12948_v45 }
 0x568   : > { %v3548_v4 = vunpack.c.l.b16 %v3535_v37  ;;  %v3551_v30 = vunpack.c.h.b16 %v3535_v37 }
 0x56b   : > { %3799 = vrot.lane.b32.xlu1 %v12782_v17, %s15081_s11  ;;  %3851 = vrot.lane.b32.xlu2 %v12847_v16, %s15080_s9 }
 0x56c   : > { %3737 = vrot.lane.b32.xlu0 %v12815_v32, %s15074_s16 }
 0x56d   : > { %v12960_v57 = vpop.permute.xlu1 %3461  ;;  %v3584_v47 = vpop.permute.xlu2 %3583 }
 0x56e   : > { %v3605_v8 = vsel %vm450_vm9, %v3584_v47, %v3588_v9  ;;  %v3460_v49 = vpop.permute.xlu0 %3459 }
 0x56f   : > { %v3611_v58 = vunpack.c.l.b16 %v3605_v8  ;;  %v3614_v15 = vunpack.c.h.b16 %v3605_v8  ;;  %v3471_v34 = vsel %vm382_vm11, %v3460_v49, %v12960_v57 }
 0x570   : > { %v3484_v50 = vunpack.c.l.b16 %v3471_v34  ;;  %v3487_v5 = vunpack.c.h.b16 %v3471_v34 }
 0x571   : > { %v3623_v51 = vpack.c.b16 %v3612_v19, %v3611_v58  ;;  %v3625_v22 = vpack.c.b16 %v3615_v39, %v3614_v15 }
 0x573   : > { %3639 = vst [vmem:[#allocation2 + $0x90] sm:$0xff] %v3623_v51  ;;  %3533 = vrot.lane.b32.xlu1 %v12876_v26, %s15058_s20  ;;  %3591 = vrot.lane.b32.xlu2 %v12847_v16, %s15062_s18 }
 0x574   : > { %3641 = vst [vmem:[#allocation2 + $0x9c] sm:$0xff] %v3625_v22  ;;  %3597 = vrot.lane.b32.xlu0 %v12876_v26, %s15062_s18 }
 0x575   : > { %v12971_v54 = vpop.permute.xlu1 %3397  ;;  %v3520_v35 = vpop.permute.xlu2 %3519 }
 0x576   : > { %v3541_v44 = vsel %vm416_vm10, %v3520_v35, %v3524_v38  ;;  %v3396_v56 = vpop.permute.xlu0 %3395 }
 0x577   : > { %v3547_v52 = vunpack.c.l.b16 %v3541_v44  ;;  %v3550_v24 = vunpack.c.h.b16 %v3541_v44  ;;  %v3407_v62 = vsel %vm347_vm12, %v3396_v56, %v12971_v54 }
 0x578   : > { %v3420_v40 = vunpack.c.l.b16 %v3407_v62  ;;  %v3423_v6 = vunpack.c.h.b16 %v3407_v62 }
 0x579   : > { %v3559_v46 = vpack.c.b16 %v3548_v4, %v3547_v52  ;;  %v3561_v55 = vpack.c.b16 %v3551_v30, %v3550_v24 }
 0x57b   : > { %3575 = vst [vmem:[#allocation2 + $0x60] sm:$0xff] %v3559_v46  ;;  %3673 = vrot.lane.b32.xlu1 %v12815_v32, %s15075_s17  ;;  %3735 = vrot.lane.b32.xlu2 %v12782_v17, %s15074_s16 }
 0x57c   : > { %3577 = vst [vmem:[#allocation2 + $0x6c] sm:$0xff] %v3561_v55  ;;  %3527 = vrot.lane.b32.xlu0 %v12847_v16, %s15058_s20 }
 0x57d   : > { %v12982_v1 = vpop.permute.xlu1 %3595  ;;  %v3456_v0 = vpop.permute.xlu2 %3455 }
 0x57e   : > { %v3477_v53 = vsel %vm382_vm11, %v3456_v0, %v3460_v49  ;;  %v12985_v60 = vpop.permute.xlu0 %3785  ;;  %v9881_v0 = vld [vmem:[%s15027_s5 + $0x48] sm:$0xff] }
 0x57f   : > { %v3483_v29 = vunpack.c.l.b16 %v3477_v53  ;;  %v3486_v61 = vunpack.c.h.b16 %v3477_v53 }
 0x581   : > { %v3495_v25 = vpack.c.b16 %v3484_v50, %v3483_v29  ;;  %v3497_v31 = vpack.c.b16 %v3487_v5, %v3486_v61  ;;  %v3795_v5 = vsel %vm554_vm1, %v12914_v63, %v12985_v60 }
 0x583   : > { %3511 = vst [vmem:[#allocation2 + $0x30] sm:$0xff] %v3495_v25  ;;  %3463 = vrot.lane.b32.xlu1 %v12847_v16, %s15054_s23  ;;  %3469 = vrot.lane.b32.xlu2 %v12876_v26, %s15054_s23  ;;  %s15087_s23 = smov 18  }
 0x584   : > { %3513 = vst [vmem:[#allocation2 + $0x3c] sm:$0xff] %v3497_v31  ;;  %3671 = vrot.lane.b32.xlu0 %v12782_v17, %s15075_s17 }
 0x585   : > { %v12995_v13 = vpop.permute.xlu1 %3531  ;;  %v3376_v28 = vpop.permute.xlu2 %3375 }
 0x586   : > { %v3413_v42 = vsel %vm347_vm12, %v3376_v28, %v3396_v56  ;;  %v12998_v23 = vpop.permute.xlu0 %3721 }
 0x587   : > { %v3419_v9 = vunpack.c.l.b16 %v3413_v42  ;;  %v3422_v38 = vunpack.c.h.b16 %v3413_v42 }
 0x589   : > { %v3431_v59 = vpack.c.b16 %v3420_v40, %v3419_v9  ;;  %v3433_v47 = vpack.c.b16 %v3423_v6, %v3422_v38  ;;  %v9982_v6 = vld [vmem:[#allocation2 + $0x90] sm:$0xf]  ;;  %v3811_v9 = vunpack.c.l.b16 %v3795_v5  ;;  %v3814_v38 = vunpack.c.h.b16 %v3795_v5  ;;  %v9958_v5 = vld [vmem:[#allocation2 + $0x60] sm:$0xf] }
 0x58b   : > { %3447 = vst [vmem:[#allocation2] sm:$0xff] %v3431_v59  ;;  %3865 = vrot.lane.b32.xlu1 %v12815_v32, %s15076_s29  ;;  %3405 = vrot.lane.b32.xlu2 %v12876_v26, %s15082_s24  ;;  %v9883_v26 = vld [vmem:[%s15027_s5 + $0x58] sm:$0xff] }
 0x58c   : > { %3449 = vst [vmem:[#allocation2 + $0xc] sm:$0xff] %v3433_v47  ;;  %3399 = vrot.lane.b32.xlu0 %v12847_v16, %s15082_s24  ;;  %v9882_v16 = vld [vmem:[%s15027_s5 + $0x50] sm:$0xff]  ;;  %v11313_v47 = vld [vmem:[#allocation2 + $0x98] sm:$0xf0] }
 0x58d   : > { %v13006_v8 = vpop.permute.xlu1 %3467  ;;  %v3586_v49 = vpop.permute.xlu2 %3585 }
 0x58e   : > { %v3594_v19 = vpop.permute.xlu0 %3593 }
 0x58f   : > { %v3601_v39 = vsel %vm450_vm9, %v3594_v19, %v12982_v1  ;;  %v3608_v58 = vsel %vm450_vm9, %v3586_v49, %v3594_v19  ;;  %v11312_v49 = vld [vmem:[#allocation2 + $0x94] sm:$0xf]  ;;  %v9984_v19 = vld [vmem:[#allocation2 + $0x9c] sm:$0xf0] }
 0x590   : > { %v3617_v15 = vunpack.c.l.b16 %v3608_v58  ;;  %v3618_v51 = vunpack.c.l.b16 %v3601_v39  ;;  %v3620_v22 = vunpack.c.h.b16 %v3608_v58  ;;  %v3621_v32 = vunpack.c.h.b16 %v3601_v39 }
 0x592   : > { %v3627_v37 = vpack.c.b16 %v3618_v51, %v3617_v15  ;;  %v3629_v35 = vpack.c.b16 %v3621_v32, %v3620_v22 }
 0x593   : > { %4000 = vperm.xlu1 %11613, %v9883_v26   ;;  %3863 = vrot.lane.b32.xlu2 %v12782_v17, %s15076_s29  ;;  %v9880_v17 = vld [vmem:[%s15027_s5 + $0x40] sm:$0xff] }
 0x594   : > { %3643 = vst [vmem:[#allocation2 + $0xa8] sm:$0xff] %v3627_v37  ;;  %3995 = vperm.xlu0 %11612, %v9882_v16  }
 0x595   : > { %3645 = vst [vmem:[#allocation2 + $0xb4] sm:$0xff] %v3629_v35  ;;  %v13019_v44 = vpop.permute.xlu1 %3403  ;;  %v3522_v56 = vpop.permute.xlu2 %3521 }
 0x596   : > { %v3530_v4 = vpop.permute.xlu0 %3529 }
 0x597   : > { %v3537_v30 = vsel %vm416_vm10, %v3530_v4, %v12995_v13  ;;  %v3544_v52 = vsel %vm416_vm10, %v3522_v56, %v3530_v4  ;;  %v9987_v56 = vor.u32 %v11312_v49, %v9984_v19 }
 0x598   : > { %v3553_v24 = vunpack.c.l.b16 %v3544_v52  ;;  %v3554_v46 = vunpack.c.l.b16 %v3537_v30  ;;  %v3556_v55 = vunpack.c.h.b16 %v3544_v52  ;;  %v3557_v34 = vunpack.c.h.b16 %v3537_v30 }
 0x599   : > { %v3731_v52 = vsel %vm520_vm3, %v12922_v2, %v12998_v23 }
 0x59a   : > { %v3563_v53 = vpack.c.b16 %v3554_v46, %v3553_v24  ;;  %v3565_v50 = vpack.c.b16 %v3557_v34, %v3556_v55 }
 0x59b   : > { %3985 = vperm.xlu2 %11611, %v9880_v17   ;;  %v9994_v29 = vld [vmem:[#allocation2 + $0xa8] sm:$0xf]  ;;  %v11315_v61 = vld [vmem:[#allocation2 + $0xac] sm:$0xf] }
 0x59c   : > { %3579 = vst [vmem:[#allocation2 + $0x78] sm:$0xff] %v3563_v53  ;;  %3990 = vperm.xlu0 %11612, %v9881_v0   ;;  %v11316_v25 = vld [vmem:[#allocation2 + $0xb0] sm:$0xf0]  ;;  %v9996_v31 = vld [vmem:[#allocation2 + $0xb4] sm:$0xf0] }
 0x59d   : > { %3581 = vst [vmem:[#allocation2 + $0x84] sm:$0xff] %v3565_v50  ;;  %v13033_v62 = vpop.permute.xlu1 %3787  ;;  %v3458_v28 = vpop.permute.xlu2 %3457  ;;  %v9995_v42 = vor.u32 %v11316_v25, %v9994_v29  ;;  %v9999_v40 = vor.u32 %v11315_v61, %v9996_v31  ;;  %v11306_v29 = vld [vmem:[#allocation2 + $0x64] sm:$0xf]  ;;  %v3747_v61 = vunpack.c.l.b16 %v3731_v52  ;;  %v3750_v25 = vunpack.c.h.b16 %v3731_v52  ;;  %v11301_v52 = vld [vmem:[#allocation2 + $0x38] sm:$0xf0] }
 0x59e   : > { %v3796_v63 = vsel %vm554_vm1, %v12985_v60, %v13033_v62  ;;  %v3466_v59 = vpop.permute.xlu0 %3465  ;;  %v9983_v60 = vor.u32 %v11313_v47, %v9982_v6 }
 0x59f   : > { %v3812_v39 = vunpack.c.l.b16 %v3796_v63  ;;  %v3815_v58 = vunpack.c.h.b16 %v3796_v63  ;;  %4327 = vmatpush.bf16.msrb.mxu1 %v9995_v42  ;;  %4384 = vmatpush.bf16.msrb.mxu2 %v9999_v40  ;;  %v3473_v15 = vsel %vm382_vm11, %v3466_v59, %v13006_v8  ;;  %v3480_v51 = vsel %vm382_vm11, %v3458_v28, %v3466_v59  ;;  %v11307_v28 = vld [vmem:[#allocation2 + $0x68] sm:$0xf0]  ;;  %v9960_v42 = vld [vmem:[#allocation2 + $0x6c] sm:$0xf0] }
 0x5a0   : > { %v3489_v22 = vunpack.c.l.b16 %v3480_v51  ;;  %v3490_v32 = vunpack.c.l.b16 %v3473_v15  ;;  %v3492_v26 = vunpack.c.h.b16 %v3480_v51  ;;  %v3493_v16 = vunpack.c.h.b16 %v3473_v15 }
 0x5a1   : > { %v3823_v37 = vpack.c.b16 %v3812_v39, %v3811_v9  ;;  %v3825_v35 = vpack.c.b16 %v3815_v58, %v3814_v38  ;;  %v9959_v58 = vor.u32 %v11307_v28, %v9958_v5  ;;  %v9910_v28 = vld [vmem:[#allocation2] sm:$0xf] }
 0x5a2   : > { %v3499_v4 = vpack.c.b16 %v3490_v32, %v3489_v22  ;;  %v3501_v30 = vpack.c.b16 %v3493_v16, %v3492_v26 }
 0x5a3   : > { %3839 = vst [vmem:[#allocation2 + $0x150] sm:$0xff] %v3823_v37  ;;  %4328 = vmatpush.bf16.msrb.mxu1 %v9983_v60  ;;  %4385 = vmatpush.bf16.msrb.mxu2 %v9987_v56  ;;  %v9970_v24 = vld [vmem:[#allocation2 + $0x78] sm:$0xf]  ;;  %v11309_v46 = vld [vmem:[#allocation2 + $0x7c] sm:$0xf] }
 0x5a4   : > { %3841 = vst [vmem:[#allocation2 + $0x15c] sm:$0xff] %v3825_v35  ;;  %v11310_v55 = vld [vmem:[#allocation2 + $0x80] sm:$0xf0]  ;;  %v9972_v34 = vld [vmem:[#allocation2 + $0x84] sm:$0xf0] }
 0x5a5   : > { %3515 = vst [vmem:[#allocation2 + $0x48] sm:$0xff] %v3499_v4  ;;  %v13044_v17 = vpop.permute.xlu1 %3723  ;;  %v3378_v0 = vpop.permute.xlu2 %3377  ;;  %v9971_v53 = vor.u32 %v11310_v55, %v9970_v24  ;;  %v9975_v50 = vor.u32 %v11309_v46, %v9972_v34  ;;  %v11300_v24 = vld [vmem:[#allocation2 + $0x34] sm:$0xf]  ;;  %v9936_v46 = vld [vmem:[#allocation2 + $0x3c] sm:$0xf0] }
 0x5a6   : > { %3517 = vst [vmem:[#allocation2 + $0x54] sm:$0xff] %v3501_v30  ;;  %v3732_v2 = vsel %vm520_vm3, %v12998_v23, %v13044_v17  ;;  %v3402_v31 = vpop.permute.xlu0 %3401  ;;  %v9963_v23 = vor.u32 %v11306_v29, %v9960_v42  ;;  %v9934_v30 = vld [vmem:[#allocation2 + $0x30] sm:$0xf]  ;;  %v9939_v34 = vor.u32 %v11300_v24, %v9936_v46  ;;  %v11295_v42 = vld [vmem:[#allocation2 + $0x8] sm:$0xf0] }
 0x5a7   : > { %v3748_v40 = vunpack.c.l.b16 %v3732_v2  ;;  %v3751_v6 = vunpack.c.h.b16 %v3732_v2  ;;  %4329 = vmatpush.bf16.msrb.mxu1 %v9971_v53  ;;  %4386 = vmatpush.bf16.msrb.mxu2 %v9975_v50  ;;  %v3409_v9 = vsel %vm347_vm12, %v3402_v31, %v13019_v44  ;;  %v3416_v38 = vsel %vm347_vm12, %v3378_v0, %v3402_v31 }
 0x5a8   : > { %v3425_v63 = vunpack.c.l.b16 %v3416_v38  ;;  %v3426_v59 = vunpack.c.l.b16 %v3409_v9  ;;  %v3428_v47 = vunpack.c.h.b16 %v3416_v38  ;;  %v3429_v49 = vunpack.c.h.b16 %v3409_v9  ;;  %v9886_v9 = vld [vmem:[%s15026_s4 + $0x60] sm:$0xf]  ;;  %v11289_v38 = vld [vmem:[%s15026_s4 + $0x68] sm:$0xf0] }
 0x5a9   : > { %v3759_v19 = vpack.c.b16 %v3748_v40, %v3747_v61  ;;  %v3761_v39 = vpack.c.b16 %v3751_v6, %v3750_v25  ;;  %v9935_v55 = vor.u32 %v11301_v52, %v9934_v30  ;;  %v11294_v40 = vld [vmem:[#allocation2 + $0x4] sm:$0xf]  ;;  %v9912_v6 = vld [vmem:[#allocation2 + $0xc] sm:$0xf0] }
 0x5aa   : > { %v3435_v15 = vpack.c.b16 %v3426_v59, %v3425_v63  ;;  %v3437_v51 = vpack.c.b16 %v3429_v49, %v3428_v47  ;;  %v9911_v63 = vor.u32 %v11295_v42, %v9910_v28  ;;  %v9915_v59 = vor.u32 %v11294_v40, %v9912_v6  ;;  %v11292_v28 = vld [vmem:[%s15026_s4 + $0x80] sm:$0xf0] }
 0x5ab   : > { %3775 = vst [vmem:[#allocation2 + $0x120] sm:$0xff] %v3759_v19  ;;  %4330 = vmatpush.bf16.msrb.mxu1 %v9959_v58  ;;  %4387 = vmatpush.bf16.msrb.mxu2 %v9963_v23  ;;  %v13068_v49 = vor.u32 %v11289_v38, %v9886_v9 }
 0x5ac   : > { %3777 = vst [vmem:[#allocation2 + $0x12c] sm:$0xff] %v3761_v39  ;;  %v9946_v22 = vld [vmem:[#allocation2 + $0x48] sm:$0xf]  ;;  %v11303_v32 = vld [vmem:[#allocation2 + $0x4c] sm:$0xf] }
 0x5ad   : > { %3451 = vst [vmem:[#allocation2 + $0x18] sm:$0xff] %v3435_v15  ;;  %v13052_v26 = vpop.permute.xlu1 %3659  ;;  %v13054_v16 = vpop.permute.xlu2 %3655  ;;  %v11304_v37 = vld [vmem:[#allocation2 + $0x50] sm:$0xf0]  ;;  %v9948_v35 = vld [vmem:[#allocation2 + $0x54] sm:$0xf0] }
 0x5ae   : > { %3453 = vst [vmem:[#allocation2 + $0x24] sm:$0xff] %v3437_v51  ;;  %v9947_v60 = vor.u32 %v11304_v37, %v9946_v22  ;;  %v9951_v56 = vor.u32 %v11303_v32, %v9948_v35  ;;  %v3792_v4 = vpop.permute.xlu0 %3791 }
 0x5af   : > { %v3797_v47 = vsel %vm554_vm1, %v12930_v41, %v3792_v4 }
 0x5b0   : > { %4331 = vmatpush.bf16.msrb.mxu1 %v9947_v60  ;;  %4388 = vmatpush.bf16.msrb.mxu2 %v9951_v56  ;;  %v3817_v58 = vunpack.c.l.b16 %v3797_v47  ;;  %v3820_v23 = vunpack.c.h.b16 %v3797_v47 }
 0x5b4   : > { %4332 = vmatpush.bf16.msrb.mxu1 %v9935_v55  ;;  %4389 = vmatpush.bf16.msrb.mxu2 %v9939_v34  ;;  %v9922_v0 = vld [vmem:[#allocation2 + $0x18] sm:$0xf]  ;;  %v11297_v53 = vld [vmem:[#allocation2 + $0x1c] sm:$0xf] }
 0x5b5   : > { %v13056_v50 = vpop.permute.xlu1 %3849  ;;  %v13058_v5 = vpop.permute.xlu2 %3853  ;;  %v11298_v29 = vld [vmem:[#allocation2 + $0x20] sm:$0xf0]  ;;  %v9924_v61 = vld [vmem:[#allocation2 + $0x24] sm:$0xf0] }
 0x5b6   : > { %v9923_v25 = vor.u32 %v11298_v29, %v9922_v0  ;;  %v9927_v2 = vor.u32 %v11297_v53, %v9924_v61  ;;  %v3728_v31 = vpop.permute.xlu0 %3727 }
 0x5b7   : > { %v3733_v24 = vsel %vm520_vm3, %v12940_v12, %v3728_v31 }
 0x5b8   : > { %4333 = vmatpush.bf16.msrb.mxu1 %v9923_v25  ;;  %4390 = vmatpush.bf16.msrb.mxu2 %v9927_v2  ;;  %v3753_v0 = vunpack.c.l.b16 %v3733_v24  ;;  %v3756_v53 = vunpack.c.h.b16 %v3733_v24  ;;  %v9898_v2 = vld [vmem:[%s15026_s4 + $0x78] sm:$0xf]  ;;  %v10080_v24 = vld [vmem:[#allocation2 + $0x15c] sm:$0xf0] }
 0x5bc   : > { %4334 = vmatpush.bf16.msrb.mxu1 %v9911_v63  ;;  %4391 = vmatpush.bf16.msrb.mxu2 %v9915_v59 }
 0x5bd   : > { %v3794_v19 = vpop.permute.xlu1 %3793  ;;  %v3802_v39 = vpop.permute.xlu2 %3801 }
 0x5be   : > { %v3798_v15 = vsel %vm554_vm1, %v3792_v4, %v3794_v19  ;;  %v3808_v51 = vsel %vm559_vm4, %v3794_v19, %v3802_v39  ;;  %v3664_v22 = vpop.permute.xlu0 %3663  ;;  %v13096_v19 = vor.u32 %v11292_v28, %v9898_v2 }
 0x5bf   : > { %4335 = vmatmul.bf16.vlgmr.msrb.gmra.mxu1 %v13068_v49  ;;  %4392 = vmatmul.bf16.vlgmr.msrb.gmra.mxu2 %v13068_v49  ;;  %v3818_v32 = vunpack.c.l.b16 %v3798_v15  ;;  %v3821_v37 = vunpack.c.h.b16 %v3798_v15  ;;  %v3819_v41 = vunpack.c.l.b16 %v3808_v51  ;;  %v3822_v35 = vunpack.c.h.b16 %v3808_v51  ;;  %v11336_v15 = vld [vmem:[#allocation2 + $0x154] sm:$0xf] }
 0x5c0   : > { %v3669_v9 = vsel %vm486_vm5, %v12950_v43, %v3664_v22  ;;  %v10083_v28 = vor.u32 %v11336_v15, %v10080_v24 }
 0x5c1   : > { %v3827_v60 = vpack.c.b16 %v3818_v32, %v3817_v58  ;;  %v3829_v56 = vpack.c.b16 %v3821_v37, %v3820_v23  ;;  %v3828_v30 = vpack.c.b16 %v3819_v41, %v3819_v41  ;;  %v3830_v52 = vpack.c.b16 %v3822_v35, %v3822_v35  ;;  %v10078_v23 = vld [vmem:[#allocation2 + $0x150] sm:$0xf]  ;;  %v11337_v35 = vld [vmem:[#allocation2 + $0x158] sm:$0xf0] }
 0x5c2   : > { %v3692_v43 = vunpack.c.h.b16 %v3669_v9  ;;  %v10079_v2 = vor.u32 %v11337_v35, %v10078_v23 }
 0x5c3   : > { %3843 = vst [vmem:[#allocation2 + $0x168] sm:$0xff] %v3827_v60  ;;  %v3689_v60 = vunpack.c.l.b16 %v3669_v9 }
 0x5c4   : > { %3845 = vst [vmem:[#allocation2 + $0x174] sm:$0xff] %v3829_v56 }
 0x5c5   : > { %3844 = vst.msk [vmem:[#allocation2 + $0x170] sm:$0xf] %vm370_vm0, %v3828_v30  ;;  %v13077_v4 = vpop.permute.xlu1 %3729  ;;  %v13079_v46 = vpop.permute.xlu2 %3851 }
 0x5c6   : > { %3846 = vst.msk [vmem:[#allocation2 + $0x17c] sm:$0xf] %vm370_vm0, %v3830_v52  ;;  %v3734_v55 = vsel %vm520_vm3, %v3728_v31, %v13077_v4  ;;  %v3658_v34 = vpop.permute.xlu0 %3657 }
 0x5c7   : > { %v3754_v29 = vunpack.c.l.b16 %v3734_v55  ;;  %v3757_v61 = vunpack.c.h.b16 %v3734_v55  ;;  %v3667_v12 = vsel %vm486_vm5, %v13054_v16, %v3658_v34  ;;  %v3668_v25 = vsel %vm486_vm5, %v3658_v34, %v13052_v26 }
 0x5c8   : > { %v3683_v40 = vunpack.c.l.b16 %v3667_v12  ;;  %v3684_v6 = vunpack.c.l.b16 %v3668_v25  ;;  %v3686_v38 = vunpack.c.h.b16 %v3667_v12  ;;  %v3687_v16 = vunpack.c.h.b16 %v3668_v25 }
 0x5c9   : > { %v3763_v31 = vpack.c.b16 %v3754_v29, %v3753_v0  ;;  %v3765_v42 = vpack.c.b16 %v3757_v61, %v3756_v53 }
 0x5ca   : > { %v10090_v63 = vld [vmem:[#allocation2 + $0x168] sm:$0xf]  ;;  %v11339_v59 = vld [vmem:[#allocation2 + $0x16c] sm:$0xf]  ;;  %v3695_v47 = vpack.c.b16 %v3684_v6, %v3683_v40  ;;  %v3697_v51 = vpack.c.b16 %v3687_v16, %v3686_v38 }
 0x5cb   : > { %3779 = vst [vmem:[#allocation2 + $0x138] sm:$0xff] %v3763_v31  ;;  %v11340_v39 = vld [vmem:[#allocation2 + $0x170] sm:$0xf0]  ;;  %v10092_v58 = vld [vmem:[#allocation2 + $0x174] sm:$0xf0] }
 0x5cc   : > { %3781 = vst [vmem:[#allocation2 + $0x144] sm:$0xff] %v3765_v42  ;;  %v10091_v32 = vor.u32 %v11340_v39, %v10090_v63  ;;  %v10095_v37 = vor.u32 %v11339_v59, %v10092_v58  ;;  %v10098_v41 = vld [vmem:[#allocation2 + $0x170] sm:$0xf]  ;;  %v11330_v39 = vld [vmem:[#allocation2 + $0x124] sm:$0xf]  ;;  %v3860_v58 = vsel %vm588_vm2, %v13056_v50, %v13079_v46 }
 0x5cd   : > { %3711 = vst [vmem:[#allocation2 + $0xf0] sm:$0xff] %v3695_v47  ;;  %v13098_v56 = vpop.permute.xlu1 %3665  ;;  %v3592_v30 = vpop.permute.xlu2 %3591  ;;  %v11341_v52 = vld [vmem:[#allocation2 + $0x178] sm:$0xf0]  ;;  %v10054_v47 = vld [vmem:[#allocation2 + $0x120] sm:$0xf] }
 0x5ce   : > { %3713 = vst [vmem:[#allocation2 + $0xfc] sm:$0xff] %v3697_v51  ;;  %v3670_v55 = vsel %vm486_vm5, %v3664_v22, %v13098_v56  ;;  %v3600_v34 = vsel %vm450_vm9, %v12938_v14, %v3592_v30  ;;  %4346 = vmatpush.bf16.msra.mxu3 %v10091_v32  ;;  %4403 = vmatpush.bf16.msra.mxu1 %v10095_v37  ;;  %v3856_v53 = vpop.permute.xlu0 %3855  ;;  %v11331_v51 = vld [vmem:[#allocation2 + $0x128] sm:$0xf0]  ;;  %v10056_v32 = vld [vmem:[#allocation2 + $0x12c] sm:$0xf0] }
 0x5cf   : > { %v10099_v0 = vor.u32 %v11341_v52, %v10098_v41  ;;  %4340 = vmatmul.bf16.gmra.mxu1 %v13096_v19  ;;  %4397 = vmatmul.bf16.gmra.mxu2 %v13096_v19  ;;  %v3690_v29 = vunpack.c.l.b16 %v3670_v55  ;;  %v3693_v61 = vunpack.c.h.b16 %v3670_v55  ;;  %v3613_v12 = vunpack.c.l.b16 %v3600_v34 }
 0x5d0   : > { %v3616_v25 = vunpack.c.h.b16 %v3600_v34  ;;  %v3861_v9 = vsel %vm588_vm2, %v13058_v5, %v3856_v53  ;;  %v10055_v34 = vor.u32 %v11331_v51, %v10054_v47 }
 0x5d1   : > { %4460 = vmatpush.bf16.msra.mxu2 %v10099_v0  ;;  %v3699_v31 = vpack.c.b16 %v3690_v29, %v3689_v60  ;;  %v3701_v22 = vpack.c.b16 %v3693_v61, %v3692_v43  ;;  %v3624_v42 = vpack.c.b16 %v3613_v12, %v3613_v12  ;;  %v3881_v5 = vunpack.c.l.b16 %v3861_v9 }
 0x5d2   : > { %v3626_v40 = vpack.c.b16 %v3616_v25, %v3616_v25  ;;  %4347 = vmatpush.bf16.msra.mxu3 %v10079_v2  ;;  %4404 = vmatpush.bf16.msra.mxu1 %v10083_v28  ;;  %v10066_v14 = vld [vmem:[#allocation2 + $0x138] sm:$0xf]  ;;  %v11333_v6 = vld [vmem:[#allocation2 + $0x13c] sm:$0xf]  ;;  %v3884_v37 = vunpack.c.h.b16 %v3861_v9  ;;  %v10059_v0 = vor.u32 %v11330_v39, %v10056_v32  ;;  %v3876_v29 = vunpack.c.l.b16 %v3860_v58 }
 0x5d3   : > { %3715 = vst [vmem:[#allocation2 + $0x108] sm:$0xff] %v3699_v31  ;;  %v11334_v38 = vld [vmem:[#allocation2 + $0x140] sm:$0xf0]  ;;  %v10068_v16 = vld [vmem:[#allocation2 + $0x144] sm:$0xf0] }
 0x5d4   : > { %3717 = vst [vmem:[#allocation2 + $0x114] sm:$0xff] %v3701_v22  ;;  %v10067_v63 = vor.u32 %v11334_v38, %v10066_v14  ;;  %v10071_v59 = vor.u32 %v11333_v6, %v10068_v16  ;;  %v10030_v38 = vld [vmem:[#allocation2 + $0xf0] sm:$0xf]  ;;  %v11324_v16 = vld [vmem:[#allocation2 + $0xf4] sm:$0xf] }
 0x5d5   : > { %3640 = vst.msk [vmem:[#allocation2 + $0x98] sm:$0xf] %vm370_vm0, %v3624_v42  ;;  %v13112_v23 = vpop.permute.xlu1 %3857  ;;  %v3736_v15 = vpop.permute.xlu2 %3735  ;;  %v11325_v47 = vld [vmem:[#allocation2 + $0xf8] sm:$0xf0]  ;;  %v10032_v39 = vld [vmem:[#allocation2 + $0xfc] sm:$0xf0] }
 0x5d6   : > { %3642 = vst.msk [vmem:[#allocation2 + $0xa4] sm:$0xf] %vm370_vm0, %v3626_v40  ;;  %v3862_v41 = vsel %vm588_vm2, %v3856_v53, %v13112_v23  ;;  %v3741_v35 = vsel %vm525_vm6, %v13044_v17, %v3736_v15  ;;  %4348 = vmatpush.bf16.msra.mxu3 %v10067_v63  ;;  %4405 = vmatpush.bf16.msra.mxu1 %v10071_v59  ;;  %v3848_v60 = vpop.permute.xlu0 %3847  ;;  %v3879_v53 = vunpack.c.h.b16 %v3860_v58 }
 0x5d7   : > { %v3882_v43 = vunpack.c.l.b16 %v3862_v41  ;;  %v3885_v30 = vunpack.c.h.b16 %v3862_v41  ;;  %v3749_v52 = vunpack.c.l.b16 %v3741_v35  ;;  %v3752_v24 = vunpack.c.h.b16 %v3741_v35 }
 0x5d8   : > { %v3859_v55 = vsel %vm588_vm2, %v3848_v60, %v13056_v50  ;;  %v10031_v60 = vor.u32 %v11325_v47, %v10030_v38 }
 0x5d9   : > { %v3891_v61 = vpack.c.b16 %v3882_v43, %v3881_v5  ;;  %v3893_v12 = vpack.c.b16 %v3885_v30, %v3884_v37  ;;  %v3760_v25 = vpack.c.b16 %v3749_v52, %v3749_v52  ;;  %v3762_v2 = vpack.c.b16 %v3752_v24, %v3752_v24  ;;  %v11319_v30 = vld [vmem:[#allocation2 + $0xc8] sm:$0xf0] }
 0x5da   : > { %v3875_v28 = vunpack.c.l.b16 %v3859_v55  ;;  %v3878_v17 = vunpack.c.h.b16 %v3859_v55  ;;  %4349 = vmatpush.bf16.msra.mxu3 %v10055_v34  ;;  %4406 = vmatpush.bf16.msra.mxu1 %v10059_v0  ;;  %v10042_v31 = vld [vmem:[#allocation2 + $0x108] sm:$0xf]  ;;  %v11327_v22 = vld [vmem:[#allocation2 + $0x10c] sm:$0xf]  ;;  %v10035_v43 = vor.u32 %v11324_v16, %v10032_v39  ;;  %v10018_v55 = vld [vmem:[#allocation2 + $0xd8] sm:$0xf] }
 0x5db   : > { %3907 = vst [vmem:[#allocation2 + $0x198] sm:$0xff] %v3891_v61  ;;  %v11328_v42 = vld [vmem:[#allocation2 + $0x110] sm:$0xf0]  ;;  %v10044_v40 = vld [vmem:[#allocation2 + $0x114] sm:$0xf0] }
 0x5dc   : > { %3909 = vst [vmem:[#allocation2 + $0x1a4] sm:$0xff] %v3893_v12  ;;  %v3887_v14 = vpack.c.b16 %v3876_v29, %v3875_v28  ;;  %v3889_v50 = vpack.c.b16 %v3879_v53, %v3878_v17  ;;  %v10043_v6 = vor.u32 %v11328_v42, %v10042_v31  ;;  %v10047_v9 = vor.u32 %v11327_v22, %v10044_v40  ;;  %v10008_v34 = vld [vmem:[#allocation2 + $0xcc] sm:$0xf0]  ;;  %v10020_v53 = vld [vmem:[#allocation2 + $0xe4] sm:$0xf0] }
 0x5dd   : > { %3776 = vst.msk [vmem:[#allocation2 + $0x128] sm:$0xf] %vm370_vm0, %v3760_v25  ;;  %v3800_v63 = vpop.permute.xlu1 %3799  ;;  %v3470_v59 = vpop.permute.xlu2 %3469  ;;  %v11321_v25 = vld [vmem:[#allocation2 + $0xdc] sm:$0xf]  ;;  %v11318_v28 = vld [vmem:[#allocation2 + $0xc4] sm:$0xf] }
 0x5de   : > { %3778 = vst.msk [vmem:[#allocation2 + $0x134] sm:$0xf] %vm370_vm0, %v3762_v2  ;;  %v3805_v58 = vsel %vm559_vm4, %v13033_v62, %v3800_v63  ;;  %v3474_v15 = vsel %vm382_vm11, %v13006_v8, %v3470_v59  ;;  %4350 = vmatpush.bf16.msra.mxu3 %v10043_v6  ;;  %4407 = vmatpush.bf16.msra.mxu1 %v10047_v9  ;;  %v3738_v51 = vpop.permute.xlu0 %3737  ;;  %v11322_v8 = vld [vmem:[#allocation2 + $0xe0] sm:$0xf0]  ;;  %v10006_v2 = vld [vmem:[#allocation2 + $0xc0] sm:$0xf] }
 0x5df   : > { %3903 = vst [vmem:[#allocation2 + $0x180] sm:$0xff] %v3887_v14  ;;  %v3813_v32 = vunpack.c.l.b16 %v3805_v58  ;;  %v3816_v5 = vunpack.c.h.b16 %v3805_v58  ;;  %v3491_v37 = vunpack.c.l.b16 %v3474_v15  ;;  %v3494_v41 = vunpack.c.h.b16 %v3474_v15  ;;  %v11288_v17 = vld [vmem:[%s15026_s4 + $0x64] sm:$0xf]  ;;  %v9888_v14 = vld [vmem:[%s15026_s4 + $0x6c] sm:$0xf0] }
 0x5e0   : > { %3905 = vst [vmem:[#allocation2 + $0x18c] sm:$0xff] %v3889_v50  ;;  %v3744_v35 = vsel %vm525_vm6, %v13077_v4, %v3738_v51  ;;  %v10019_v42 = vor.u32 %v11322_v8, %v10018_v55  ;;  %v9894_v50 = vld [vmem:[%s15026_s4 + $0x68] sm:$0xf]  ;;  %v10023_v38 = vor.u32 %v11321_v25, %v10020_v53  ;;  %v10007_v16 = vor.u32 %v11319_v30, %v10006_v2  ;;  %v11290_v59 = vld [vmem:[%s15026_s4 + $0x70] sm:$0xf0] }
 0x5e1   : > { %v3824_v52 = vpack.c.b16 %v3813_v32, %v3813_v32  ;;  %v3826_v62 = vpack.c.b16 %v3816_v5, %v3816_v5  ;;  %v3500_v24 = vpack.c.b16 %v3491_v37, %v3491_v37  ;;  %v3502_v0 = vpack.c.b16 %v3494_v41, %v3494_v41 }
 0x5e2   : > { %v3755_v29 = vunpack.c.l.b16 %v3744_v35  ;;  %v3758_v61 = vunpack.c.h.b16 %v3744_v35  ;;  %4351 = vmatpush.bf16.msra.mxu3 %v10031_v60  ;;  %4408 = vmatpush.bf16.msra.mxu1 %v10035_v43  ;;  %v10114_v12 = vld [vmem:[#allocation2 + $0x198] sm:$0xf]  ;;  %v11345_v63 = vld [vmem:[#allocation2 + $0x19c] sm:$0xf]  ;;  %v10011_v51 = vor.u32 %v11318_v28, %v10008_v34  ;;  %v13153_v43 = vor.u32 %v11288_v17, %v9888_v14 }
 0x5e3   : > { %3840 = vst.msk [vmem:[#allocation2 + $0x158] sm:$0xf] %vm370_vm0, %v3824_v52  ;;  %v11346_v4 = vld [vmem:[#allocation2 + $0x1a0] sm:$0xf0]  ;;  %v10116_v32 = vld [vmem:[#allocation2 + $0x1a4] sm:$0xf0]  ;;  %v13155_v30 = vor.u32 %v11290_v59, %v9894_v50 }
 0x5e4   : > { %3842 = vst.msk [vmem:[#allocation2 + $0x164] sm:$0xf] %vm370_vm0, %v3826_v62  ;;  %v3764_v31 = vpack.c.b16 %v3755_v29, %v3755_v29  ;;  %v3766_v22 = vpack.c.b16 %v3758_v61, %v3758_v61  ;;  %v10115_v40 = vor.u32 %v11346_v4, %v10114_v12  ;;  %v10119_v55 = vor.u32 %v11345_v63, %v10116_v32 }
 0x5e5   : > { %3516 = vst.msk [vmem:[#allocation2 + $0x50] sm:$0xf] %vm370_vm0, %v3500_v24  ;;  %v3534_v6 = vpop.permute.xlu1 %3533  ;;  %v3406_v9 = vpop.permute.xlu2 %3405 }
 0x5e6   : > { %3518 = vst.msk [vmem:[#allocation2 + $0x5c] sm:$0xf] %vm370_vm0, %v3502_v0  ;;  %v3538_v47 = vsel %vm416_vm10, %v12995_v13, %v3534_v6  ;;  %v3410_v39 = vsel %vm347_vm12, %v13019_v44, %v3406_v9  ;;  %4352 = vmatpush.bf16.msra.mxu3 %v10019_v42  ;;  %4371 = vmatpush.bf16.msra.mxu0 %v10115_v40  ;;  %v3598_v58 = vpop.permute.xlu0 %3597  ;;  %v10102_v15 = vld [vmem:[#allocation2 + $0x180] sm:$0xf]  ;;  %v11342_v61 = vld [vmem:[#allocation2 + $0x184] sm:$0xf] }
 0x5e7   : > { %3780 = vst.msk [vmem:[#allocation2 + $0x140] sm:$0xf] %vm370_vm0, %v3764_v31  ;;  %v3555_v5 = vunpack.c.l.b16 %v3538_v47  ;;  %v3558_v37 = vunpack.c.h.b16 %v3538_v47  ;;  %v3427_v41 = vunpack.c.l.b16 %v3410_v39  ;;  %v3430_v35 = vunpack.c.h.b16 %v3410_v39  ;;  %4409 = vmatpush.bf16.msra.mxu1 %v10023_v38  ;;  %v11343_v60 = vld [vmem:[#allocation2 + $0x188] sm:$0xf0]  ;;  %v10104_v12 = vld [vmem:[#allocation2 + $0x18c] sm:$0xf0] }
 0x5e8   : > { %3782 = vst.msk [vmem:[#allocation2 + $0x14c] sm:$0xf] %vm370_vm0, %v3766_v22  ;;  %v3602_v13 = vsel %vm450_vm9, %v12982_v1, %v3598_v58  ;;  %v10103_v44 = vor.u32 %v11343_v60, %v10102_v15  ;;  %v10107_v17 = vor.u32 %v11342_v61, %v10104_v12  ;;  %v10062_v47 = vld [vmem:[#allocation2 + $0x128] sm:$0xf]  ;;  %v11332_v39 = vld [vmem:[#allocation2 + $0x130] sm:$0xf0] }
 0x5e9   : > { %v3564_v52 = vpack.c.b16 %v3555_v5, %v3555_v5  ;;  %v3566_v62 = vpack.c.b16 %v3558_v37, %v3558_v37  ;;  %v3436_v24 = vpack.c.b16 %v3427_v41, %v3427_v41  ;;  %v3438_v8 = vpack.c.b16 %v3430_v35, %v3430_v35  ;;  %v9900_v35 = vld [vmem:[%s15026_s4 + $0x84] sm:$0xf0]  ;;  %v9906_v60 = vld [vmem:[%s15026_s4 + $0x80] sm:$0xf] }
 0x5ea   : > { %v3619_v34 = vunpack.c.l.b16 %v3602_v13  ;;  %v3622_v0 = vunpack.c.h.b16 %v3602_v13  ;;  %4353 = vmatpush.bf16.msra.mxu3 %v10007_v16  ;;  %4372 = vmatpush.bf16.msra.mxu0 %v10103_v44  ;;  %v10086_v29 = vld [vmem:[#allocation2 + $0x158] sm:$0xf]  ;;  %v10063_v37 = vor.u32 %v11332_v39, %v10062_v47 }
 0x5eb   : > { %3580 = vst.msk [vmem:[#allocation2 + $0x80] sm:$0xf] %vm370_vm0, %v3564_v52  ;;  %4410 = vmatpush.bf16.msra.mxu1 %v10011_v51  ;;  %v11338_v1 = vld [vmem:[#allocation2 + $0x160] sm:$0xf0] }
 0x5ec   : > { %3582 = vst.msk [vmem:[#allocation2 + $0x8c] sm:$0xf] %vm370_vm0, %v3566_v62  ;;  %v3628_v25 = vpack.c.b16 %v3619_v34, %v3619_v34  ;;  %v3630_v53 = vpack.c.b16 %v3622_v0, %v3622_v0  ;;  %v10087_v2 = vor.u32 %v11338_v1, %v10086_v29  ;;  %v11293_v62 = vld [vmem:[%s15026_s4 + $0x88] sm:$0xf0]  ;;  %v9990_v1 = vld [vmem:[#allocation2 + $0x98] sm:$0xf] }
 0x5ed   : > { %3452 = vst.msk [vmem:[#allocation2 + $0x20] sm:$0xf] %vm370_vm0, %v3436_v24  ;;  %4354 = vmatmul.bf16.vlgmr.msra.gmra.mxu3 %v13153_v43  ;;  %v3674_v4 = vpop.permute.xlu1 %3673  ;;  %v3864_v28 = vpop.permute.xlu2 %3863  ;;  %10124 = vmatmul.msk.bf16.vlgmr.msra.gmra.mxu0 %vm1950_vm14, %v13155_v30 }
 0x5ee   : > { %4428 = vmatpush.bf16.msrb.mxu3 %v10119_v55  ;;  %3454 = vst.msk [vmem:[#allocation2 + $0x2c] sm:$0xf] %vm370_vm0, %v3438_v8  ;;  %4411 = vmatmul.bf16.vlgmr.msra.gmra.mxu1 %v13153_v43  ;;  %v3680_v31 = vsel %vm491_vm7, %v13098_v56, %v3674_v4  ;;  %v3869_v22 = vsel %vm593_vm13, %v13079_v46, %v3864_v28  ;;  %v3528_v42 = vpop.permute.xlu0 %3527  ;;  %v10074_v40 = vld [vmem:[#allocation2 + $0x140] sm:$0xf] }
 0x5ef   : > { %4461 = vmatpush.bf16.msra.mxu2 %v10087_v2  ;;  %3644 = vst.msk [vmem:[#allocation2 + $0xb0] sm:$0xf] %vm370_vm0, %v3628_v25  ;;  %v3691_v14 = vunpack.c.l.b16 %v3680_v31  ;;  %v3694_v50 = vunpack.c.h.b16 %v3680_v31  ;;  %v3877_v6 = vunpack.c.l.b16 %v3869_v22  ;;  %v3880_v9 = vunpack.c.h.b16 %v3869_v22  ;;  %v11335_v38 = vld [vmem:[#allocation2 + $0x148] sm:$0xf0]  ;;  %v11314_v25 = vld [vmem:[#allocation2 + $0xa0] sm:$0xf0] }
 0x5f0   : > { %3646 = vst.msk [vmem:[#allocation2 + $0xbc] sm:$0xf] %vm370_vm0, %v3630_v53  ;;  %v3536_v16 = vsel %vm416_vm10, %v12948_v45, %v3528_v42  ;;  %v10075_v56 = vor.u32 %v11335_v38, %v10074_v40  ;;  %v11291_v45 = vld [vmem:[%s15026_s4 + $0x7c] sm:$0xf]  ;;  %v13197_v2 = vor.u32 %v11293_v62, %v9906_v60  ;;  %v9991_v31 = vor.u32 %v11314_v25, %v9990_v1 }
 0x5f1   : > { %v3700_v63 = vpack.c.b16 %v3691_v14, %v3691_v14  ;;  %v3702_v59 = vpack.c.b16 %v3694_v50, %v3694_v50  ;;  %v3888_v46 = vpack.c.b16 %v3877_v6, %v3877_v6  ;;  %v3890_v58 = vpack.c.b16 %v3880_v9, %v3880_v9 }
 0x5f2   : > { %4429 = vmatpush.bf16.msrb.mxu3 %v10107_v17  ;;  %v3549_v15 = vunpack.c.l.b16 %v3536_v16  ;;  %v3552_v51 = vunpack.c.h.b16 %v3536_v16  ;;  %v13195_v53 = vor.u32 %v11291_v45, %v9900_v35  ;;  %v9978_v40 = vld [vmem:[#allocation2 + $0x80] sm:$0xf] }
 0x5f3   : > { %4462 = vmatpush.bf16.msra.mxu2 %v10075_v56  ;;  %3716 = vst.msk [vmem:[#allocation2 + $0x110] sm:$0xf] %vm370_vm0, %v3700_v63  ;;  %v11311_v14 = vld [vmem:[#allocation2 + $0x88] sm:$0xf0] }
 0x5f4   : > { %3718 = vst.msk [vmem:[#allocation2 + $0x11c] sm:$0xf] %vm370_vm0, %v3702_v59  ;;  %v3560_v32 = vpack.c.b16 %v3549_v15, %v3549_v15  ;;  %v3562_v5 = vpack.c.b16 %v3552_v51, %v3552_v51  ;;  %v9979_v56 = vor.u32 %v11311_v14, %v9978_v40 }
 0x5f5   : > { %3904 = vst.msk [vmem:[#allocation2 + $0x188] sm:$0xf] %vm370_vm0, %v3888_v46  ;;  %v3464_v41 = vpop.permute.xlu1 %3463 }
 0x5f6   : > { %3906 = vst.msk [vmem:[#allocation2 + $0x194] sm:$0xf] %vm370_vm0, %v3890_v58  ;;  %v3472_v13 = vsel %vm382_vm11, %v12960_v57, %v3464_v41  ;;  %v10002_v44 = vld [vmem:[#allocation2 + $0xb0] sm:$0xf]  ;;  %v3672_v52 = vpop.permute.xlu0 %3671  ;;  %v11323_v41 = vld [vmem:[#allocation2 + $0xe8] sm:$0xf0] }
 0x5f7   : > { %4463 = vmatpush.bf16.msra.mxu2 %v10063_v37  ;;  %3576 = vst.msk [vmem:[#allocation2 + $0x68] sm:$0xf] %vm370_vm0, %v3560_v32  ;;  %v3485_v24 = vunpack.c.l.b16 %v3472_v13  ;;  %v3488_v55 = vunpack.c.h.b16 %v3472_v13  ;;  %v11317_v8 = vld [vmem:[#allocation2 + $0xb8] sm:$0xf0]  ;;  %v3677_v34 = vsel %vm491_vm7, %v13052_v26, %v3672_v52  ;;  %v9954_v32 = vld [vmem:[#allocation2 + $0x50] sm:$0xf] }
 0x5f8   : > { %3578 = vst.msk [vmem:[#allocation2 + $0x74] sm:$0xf] %vm370_vm0, %v3562_v5  ;;  %v10003_v0 = vor.u32 %v11317_v8, %v10002_v44  ;;  %v3685_v29 = vunpack.c.l.b16 %v3677_v34  ;;  %v3688_v57 = vunpack.c.h.b16 %v3677_v34  ;;  %v10026_v44 = vld [vmem:[#allocation2 + $0xe0] sm:$0xf] }
 0x5f9   : > { %v3496_v61 = vpack.c.b16 %v3485_v24, %v3485_v24  ;;  %v3498_v12 = vpack.c.b16 %v3488_v55, %v3488_v55  ;;  %v10027_v52 = vor.u32 %v11323_v41, %v10026_v44  ;;  %v11320_v24 = vld [vmem:[#allocation2 + $0xd0] sm:$0xf0]  ;;  %v9930_v34 = vld [vmem:[#allocation2 + $0x20] sm:$0xf] }
 0x5fa   : > { %4441 = vmatpush.bf16.msrb.mxu0 %v10003_v0  ;;  %v3696_v4 = vpack.c.b16 %v3685_v29, %v3685_v29  ;;  %v3698_v28 = vpack.c.b16 %v3688_v57, %v3688_v57  ;;  %v10050_v17 = vld [vmem:[#allocation2 + $0x110] sm:$0xf]  ;;  %v10014_v0 = vld [vmem:[#allocation2 + $0xc8] sm:$0xf]  ;;  %v11299_v57 = vld [vmem:[#allocation2 + $0x28] sm:$0xf0] }
 0x5fb   : > { %3512 = vst.msk [vmem:[#allocation2 + $0x38] sm:$0xf] %vm370_vm0, %v3496_v61  ;;  %v11329_v26 = vld [vmem:[#allocation2 + $0x118] sm:$0xf0]  ;;  %v10015_v1 = vor.u32 %v11320_v24, %v10014_v0  ;;  %v9931_v25 = vor.u32 %v11299_v57, %v9930_v34 }
 0x5fc   : > { %3514 = vst.msk [vmem:[#allocation2 + $0x44] sm:$0xf] %vm370_vm0, %v3498_v12  ;;  %v10051_v22 = vor.u32 %v11329_v26, %v10050_v17  ;;  %v10110_v61 = vld [vmem:[#allocation2 + $0x188] sm:$0xf] }
 0x5fd   : > { %3712 = vst.msk [vmem:[#allocation2 + $0xf8] sm:$0xf] %vm370_vm0, %v3696_v4  ;;  %4359 = vmatmul.bf16.gmra.mxu3 %v13195_v53  ;;  %v3866_v42 = vpop.permute.xlu1 %3865  ;;  %10125 = vmatmul.msk.bf16.gmra.mxu0 %vm1950_vm14, %v13197_v2  ;;  %v11344_v12 = vld [vmem:[#allocation2 + $0x190] sm:$0xf0] }
 0x5fe   : > { %3714 = vst.msk [vmem:[#allocation2 + $0x104] sm:$0xf] %vm370_vm0, %v3698_v28  ;;  %4442 = vmatpush.bf16.msrb.mxu0 %v9991_v31  ;;  %4416 = vmatmul.bf16.gmra.mxu1 %v13195_v53  ;;  %v3872_v50 = vsel %vm593_vm13, %v13112_v23, %v3866_v42  ;;  %v3400_v6 = vpop.permute.xlu0 %3399  ;;  %v9966_v39 = vld [vmem:[#allocation2 + $0x68] sm:$0xf]  ;;  %v10111_v4 = vor.u32 %v11344_v12, %v10110_v61 }
 0x5ff   : > { %v3883_v9 = vunpack.c.l.b16 %v3872_v50  ;;  %v3886_v38 = vunpack.c.h.b16 %v3872_v50  ;;  %4464 = vmatpush.bf16.msra.mxu2 %v10051_v22  ;;  %v3408_v16 = vsel %vm347_vm12, %v12971_v54, %v3400_v6  ;;  %v11308_v58 = vld [vmem:[#allocation2 + $0x70] sm:$0xf0]  ;;  %v11305_v54 = vld [vmem:[#allocation2 + $0x58] sm:$0xf0] }
 0x600   : > { %v3421_v63 = vunpack.c.l.b16 %v3408_v16  ;;  %v3424_v59 = vunpack.c.h.b16 %v3408_v16  ;;  %v9967_v23 = vor.u32 %v11308_v58, %v9966_v39  ;;  %v9955_v35 = vor.u32 %v11305_v54, %v9954_v32 }
 0x601   : > { %v3892_v46 = vpack.c.b16 %v3883_v9, %v3883_v9  ;;  %v3894_v47 = vpack.c.b16 %v3886_v38, %v3886_v38 }
 0x602   : > { %4443 = vmatpush.bf16.msrb.mxu0 %v9979_v56  ;;  %v3432_v15 = vpack.c.b16 %v3421_v63, %v3421_v63  ;;  %v3434_v51 = vpack.c.b16 %v3424_v59, %v3424_v59  ;;  %v9942_v60 = vld [vmem:[#allocation2 + $0x38] sm:$0xf]  ;;  %v3986_v59 = vpop.permute.xlu2 %3985 }
 0x603   : > { %3908 = vst.msk [vmem:[#allocation2 + $0x1a0] sm:$0xf] %vm370_vm0, %v3892_v46  ;;  %v11302_v13 = vld [vmem:[#allocation2 + $0x40] sm:$0xf0] }
 0x604   : > { %3910 = vst.msk [vmem:[#allocation2 + $0x1ac] sm:$0xf] %vm370_vm0, %v3894_v47  ;;  %v10038_v5 = vld [vmem:[#allocation2 + $0xf8] sm:$0xf]  ;;  %v9943_v8 = vor.u32 %v11302_v13, %v9942_v60 }
 0x605   : > { %3448 = vst.msk [vmem:[#allocation2 + $0x8] sm:$0xf] %vm370_vm0, %v3432_v15  ;;  %v11326_v37 = vld [vmem:[#allocation2 + $0x100] sm:$0xf0] }
 0x606   : > { %3450 = vst.msk [vmem:[#allocation2 + $0x14] sm:$0xf] %vm370_vm0, %v3434_v51  ;;  %4444 = vmatpush.bf16.msrb.mxu0 %v9967_v23  ;;  %v10039_v45 = vor.u32 %v11326_v37, %v10038_v5  ;;  %v13227_v63 = vpop.permute.xlu0 %3995 }
 0x608   : > { %4465 = vmatpush.bf16.msra.mxu2 %v10039_v45 }
 0x60a   : > { %4445 = vmatpush.bf16.msrb.mxu0 %v9955_v35  ;;  %v10122_v62 = vld [vmem:[#allocation2 + $0x1a0] sm:$0xf] }
 0x60b   : > { %v11347_v55 = vld [vmem:[#allocation2 + $0x1a8] sm:$0xf0] }
 0x60c   : > { %4466 = vmatpush.bf16.msra.mxu2 %v10027_v52  ;;  %v10123_v29 = vor.u32 %v11347_v55, %v10122_v62  ;;  %v9918_v28 = vld [vmem:[#allocation2 + $0x8] sm:$0xf] }
 0x60d   : > { %10126 = vmatmul.msk.bf16.vlgmr.msrb.gmra.mxu3 %vm1950_vm14, %v13155_v30  ;;  %v11296_v17 = vld [vmem:[#allocation2 + $0x10] sm:$0xf0] }
 0x60e   : > { %4446 = vmatpush.bf16.msrb.mxu0 %v9943_v8  ;;  %4485 = vmatpush.bf16.msrb.mxu1 %v10123_v29  ;;  %v9919_v26 = vor.u32 %v11296_v17, %v9918_v28  ;;  %v3991_v23 = vpop.permute.xlu0 %3990 }
 0x610   : > { %4467 = vmatpush.bf16.msra.mxu2 %v10015_v1 }
 0x612   : > { %4447 = vmatpush.bf16.msrb.mxu0 %v9931_v25  ;;  %4486 = vmatpush.bf16.msrb.mxu1 %v10111_v4 }
 0x613   : > { %4468 = vmatmul.bf16.vlgmr.msra.gmra.mxu2 %v13153_v43 }
 0x615   : > { %10128 = vmatmul.msk.bf16.vlgmr.msrb.gmra.mxu1 %vm1950_vm14, %v13155_v30 }
 0x616   : > { %4448 = vmatpush.bf16.msrb.mxu0 %v9919_v26 }
 0x619   : > { %4449 = vmatmul.bf16.vlgmr.msrb.gmra.mxu0 %v13068_v49 }
 0x61d   : > { %10127 = vmatmul.msk.bf16.gmra.mxu3 %vm1950_vm14, %v13197_v2 }
 0x623   : > { %4473 = vmatmul.bf16.gmra.mxu2 %v13195_v53 }
 0x625   : > { %10129 = vmatmul.msk.bf16.gmra.mxu1 %vm1950_vm14, %v13197_v2 }
 0x629   : > { %4454 = vmatmul.bf16.gmra.mxu0 %v13096_v19 }
 0x63c   : > { %v4336_v31 = vpop.f32.mrf.mxu1 }
 0x63d   : > { %v4337_v19 = vadd.f32 %v4336_v31, %v3986_v59  ;;  %v13236_v31 = vpop.permute.xlu1 %4000 }
 0x642   : > { %v4393_v30 = vpop.f32.mrf.mxu2 }
 0x643   : > { %v4394_v15 = vadd.f32 %v4393_v30, %v3986_v59 }
 0x644   : > { %v4338_v22 = vpop.f32.mrf.mxu1 }
 0x645   : > { %v4339_v5 = vadd.f32 %v4338_v22, %v3991_v23 }
 0x64a   : > { %v4395_v38 = vpop.f32.mrf.mxu2 }
 0x64b   : > { %v4396_v44 = vadd.f32 %v4395_v38, %v3991_v23 }
 0x64c   : > { %v4341_v43 = vpop.f32.mrf.mxu1 }
 0x64d   : > { %v4342_v57 = vadd.f32 %v4341_v43, %v13227_v63 }
 0x652   : > { %v4398_v2 = vpop.f32.mrf.mxu2 }
 0x653   : > { %v4399_v30 = vadd.f32 %v4398_v2, %v13227_v63 }
 0x654   : > { %v4343_v42 = vpop.f32.mrf.mxu1 }
 0x655   : > { %v4344_v43 = vadd.f32 %v4343_v42, %v13236_v31 }
 0x65a   : > { %v4400_v32 = vpop.f32.mrf.mxu2 }
 0x66a   : > { %v4374_v14 = vpop.f32.mrf.mxu0 }
 0x66b   : > { %v4412_v40 = vpop.f32.mrf.mxu1 }
 0x66c   : > { %v4413_v54 = vadd.f32 %v4412_v40, %v4394_v15 }
 0x670   : > { %v4355_v50 = vpop.f32.mrf.mxu3 }
 0x671   : > { %v4356_v47 = vadd.f32 %v4355_v50, %v4337_v19 }
 0x672   : > { %v4376_v9 = vpop.f32.mrf.mxu0 }
 0x673   : > { %v4414_v6 = vpop.f32.mrf.mxu1  ;;  %v4375_v51 = vadd.f32 %v4374_v14, %v4356_v47 }
 0x674   : > { %v4415_v34 = vadd.f32 %v4414_v6, %v4396_v44 }
 0x675   : > { %v4498_v45 = vmul.f32 %v4375_v51, %v11889_v18 }
 0x677   : > { %v4510_v52 = vmax.f32 %v4498_v45, 0.0 }
 0x678   : > { %v4357_v49 = vpop.f32.mrf.mxu3 }
 0x679   : > { %v4358_v41 = vadd.f32 %v4357_v49, %v4339_v5 }
 0x67a   : > { %v4379_v53 = vpop.f32.mrf.mxu0 }
 0x67b   : > { %v4417_v16 = vpop.f32.mrf.mxu1  ;;  %v4377_v62 = vadd.f32 %v4376_v9, %v4358_v41  ;;  %v4401_v41 = vadd.f32 %v4400_v32, %v13236_v31 }
 0x67d   : > { %v4501_v12 = vmul.f32 %v4377_v62, %v11889_v18 }
 0x67f   : > { %v4513_v22 = vmax.f32 %v4501_v12, 0.0 }
 0x680   : > { %v4360_v56 = vpop.f32.mrf.mxu3 }
 0x681   : > { %v4361_v4 = vadd.f32 %v4360_v56, %v4342_v57 }
 0x682   : > { %v4381_v58 = vpop.f32.mrf.mxu0 }
 0x683   : > { %v13229_v39 = vpop.f32.mrf.mxu1  ;;  %v4380_v50 = vadd.f32 %v4379_v53, %v4361_v4 }
 0x685   : > { %v4504_v2 = vmul.f32 %v4380_v50, %v11889_v18 }
 0x687   : > { %v4516_v44 = vmax.f32 %v4504_v2, 0.0 }
 0x688   : > { %v4362_v46 = vpop.f32.mrf.mxu3 }
 0x689   : > { %v4363_v19 = vadd.f32 %v4362_v46, %v4344_v43 }
 0x690   : > { %v4431_v37 = vpop.f32.mrf.mxu3 }
 0x691   : > { %v4432_v35 = vadd.f32 %v4431_v37, %v4413_v54 }
 0x692   : > { %v4488_v60 = vpop.f32.mrf.mxu1 }
 0x693   : > { %v4499_v13 = vmul.f32 %v4432_v35, %v11891_v20  ;;  %v4382_v35 = vadd.f32 %v4381_v58, %v4363_v19 }
 0x695   : > { %v4511_v24 = vmax.f32 %v4499_v13, 0.0 }
 0x696   : > { %v4450_v55 = vpop.f32.mrf.mxu0  ;;  %v4469_v8 = vpop.f32.mrf.mxu2 }
 0x697   : > { %v4522_v0 = vpack.c.bf16 %v4511_v24, %v4510_v52  ;;  %v4451_v29 = vadd.f32 %v4450_v55, %v3986_v59  ;;  %v4418_v59 = vadd.f32 %v4417_v16, %v4399_v30  ;;  %v4420_v55 = vadd.f32 %v13229_v39, %v4401_v41 }
 0x698   : > { %v4433_v61 = vpop.f32.mrf.mxu3 }
 0x699   : > { %4826 = vst [vmem:[#allocation2 + $0xc0] sm:$0xff] %v4522_v0  ;;  %v4470_v1 = vadd.f32 %v4469_v8, %v4451_v29  ;;  %v4434_v25 = vadd.f32 %v4433_v61, %v4415_v34  ;;  %v4562_v47 = vunpack.c.l.b16 %v4522_v0  ;;  %v4563_v15 = vunpack.c.h.b16 %v4522_v0 }
 0x69a   : > { %v4490_v26 = vpop.f32.mrf.mxu1  ;;  %v4507_v0 = vmul.f32 %v4382_v35, %v11889_v18 }
 0x69b   : > { %v4489_v28 = vadd.f32 %v4488_v60, %v4470_v1  ;;  %v4502_v17 = vmul.f32 %v4434_v25, %v11891_v20 }
 0x69c   : > { %v4519_v25 = vmax.f32 %v4507_v0, 0.0 }
 0x69d   : > { %v4500_v40 = vmul.f32 %v4489_v28, %v11897_v33  ;;  %v4514_v14 = vmax.f32 %v4502_v17, 0.0 }
 0x69e   : > { %v4452_v6 = vpop.f32.mrf.mxu0  ;;  %v4471_v49 = vpop.f32.mrf.mxu2 }
 0x69f   : > { %v4512_v9 = vmax.f32 %v4500_v40, 0.0  ;;  %v4524_v38 = vpack.c.bf16 %v4514_v14, %v4513_v22  ;;  %v4453_v56 = vadd.f32 %v4452_v6, %v3991_v23 }
 0x6a0   : > { %v4436_v51 = vpop.f32.mrf.mxu3 }
 0x6a1   : > { %v13241_v5 = vpack.c.bf16 %v4512_v9, %v4512_v9  ;;  %v4564_v54 = vunpack.c.l.b16 %v4524_v38  ;;  %v4565_v37 = vunpack.c.h.b16 %v4524_v38  ;;  %4828 = vst [vmem:[#allocation2 + $0xcc] sm:$0xff] %v4524_v38  ;;  %v4472_v45 = vadd.f32 %v4471_v49, %v4453_v56 }
 0x6a2   : > { %v4437_v42 = vadd.f32 %v4436_v51, %v4418_v59  ;;  %v4493_v13 = vpop.f32.mrf.mxu1 }
 0x6a3   : > { %4827 = vst.msk [vmem:[#allocation2 + $0xc8] sm:$0xf] %vm370_vm0, %v13241_v5  ;;  %v13246_v53 = vpack.c.b16 %v4564_v54, %v4562_v47  ;;  %v13248_v23 = vpack.c.b16 %v4565_v37, %v4563_v15  ;;  %v4491_v16 = vadd.f32 %v4490_v26, %v4472_v45  ;;  %v4548_v15 = vunpack.c.l.b16 %v13241_v5 }
 0x6a4   : > { %v4505_v46 = vmul.f32 %v4437_v42, %v11891_v20 }
 0x6a5   : > { %v4503_v60 = vmul.f32 %v4491_v16, %v11897_v33  ;;  %4768 = vrot.lane.b32.xlu0 %v13248_v23, %s15062_s18  ;;  %4962 = vrot.lane.b32.xlu1 %v13246_v53, %s15060_s12 }
 0x6a6   : > { %v4517_v52 = vmax.f32 %v4505_v46, 0.0  ;;  %v4455_v62 = vpop.f32.mrf.mxu0  ;;  %v4474_v24 = vpop.f32.mrf.mxu2  ;;  %4766 = vrot.lane.b32.xlu2 %v13246_v53, %s15062_s18 }
 0x6a7   : > { %v4515_v32 = vmax.f32 %v4503_v60, 0.0  ;;  %v4456_v58 = vadd.f32 %v4455_v62, %v13227_v63 }
 0x6a8   : > { %v4526_v8 = vpack.c.bf16 %v4517_v52, %v4516_v44  ;;  %v4438_v34 = vpop.f32.mrf.mxu3 }
 0x6a9   : > { %v4525_v29 = vpack.c.bf16 %v4515_v32, %v4515_v32  ;;  %v4475_v57 = vadd.f32 %v4474_v24, %v4456_v58  ;;  %v4439_v61 = vadd.f32 %v4438_v34, %v4420_v55 }
 0x6aa   : > { %4830 = vst [vmem:[#allocation2 + $0xd8] sm:$0xff] %v4526_v8  ;;  %v4495_v40 = vpop.f32.mrf.mxu1  ;;  %v4566_v14 = vunpack.c.l.b16 %v4526_v8  ;;  %v4567_v59 = vunpack.c.h.b16 %v4526_v8 }
 0x6ab   : > { %4829 = vst.msk [vmem:[#allocation2 + $0xd4] sm:$0xf] %vm370_vm0, %v4525_v29  ;;  %v4494_v12 = vadd.f32 %v4493_v13, %v4475_v57  ;;  %v4508_v1 = vmul.f32 %v4439_v61, %v11891_v20  ;;  %v4549_v47 = vunpack.c.l.b16 %v4525_v29 }
 0x6ad   : > { %v4506_v4 = vmul.f32 %v4494_v12, %v11897_v33  ;;  %v4520_v39 = vmax.f32 %v4508_v1, 0.0  ;;  %4704 = vrot.lane.b32.xlu0 %v13248_v23, %s15085_s14  ;;  %4898 = vrot.lane.b32.xlu1 %v13246_v53, %s15086_s25  ;;  %v13295_v51 = vpack.c.b16 %v4549_v47, %v4548_v15 }
 0x6ae   : > { %v4457_v63 = vpop.f32.mrf.mxu0  ;;  %v4476_v28 = vpop.f32.mrf.mxu2  ;;  %4702 = vrot.lane.b32.xlu2 %v13246_v53, %s15085_s14 }
 0x6af   : > { %v4518_v17 = vmax.f32 %v4506_v4, 0.0  ;;  %v4528_v26 = vpack.c.bf16 %v4520_v39, %v4519_v25  ;;  %v4458_v22 = vadd.f32 %v4457_v63, %v13236_v31 }
 0x6b1   : > { %v4527_v30 = vpack.c.bf16 %v4518_v17, %v4518_v17  ;;  %v4568_v43 = vunpack.c.l.b16 %v4528_v26  ;;  %4832 = vst [vmem:[#allocation2 + $0xe4] sm:$0xff] %v4528_v26  ;;  %v4477_v50 = vadd.f32 %v4476_v28, %v4458_v22  ;;  %v4569_v56 = vunpack.c.h.b16 %v4528_v26 }
 0x6b3   : > { %4831 = vst.msk [vmem:[#allocation2 + $0xe0] sm:$0xf] %vm370_vm0, %v4527_v30  ;;  %v13273_v6 = vpack.c.b16 %v4568_v43, %v4566_v14  ;;  %v4496_v49 = vadd.f32 %v4495_v40, %v4477_v50  ;;  %v4573_v19 = vpack.c.b16 %v4569_v56, %v4567_v59  ;;  %v4550_v54 = vunpack.c.l.b16 %v4527_v30 }
 0x6b5   : > { %v4509_v9 = vmul.f32 %v4496_v49, %v11897_v33  ;;  %4640 = vrot.lane.b32.xlu0 %v13248_v23, %s15087_s23  ;;  %4968 = vrot.lane.b32.xlu1 %v13273_v6, %s15060_s12 }
 0x6b6   : > { %4638 = vrot.lane.b32.xlu2 %v13246_v53, %s15087_s23 }
 0x6b7   : > { %v4521_v31 = vmax.f32 %v4509_v9, 0.0 }
 0x6b9   : > { %v4529_v38 = vpack.c.bf16 %v4521_v31, %v4521_v31  ;;  %v10140_v31 = vld [vmem:[%s15027_s5 + $0x70] sm:$0xff] }
 0x6bb   : > { %4833 = vst.msk [vmem:[#allocation2 + $0xec] sm:$0xf] %vm370_vm0, %v4529_v38  ;;  %v4551_v5 = vunpack.c.l.b16 %v4529_v38 }
 0x6bd   : > { %4576 = vrot.lane.b32.xlu0 %v13248_v23, %s15082_s24  ;;  %4904 = vrot.lane.b32.xlu1 %v13273_v6, %s15086_s25  ;;  %v4553_v37 = vpack.c.b16 %v4551_v5, %v4550_v54 }
 0x6be   : > { %4574 = vrot.lane.b32.xlu2 %v13246_v53, %s15082_s24 }
 0x6c5   : > { %4774 = vrot.lane.b32.xlu0 %v4573_v19, %s15062_s18  ;;  %4840 = vrot.lane.b32.xlu1 %v13273_v6, %s15083_s26 }
 0x6c6   : > { %4964 = vrot.lane.b32.xlu2 %v13248_v23, %s15060_s12 }
 0x6cd   : > { %4710 = vrot.lane.b32.xlu0 %v4573_v19, %s15085_s14  ;;  %4762 = vrot.lane.b32.xlu1 %v13295_v51, %s15084_s19 }
 0x6ce   : > { %4900 = vrot.lane.b32.xlu2 %v13248_v23, %s15086_s25 }
 0x6d5   : > { %4646 = vrot.lane.b32.xlu0 %v4573_v19, %s15087_s23  ;;  %4698 = vrot.lane.b32.xlu1 %v13295_v51, %s15077_s21 }
 0x6d6   : > { %4772 = vrot.lane.b32.xlu2 %v13273_v6, %s15062_s18 }
 0x6dd   : > { %4582 = vrot.lane.b32.xlu0 %v4573_v19, %s15082_s24  ;;  %4634 = vrot.lane.b32.xlu1 %v13295_v51, %s15078_s22 }
 0x6de   : > { %4708 = vrot.lane.b32.xlu2 %v13273_v6, %s15085_s14 }
 0x6e5   : > { %4966 = vrot.lane.b32.xlu0 %v13295_v51, %s15060_s12  ;;  %4554 = vrot.lane.b32.xlu1 %v13295_v51, %s15079_s30 }
 0x6e6   : > { %4644 = vrot.lane.b32.xlu2 %v13273_v6, %s15087_s23 }
 0x6ed   : > { %4902 = vrot.lane.b32.xlu0 %v13295_v51, %s15086_s25  ;;  %4764 = vrot.lane.b32.xlu1 %v4553_v37, %s15084_s19 }
 0x6ee   : > { %4580 = vrot.lane.b32.xlu2 %v13273_v6, %s15082_s24 }
 0x6f5   : > { %4838 = vrot.lane.b32.xlu0 %v13295_v51, %s15083_s26  ;;  %4700 = vrot.lane.b32.xlu1 %v4553_v37, %s15077_s21 }
 0x6f6   : > { %4970 = vrot.lane.b32.xlu2 %v4573_v19, %s15060_s12 }
 0x6fd   : > { %5030 = vrot.lane.b32.xlu0 %v13295_v51, %s15080_s9  ;;  %4636 = vrot.lane.b32.xlu1 %v4553_v37, %s15078_s22 }
 0x6fe   : > { %4906 = vrot.lane.b32.xlu2 %v4573_v19, %s15086_s25 }
 0x700   : > { %v4767_v45 = vpop.permute.xlu2 %4766 }
 0x705   : > { %4972 = vrot.lane.b32.xlu0 %v4553_v37, %s15060_s12  ;;  %4556 = vrot.lane.b32.xlu1 %v4553_v37, %s15079_s30 }
 0x706   : > { %4842 = vrot.lane.b32.xlu2 %v4573_v19, %s15083_s26 }
 0x708   : > { %v4703_v2 = vpop.permute.xlu2 %4702 }
 0x70d   : > { %4908 = vrot.lane.b32.xlu0 %v4553_v37, %s15086_s25  ;;  %4834 = vrot.lane.b32.xlu1 %v13246_v53, %s15083_s26 }
 0x70e   : > { %4836 = vrot.lane.b32.xlu2 %v13248_v23, %s15083_s26 }
 0x710   : > { %v13339_v42 = vpop.permute.xlu2 %4638 }
 0x715   : > { %4844 = vrot.lane.b32.xlu0 %v4553_v37, %s15083_s26  ;;  %5032 = vrot.lane.b32.xlu1 %v13273_v6, %s15080_s9 }
 0x716   : > { %5034 = vrot.lane.b32.xlu2 %v4573_v19, %s15080_s9 }
 0x717   : > { %v13345_v16 = vpop.permute.xlu0 %4768  ;;  %v13347_v46 = vpop.permute.xlu1 %4962 }
 0x718   : > { %v13349_v41 = vpop.permute.xlu2 %4574  ;;  %v4778_v34 = vsel %vm450_vm9, %v4767_v45, %v13345_v16 }
 0x719   : > { %v4791_v12 = vunpack.c.l.b16 %v4778_v34  ;;  %v4794_v1 = vunpack.c.h.b16 %v4778_v34 }
 0x71d   : > { %5036 = vrot.lane.b32.xlu0 %v4553_v37, %s15080_s9  ;;  %5026 = vrot.lane.b32.xlu1 %v13246_v53, %s15080_s9 }
 0x71e   : > { %5028 = vrot.lane.b32.xlu2 %v13248_v23, %s15080_s9 }
 0x71f   : > { %v13356_v35 = vpop.permute.xlu0 %4704  ;;  %v13358_v60 = vpop.permute.xlu1 %4898 }
 0x720   : > { %v13360_v13 = vpop.permute.xlu2 %4964  ;;  %v4714_v28 = vsel %vm416_vm10, %v4703_v2, %v13356_v35 }
 0x721   : > { %v4727_v14 = vunpack.c.l.b16 %v4714_v28  ;;  %v4730_v30 = vunpack.c.h.b16 %v4714_v28 }
 0x725   : > { %4978 = vrot.lane.b32.xlu0 %v13246_v53, %s15081_s11  ;;  %4980 = vrot.lane.b32.xlu1 %v13273_v6, %s15081_s11 }
 0x726   : > { %4770 = vrot.lane.b32.xlu2 %v13295_v51, %s15062_s18 }
 0x727   : > { %v13368_v44 = vpop.permute.xlu0 %4640  ;;  %v13370_v52 = vpop.permute.xlu1 %4968 }
 0x728   : > { %v13372_v23 = vpop.permute.xlu2 %4900  ;;  %v4650_v38 = vsel %vm382_vm11, %v13339_v42, %v13368_v44 }
 0x729   : > { %v4663_v15 = vunpack.c.l.b16 %v4650_v38 }
 0x72d   : > { %4712 = vrot.lane.b32.xlu0 %v4553_v37, %s15085_s14  ;;  %4776 = vrot.lane.b32.xlu1 %v4553_v37, %s15062_s18  ;;  %s15001_s18 = scalar_lea.vmem %s15030_s8, %s15090_s13 }
 0x72e   : > { %4706 = vrot.lane.b32.xlu2 %v13295_v51, %s15085_s14 }
 0x72f   : > { %v13378_v62 = vpop.permute.xlu0 %4576  ;;  %v13380_v24 = vpop.permute.xlu1 %4904 }
 0x730   : > { %v13382_v55 = vpop.permute.xlu2 %4772  ;;  %v4586_v34 = vsel %vm347_vm12, %v13349_v41, %v13378_v62 }
 0x735   : > { %4642 = vrot.lane.b32.xlu0 %v13295_v51, %s15087_s23  ;;  %4914 = vrot.lane.b32.xlu1 %v13246_v53, %s15074_s16 }
 0x736   : > { %4916 = vrot.lane.b32.xlu2 %v13273_v6, %s15074_s16 }
 0x737   : > { %v13390_v32 = vpop.permute.xlu0 %4774  ;;  %v13392_v58 = vpop.permute.xlu1 %4840 }
 0x738   : > { %v13394_v8 = vpop.permute.xlu2 %4708 }
 0x73d   : > { %4852 = vrot.lane.b32.xlu0 %v13273_v6, %s15075_s17  ;;  %4648 = vrot.lane.b32.xlu1 %v4553_v37, %s15087_s23 }
 0x73e   : > { %4584 = vrot.lane.b32.xlu2 %v4553_v37, %s15082_s24 }
 0x73f   : > { %v13402_v0 = vpop.permute.xlu0 %4710  ;;  %v4763_v29 = vpop.permute.xlu1 %4762 }
 0x740   : > { %v4784_v57 = vsel %vm450_vm9, %v4763_v29, %v4767_v45  ;;  %v13405_v61 = vpop.permute.xlu2 %4644 }
 0x741   : > { %v4790_v25 = vunpack.c.l.b16 %v4784_v57  ;;  %v4793_v4 = vunpack.c.h.b16 %v4784_v57 }
 0x743   : > { %v4802_v39 = vpack.c.b16 %v4791_v12, %v4790_v25  ;;  %v4804_v63 = vpack.c.b16 %v4794_v1, %v4793_v4  ;;  %v4599_v25 = vunpack.c.l.b16 %v4586_v34 }
 0x745   : > { %4818 = vst [vmem:[#allocation2 + $0x90] sm:$0xff] %v4802_v39  ;;  %5044 = vrot.lane.b32.xlu0 %v13273_v6, %s15076_s29  ;;  %4578 = vrot.lane.b32.xlu1 %v13295_v51, %s15082_s24  ;;  %v10141_v6 = vld [vmem:[%s15027_s5 + $0x78] sm:$0xff]  ;;  %v4666_v51 = vunpack.c.h.b16 %v4650_v38 }
 0x746   : > { %4820 = vst [vmem:[#allocation2 + $0x9c] sm:$0xff] %v4804_v63  ;;  %4850 = vrot.lane.b32.xlu2 %v13246_v53, %s15075_s17 }
 0x747   : > { %v13415_v17 = vpop.permute.xlu0 %4646  ;;  %v4699_v26 = vpop.permute.xlu1 %4698 }
 0x748   : > { %v4720_v22 = vsel %vm416_vm10, %v4699_v26, %v4703_v2  ;;  %v13418_v40 = vpop.permute.xlu2 %4580  ;;  %v10139_v2 = vld [vmem:[%s15027_s5 + $0x68] sm:$0xff] }
 0x749   : > { %v4726_v43 = vunpack.c.l.b16 %v4720_v22  ;;  %v4729_v50 = vunpack.c.h.b16 %v4720_v22 }
 0x74b   : > { %v4738_v49 = vpack.c.b16 %v4727_v14, %v4726_v43  ;;  %v4740_v9 = vpack.c.b16 %v4730_v30, %v4729_v50  ;;  %v4602_v14 = vunpack.c.h.b16 %v4586_v34 }
 0x74d   : > { %4754 = vst [vmem:[#allocation2 + $0x60] sm:$0xff] %v4738_v49  ;;  %5179 = vperm.xlu0 %11612, %v10141_v6   ;;  %5042 = vrot.lane.b32.xlu1 %v13246_v53, %s15076_s29  ;;  %v10138_v53 = vld [vmem:[%s15027_s5 + $0x60] sm:$0xff]  ;;  %v4910_v6 = vsel %vm520_vm3, %v13358_v60, %v13372_v23 }
 0x74e   : > { %4756 = vst [vmem:[#allocation2 + $0x6c] sm:$0xff] %v4740_v9  ;;  %5174 = vperm.xlu2 %11611, %v10140_v31   ;;  %v4929_v38 = vunpack.c.h.b16 %v4910_v6 }
 0x74f   : > { %v13431_v56 = vpop.permute.xlu0 %4582  ;;  %v4635_v59 = vpop.permute.xlu1 %4634 }
 0x750   : > { %v4656_v19 = vsel %vm382_vm11, %v4635_v59, %v13339_v42  ;;  %v13435_v47 = vpop.permute.xlu2 %4970  ;;  %v4974_v42 = vsel %vm554_vm1, %v13347_v46, %v13360_v13 }
 0x751   : > { %v4662_v5 = vunpack.c.l.b16 %v4656_v19  ;;  %v4665_v54 = vunpack.c.h.b16 %v4656_v19  ;;  %v4990_v29 = vunpack.c.l.b16 %v4974_v42  ;;  %v4993_v1 = vunpack.c.h.b16 %v4974_v42 }
 0x753   : > { %v4674_v37 = vpack.c.b16 %v4663_v15, %v4662_v5  ;;  %v4676_v45 = vpack.c.b16 %v4666_v51, %v4665_v54 }
 0x755   : > { %4690 = vst [vmem:[#allocation2 + $0x30] sm:$0xff] %v4674_v37  ;;  %5164 = vperm.xlu1 %11613, %v10138_v53  }
 0x756   : > { %4692 = vst [vmem:[#allocation2 + $0x3c] sm:$0xff] %v4676_v45  ;;  %5169 = vperm.xlu2 %11611, %v10139_v2  }
 0x757   : > { %v13449_v57 = vpop.permute.xlu0 %4966  ;;  %v4555_v12 = vpop.permute.xlu1 %4554 }
 0x758   : > { %v4975_v4 = vsel %vm554_vm1, %v13360_v13, %v13449_v57  ;;  %v4592_v46 = vsel %vm347_vm12, %v4555_v12, %v13349_v41  ;;  %v13456_v39 = vpop.permute.xlu2 %4906  ;;  %v4780_v13 = vsel %vm450_vm9, %v13382_v55, %v13390_v32  ;;  %v4926_v41 = vunpack.c.l.b16 %v4910_v6 }
 0x759   : > { %v4991_v63 = vunpack.c.l.b16 %v4975_v4  ;;  %v4994_v28 = vunpack.c.h.b16 %v4975_v4  ;;  %v4598_v26 = vunpack.c.l.b16 %v4592_v46  ;;  %v4601_v22 = vunpack.c.h.b16 %v4592_v46 }
 0x75a   : > { %v4797_v59 = vunpack.c.l.b16 %v4780_v13  ;;  %v4800_v37 = vunpack.c.h.b16 %v4780_v13 }
 0x75b   : > { %v5002_v30 = vpack.c.b16 %v4991_v63, %v4990_v29  ;;  %v5004_v43 = vpack.c.b16 %v4994_v28, %v4993_v1  ;;  %v4610_v50 = vpack.c.b16 %v4599_v25, %v4598_v26  ;;  %v4612_v49 = vpack.c.b16 %v4602_v14, %v4601_v22 }
 0x75c   : > { %v4716_v29 = vsel %vm416_vm10, %v13394_v8, %v13402_v0  ;;  %v4652_v22 = vsel %vm382_vm11, %v13405_v61, %v13415_v17 }
 0x75d   : > { %5018 = vst [vmem:[#allocation2 + $0x150] sm:$0xff] %v5002_v30  ;;  %v4733_v25 = vunpack.c.l.b16 %v4716_v29  ;;  %v4736_v4 = vunpack.c.h.b16 %v4716_v29 }
 0x75e   : > { %5020 = vst [vmem:[#allocation2 + $0x15c] sm:$0xff] %v5004_v43 }
 0x75f   : > { %4626 = vst [vmem:[#allocation2] sm:$0xff] %v4610_v50  ;;  %v13464_v9 = vpop.permute.xlu0 %4902  ;;  %v4765_v31 = vpop.permute.xlu1 %4764 }
 0x760   : > { %4628 = vst [vmem:[#allocation2 + $0xc] sm:$0xff] %v4612_v49  ;;  %v4911_v19 = vsel %vm520_vm3, %v13372_v23, %v13464_v9  ;;  %v4787_v60 = vsel %vm450_vm9, %v4765_v31, %v13382_v55  ;;  %v13471_v15 = vpop.permute.xlu2 %4842 }
 0x761   : > { %v4927_v51 = vunpack.c.l.b16 %v4911_v19  ;;  %v4930_v5 = vunpack.c.h.b16 %v4911_v19  ;;  %v4796_v54 = vunpack.c.l.b16 %v4787_v60  ;;  %v4799_v53 = vunpack.c.h.b16 %v4787_v60 }
 0x762   : > { %v4672_v19 = vunpack.c.h.b16 %v4652_v22 }
 0x763   : > { %v4938_v45 = vpack.c.b16 %v4927_v51, %v4926_v41  ;;  %v4940_v2 = vpack.c.b16 %v4930_v5, %v4929_v38  ;;  %v4806_v42 = vpack.c.b16 %v4797_v59, %v4796_v54  ;;  %v4808_v34 = vpack.c.b16 %v4800_v37, %v4799_v53  ;;  %v10240_v38 = vld [vmem:[#allocation2 + $0x90] sm:$0xf]  ;;  %v11373_v5 = vld [vmem:[#allocation2 + $0x98] sm:$0xf0]  ;;  %v11372_v54 = vld [vmem:[#allocation2 + $0x94] sm:$0xf] }
 0x764   : > { %v4669_v59 = vunpack.c.l.b16 %v4652_v22  ;;  %v10242_v53 = vld [vmem:[#allocation2 + $0x9c] sm:$0xf0] }
 0x765   : > { %4954 = vst [vmem:[#allocation2 + $0x120] sm:$0xff] %v4938_v45 }
 0x766   : > { %4956 = vst [vmem:[#allocation2 + $0x12c] sm:$0xff] %v4940_v2  ;;  %v10241_v2 = vor.u32 %v11373_v5, %v10240_v38  ;;  %v11367_v38 = vld [vmem:[#allocation2 + $0x68] sm:$0xf0] }
 0x767   : > { %4822 = vst [vmem:[#allocation2 + $0xa8] sm:$0xff] %v4806_v42  ;;  %v13476_v23 = vpop.permute.xlu0 %4838  ;;  %v4701_v55 = vpop.permute.xlu1 %4700  ;;  %v10245_v42 = vor.u32 %v11372_v54, %v10242_v53 }
 0x768   : > { %4824 = vst [vmem:[#allocation2 + $0xb4] sm:$0xff] %v4808_v34  ;;  %v4723_v12 = vsel %vm416_vm10, %v4701_v55, %v13394_v8  ;;  %v13480_v1 = vpop.permute.xlu2 %4836  ;;  %v4976_v55 = vsel %vm554_vm1, %v13370_v52, %v13435_v47 }
 0x769   : > { %v4732_v46 = vunpack.c.l.b16 %v4723_v12  ;;  %v4735_v63 = vunpack.c.h.b16 %v4723_v12  ;;  %v4996_v22 = vunpack.c.l.b16 %v4976_v55 }
 0x76b   : > { %v4742_v28 = vpack.c.b16 %v4733_v25, %v4732_v46  ;;  %v4744_v26 = vpack.c.b16 %v4736_v4, %v4735_v63 }
 0x76d   : > { %4758 = vst [vmem:[#allocation2 + $0x78] sm:$0xff] %v4742_v28 }
 0x76e   : > { %4760 = vst [vmem:[#allocation2 + $0x84] sm:$0xff] %v4744_v26  ;;  %v10252_v14 = vld [vmem:[#allocation2 + $0xa8] sm:$0xf]  ;;  %v11375_v30 = vld [vmem:[#allocation2 + $0xac] sm:$0xf] }
 0x76f   : > { %v13485_v43 = vpop.permute.xlu0 %5030  ;;  %v4637_v50 = vpop.permute.xlu1 %4636  ;;  %v11376_v8 = vld [vmem:[#allocation2 + $0xb0] sm:$0xf0]  ;;  %v10254_v6 = vld [vmem:[#allocation2 + $0xb4] sm:$0xf0] }
 0x770   : > { %v4659_v49 = vsel %vm382_vm11, %v4637_v50, %v13405_v61  ;;  %v10253_v13 = vor.u32 %v11376_v8, %v10252_v14  ;;  %v10257_v41 = vor.u32 %v11375_v30, %v10254_v6  ;;  %v13489_v31 = vpop.permute.xlu2 %5034  ;;  %v4588_v61 = vsel %vm347_vm12, %v13418_v40, %v13431_v56  ;;  %v10216_v8 = vld [vmem:[#allocation2 + $0x60] sm:$0xf] }
 0x771   : > { %v4668_v60 = vunpack.c.l.b16 %v4659_v49  ;;  %v4671_v51 = vunpack.c.h.b16 %v4659_v49  ;;  %v4605_v63 = vunpack.c.l.b16 %v4588_v61  ;;  %v4999_v14 = vunpack.c.h.b16 %v4976_v55 }
 0x772   : > { %5506 = vmatpush.bf16.msra.mxu3 %v10253_v13  ;;  %5563 = vmatpush.bf16.msra.mxu1 %v10257_v41  ;;  %v10217_v53 = vor.u32 %v11367_v38, %v10216_v8 }
 0x773   : > { %v4678_v37 = vpack.c.b16 %v4669_v59, %v4668_v60  ;;  %v4680_v45 = vpack.c.b16 %v4672_v19, %v4671_v51  ;;  %v11366_v59 = vld [vmem:[#allocation2 + $0x64] sm:$0xf]  ;;  %v10218_v19 = vld [vmem:[#allocation2 + $0x6c] sm:$0xf0]  ;;  %v4608_v60 = vunpack.c.h.b16 %v4588_v61 }
 0x774   : > { %v10228_v34 = vld [vmem:[#allocation2 + $0x78] sm:$0xf]  ;;  %v11369_v29 = vld [vmem:[#allocation2 + $0x7c] sm:$0xf] }
 0x775   : > { %4694 = vst [vmem:[#allocation2 + $0x48] sm:$0xff] %v4678_v37  ;;  %v11370_v12 = vld [vmem:[#allocation2 + $0x80] sm:$0xf0]  ;;  %v10230_v25 = vld [vmem:[#allocation2 + $0x84] sm:$0xf0]  ;;  %v10221_v37 = vor.u32 %v11366_v59, %v10218_v19 }
 0x776   : > { %4696 = vst [vmem:[#allocation2 + $0x54] sm:$0xff] %v4680_v45  ;;  %5507 = vmatpush.bf16.msra.mxu3 %v10241_v2  ;;  %5564 = vmatpush.bf16.msra.mxu1 %v10245_v42  ;;  %v10229_v4 = vor.u32 %v11370_v12, %v10228_v34  ;;  %v10233_v46 = vor.u32 %v11369_v29, %v10230_v25 }
 0x777   : > { %v13497_v28 = vpop.permute.xlu0 %4972  ;;  %v4557_v26 = vpop.permute.xlu1 %4556  ;;  %v4847_v42 = vsel %vm486_vm5, %v13480_v1, %v13476_v23 }
 0x778   : > { %v4977_v30 = vsel %vm554_vm1, %v13435_v47, %v13497_v28  ;;  %v4595_v52 = vsel %vm347_vm12, %v4557_v26, %v13418_v40  ;;  %v13504_v50 = vpop.permute.xlu2 %5028  ;;  %v4912_v40 = vsel %vm520_vm3, %v13380_v24, %v13456_v39  ;;  %v4866_v38 = vunpack.c.h.b16 %v4847_v42 }
 0x779   : > { %v4997_v6 = vunpack.c.l.b16 %v4977_v30  ;;  %v5000_v49 = vunpack.c.h.b16 %v4977_v30  ;;  %v4604_v13 = vunpack.c.l.b16 %v4595_v52  ;;  %v4607_v41 = vunpack.c.h.b16 %v4595_v52  ;;  %v11361_v30 = vld [vmem:[#allocation2 + $0x38] sm:$0xf0] }
 0x77a   : > { %5508 = vmatpush.bf16.msra.mxu3 %v10229_v4  ;;  %5565 = vmatpush.bf16.msra.mxu1 %v10233_v46  ;;  %v4932_v12 = vunpack.c.l.b16 %v4912_v40  ;;  %v4935_v4 = vunpack.c.h.b16 %v4912_v40  ;;  %v4863_v46 = vunpack.c.l.b16 %v4847_v42 }
 0x77b   : > { %v5006_v51 = vpack.c.b16 %v4997_v6, %v4996_v22  ;;  %v5008_v5 = vpack.c.b16 %v5000_v49, %v4999_v14  ;;  %v4614_v54 = vpack.c.b16 %v4605_v63, %v4604_v13  ;;  %v4616_v47 = vpack.c.b16 %v4608_v60, %v4607_v41  ;;  %v10192_v14 = vld [vmem:[#allocation2 + $0x30] sm:$0xf]  ;;  %v11360_v13 = vld [vmem:[#allocation2 + $0x34] sm:$0xf]  ;;  %v10194_v41 = vld [vmem:[#allocation2 + $0x3c] sm:$0xf0] }
 0x77c   : > { %v10204_v45 = vld [vmem:[#allocation2 + $0x48] sm:$0xf]  ;;  %v11363_v2 = vld [vmem:[#allocation2 + $0x4c] sm:$0xf]  ;;  %v10197_v40 = vor.u32 %v11360_v13, %v10194_v41 }
 0x77d   : > { %5022 = vst [vmem:[#allocation2 + $0x168] sm:$0xff] %v5006_v51  ;;  %v11364_v61 = vld [vmem:[#allocation2 + $0x50] sm:$0xf0]  ;;  %v10206_v34 = vld [vmem:[#allocation2 + $0x54] sm:$0xf0]  ;;  %v10193_v51 = vor.u32 %v11361_v30, %v10192_v14 }
 0x77e   : > { %5024 = vst [vmem:[#allocation2 + $0x174] sm:$0xff] %v5008_v5  ;;  %5509 = vmatpush.bf16.msra.mxu3 %v10217_v53  ;;  %5566 = vmatpush.bf16.msra.mxu1 %v10221_v37  ;;  %v10205_v29 = vor.u32 %v11364_v61, %v10204_v45  ;;  %v10209_v55 = vor.u32 %v11363_v2, %v10206_v34  ;;  %v10336_v45 = vld [vmem:[#allocation2 + $0x150] sm:$0xf]  ;;  %v11397_v2 = vld [vmem:[#allocation2 + $0x158] sm:$0xf0] }
 0x77f   : > { %4630 = vst [vmem:[#allocation2 + $0x18] sm:$0xff] %v4614_v54  ;;  %v13512_v24 = vpop.permute.xlu0 %4908  ;;  %v4835_v25 = vpop.permute.xlu1 %4834  ;;  %v4848_v53 = vsel %vm486_vm5, %v13392_v58, %v13471_v15  ;;  %v10337_v41 = vor.u32 %v11397_v2, %v10336_v45 }
 0x780   : > { %4632 = vst [vmem:[#allocation2 + $0x24] sm:$0xff] %v4616_v47  ;;  %v4913_v63 = vsel %vm520_vm3, %v13456_v39, %v13512_v24  ;;  %v4846_v26 = vsel %vm486_vm5, %v4835_v25, %v13480_v1  ;;  %v4771_v22 = vpop.permute.xlu2 %4770  ;;  %v4868_v14 = vunpack.c.l.b16 %v4848_v53  ;;  %v4871_v30 = vunpack.c.h.b16 %v4848_v53 }
 0x781   : > { %v4933_v52 = vunpack.c.l.b16 %v4913_v63  ;;  %v4936_v8 = vunpack.c.h.b16 %v4913_v63  ;;  %v4862_v6 = vunpack.c.l.b16 %v4846_v26  ;;  %v4865_v49 = vunpack.c.h.b16 %v4846_v26  ;;  %v10168_v26 = vld [vmem:[#allocation2] sm:$0xf] }
 0x782   : > { %5510 = vmatpush.bf16.msra.mxu3 %v10205_v29  ;;  %5567 = vmatpush.bf16.msra.mxu1 %v10209_v55  ;;  %v4779_v59 = vsel %vm450_vm9, %v13345_v16, %v4771_v22  ;;  %v11355_v22 = vld [vmem:[#allocation2 + $0x8] sm:$0xf0] }
 0x783   : > { %v4942_v19 = vpack.c.b16 %v4933_v52, %v4932_v12  ;;  %v4944_v39 = vpack.c.b16 %v4936_v8, %v4935_v4  ;;  %v4874_v60 = vpack.c.b16 %v4863_v46, %v4862_v6  ;;  %v4876_v1 = vpack.c.b16 %v4866_v38, %v4865_v49  ;;  %v10144_v6 = vld [vmem:[%s15026_s4 + $0x90] sm:$0xf]  ;;  %v11349_v49 = vld [vmem:[%s15026_s4 + $0x98] sm:$0xf0] }
 0x784   : > { %v4792_v5 = vunpack.c.l.b16 %v4779_v59  ;;  %v4795_v54 = vunpack.c.h.b16 %v4779_v59  ;;  %v10348_v47 = vld [vmem:[#allocation2 + $0x168] sm:$0xf]  ;;  %v11399_v38 = vld [vmem:[#allocation2 + $0x16c] sm:$0xf] }
 0x785   : > { %4958 = vst [vmem:[#allocation2 + $0x138] sm:$0xff] %v4942_v19  ;;  %v11400_v37 = vld [vmem:[#allocation2 + $0x170] sm:$0xf0]  ;;  %v10350_v59 = vld [vmem:[#allocation2 + $0x174] sm:$0xf0] }
 0x786   : > { %4960 = vst [vmem:[#allocation2 + $0x144] sm:$0xff] %v4944_v39  ;;  %v4803_v42 = vpack.c.b16 %v4792_v5, %v4792_v5  ;;  %v4805_v16 = vpack.c.b16 %v4795_v54, %v4795_v54  ;;  %5511 = vmatpush.bf16.msra.mxu3 %v10193_v51  ;;  %5568 = vmatpush.bf16.msra.mxu1 %v10197_v40  ;;  %v10180_v61 = vld [vmem:[#allocation2 + $0x18] sm:$0xf]  ;;  %v11357_v29 = vld [vmem:[#allocation2 + $0x1c] sm:$0xf] }
 0x787   : > { %v10349_v34 = vor.u32 %v11400_v37, %v10348_v47  ;;  %4890 = vst [vmem:[#allocation2 + $0xf0] sm:$0xff] %v4874_v60  ;;  %v13524_v55 = vpop.permute.xlu0 %4844  ;;  %v5033_v12 = vpop.permute.xlu1 %5032  ;;  %v11358_v25 = vld [vmem:[#allocation2 + $0x20] sm:$0xf0]  ;;  %v10182_v4 = vld [vmem:[#allocation2 + $0x24] sm:$0xf0]  ;;  %v5039_v54 = vsel %vm588_vm2, %v13504_v50, %v13485_v43  ;;  %v10169_v40 = vor.u32 %v11355_v22, %v10168_v26  ;;  %v13542_v47 = vor.u32 %v11349_v49, %v10144_v6 }
 0x788   : > { %4892 = vst [vmem:[#allocation2 + $0xfc] sm:$0xff] %v4876_v1  ;;  %v4849_v58 = vsel %vm486_vm5, %v13471_v15, %v13524_v55  ;;  %v10181_v46 = vor.u32 %v11358_v25, %v10180_v61  ;;  %v4707_v63 = vpop.permute.xlu2 %4706  ;;  %v10185_v15 = vor.u32 %v11357_v29, %v10182_v4  ;;  %v11354_v1 = vld [vmem:[#allocation2 + $0x4] sm:$0xf]  ;;  %v10170_v5 = vld [vmem:[#allocation2 + $0xc] sm:$0xf0]  ;;  %v10353_v2 = vor.u32 %v11399_v38, %v10350_v59 }
 0x789   : > { %5525 = vmatpush.bf16.msra.mxu0 %v10349_v34  ;;  %4819 = vst.msk [vmem:[#allocation2 + $0x98] sm:$0xf] %vm370_vm0, %v4803_v42  ;;  %v4869_v52 = vunpack.c.l.b16 %v4849_v58  ;;  %v4872_v8 = vunpack.c.h.b16 %v4849_v58  ;;  %v4715_v13 = vsel %vm416_vm10, %v13356_v35, %v4707_v63  ;;  %v5040_v35 = vsel %vm588_vm2, %v5033_v12, %v13489_v31  ;;  %v11396_v34 = vld [vmem:[#allocation2 + $0x154] sm:$0xf]  ;;  %v10338_v29 = vld [vmem:[#allocation2 + $0x15c] sm:$0xf0] }
 0x78a   : > { %4821 = vst.msk [vmem:[#allocation2 + $0xa4] sm:$0xf] %vm370_vm0, %v4805_v16  ;;  %5512 = vmatpush.bf16.msra.mxu3 %v10181_v46  ;;  %v4728_v60 = vunpack.c.l.b16 %v4715_v13  ;;  %v4731_v51 = vunpack.c.h.b16 %v4715_v13  ;;  %5569 = vmatpush.bf16.msra.mxu1 %v10185_v15  ;;  %v10173_v16 = vor.u32 %v11354_v1, %v10170_v5  ;;  %v5055_v25 = vunpack.c.l.b16 %v5039_v54  ;;  %v10312_v46 = vld [vmem:[#allocation2 + $0x120] sm:$0xf]  ;;  %v11391_v63 = vld [vmem:[#allocation2 + $0x128] sm:$0xf0] }
 0x78b   : > { %v4878_v19 = vpack.c.b16 %v4869_v52, %v4868_v14  ;;  %v4880_v39 = vpack.c.b16 %v4872_v8, %v4871_v30  ;;  %v5060_v12 = vunpack.c.l.b16 %v5040_v35  ;;  %v5063_v26 = vunpack.c.h.b16 %v5040_v35 }
 0x78c   : > { %v10324_v53 = vld [vmem:[#allocation2 + $0x138] sm:$0xf]  ;;  %v4739_v37 = vpack.c.b16 %v4728_v60, %v4728_v60  ;;  %v4741_v45 = vpack.c.b16 %v4731_v51, %v4731_v51  ;;  %v5058_v15 = vunpack.c.h.b16 %v5039_v54  ;;  %v10313_v38 = vor.u32 %v11391_v63, %v10312_v46 }
 0x78d   : > { %5526 = vmatpush.bf16.msra.mxu0 %v10337_v41  ;;  %4894 = vst [vmem:[#allocation2 + $0x108] sm:$0xff] %v4878_v19  ;;  %v11394_v42 = vld [vmem:[#allocation2 + $0x140] sm:$0xf0]  ;;  %v10341_v41 = vor.u32 %v11396_v34, %v10338_v29 }
 0x78e   : > { %4896 = vst [vmem:[#allocation2 + $0x114] sm:$0xff] %v4880_v39  ;;  %5513 = vmatpush.bf16.msra.mxu3 %v10169_v40  ;;  %v10325_v61 = vor.u32 %v11394_v42, %v10324_v53  ;;  %5570 = vmatpush.bf16.msra.mxu1 %v10173_v16  ;;  %v10326_v39 = vld [vmem:[#allocation2 + $0x144] sm:$0xf0]  ;;  %v10288_v16 = vld [vmem:[#allocation2 + $0xf0] sm:$0xf] }
 0x78f   : > { %4755 = vst.msk [vmem:[#allocation2 + $0x68] sm:$0xf] %vm370_vm0, %v4739_v37  ;;  %v13547_v4 = vpop.permute.xlu0 %5036  ;;  %v5027_v58 = vpop.permute.xlu1 %5026  ;;  %v11390_v37 = vld [vmem:[#allocation2 + $0x124] sm:$0xf] }
 0x790   : > { %4757 = vst.msk [vmem:[#allocation2 + $0x74] sm:$0xf] %vm370_vm0, %v4741_v45  ;;  %v5041_v22 = vsel %vm588_vm2, %v13489_v31, %v13547_v4  ;;  %v5038_v14 = vsel %vm588_vm2, %v5027_v58, %v13504_v50  ;;  %v4917_v30 = vpop.permute.xlu2 %4916  ;;  %v11393_v50 = vld [vmem:[#allocation2 + $0x13c] sm:$0xf]  ;;  %v10314_v45 = vld [vmem:[#allocation2 + $0x12c] sm:$0xf0] }
 0x791   : > { %5527 = vmatpush.bf16.msra.mxu0 %v10325_v61  ;;  %5514 = vmatmul.bf16.vlgmr.msra.gmra.mxu3 %v13542_v47  ;;  %v5061_v52 = vunpack.c.l.b16 %v5041_v22  ;;  %v5064_v8 = vunpack.c.h.b16 %v5041_v22  ;;  %v5054_v6 = vunpack.c.l.b16 %v5038_v14  ;;  %v5057_v49 = vunpack.c.h.b16 %v5038_v14  ;;  %v11385_v61 = vld [vmem:[#allocation2 + $0xf8] sm:$0xf0] }
 0x792   : > { %5582 = vmatpush.bf16.msrb.mxu3 %v10353_v2  ;;  %v4923_v13 = vsel %vm525_vm6, %v13512_v24, %v4917_v30  ;;  %5571 = vmatmul.bf16.vlgmr.msra.gmra.mxu1 %v13542_v47  ;;  %v10329_v53 = vor.u32 %v11393_v50, %v10326_v39  ;;  %v10317_v14 = vor.u32 %v11390_v37, %v10314_v45 }
 0x793   : > { %v5070_v31 = vpack.c.b16 %v5061_v52, %v5060_v12  ;;  %v5072_v59 = vpack.c.b16 %v5064_v8, %v5063_v26  ;;  %v5066_v19 = vpack.c.b16 %v5055_v25, %v5054_v6  ;;  %v5068_v60 = vpack.c.b16 %v5058_v15, %v5057_v49  ;;  %v11382_v26 = vld [vmem:[#allocation2 + $0xe0] sm:$0xf0] }
 0x794   : > { %v4934_v51 = vunpack.c.l.b16 %v4923_v13  ;;  %v4937_v1 = vunpack.c.h.b16 %v4923_v13  ;;  %v10300_v5 = vld [vmem:[#allocation2 + $0x108] sm:$0xf]  ;;  %v10289_v30 = vor.u32 %v11385_v61, %v10288_v16  ;;  %v11387_v49 = vld [vmem:[#allocation2 + $0x10c] sm:$0xf] }
 0x795   : > { %5528 = vmatpush.bf16.msra.mxu0 %v10313_v38  ;;  %5086 = vst [vmem:[#allocation2 + $0x198] sm:$0xff] %v5070_v31  ;;  %v11388_v54 = vld [vmem:[#allocation2 + $0x110] sm:$0xf0]  ;;  %v10302_v15 = vld [vmem:[#allocation2 + $0x114] sm:$0xf0] }
 0x796   : > { %5583 = vmatpush.bf16.msrb.mxu3 %v10341_v41  ;;  %5088 = vst [vmem:[#allocation2 + $0x1a4] sm:$0xff] %v5072_v59  ;;  %v4943_v40 = vpack.c.b16 %v4934_v51, %v4934_v51  ;;  %v4945_v24 = vpack.c.b16 %v4937_v1, %v4937_v1  ;;  %v10301_v35 = vor.u32 %v11388_v54, %v10300_v5  ;;  %v11379_v59 = vld [vmem:[#allocation2 + $0xc8] sm:$0xf0]  ;;  %v11348_v51 = vld [vmem:[%s15026_s4 + $0x94] sm:$0xf] }
 0x797   : > { %5082 = vst [vmem:[#allocation2 + $0x180] sm:$0xff] %v5066_v19  ;;  %v4979_v2 = vpop.permute.xlu0 %4978  ;;  %v4981_v42 = vpop.permute.xlu1 %4980  ;;  %v10146_v1 = vld [vmem:[%s15026_s4 + $0x9c] sm:$0xf0] }
 0x798   : > { %5084 = vst [vmem:[#allocation2 + $0x18c] sm:$0xff] %v5068_v60  ;;  %v4984_v34 = vsel %vm559_vm4, %v13449_v57, %v4979_v2  ;;  %v4987_v29 = vsel %vm559_vm4, %v13497_v28, %v4981_v42  ;;  %v4585_v25 = vpop.permute.xlu2 %4584  ;;  %v10156_v57 = vld [vmem:[%s15026_s4 + $0xa8] sm:$0xf]  ;;  %v11352_v28 = vld [vmem:[%s15026_s4 + $0xb0] sm:$0xf0] }
 0x799   : > { %5529 = vmatpush.bf16.msra.mxu0 %v10301_v35  ;;  %4959 = vst.msk [vmem:[#allocation2 + $0x140] sm:$0xf] %vm370_vm0, %v4943_v40  ;;  %v4992_v58 = vunpack.c.l.b16 %v4984_v34  ;;  %v4995_v46 = vunpack.c.h.b16 %v4984_v34  ;;  %v4998_v63 = vunpack.c.l.b16 %v4987_v29  ;;  %v5001_v12 = vunpack.c.h.b16 %v4987_v29  ;;  %v10264_v60 = vld [vmem:[#allocation2 + $0xc0] sm:$0xf] }
 0x79a   : > { %5584 = vmatpush.bf16.msrb.mxu3 %v10329_v53  ;;  %4961 = vst.msk [vmem:[#allocation2 + $0x14c] sm:$0xf] %vm370_vm0, %v4945_v24  ;;  %v4589_v22 = vsel %vm347_vm12, %v13431_v56, %v4585_v25  ;;  %v10276_v56 = vld [vmem:[#allocation2 + $0xd8] sm:$0xf]  ;;  %v13574_v19 = vor.u32 %v11352_v28, %v10156_v57  ;;  %v10305_v40 = vor.u32 %v11387_v49, %v10302_v15  ;;  %v11384_v53 = vld [vmem:[#allocation2 + $0xf4] sm:$0xf] }
 0x79b   : > { %v5003_v52 = vpack.c.b16 %v4992_v58, %v4992_v58  ;;  %v5005_v8 = vpack.c.b16 %v4995_v46, %v4995_v46  ;;  %v5007_v6 = vpack.c.b16 %v4998_v63, %v4998_v63  ;;  %v5009_v13 = vpack.c.b16 %v5001_v12, %v5001_v12  ;;  %v10290_v35 = vld [vmem:[#allocation2 + $0xfc] sm:$0xf0]  ;;  %v10278_v49 = vld [vmem:[#allocation2 + $0xe4] sm:$0xf0] }
 0x79c   : > { %v4606_v41 = vunpack.c.l.b16 %v4589_v22  ;;  %v4609_v38 = vunpack.c.h.b16 %v4589_v22  ;;  %v10372_v31 = vld [vmem:[#allocation2 + $0x198] sm:$0xf]  ;;  %v10277_v50 = vor.u32 %v11382_v26, %v10276_v56  ;;  %v11405_v2 = vld [vmem:[#allocation2 + $0x19c] sm:$0xf]  ;;  %v10265_v29 = vor.u32 %v11379_v59, %v10264_v60 }
 0x79d   : > { %5530 = vmatpush.bf16.msra.mxu0 %v10289_v30  ;;  %5019 = vst.msk [vmem:[#allocation2 + $0x158] sm:$0xf] %vm370_vm0, %v5003_v52  ;;  %v11406_v39 = vld [vmem:[#allocation2 + $0x1a0] sm:$0xf0]  ;;  %v10374_v42 = vld [vmem:[#allocation2 + $0x1a4] sm:$0xf0]  ;;  %v13600_v57 = vor.u32 %v11348_v51, %v10146_v1 }
 0x79e   : > { %5585 = vmatpush.bf16.msrb.mxu3 %v10317_v14  ;;  %5021 = vst.msk [vmem:[#allocation2 + $0x164] sm:$0xf] %vm370_vm0, %v5005_v8  ;;  %v4615_v5 = vpack.c.b16 %v4606_v41, %v4606_v41  ;;  %v4617_v54 = vpack.c.b16 %v4609_v38, %v4609_v38  ;;  %v10373_v24 = vor.u32 %v11406_v39, %v10372_v31  ;;  %v10360_v25 = vld [vmem:[#allocation2 + $0x180] sm:$0xf]  ;;  %v11402_v56 = vld [vmem:[#allocation2 + $0x184] sm:$0xf] }
 0x79f   : > { %5023 = vst.msk [vmem:[#allocation2 + $0x170] sm:$0xf] %vm370_vm0, %v5007_v6  ;;  %v4713_v37 = vpop.permute.xlu0 %4712  ;;  %v4777_v45 = vpop.permute.xlu1 %4776  ;;  %v11403_v58 = vld [vmem:[#allocation2 + $0x188] sm:$0xf0]  ;;  %v10293_v14 = vor.u32 %v11384_v53, %v10290_v35  ;;  %v10377_v30 = vor.u32 %v11405_v2, %v10374_v42  ;;  %v11381_v31 = vld [vmem:[#allocation2 + $0xdc] sm:$0xf] }
 0x7a0   : > { %5025 = vst.msk [vmem:[#allocation2 + $0x17c] sm:$0xf] %vm370_vm0, %v5009_v13  ;;  %v4717_v16 = vsel %vm416_vm10, %v13402_v0, %v4713_v37  ;;  %v4781_v61 = vsel %vm450_vm9, %v13390_v32, %v4777_v45  ;;  %v4851_v34 = vpop.permute.xlu2 %4850  ;;  %5550 = vmatpush.bf16.msrb.mxu2 %v10373_v24  ;;  %v10152_v0 = vld [vmem:[%s15026_s4 + $0x98] sm:$0xf]  ;;  %v11350_v32 = vld [vmem:[%s15026_s4 + $0xa0] sm:$0xf0]  ;;  %v10361_v6 = vor.u32 %v11403_v58, %v10360_v25 }
 0x7a1   : > { %5531 = vmatpush.bf16.msra.mxu0 %v10277_v50  ;;  %4631 = vst.msk [vmem:[#allocation2 + $0x20] sm:$0xf] %vm370_vm0, %v4615_v5  ;;  %5519 = vmatmul.bf16.gmra.mxu3 %v13574_v19  ;;  %v4734_v46 = vunpack.c.l.b16 %v4717_v16  ;;  %v4737_v63 = vunpack.c.h.b16 %v4717_v16  ;;  %v4798_v12 = vunpack.c.l.b16 %v4781_v61  ;;  %v4801_v26 = vunpack.c.h.b16 %v4781_v61  ;;  %v11378_v37 = vld [vmem:[#allocation2 + $0xc4] sm:$0xf] }
 0x7a2   : > { %5586 = vmatpush.bf16.msrb.mxu3 %v10305_v40  ;;  %4633 = vst.msk [vmem:[#allocation2 + $0x2c] sm:$0xf] %vm370_vm0, %v4617_v54  ;;  %v4856_v22 = vsel %vm491_vm7, %v13476_v23, %v4851_v34  ;;  %5576 = vmatmul.bf16.gmra.mxu1 %v13574_v19  ;;  %v13603_v38 = vor.u32 %v11350_v32, %v10152_v0  ;;  %v10362_v23 = vld [vmem:[#allocation2 + $0x18c] sm:$0xf0] }
 0x7a3   : > { %v4743_v28 = vpack.c.b16 %v4734_v46, %v4734_v46  ;;  %v4745_v52 = vpack.c.b16 %v4737_v63, %v4737_v63  ;;  %v4807_v8 = vpack.c.b16 %v4798_v12, %v4798_v12  ;;  %v4809_v15 = vpack.c.b16 %v4801_v26, %v4801_v26  ;;  %v10266_v54 = vld [vmem:[#allocation2 + $0xcc] sm:$0xf0]  ;;  %v10332_v63 = vld [vmem:[#allocation2 + $0x140] sm:$0xf]  ;;  %v11395_v12 = vld [vmem:[#allocation2 + $0x148] sm:$0xf0] }
 0x7a4   : > { %v4864_v13 = vunpack.c.l.b16 %v4856_v22  ;;  %v4867_v41 = vunpack.c.h.b16 %v4856_v22  ;;  %5551 = vmatpush.bf16.msrb.mxu2 %v10361_v6  ;;  %v10281_v39 = vor.u32 %v11381_v31, %v10278_v49  ;;  %v10365_v40 = vor.u32 %v11402_v56, %v10362_v23  ;;  %v10344_v61 = vld [vmem:[#allocation2 + $0x158] sm:$0xf]  ;;  %v11351_v6 = vld [vmem:[%s15026_s4 + $0xac] sm:$0xf]  ;;  %v11353_v23 = vld [vmem:[%s15026_s4 + $0xb8] sm:$0xf0] }
 0x7a5   : > { %5532 = vmatpush.bf16.msra.mxu0 %v10265_v29  ;;  %4759 = vst.msk [vmem:[#allocation2 + $0x80] sm:$0xf] %vm370_vm0, %v4743_v28  ;;  %v11398_v34 = vld [vmem:[#allocation2 + $0x160] sm:$0xf0]  ;;  %v10269_v29 = vor.u32 %v11378_v37, %v10266_v54  ;;  %v10158_v49 = vld [vmem:[%s15026_s4 + $0xb4] sm:$0xf0] }
 0x7a6   : > { %5587 = vmatpush.bf16.msrb.mxu3 %v10293_v14  ;;  %4761 = vst.msk [vmem:[#allocation2 + $0x8c] sm:$0xf] %vm370_vm0, %v4745_v52  ;;  %v4875_v59 = vpack.c.b16 %v4864_v13, %v4864_v13  ;;  %v4877_v50 = vpack.c.b16 %v4867_v41, %v4867_v41  ;;  %v10356_v60 = vld [vmem:[#allocation2 + $0x170] sm:$0xf]  ;;  %v10248_v14 = vld [vmem:[#allocation2 + $0x98] sm:$0xf] }
 0x7a7   : > { %4823 = vst.msk [vmem:[#allocation2 + $0xb0] sm:$0xf] %vm370_vm0, %v4807_v8  ;;  %v4643_v51 = vpop.permute.xlu0 %4642  ;;  %v4915_v1 = vpop.permute.xlu1 %4914  ;;  %v11401_v5 = vld [vmem:[#allocation2 + $0x178] sm:$0xf0]  ;;  %10382 = vmatmul.msk.bf16.vlgmr.msrb.gmra.mxu2 %vm1950_vm14, %v13603_v38  ;;  %v10333_v8 = vor.u32 %v11395_v12, %v10332_v63 }
 0x7a8   : > { %5533 = vmatmul.bf16.vlgmr.msra.gmra.mxu0 %v13600_v57  ;;  %4825 = vst.msk [vmem:[#allocation2 + $0xbc] sm:$0xf] %vm370_vm0, %v4809_v15  ;;  %v4651_v24 = vsel %vm382_vm11, %v13368_v44, %v4643_v51  ;;  %v4920_v53 = vsel %vm525_vm6, %v13464_v9, %v4915_v1  ;;  %v10357_v35 = vor.u32 %v11401_v5, %v10356_v60 }
 0x7a9   : > { %5607 = vmatpush.bf16.msrb.mxu0 %v10377_v30  ;;  %4891 = vst.msk [vmem:[#allocation2 + $0xf8] sm:$0xf] %vm370_vm0, %v4875_v59  ;;  %v4664_v45 = vunpack.c.l.b16 %v4651_v24  ;;  %v4667_v2 = vunpack.c.h.b16 %v4651_v24  ;;  %v4928_v42 = vunpack.c.l.b16 %v4920_v53  ;;  %v4931_v16 = vunpack.c.h.b16 %v4920_v53 }
 0x7aa   : > { %5588 = vmatpush.bf16.msrb.mxu3 %v10281_v39  ;;  %4893 = vst.msk [vmem:[#allocation2 + $0x104] sm:$0xf] %vm370_vm0, %v4877_v50  ;;  %5639 = vmatpush.bf16.msrb.mxu1 %v10357_v35  ;;  %v10345_v9 = vor.u32 %v11398_v34, %v10344_v61  ;;  %v13639_v39 = vor.u32 %v11351_v6, %v10158_v49 }
 0x7ab   : > { %v4675_v25 = vpack.c.b16 %v4664_v45, %v4664_v45  ;;  %v4677_v44 = vpack.c.b16 %v4667_v2, %v4667_v2  ;;  %v4939_v58 = vpack.c.b16 %v4928_v42, %v4928_v42  ;;  %v4941_v46 = vpack.c.b16 %v4931_v16, %v4931_v16 }
 0x7ac   : > { %v10236_v5 = vld [vmem:[#allocation2 + $0x80] sm:$0xf] }
 0x7ad   : > { %5608 = vmatpush.bf16.msrb.mxu0 %v10365_v40  ;;  %4691 = vst.msk [vmem:[#allocation2 + $0x38] sm:$0xf] %vm370_vm0, %v4675_v25  ;;  %v11371_v54 = vld [vmem:[#allocation2 + $0x88] sm:$0xf0]  ;;  %v10224_v25 = vld [vmem:[#allocation2 + $0x68] sm:$0xf] }
 0x7ae   : > { %5589 = vmatpush.bf16.msrb.mxu3 %v10269_v29  ;;  %4693 = vst.msk [vmem:[#allocation2 + $0x44] sm:$0xf] %vm370_vm0, %v4677_v44  ;;  %5640 = vmatpush.bf16.msrb.mxu1 %v10345_v9  ;;  %v10260_v26 = vld [vmem:[#allocation2 + $0xb0] sm:$0xf]  ;;  %v10237_v35 = vor.u32 %v11371_v54, %v10236_v5  ;;  %v11368_v44 = vld [vmem:[#allocation2 + $0x70] sm:$0xf0] }
 0x7af   : > { %4955 = vst.msk [vmem:[#allocation2 + $0x128] sm:$0xf] %vm370_vm0, %v4939_v58  ;;  %v4853_v0 = vpop.permute.xlu0 %4852  ;;  %v4649_v32 = vpop.permute.xlu1 %4648  ;;  %v11377_v22 = vld [vmem:[#allocation2 + $0xb8] sm:$0xf0]  ;;  %v10225_v12 = vor.u32 %v11368_v44, %v10224_v25  ;;  %v11380_v5 = vld [vmem:[#allocation2 + $0xd0] sm:$0xf0] }
 0x7b0   : > { %4957 = vst.msk [vmem:[#allocation2 + $0x134] sm:$0xf] %vm370_vm0, %v4941_v46  ;;  %v4859_v30 = vsel %vm491_vm7, %v13524_v55, %v4853_v0  ;;  %v4653_v28 = vsel %vm382_vm11, %v13415_v17, %v4649_v32  ;;  %v10261_v52 = vor.u32 %v11377_v22, %v10260_v26  ;;  %v11374_v55 = vld [vmem:[#allocation2 + $0xa0] sm:$0xf0]  ;;  %v10164_v17 = vld [vmem:[%s15026_s4 + $0xb0] sm:$0xf] }
 0x7b1   : > { %5590 = vmatmul.bf16.vlgmr.msrb.gmra.mxu3 %v13600_v57  ;;  %v4870_v15 = vunpack.c.l.b16 %v4859_v30  ;;  %v4873_v13 = vunpack.c.h.b16 %v4859_v30  ;;  %v4670_v41 = vunpack.c.l.b16 %v4653_v28  ;;  %v4673_v56 = vunpack.c.h.b16 %v4653_v28  ;;  %v10296_v32 = vld [vmem:[#allocation2 + $0xf8] sm:$0xf]  ;;  %v11386_v30 = vld [vmem:[#allocation2 + $0x100] sm:$0xf0] }
 0x7b2   : > { %5620 = vmatpush.bf16.msra.mxu2 %v10261_v52  ;;  %5641 = vmatpush.bf16.msrb.mxu1 %v10333_v8  ;;  %v10249_v51 = vor.u32 %v11374_v55, %v10248_v14  ;;  %v13641_v1 = vor.u32 %v11353_v23, %v10164_v17  ;;  %v11383_v55 = vld [vmem:[#allocation2 + $0xe8] sm:$0xf0]  ;;  %v10188_v23 = vld [vmem:[#allocation2 + $0x20] sm:$0xf] }
 0x7b3   : > { %v4879_v31 = vpack.c.b16 %v4870_v15, %v4870_v15  ;;  %v4881_v59 = vpack.c.b16 %v4873_v13, %v4873_v13  ;;  %v4679_v50 = vpack.c.b16 %v4670_v41, %v4670_v41  ;;  %v4681_v60 = vpack.c.b16 %v4673_v56, %v4673_v56 }
 0x7b4   : > { %v10200_v49 = vld [vmem:[#allocation2 + $0x38] sm:$0xf]  ;;  %v10297_v13 = vor.u32 %v11386_v30, %v10296_v32 }
 0x7b5   : > { %4895 = vst.msk [vmem:[#allocation2 + $0x110] sm:$0xf] %vm370_vm0, %v4879_v31  ;;  %v11362_v15 = vld [vmem:[#allocation2 + $0x40] sm:$0xf0]  ;;  %v10284_v31 = vld [vmem:[#allocation2 + $0xe0] sm:$0xf] }
 0x7b6   : > { %4897 = vst.msk [vmem:[#allocation2 + $0x11c] sm:$0xf] %vm370_vm0, %v4881_v59  ;;  %5621 = vmatpush.bf16.msra.mxu2 %v10249_v51  ;;  %v10320_v40 = vld [vmem:[#allocation2 + $0x128] sm:$0xf]  ;;  %v10201_v17 = vor.u32 %v11362_v15, %v10200_v49  ;;  %v5689_v15 = vunpack.c.l.bf16 %v12760_v7 }
 0x7b7   : > { %4695 = vst.msk [vmem:[#allocation2 + $0x50] sm:$0xf] %vm370_vm0, %v4679_v50  ;;  %v5045_v24 = vpop.permute.xlu0 %5044  ;;  %v4579_v53 = vpop.permute.xlu1 %4578  ;;  %v11392_v37 = vld [vmem:[#allocation2 + $0x130] sm:$0xf0]  ;;  %10383 = vmatmul.msk.bf16.gmra.mxu2 %vm1950_vm14, %v13641_v1 }
 0x7b8   : > { %5538 = vmatmul.bf16.gmra.mxu0 %v13639_v39  ;;  %4697 = vst.msk [vmem:[#allocation2 + $0x5c] sm:$0xf] %vm370_vm0, %v4681_v60  ;;  %v5051_v45 = vsel %vm593_vm13, %v13547_v4, %v5045_v24  ;;  %v4587_v2 = vsel %vm347_vm12, %v13378_v62, %v4579_v53  ;;  %v10321_v42 = vor.u32 %v11392_v37, %v10320_v40  ;;  %v10272_v53 = vld [vmem:[#allocation2 + $0xc8] sm:$0xf] }
 0x7b9   : > { %v5062_v16 = vunpack.c.l.b16 %v5051_v45  ;;  %v5065_v61 = vunpack.c.h.b16 %v5051_v45  ;;  %v4600_v34 = vunpack.c.l.b16 %v4587_v2  ;;  %v4603_v29 = vunpack.c.h.b16 %v4587_v2 }
 0x7ba   : > { %5622 = vmatpush.bf16.msra.mxu2 %v10237_v35  ;;  %5642 = vmatpush.bf16.msrb.mxu1 %v10321_v42  ;;  %v10285_v60 = vor.u32 %v11383_v55, %v10284_v31  ;;  %v10273_v35 = vor.u32 %v11380_v5, %v10272_v53  ;;  %v5692_v53 = vunpack.c.l.bf16 %v12771_v48 }
 0x7bb   : > { %v5071_v58 = vpack.c.b16 %v5062_v16, %v5062_v16  ;;  %v5073_v46 = vpack.c.b16 %v5065_v61, %v5065_v61  ;;  %v4611_v9 = vpack.c.b16 %v4600_v34, %v4600_v34  ;;  %v4613_v63 = vpack.c.b16 %v4603_v29, %v4603_v29 }
 0x7bc   : > { %v10308_v26 = vld [vmem:[#allocation2 + $0x110] sm:$0xf] }
 0x7bd   : > { %5087 = vst.msk [vmem:[#allocation2 + $0x1a0] sm:$0xf] %vm370_vm0, %v5071_v58  ;;  %v11389_v4 = vld [vmem:[#allocation2 + $0x118] sm:$0xf0] }
 0x7be   : > { %5089 = vst.msk [vmem:[#allocation2 + $0x1ac] sm:$0xf] %vm370_vm0, %v5073_v46  ;;  %5623 = vmatpush.bf16.msra.mxu2 %v10225_v12  ;;  %v10212_v62 = vld [vmem:[#allocation2 + $0x50] sm:$0xf]  ;;  %v10309_v0 = vor.u32 %v11389_v4, %v10308_v26 }
 0x7bf   : > { %4627 = vst.msk [vmem:[#allocation2 + $0x8] sm:$0xf] %vm370_vm0, %v4611_v9  ;;  %v5043_v22 = vpop.permute.xlu1 %5042  ;;  %v11365_v14 = vld [vmem:[#allocation2 + $0x58] sm:$0xf0] }
 0x7c0   : > { %4629 = vst.msk [vmem:[#allocation2 + $0x14] sm:$0xf] %vm370_vm0, %v4613_v63  ;;  %v5048_v28 = vsel %vm593_vm13, %v13485_v43, %v5043_v22  ;;  %v10213_v52 = vor.u32 %v11365_v14, %v10212_v62  ;;  %5643 = vmatpush.bf16.msrb.mxu1 %v10309_v0  ;;  %v11359_v43 = vld [vmem:[#allocation2 + $0x28] sm:$0xf0]  ;;  %v13677_v63 = vpop.permute.xlu2 %5174 }
 0x7c1   : > { %5595 = vmatmul.bf16.gmra.mxu3 %v13639_v39  ;;  %v5056_v8 = vunpack.c.l.b16 %v5048_v28  ;;  %v5059_v6 = vunpack.c.h.b16 %v5048_v28  ;;  %v10189_v54 = vor.u32 %v11359_v43, %v10188_v23 }
 0x7c2   : > { %5624 = vmatpush.bf16.msra.mxu2 %v10213_v52 }
 0x7c3   : > { %v5067_v41 = vpack.c.b16 %v5056_v8, %v5056_v8  ;;  %v5069_v56 = vpack.c.b16 %v5059_v6, %v5059_v6 }
 0x7c4   : > { %5644 = vmatpush.bf16.msrb.mxu1 %v10297_v13  ;;  %v10380_v59 = vld [vmem:[#allocation2 + $0x1a0] sm:$0xf] }
 0x7c5   : > { %5083 = vst.msk [vmem:[#allocation2 + $0x188] sm:$0xf] %vm370_vm0, %v5067_v41  ;;  %v11407_v50 = vld [vmem:[#allocation2 + $0x1a8] sm:$0xf0] }
 0x7c6   : > { %5085 = vst.msk [vmem:[#allocation2 + $0x194] sm:$0xf] %vm370_vm0, %v5069_v56  ;;  %5625 = vmatpush.bf16.msra.mxu2 %v10201_v17  ;;  %v10381_v51 = vor.u32 %v11407_v50, %v10380_v59  ;;  %v10176_v40 = vld [vmem:[#allocation2 + $0x8] sm:$0xf]  ;;  %v5690_v56 = vunpack.c.h.bf16 %v12760_v7 }
 0x7c7   : > { %v11356_v24 = vld [vmem:[#allocation2 + $0x10] sm:$0xf0] }
 0x7c8   : > { %10384 = vmatmul.msk.bf16.vlgmr.msrb.gmra.mxu0 %vm1950_vm14, %v13603_v38  ;;  %5645 = vmatpush.bf16.msrb.mxu1 %v10285_v60  ;;  %v10177_v37 = vor.u32 %v11356_v24, %v10176_v40  ;;  %v13679_v22 = vpop.permute.xlu2 %5169 }
 0x7c9   : > { %5664 = vmatpush.bf16.msra.mxu3 %v10381_v51 }
 0x7ca   : > { %5626 = vmatpush.bf16.msra.mxu2 %v10189_v54 }
 0x7cc   : > { %5646 = vmatpush.bf16.msrb.mxu1 %v10273_v35  ;;  %v10368_v45 = vld [vmem:[#allocation2 + $0x188] sm:$0xf] }
 0x7cd   : > { %v11404_v2 = vld [vmem:[#allocation2 + $0x190] sm:$0xf0] }
 0x7ce   : > { %5627 = vmatpush.bf16.msra.mxu2 %v10177_v37  ;;  %v10369_v42 = vor.u32 %v11404_v2, %v10368_v45  ;;  %v5693_v37 = vunpack.c.h.bf16 %v12771_v48 }
 0x7cf   : > { %5647 = vmatmul.bf16.vlgmr.msrb.gmra.mxu1 %v13600_v57 }
 0x7d0   : > { %5665 = vmatpush.bf16.msra.mxu3 %v10369_v42 }
 0x7d1   : > { %5628 = vmatmul.bf16.vlgmr.msra.gmra.mxu2 %v13542_v47 }
 0x7d3   : > { %10386 = vmatmul.msk.bf16.vlgmr.msra.gmra.mxu3 %vm1950_vm14, %v13603_v38 }
 0x7d8   : > { %10385 = vmatmul.msk.bf16.gmra.mxu0 %vm1950_vm14, %v13641_v1 }
 0x7df   : > { %5652 = vmatmul.bf16.gmra.mxu1 %v13639_v39  ;;  %v5165_v39 = vpop.permute.xlu1 %5164 }
 0x7e1   : > { %5633 = vmatmul.bf16.gmra.mxu2 %v13574_v19 }
 0x7e3   : > { %10387 = vmatmul.msk.bf16.gmra.mxu3 %vm1950_vm14, %v13641_v1 }
 0x80f   : > { %v5572_v29 = vpop.f32.mrf.mxu1 }
 0x810   : > { %v5573_v62 = vadd.f32 %v5572_v29, %v5165_v39 }
 0x814   : > { %v5515_v16 = vpop.f32.mrf.mxu3 }
 0x815   : > { %v5516_v1 = vadd.f32 %v5515_v16, %v5165_v39 }
 0x817   : > { %v5574_v38 = vpop.f32.mrf.mxu1 }
 0x818   : > { %v5575_v55 = vadd.f32 %v5574_v38, %v13679_v22 }
 0x81c   : > { %v5517_v61 = vpop.f32.mrf.mxu3 }
 0x81d   : > { %v5518_v52 = vadd.f32 %v5517_v61, %v13679_v22 }
 0x81f   : > { %v5577_v19 = vpop.f32.mrf.mxu1 }
 0x820   : > { %v5578_v2 = vadd.f32 %v5577_v19, %v13677_v63 }
 0x824   : > { %v5520_v34 = vpop.f32.mrf.mxu3 }
 0x825   : > { %v5534_v57 = vpop.f32.mrf.mxu0  ;;  %v5521_v50 = vadd.f32 %v5520_v34, %v13677_v63 }
 0x826   : > { %v5535_v4 = vadd.f32 %v5534_v57, %v5516_v1  ;;  %v5695_v1 = vunpack.c.l.bf16 %v12794_v3 }
 0x827   : > { %v5579_v49 = vpop.f32.mrf.mxu1 }
 0x82a   : > { %v5553_v44 = vpop.f32.mrf.mxu2 }
 0x82b   : > { %v5554_v0 = vadd.f32 %v5553_v44, %v5535_v4  ;;  %v5696_v4 = vunpack.c.h.bf16 %v12794_v3 }
 0x82c   : > { %v13675_v25 = vpop.f32.mrf.mxu3 }
 0x82d   : > { %v5536_v47 = vpop.f32.mrf.mxu0  ;;  %v5677_v8 = vmul.f32 %v5554_v0, %v11889_v18 }
 0x82e   : > { %v5537_v13 = vadd.f32 %v5536_v47, %v5518_v52 }
 0x82f   : > { %v5701_v17 = vadd.f32 %v5689_v15, %v5677_v8 }
 0x832   : > { %v5555_v9 = vpop.f32.mrf.mxu2 }
 0x833   : > { %v5556_v23 = vadd.f32 %v5555_v9, %v5537_v13  ;;  %v5691_v13 = vunpack.c.l.bf16 %v12828_v11  ;;  %v5699_v11 = vunpack.c.h.bf16 %v12808_v10 }
 0x834   : > { %v5591_v58 = vpop.f32.mrf.mxu3 }
 0x835   : > { %v5539_v46 = vpop.f32.mrf.mxu0  ;;  %v5592_v14 = vadd.f32 %v5591_v58, %v5573_v62  ;;  %v5680_v5 = vmul.f32 %v5556_v23, %v11889_v18  ;;  %v13701_v58 = vpop.permute.xlu0 %5179 }
 0x836   : > { %v5540_v40 = vadd.f32 %v5539_v46, %v5521_v50  ;;  %v5580_v3 = vadd.f32 %v5579_v49, %v13701_v58 }
 0x837   : > { %v5704_v42 = vadd.f32 %v5692_v53, %v5680_v5 }
 0x83a   : > { %v5558_v32 = vpop.f32.mrf.mxu2 }
 0x83b   : > { %v5559_v45 = vadd.f32 %v5558_v32, %v5540_v40 }
 0x83c   : > { %v5593_v12 = vpop.f32.mrf.mxu3 }
 0x83d   : > { %v5541_v26 = vpop.f32.mrf.mxu0  ;;  %v5594_v59 = vadd.f32 %v5593_v12, %v5575_v55  ;;  %v5683_v57 = vmul.f32 %v5559_v45, %v11889_v18  ;;  %v5523_v12 = vadd.f32 %v13675_v25, %v13701_v58 }
 0x83f   : > { %v5707_v8 = vadd.f32 %v5695_v1, %v5683_v57 }
 0x842   : > { %v5560_v60 = vpop.f32.mrf.mxu2 }
 0x844   : > { %v5596_v30 = vpop.f32.mrf.mxu3 }
 0x845   : > { %v5610_v28 = vpop.f32.mrf.mxu0  ;;  %v5597_v61 = vadd.f32 %v5596_v30, %v5578_v2 }
 0x846   : > { %v5611_v6 = vadd.f32 %v5610_v28, %v5592_v14  ;;  %v5542_v28 = vadd.f32 %v5541_v26, %v5523_v12 }
 0x848   : > { %v5678_v41 = vmul.f32 %v5611_v6, %v11891_v20  ;;  %v5561_v25 = vadd.f32 %v5560_v60, %v5542_v28 }
 0x84a   : > { %v5702_v31 = vadd.f32 %v5690_v56, %v5678_v41  ;;  %v5686_v49 = vmul.f32 %v5561_v25, %v11889_v18 }
 0x84c   : > { %v13687_v43 = vpack.c.bf16 %v5702_v31, %v5701_v17  ;;  %v5598_v24 = vpop.f32.mrf.mxu3  ;;  %v5648_v7 = vpop.f32.mrf.mxu1 }
 0x84d   : > { %v5612_v51 = vpop.f32.mrf.mxu0  ;;  %v5599_v41 = vadd.f32 %v5598_v24, %v5580_v3 }
 0x84e   : > { %6017 = vst [vmem:[#allocation2 + $0xc0] sm:$0xff] %v13687_v43  ;;  %v5613_v54 = vadd.f32 %v5612_v51, %v5594_v59  ;;  %v5753_v29 = vunpack.c.l.b16 %v13687_v43  ;;  %v5754_v47 = vunpack.c.h.b16 %v13687_v43  ;;  %v5698_v51 = vunpack.c.l.bf16 %v12808_v10 }
 0x84f   : > { %v5694_v10 = vunpack.c.l.bf16 %v12841_v27 }
 0x850   : > { %v5681_v35 = vmul.f32 %v5613_v54, %v11891_v20 }
 0x852   : > { %v5705_v16 = vadd.f32 %v5693_v37, %v5681_v35 }
 0x854   : > { %v13696_v34 = vpack.c.bf16 %v5705_v16, %v5704_v42  ;;  %v5629_v44 = vpop.f32.mrf.mxu2  ;;  %v5650_v52 = vpop.f32.mrf.mxu1 }
 0x855   : > { %v5615_v38 = vpop.f32.mrf.mxu0  ;;  %v5630_v9 = vadd.f32 %v5629_v44, %v5165_v39 }
 0x856   : > { %v5755_v48 = vunpack.c.l.b16 %v13696_v34  ;;  %v5756_v46 = vunpack.c.h.b16 %v13696_v34  ;;  %6019 = vst [vmem:[#allocation2 + $0xcc] sm:$0xff] %v13696_v34  ;;  %v5616_v19 = vadd.f32 %v5615_v38, %v5597_v61  ;;  %v5667_v62 = vpop.f32.mrf.mxu3 }
 0x857   : > { %v5649_v30 = vadd.f32 %v5648_v7, %v5630_v9 }
 0x858   : > { %v13710_v0 = vpack.c.b16 %v5755_v48, %v5753_v29  ;;  %v13712_v32 = vpack.c.b16 %v5756_v46, %v5754_v47  ;;  %v5684_v14 = vmul.f32 %v5616_v19, %v11891_v20  ;;  %v5697_v19 = vunpack.c.l.bf16 %v12858_v36 }
 0x859   : > { %v5668_v6 = vadd.f32 %v5667_v62, %v5649_v30 }
 0x85a   : > { %v5708_v39 = vadd.f32 %v5696_v4, %v5684_v14  ;;  %5959 = vrot.lane.b32.xlu2 %v13712_v32, %s15088_s0  ;;  %6153 = vrot.lane.b32.xlu0 %v13710_v0, %s15089_s1 }
 0x85b   : > { %5957 = vrot.lane.b32.xlu1 %v13710_v0, %s15088_s0  ;;  %v5679_v26 = vmul.f32 %v5668_v6, %v11897_v33 }
 0x85c   : > { %v13722_v15 = vpack.c.bf16 %v5708_v39, %v5707_v8  ;;  %v5631_v56 = vpop.f32.mrf.mxu2  ;;  %v5653_v24 = vpop.f32.mrf.mxu1 }
 0x85d   : > { %v5617_v55 = vpop.f32.mrf.mxu0  ;;  %v5703_v17 = vadd.f32 %v5691_v13, %v5679_v26  ;;  %v5632_v23 = vadd.f32 %v5631_v56, %v13679_v22  ;;  %v5710_v22 = vadd.f32 %v5698_v51, %v5686_v49 }
 0x85e   : > { %6021 = vst [vmem:[#allocation2 + $0xd8] sm:$0xff] %v13722_v15  ;;  %v5618_v31 = vadd.f32 %v5617_v55, %v5599_v41  ;;  %v5669_v59 = vpop.f32.mrf.mxu3  ;;  %v5757_v2 = vunpack.c.l.b16 %v13722_v15  ;;  %v5758_v42 = vunpack.c.h.b16 %v13722_v15 }
 0x85f   : > { %v13729_v50 = vpack.c.bf16 %v5703_v17, %v5703_v17  ;;  %v5651_v60 = vadd.f32 %v5650_v52, %v5632_v23 }
 0x860   : > { %v5687_v5 = vmul.f32 %v5618_v31, %v11891_v20 }
 0x861   : > { %6018 = vst.msk [vmem:[#allocation2 + $0xc8] sm:$0xf] %vm370_vm0, %v13729_v50  ;;  %v5670_v54 = vadd.f32 %v5669_v59, %v5651_v60 }
 0x862   : > { %5895 = vrot.lane.b32.xlu2 %v13712_v32, %s15085_s14  ;;  %6089 = vrot.lane.b32.xlu0 %v13710_v0, %s15086_s25  ;;  %v5711_v40 = vadd.f32 %v5699_v11, %v5687_v5 }
 0x863   : > { %5893 = vrot.lane.b32.xlu1 %v13710_v0, %s15085_s14  ;;  %v5682_v7 = vmul.f32 %v5670_v54, %v11897_v33 }
 0x864   : > { %v13744_v53 = vpack.c.bf16 %v5711_v40, %v5710_v22  ;;  %v5634_v35 = vpop.f32.mrf.mxu2  ;;  %v5655_v1 = vpop.f32.mrf.mxu1 }
 0x865   : > { %v5706_v37 = vadd.f32 %v5694_v10, %v5682_v7  ;;  %v5635_v45 = vadd.f32 %v5634_v35, %v13677_v63  ;;  %v5739_v63 = vunpack.c.l.b16 %v13729_v50 }
 0x866   : > { %v5759_v16 = vunpack.c.l.b16 %v13744_v53  ;;  %v5760_v61 = vunpack.c.h.b16 %v13744_v53  ;;  %6023 = vst [vmem:[#allocation2 + $0xe4] sm:$0xff] %v13744_v53  ;;  %v5672_v57 = vpop.f32.mrf.mxu3 }
 0x867   : > { %v13752_v29 = vpack.c.bf16 %v5706_v37, %v5706_v37  ;;  %v5654_v27 = vadd.f32 %v5653_v24, %v5635_v45 }
 0x868   : > { %v13754_v47 = vpack.c.b16 %v5759_v16, %v5757_v2  ;;  %v13756_v44 = vpack.c.b16 %v5760_v61, %v5758_v42 }
 0x869   : > { %v5740_v38 = vunpack.c.l.b16 %v13752_v29  ;;  %6020 = vst.msk [vmem:[#allocation2 + $0xd4] sm:$0xf] %vm370_vm0, %v13752_v29  ;;  %v5673_v48 = vadd.f32 %v5672_v57, %v5654_v27 }
 0x86a   : > { %5831 = vrot.lane.b32.xlu2 %v13712_v32, %s15087_s23  ;;  %6159 = vrot.lane.b32.xlu0 %v13754_v47, %s15089_s1 }
 0x86b   : > { %5829 = vrot.lane.b32.xlu1 %v13710_v0, %s15087_s23  ;;  %v13768_v46 = vpack.c.b16 %v5740_v38, %v5739_v63  ;;  %v5685_v9 = vmul.f32 %v5673_v48, %v11897_v33 }
 0x86c   : > { %v5636_v12 = vpop.f32.mrf.mxu2 }
 0x86d   : > { %v5709_v4 = vadd.f32 %v5697_v19, %v5685_v9  ;;  %v5637_v62 = vadd.f32 %v5636_v12, %v13701_v58  ;;  %v5700_v58 = vunpack.c.l.bf16 %v12870_v21 }
 0x86e   : > { %v5674_v14 = vpop.f32.mrf.mxu3 }
 0x86f   : > { %v13773_v30 = vpack.c.bf16 %v5709_v4, %v5709_v4  ;;  %v5656_v28 = vadd.f32 %v5655_v1, %v5637_v62 }
 0x871   : > { %6022 = vst.msk [vmem:[#allocation2 + $0xe0] sm:$0xf] %vm370_vm0, %v13773_v30  ;;  %v5675_v52 = vadd.f32 %v5674_v14, %v5656_v28  ;;  %v5741_v6 = vunpack.c.l.b16 %v13773_v30 }
 0x872   : > { %5767 = vrot.lane.b32.xlu2 %v13712_v32, %s15082_s24  ;;  %6095 = vrot.lane.b32.xlu0 %v13754_v47, %s15086_s25 }
 0x873   : > { %5765 = vrot.lane.b32.xlu1 %v13710_v0, %s15082_s24  ;;  %v5688_v36 = vmul.f32 %v5675_v52, %v11897_v33 }
 0x875   : > { %v5712_v8 = vadd.f32 %v5700_v58, %v5688_v36 }
 0x877   : > { %v13785_v39 = vpack.c.bf16 %v5712_v8, %v5712_v8 }
 0x879   : > { %v5742_v3 = vunpack.c.l.b16 %v13785_v39  ;;  %6024 = vst.msk [vmem:[#allocation2 + $0xec] sm:$0xf] %vm370_vm0, %v13785_v39 }
 0x87a   : > { %5965 = vrot.lane.b32.xlu2 %v13756_v44, %s15088_s0  ;;  %6031 = vrot.lane.b32.xlu0 %v13754_v47, %s15083_s26 }
 0x87b   : > { %6155 = vrot.lane.b32.xlu1 %v13712_v32, %s15089_s1  ;;  %v13797_v21 = vpack.c.b16 %v5742_v3, %v5741_v6 }
 0x882   : > { %5901 = vrot.lane.b32.xlu2 %v13756_v44, %s15085_s14  ;;  %5953 = vrot.lane.b32.xlu0 %v13768_v46, %s15084_s19 }
 0x883   : > { %6091 = vrot.lane.b32.xlu1 %v13712_v32, %s15086_s25 }
 0x88a   : > { %5837 = vrot.lane.b32.xlu2 %v13756_v44, %s15087_s23  ;;  %5889 = vrot.lane.b32.xlu0 %v13768_v46, %s15077_s21 }
 0x88b   : > { %5963 = vrot.lane.b32.xlu1 %v13754_v47, %s15088_s0 }
 0x892   : > { %5773 = vrot.lane.b32.xlu2 %v13756_v44, %s15082_s24  ;;  %5825 = vrot.lane.b32.xlu0 %v13768_v46, %s15078_s22 }
 0x893   : > { %5899 = vrot.lane.b32.xlu1 %v13754_v47, %s15085_s14 }
 0x89a   : > { %6157 = vrot.lane.b32.xlu2 %v13768_v46, %s15089_s1  ;;  %5745 = vrot.lane.b32.xlu0 %v13768_v46, %s15079_s30 }
 0x89b   : > { %5835 = vrot.lane.b32.xlu1 %v13754_v47, %s15087_s23 }
 0x8a2   : > { %6093 = vrot.lane.b32.xlu2 %v13768_v46, %s15086_s25  ;;  %5955 = vrot.lane.b32.xlu0 %v13797_v21, %s15084_s19 }
 0x8a3   : > { %5771 = vrot.lane.b32.xlu1 %v13754_v47, %s15082_s24 }
 0x8aa   : > { %6029 = vrot.lane.b32.xlu2 %v13768_v46, %s15083_s26  ;;  %5891 = vrot.lane.b32.xlu0 %v13797_v21, %s15077_s21 }
 0x8ab   : > { %6161 = vrot.lane.b32.xlu1 %v13756_v44, %s15089_s1 }
 0x8b2   : > { %6219 = vrot.lane.b32.xlu2 %v13712_v32, %s15080_s9  ;;  %5827 = vrot.lane.b32.xlu0 %v13797_v21, %s15078_s22 }
 0x8b3   : > { %6097 = vrot.lane.b32.xlu1 %v13756_v44, %s15086_s25 }
 0x8b4   : > { %v13841_v25 = vpop.permute.xlu2 %5959 }
 0x8ba   : > { %6163 = vrot.lane.b32.xlu2 %v13797_v21, %s15089_s1  ;;  %5747 = vrot.lane.b32.xlu0 %v13797_v21, %s15079_s30 }
 0x8bb   : > { %6033 = vrot.lane.b32.xlu1 %v13756_v44, %s15083_s26 }
 0x8bc   : > { %v13849_v26 = vpop.permute.xlu2 %5895 }
 0x8c2   : > { %6099 = vrot.lane.b32.xlu2 %v13797_v21, %s15086_s25  ;;  %6025 = vrot.lane.b32.xlu0 %v13710_v0, %s15083_s26 }
 0x8c3   : > { %6027 = vrot.lane.b32.xlu1 %v13712_v32, %s15083_s26 }
 0x8c4   : > { %v13857_v13 = vpop.permute.xlu2 %5831 }
 0x8ca   : > { %6035 = vrot.lane.b32.xlu2 %v13797_v21, %s15083_s26  ;;  %6223 = vrot.lane.b32.xlu0 %v13754_v47, %s15080_s9 }
 0x8cb   : > { %6225 = vrot.lane.b32.xlu1 %v13756_v44, %s15080_s9 }
 0x8cc   : > { %v13865_v41 = vpop.permute.xlu2 %5767  ;;  %v6154_v56 = vpop.permute.xlu0 %6153 }
 0x8cd   : > { %v5958_v55 = vpop.permute.xlu1 %5957 }
 0x8ce   : > { %v5969_v24 = vsel %vm450_vm9, %v5958_v55, %v13841_v25 }
 0x8cf   : > { %v5982_v57 = vunpack.c.l.b16 %v5969_v24  ;;  %v5985_v27 = vunpack.c.h.b16 %v5969_v24 }
 0x8d2   : > { %6227 = vrot.lane.b32.xlu2 %v13797_v21, %s15080_s9  ;;  %6171 = vrot.lane.b32.xlu0 %v13754_v47, %s15081_s11 }
 0x8d3   : > { %6217 = vrot.lane.b32.xlu1 %v13710_v0, %s15080_s9 }
 0x8d4   : > { %v13873_v32 = vpop.permute.xlu2 %5965  ;;  %v6090_v17 = vpop.permute.xlu0 %6089 }
 0x8d5   : > { %v5894_v23 = vpop.permute.xlu1 %5893 }
 0x8d6   : > { %v5905_v1 = vsel %vm416_vm10, %v5894_v23, %v13849_v26 }
 0x8d7   : > { %v5918_v6 = vunpack.c.l.b16 %v5905_v1 }
 0x8da   : > { %6169 = vrot.lane.b32.xlu2 %v13710_v0, %s15081_s11  ;;  %6221 = vrot.lane.b32.xlu0 %v13768_v46, %s15080_s9 }
 0x8db   : > { %6107 = vrot.lane.b32.xlu1 %v13754_v47, %s15074_s16 }
 0x8dc   : > { %v13881_v49 = vpop.permute.xlu2 %5901  ;;  %v13883_v31 = vpop.permute.xlu0 %6159 }
 0x8dd   : > { %v13885_v59 = vpop.permute.xlu1 %5829 }
 0x8e2   : > { %5903 = vrot.lane.b32.xlu2 %v13797_v21, %s15085_s14  ;;  %5961 = vrot.lane.b32.xlu0 %v13768_v46, %s15088_s0 }
 0x8e3   : > { %5967 = vrot.lane.b32.xlu1 %v13797_v21, %s15088_s0 }
 0x8e4   : > { %v13893_v60 = vpop.permute.xlu2 %5837  ;;  %v13895_v51 = vpop.permute.xlu0 %6095 }
 0x8e5   : > { %v13897_v5 = vpop.permute.xlu1 %5765 }
 0x8ea   : > { %6043 = vrot.lane.b32.xlu2 %v13754_v47, %s15075_s17  ;;  %6105 = vrot.lane.b32.xlu0 %v13710_v0, %s15074_s16 }
 0x8eb   : > { %5897 = vrot.lane.b32.xlu1 %v13768_v46, %s15085_s14 }
 0x8ec   : > { %v13905_v11 = vpop.permute.xlu2 %5773  ;;  %v13907_v54 = vpop.permute.xlu0 %6031 }
 0x8ed   : > { %v6156_v22 = vpop.permute.xlu1 %6155 }
 0x8ee   : > { %v6165_v40 = vsel %vm554_vm1, %v6154_v56, %v6156_v22  ;;  %v10399_v56 = vld [vmem:[%s15027_s5 + $0x98] sm:$0xff] }
 0x8ef   : > { %v6181_v10 = vunpack.c.l.b16 %v6165_v40  ;;  %v6184_v2 = vunpack.c.h.b16 %v6165_v40 }
 0x8f2   : > { %5833 = vrot.lane.b32.xlu2 %v13768_v46, %s15087_s23  ;;  %5839 = vrot.lane.b32.xlu0 %v13797_v21, %s15087_s23 }
 0x8f3   : > { %6041 = vrot.lane.b32.xlu1 %v13710_v0, %s15075_s17 }
 0x8f4   : > { %v13918_v7 = vpop.permute.xlu2 %6157  ;;  %v5954_v37 = vpop.permute.xlu0 %5953 }
 0x8f5   : > { %v6166_v35 = vsel %vm554_vm1, %v6156_v22, %v13918_v7  ;;  %v6092_v45 = vpop.permute.xlu1 %6091  ;;  %v5975_v61 = vsel %vm450_vm9, %v5954_v37, %v5958_v55  ;;  %v10398_v22 = vld [vmem:[%s15027_s5 + $0x90] sm:$0xff] }
 0x8f6   : > { %v6182_v42 = vunpack.c.l.b16 %v6166_v35  ;;  %v6185_v16 = vunpack.c.h.b16 %v6166_v35  ;;  %v5981_v44 = vunpack.c.l.b16 %v5975_v61  ;;  %v5984_v63 = vunpack.c.h.b16 %v5975_v61 }
 0x8f7   : > { %v6101_v12 = vsel %vm520_vm3, %v6090_v17, %v6092_v45 }
 0x8f8   : > { %v6193_v38 = vpack.c.b16 %v6182_v42, %v6181_v10  ;;  %v6195_v48 = vpack.c.b16 %v6185_v16, %v6184_v2  ;;  %v5993_v9 = vpack.c.b16 %v5982_v57, %v5981_v44  ;;  %v5995_v19 = vpack.c.b16 %v5985_v27, %v5984_v63  ;;  %v10397_v57 = vld [vmem:[%s15027_s5 + $0x88] sm:$0xff] }
 0x8f9   : > { %v6117_v62 = vunpack.c.l.b16 %v6101_v12  ;;  %v6120_v52 = vunpack.c.h.b16 %v6101_v12 }
 0x8fa   : > { %6209 = vst [vmem:[#allocation2 + $0x150] sm:$0xff] %v6193_v38  ;;  %6235 = vrot.lane.b32.xlu2 %v13754_v47, %s15076_s29  ;;  %5775 = vrot.lane.b32.xlu0 %v13797_v21, %s15082_s24 }
 0x8fb   : > { %6211 = vst [vmem:[#allocation2 + $0x15c] sm:$0xff] %v6195_v48  ;;  %5769 = vrot.lane.b32.xlu1 %v13768_v46, %s15082_s24  ;;  %v5921_v46 = vunpack.c.h.b16 %v5905_v1 }
 0x8fc   : > { %6009 = vst [vmem:[#allocation2 + $0x90] sm:$0xff] %v5993_v9  ;;  %v13932_v4 = vpop.permute.xlu2 %6093  ;;  %v5890_v28 = vpop.permute.xlu0 %5889 }
 0x8fd   : > { %6011 = vst [vmem:[#allocation2 + $0x9c] sm:$0xff] %v5995_v19  ;;  %v6102_v14 = vsel %vm520_vm3, %v6092_v45, %v13932_v4  ;;  %v5964_v47 = vpop.permute.xlu1 %5963  ;;  %v5911_v8 = vsel %vm416_vm10, %v5890_v28, %v5894_v23  ;;  %v5841_v23 = vsel %vm382_vm11, %v13885_v59, %v13857_v13 }
 0x8fe   : > { %v6118_v36 = vunpack.c.l.b16 %v6102_v14  ;;  %v6121_v58 = vunpack.c.h.b16 %v6102_v14  ;;  %v5917_v3 = vunpack.c.l.b16 %v5911_v8  ;;  %v5920_v21 = vunpack.c.h.b16 %v5911_v8 }
 0x8ff   : > { %v5854_v2 = vunpack.c.l.b16 %v5841_v23  ;;  %v5857_v42 = vunpack.c.h.b16 %v5841_v23 }
 0x900   : > { %v6129_v55 = vpack.c.b16 %v6118_v36, %v6117_v62  ;;  %v6131_v17 = vpack.c.b16 %v6121_v58, %v6120_v52  ;;  %v5929_v40 = vpack.c.b16 %v5918_v6, %v5917_v3  ;;  %v5931_v24 = vpack.c.b16 %v5921_v46, %v5920_v21 }
 0x901   : > { %v5971_v52 = vsel %vm450_vm9, %v5964_v47, %v13873_v32 }
 0x902   : > { %6145 = vst [vmem:[#allocation2 + $0x120] sm:$0xff] %v6129_v55  ;;  %6370 = vperm.xlu2 %11611, %v10399_v56   ;;  %6233 = vrot.lane.b32.xlu0 %v13710_v0, %s15076_s29  ;;  %v10396_v0 = vld [vmem:[%s15027_s5 + $0x80] sm:$0xff]  ;;  %v5988_v46 = vunpack.c.l.b16 %v5971_v52 }
 0x903   : > { %6147 = vst [vmem:[#allocation2 + $0x12c] sm:$0xff] %v6131_v17  ;;  %6365 = vperm.xlu1 %11613, %v10398_v22  }
 0x904   : > { %5945 = vst [vmem:[#allocation2 + $0x60] sm:$0xff] %v5929_v40  ;;  %v13948_v10 = vpop.permute.xlu2 %6029  ;;  %v5826_v35 = vpop.permute.xlu0 %5825 }
 0x905   : > { %5947 = vst [vmem:[#allocation2 + $0x6c] sm:$0xff] %v5931_v24  ;;  %v5900_v37 = vpop.permute.xlu1 %5899  ;;  %v5847_v45 = vsel %vm382_vm11, %v5826_v35, %v13885_v59  ;;  %v5777_v59 = vsel %vm347_vm12, %v13897_v5, %v13865_v41 }
 0x906   : > { %v5853_v16 = vunpack.c.l.b16 %v5847_v45  ;;  %v5856_v61 = vunpack.c.h.b16 %v5847_v45  ;;  %v5790_v19 = vunpack.c.l.b16 %v5777_v59  ;;  %v5793_v12 = vunpack.c.h.b16 %v5777_v59 }
 0x907   : > { %v5907_v17 = vsel %vm416_vm10, %v5900_v37, %v13881_v49 }
 0x908   : > { %v5865_v27 = vpack.c.b16 %v5854_v2, %v5853_v16  ;;  %v5867_v44 = vpack.c.b16 %v5857_v42, %v5856_v61  ;;  %v5924_v40 = vunpack.c.l.b16 %v5907_v17  ;;  %v5927_v35 = vunpack.c.h.b16 %v5907_v17 }
 0x90a   : > { %5881 = vst [vmem:[#allocation2 + $0x30] sm:$0xff] %v5865_v27  ;;  %6355 = vperm.xlu0 %11612, %v10396_v0  }
 0x90b   : > { %6360 = vperm.xlu1 %11613, %v10397_v57   ;;  %5883 = vst [vmem:[#allocation2 + $0x3c] sm:$0xff] %v5867_v44 }
 0x90c   : > { %v13961_v63 = vpop.permute.xlu2 %6219  ;;  %v5746_v38 = vpop.permute.xlu0 %5745 }
 0x90d   : > { %v13963_v48 = vpop.permute.xlu1 %5835  ;;  %v5783_v9 = vsel %vm347_vm12, %v5746_v38, %v13897_v5  ;;  %v5991_v5 = vunpack.c.h.b16 %v5971_v52  ;;  %v10498_v52 = vld [vmem:[#allocation2 + $0x90] sm:$0xf] }
 0x90e   : > { %v5789_v1 = vunpack.c.l.b16 %v5783_v9  ;;  %v5792_v62 = vunpack.c.h.b16 %v5783_v9  ;;  %v5843_v9 = vsel %vm382_vm11, %v13963_v48, %v13893_v60 }
 0x910   : > { %v5801_v14 = vpack.c.b16 %v5790_v19, %v5789_v1  ;;  %v5803_v28 = vpack.c.b16 %v5793_v12, %v5792_v62 }
 0x912   : > { %5817 = vst [vmem:[#allocation2] sm:$0xff] %v5801_v14 }
 0x913   : > { %5819 = vst [vmem:[#allocation2 + $0xc] sm:$0xff] %v5803_v28 }
 0x914   : > { %v13969_v36 = vpop.permute.xlu2 %6163  ;;  %v5956_v58 = vpop.permute.xlu0 %5955 }
 0x915   : > { %v13971_v8 = vpop.permute.xlu1 %5771  ;;  %v5978_v6 = vsel %vm450_vm9, %v5956_v58, %v5964_v47  ;;  %v11432_v58 = vld [vmem:[#allocation2 + $0x94] sm:$0xf] }
 0x916   : > { %v5987_v3 = vunpack.c.l.b16 %v5978_v6  ;;  %v5990_v21 = vunpack.c.h.b16 %v5978_v6  ;;  %v5860_v6 = vunpack.c.l.b16 %v5843_v9 }
 0x918   : > { %v5997_v56 = vpack.c.b16 %v5988_v46, %v5987_v3  ;;  %v5999_v55 = vpack.c.b16 %v5991_v5, %v5990_v21  ;;  %v5863_v46 = vunpack.c.h.b16 %v5843_v9  ;;  %v11433_v21 = vld [vmem:[#allocation2 + $0x98] sm:$0xf0] }
 0x91a   : > { %6013 = vst [vmem:[#allocation2 + $0xa8] sm:$0xff] %v5997_v56  ;;  %v10500_v56 = vld [vmem:[#allocation2 + $0x9c] sm:$0xf0] }
 0x91b   : > { %6015 = vst [vmem:[#allocation2 + $0xb4] sm:$0xff] %v5999_v55 }
 0x91c   : > { %v13976_v22 = vpop.permute.xlu2 %6099  ;;  %v5892_v24 = vpop.permute.xlu0 %5891 }
 0x91d   : > { %v6162_v23 = vpop.permute.xlu1 %6161  ;;  %v5914_v45 = vsel %vm416_vm10, %v5892_v24, %v5900_v37 }
 0x91e   : > { %v6167_v47 = vsel %vm554_vm1, %v13883_v31, %v6162_v23  ;;  %v6168_v2 = vsel %vm554_vm1, %v6162_v23, %v13969_v36  ;;  %v5923_v42 = vunpack.c.l.b16 %v5914_v45  ;;  %v5926_v16 = vunpack.c.h.b16 %v5914_v45 }
 0x91f   : > { %v6187_v61 = vunpack.c.l.b16 %v6167_v47  ;;  %v6188_v0 = vunpack.c.l.b16 %v6168_v2  ;;  %v6190_v57 = vunpack.c.h.b16 %v6167_v47  ;;  %v6191_v27 = vunpack.c.h.b16 %v6168_v2 }
 0x920   : > { %v5933_v44 = vpack.c.b16 %v5924_v40, %v5923_v42  ;;  %v5935_v59 = vpack.c.b16 %v5927_v35, %v5926_v16  ;;  %v10499_v42 = vor.u32 %v11433_v21, %v10498_v52  ;;  %v10503_v16 = vor.u32 %v11432_v58, %v10500_v56 }
 0x921   : > { %v6197_v38 = vpack.c.b16 %v6188_v0, %v6187_v61  ;;  %v6199_v37 = vpack.c.b16 %v6191_v27, %v6190_v57  ;;  %v10510_v19 = vld [vmem:[#allocation2 + $0xa8] sm:$0xf]  ;;  %v11435_v12 = vld [vmem:[#allocation2 + $0xac] sm:$0xf]  ;;  %v5779_v27 = vsel %vm347_vm12, %v13971_v8, %v13905_v11 }
 0x922   : > { %5949 = vst [vmem:[#allocation2 + $0x78] sm:$0xff] %v5933_v44  ;;  %v11436_v31 = vld [vmem:[#allocation2 + $0xb0] sm:$0xf0]  ;;  %v10512_v1 = vld [vmem:[#allocation2 + $0xb4] sm:$0xf0]  ;;  %v5799_v52 = vunpack.c.h.b16 %v5779_v27 }
 0x923   : > { %5951 = vst [vmem:[#allocation2 + $0x84] sm:$0xff] %v5935_v59  ;;  %v10511_v14 = vor.u32 %v11436_v31, %v10510_v19  ;;  %v10515_v28 = vor.u32 %v11435_v12, %v10512_v1 }
 0x924   : > { %v13986_v62 = vpop.permute.xlu2 %6035  ;;  %6213 = vst [vmem:[#allocation2 + $0x168] sm:$0xff] %v6197_v38  ;;  %v5828_v5 = vpop.permute.xlu0 %5827  ;;  %v11427_v38 = vld [vmem:[#allocation2 + $0x68] sm:$0xf0] }
 0x925   : > { %v6098_v3 = vpop.permute.xlu1 %6097  ;;  %6215 = vst [vmem:[#allocation2 + $0x174] sm:$0xff] %v6199_v37  ;;  %v5850_v55 = vsel %vm382_vm11, %v5828_v5, %v13963_v48  ;;  %6697 = vmatpush.bf16.msra.mxu0 %v10511_v14  ;;  %6754 = vmatpush.bf16.msrb.mxu3 %v10515_v28  ;;  %v10474_v48 = vld [vmem:[#allocation2 + $0x60] sm:$0xf]  ;;  %v11426_v14 = vld [vmem:[#allocation2 + $0x64] sm:$0xf]  ;;  %v5796_v28 = vunpack.c.l.b16 %v5779_v27 }
 0x926   : > { %v6103_v17 = vsel %vm520_vm3, %v13895_v51, %v6098_v3  ;;  %v6104_v40 = vsel %vm520_vm3, %v6098_v3, %v13976_v22  ;;  %v5859_v24 = vunpack.c.l.b16 %v5850_v55  ;;  %v5862_v23 = vunpack.c.h.b16 %v5850_v55  ;;  %v10476_v3 = vld [vmem:[#allocation2 + $0x6c] sm:$0xf0] }
 0x927   : > { %v6123_v35 = vunpack.c.l.b16 %v6103_v17  ;;  %v6124_v45 = vunpack.c.l.b16 %v6104_v40  ;;  %v6126_v47 = vunpack.c.h.b16 %v6103_v17  ;;  %v6127_v2 = vunpack.c.h.b16 %v6104_v40 }
 0x928   : > { %v5869_v61 = vpack.c.b16 %v5860_v6, %v5859_v24  ;;  %v5871_v0 = vpack.c.b16 %v5863_v46, %v5862_v23  ;;  %v10475_v5 = vor.u32 %v11427_v38, %v10474_v48 }
 0x929   : > { %v6133_v57 = vpack.c.b16 %v6124_v45, %v6123_v35  ;;  %v6135_v51 = vpack.c.b16 %v6127_v2, %v6126_v47  ;;  %6698 = vmatpush.bf16.msra.mxu0 %v10499_v42  ;;  %6755 = vmatpush.bf16.msrb.mxu3 %v10503_v16  ;;  %v10486_v44 = vld [vmem:[#allocation2 + $0x78] sm:$0xf]  ;;  %v11429_v59 = vld [vmem:[#allocation2 + $0x7c] sm:$0xf]  ;;  %v10594_v35 = vld [vmem:[#allocation2 + $0x150] sm:$0xf]  ;;  %v10479_v16 = vor.u32 %v11426_v14, %v10476_v3 }
 0x92a   : > { %5885 = vst [vmem:[#allocation2 + $0x48] sm:$0xff] %v5869_v61  ;;  %v11430_v9 = vld [vmem:[#allocation2 + $0x80] sm:$0xf0]  ;;  %v10488_v37 = vld [vmem:[#allocation2 + $0x84] sm:$0xf0] }
 0x92b   : > { %5887 = vst [vmem:[#allocation2 + $0x54] sm:$0xff] %v5871_v0  ;;  %v10487_v12 = vor.u32 %v11430_v9, %v10486_v44  ;;  %v10606_v31 = vld [vmem:[#allocation2 + $0x168] sm:$0xf]  ;;  %v10491_v1 = vor.u32 %v11429_v59, %v10488_v37  ;;  %v11457_v45 = vld [vmem:[#allocation2 + $0x158] sm:$0xf0] }
 0x92c   : > { %v13997_v19 = vpop.permute.xlu2 %6227  ;;  %6149 = vst [vmem:[#allocation2 + $0x138] sm:$0xff] %v6133_v57  ;;  %v5748_v58 = vpop.permute.xlu0 %5747  ;;  %v11460_v6 = vld [vmem:[#allocation2 + $0x170] sm:$0xf0]  ;;  %v10450_v0 = vld [vmem:[#allocation2 + $0x30] sm:$0xf] }
 0x92d   : > { %v6034_v46 = vpop.permute.xlu1 %6033  ;;  %6151 = vst [vmem:[#allocation2 + $0x144] sm:$0xff] %v6135_v51  ;;  %v5786_v21 = vsel %vm347_vm12, %v5748_v58, %v13971_v8  ;;  %6699 = vmatpush.bf16.msra.mxu0 %v10487_v12  ;;  %v10607_v56 = vor.u32 %v11460_v6, %v10606_v31  ;;  %6756 = vmatpush.bf16.msrb.mxu3 %v10491_v1  ;;  %v11421_v44 = vld [vmem:[#allocation2 + $0x38] sm:$0xf0]  ;;  %v11420_v59 = vld [vmem:[#allocation2 + $0x34] sm:$0xf] }
 0x92e   : > { %v6039_v55 = vsel %vm486_vm5, %v13907_v54, %v6034_v46  ;;  %v5795_v17 = vunpack.c.l.b16 %v5786_v21  ;;  %v5798_v40 = vunpack.c.h.b16 %v5786_v21  ;;  %v6040_v24 = vsel %vm486_vm5, %v6034_v46, %v13986_v62  ;;  %v10452_v14 = vld [vmem:[#allocation2 + $0x3c] sm:$0xf0] }
 0x92f   : > { %v6059_v23 = vunpack.c.l.b16 %v6039_v55  ;;  %6716 = vmatpush.bf16.msrb.mxu2 %v10607_v56  ;;  %v6060_v47 = vunpack.c.l.b16 %v6040_v24  ;;  %v6062_v2 = vunpack.c.h.b16 %v6039_v55  ;;  %v6063_v42 = vunpack.c.h.b16 %v6040_v24  ;;  %v10570_v24 = vld [vmem:[#allocation2 + $0x120] sm:$0xf] }
 0x930   : > { %v5805_v8 = vpack.c.b16 %v5796_v28, %v5795_v17  ;;  %v5807_v61 = vpack.c.b16 %v5799_v52, %v5798_v40  ;;  %v10595_v54 = vor.u32 %v11457_v45, %v10594_v35  ;;  %v10451_v46 = vor.u32 %v11421_v44, %v10450_v0 }
 0x931   : > { %v6069_v57 = vpack.c.b16 %v6060_v47, %v6059_v23  ;;  %v6071_v48 = vpack.c.b16 %v6063_v42, %v6062_v2  ;;  %6700 = vmatpush.bf16.msra.mxu0 %v10475_v5  ;;  %6757 = vmatpush.bf16.msrb.mxu3 %v10479_v16  ;;  %v10462_v27 = vld [vmem:[#allocation2 + $0x48] sm:$0xf]  ;;  %v11423_v51 = vld [vmem:[#allocation2 + $0x4c] sm:$0xf]  ;;  %v10426_v42 = vld [vmem:[#allocation2] sm:$0xf] }
 0x932   : > { %5821 = vst [vmem:[#allocation2 + $0x18] sm:$0xff] %v5805_v8  ;;  %v11424_v38 = vld [vmem:[#allocation2 + $0x50] sm:$0xf0]  ;;  %v10464_v9 = vld [vmem:[#allocation2 + $0x54] sm:$0xf0] }
 0x933   : > { %5823 = vst [vmem:[#allocation2 + $0x24] sm:$0xff] %v5807_v61  ;;  %6717 = vmatpush.bf16.msrb.mxu2 %v10595_v54  ;;  %v10463_v12 = vor.u32 %v11424_v38, %v10462_v27  ;;  %v10582_v31 = vld [vmem:[#allocation2 + $0x138] sm:$0xf]  ;;  %v10467_v1 = vor.u32 %v11423_v51, %v10464_v9  ;;  %v11451_v23 = vld [vmem:[#allocation2 + $0x128] sm:$0xf0] }
 0x934   : > { %v6170_v37 = vpop.permute.xlu2 %6169  ;;  %6085 = vst [vmem:[#allocation2 + $0x108] sm:$0xff] %v6069_v57  ;;  %v6026_v52 = vpop.permute.xlu0 %6025  ;;  %v11454_v58 = vld [vmem:[#allocation2 + $0x140] sm:$0xf0]  ;;  %v11415_v16 = vld [vmem:[#allocation2 + $0x8] sm:$0xf0]  ;;  %v10571_v0 = vor.u32 %v11451_v23, %v10570_v24 }
 0x935   : > { %v6175_v28 = vsel %vm559_vm4, %v13918_v7, %v6170_v37  ;;  %v6028_v6 = vpop.permute.xlu1 %6027  ;;  %6087 = vst [vmem:[#allocation2 + $0x114] sm:$0xff] %v6071_v48  ;;  %6701 = vmatpush.bf16.msra.mxu0 %v10463_v12  ;;  %v10583_v21 = vor.u32 %v11454_v58, %v10582_v31  ;;  %6758 = vmatpush.bf16.msrb.mxu3 %v10467_v1  ;;  %v11414_v54 = vld [vmem:[#allocation2 + $0x4] sm:$0xf]  ;;  %v10428_v37 = vld [vmem:[#allocation2 + $0xc] sm:$0xf0] }
 0x936   : > { %v6183_v5 = vunpack.c.l.b16 %v6175_v28  ;;  %v6186_v3 = vunpack.c.h.b16 %v6175_v28  ;;  %v6037_v56 = vsel %vm486_vm5, %v6026_v52, %v6028_v6  ;;  %v6038_v55 = vsel %vm486_vm5, %v6028_v6, %v13948_v10  ;;  %v10402_v52 = vld [vmem:[%s15026_s4 + $0xc0] sm:$0xf] }
 0x937   : > { %v6053_v17 = vunpack.c.l.b16 %v6037_v56  ;;  %v6056_v40 = vunpack.c.h.b16 %v6037_v56  ;;  %v10455_v7 = vor.u32 %v11420_v59, %v10452_v14  ;;  %6718 = vmatpush.bf16.msrb.mxu2 %v10583_v21  ;;  %v6054_v47 = vunpack.c.l.b16 %v6038_v55  ;;  %v10608_v21 = vld [vmem:[#allocation2 + $0x174] sm:$0xf0] }
 0x938   : > { %v6194_v35 = vpack.c.b16 %v6183_v5, %v6183_v5  ;;  %v6196_v45 = vpack.c.b16 %v6186_v3, %v6186_v3  ;;  %v6057_v2 = vunpack.c.h.b16 %v6038_v55  ;;  %v10427_v28 = vor.u32 %v11415_v16, %v10426_v42  ;;  %v11459_v3 = vld [vmem:[#allocation2 + $0x16c] sm:$0xf]  ;;  %v11456_v16 = vld [vmem:[#allocation2 + $0x154] sm:$0xf] }
 0x939   : > { %v6065_v8 = vpack.c.b16 %v6054_v47, %v6053_v17  ;;  %6702 = vmatpush.bf16.msra.mxu0 %v10451_v46  ;;  %6759 = vmatpush.bf16.msrb.mxu3 %v10455_v7  ;;  %v10438_v57 = vld [vmem:[#allocation2 + $0x18] sm:$0xf]  ;;  %v11417_v48 = vld [vmem:[#allocation2 + $0x1c] sm:$0xf] }
 0x93a   : > { %6210 = vst.msk [vmem:[#allocation2 + $0x158] sm:$0xf] %vm370_vm0, %v6194_v35  ;;  %v6067_v61 = vpack.c.b16 %v6057_v2, %v6056_v40  ;;  %v11418_v27 = vld [vmem:[#allocation2 + $0x20] sm:$0xf0]  ;;  %v10440_v51 = vld [vmem:[#allocation2 + $0x24] sm:$0xf0]  ;;  %v10431_v40 = vor.u32 %v11414_v54, %v10428_v37 }
 0x93b   : > { %6212 = vst.msk [vmem:[#allocation2 + $0x164] sm:$0xf] %vm370_vm0, %v6196_v45  ;;  %6719 = vmatpush.bf16.msrb.mxu2 %v10571_v0  ;;  %v10439_v59 = vor.u32 %v11418_v27, %v10438_v57  ;;  %v10558_v38 = vld [vmem:[#allocation2 + $0x108] sm:$0xf]  ;;  %v10443_v9 = vor.u32 %v11417_v48, %v10440_v51  ;;  %v10611_v45 = vor.u32 %v11459_v3, %v10608_v21 }
 0x93c   : > { %6081 = vst [vmem:[#allocation2 + $0xf0] sm:$0xff] %v6065_v8  ;;  %v5904_v44 = vpop.permute.xlu2 %5903  ;;  %v6224_v31 = vpop.permute.xlu0 %6223  ;;  %v11448_v1 = vld [vmem:[#allocation2 + $0x110] sm:$0xf0]  ;;  %v10596_v8 = vld [vmem:[#allocation2 + $0x15c] sm:$0xf0] }
 0x93d   : > { %6083 = vst [vmem:[#allocation2 + $0xfc] sm:$0xff] %v6067_v61  ;;  %v5908_v12 = vsel %vm416_vm10, %v13881_v49, %v5904_v44  ;;  %v6226_v14 = vpop.permute.xlu1 %6225  ;;  %6703 = vmatpush.bf16.msra.mxu0 %v10439_v59  ;;  %v10559_v46 = vor.u32 %v11448_v1, %v10558_v38  ;;  %6760 = vmatpush.bf16.msrb.mxu3 %v10443_v9  ;;  %v11409_v49 = vld [vmem:[%s15026_s4 + $0xc8] sm:$0xf0]  ;;  %v11442_v59 = vld [vmem:[#allocation2 + $0xe0] sm:$0xf0] }
 0x93e   : > { %v5925_v58 = vunpack.c.l.b16 %v5908_v12  ;;  %v5928_v6 = vunpack.c.h.b16 %v5908_v12  ;;  %v6231_v5 = vsel %vm588_vm2, %v6224_v31, %v6226_v14  ;;  %v6232_v56 = vsel %vm588_vm2, %v6226_v14, %v13997_v19  ;;  %v11453_v12 = vld [vmem:[#allocation2 + $0x13c] sm:$0xf]  ;;  %v10584_v31 = vld [vmem:[#allocation2 + $0x144] sm:$0xf0] }
 0x93f   : > { %v6251_v55 = vunpack.c.l.b16 %v6231_v5  ;;  %v6254_v17 = vunpack.c.h.b16 %v6231_v5  ;;  %6720 = vmatpush.bf16.msrb.mxu2 %v10559_v46  ;;  %v6252_v7 = vunpack.c.l.b16 %v6232_v56  ;;  %v6255_v35 = vunpack.c.h.b16 %v6232_v56  ;;  %v11450_v46 = vld [vmem:[#allocation2 + $0x124] sm:$0xf]  ;;  %v10572_v56 = vld [vmem:[#allocation2 + $0x12c] sm:$0xf0] }
 0x940   : > { %v5934_v24 = vpack.c.b16 %v5925_v58, %v5925_v58  ;;  %v5936_v23 = vpack.c.b16 %v5928_v6, %v5928_v6  ;;  %v14023_v47 = vor.u32 %v11409_v49, %v10402_v52  ;;  %v10599_v44 = vor.u32 %v11456_v16, %v10596_v8  ;;  %v11439_v6 = vld [vmem:[#allocation2 + $0xc8] sm:$0xf0] }
 0x941   : > { %v6261_v2 = vpack.c.b16 %v6252_v7, %v6251_v55  ;;  %v6263_v42 = vpack.c.b16 %v6255_v35, %v6254_v17  ;;  %6704 = vmatpush.bf16.msra.mxu0 %v10427_v28  ;;  %6761 = vmatpush.bf16.msrb.mxu3 %v10431_v40  ;;  %v10534_v28 = vld [vmem:[#allocation2 + $0xd8] sm:$0xf]  ;;  %v10587_v49 = vor.u32 %v11453_v12, %v10584_v31  ;;  %v10404_v55 = vld [vmem:[%s15026_s4 + $0xcc] sm:$0xf0]  ;;  %v10522_v17 = vld [vmem:[#allocation2 + $0xc0] sm:$0xf] }
 0x942   : > { %5950 = vst.msk [vmem:[#allocation2 + $0x80] sm:$0xf] %vm370_vm0, %v5934_v24  ;;  %v10523_v35 = vor.u32 %v11439_v6, %v10522_v17 }
 0x943   : > { %5952 = vst.msk [vmem:[#allocation2 + $0x8c] sm:$0xf] %vm370_vm0, %v5936_v23  ;;  %v10546_v61 = vld [vmem:[#allocation2 + $0xf0] sm:$0xf] }
 0x944   : > { %6277 = vst [vmem:[#allocation2 + $0x198] sm:$0xff] %v6261_v2  ;;  %v6044_v0 = vpop.permute.xlu2 %6043  ;;  %v11445_v57 = vld [vmem:[#allocation2 + $0xf8] sm:$0xf0]  ;;  %6705 = vmatmul.bf16.vlgmr.msra.gmra.mxu0 %v14023_v47  ;;  %6762 = vmatmul.bf16.vlgmr.msrb.gmra.mxu3 %v14023_v47  ;;  %v6172_v54 = vpop.permute.xlu0 %6171  ;;  %v10575_v2 = vor.u32 %v11450_v46, %v10572_v56  ;;  %v11444_v46 = vld [vmem:[#allocation2 + $0xf4] sm:$0xf] }
 0x945   : > { %6773 = vmatpush.bf16.msrb.mxu0 %v10611_v45  ;;  %6279 = vst [vmem:[#allocation2 + $0x1a4] sm:$0xff] %v6263_v42  ;;  %v6050_v48 = vsel %vm491_vm7, %v13986_v62, %v6044_v0  ;;  %v10547_v27 = vor.u32 %v11445_v57, %v10546_v61  ;;  %v6218_v51 = vpop.permute.xlu1 %6217  ;;  %v6178_v37 = vsel %vm559_vm4, %v13969_v36, %v6172_v54  ;;  %v11408_v36 = vld [vmem:[%s15026_s4 + $0xc4] sm:$0xf] }
 0x946   : > { %v6061_v38 = vunpack.c.l.b16 %v6050_v48  ;;  %v6064_v9 = vunpack.c.h.b16 %v6050_v48  ;;  %v6189_v1 = vunpack.c.l.b16 %v6178_v37  ;;  %v6192_v14 = vunpack.c.h.b16 %v6178_v37 }
 0x947   : > { %6721 = vmatpush.bf16.msrb.mxu2 %v10547_v27  ;;  %v10535_v62 = vor.u32 %v11442_v59, %v10534_v28  ;;  %v6229_v21 = vsel %vm588_vm2, %v6218_v51, %v13961_v63  ;;  %v14044_v16 = vor.u32 %v11408_v36, %v10404_v55 }
 0x948   : > { %v6070_v52 = vpack.c.b16 %v6061_v38, %v6061_v38  ;;  %v6072_v58 = vpack.c.b16 %v6064_v9, %v6064_v9  ;;  %v6198_v5 = vpack.c.b16 %v6189_v1, %v6189_v1  ;;  %v6200_v3 = vpack.c.b16 %v6192_v14, %v6192_v14  ;;  %v10414_v38 = vld [vmem:[%s15026_s4 + $0xd8] sm:$0xf]  ;;  %v11447_v1 = vld [vmem:[#allocation2 + $0x10c] sm:$0xf] }
 0x949   : > { %6774 = vmatpush.bf16.msrb.mxu0 %v10599_v44  ;;  %v6245_v23 = vunpack.c.l.b16 %v6229_v21  ;;  %v6248_v8 = vunpack.c.h.b16 %v6229_v21  ;;  %v10560_v14 = vld [vmem:[#allocation2 + $0x114] sm:$0xf0] }
 0x94a   : > { %6086 = vst.msk [vmem:[#allocation2 + $0x110] sm:$0xf] %vm370_vm0, %v6070_v52  ;;  %v10563_v6 = vor.u32 %v11447_v1, %v10560_v14  ;;  %v11410_v1 = vld [vmem:[%s15026_s4 + $0xd0] sm:$0xf0] }
 0x94b   : > { %6088 = vst.msk [vmem:[#allocation2 + $0x11c] sm:$0xf] %vm370_vm0, %v6072_v58  ;;  %6722 = vmatpush.bf16.msrb.mxu2 %v10535_v62  ;;  %v10630_v40 = vld [vmem:[#allocation2 + $0x198] sm:$0xf]  ;;  %v11465_v24 = vld [vmem:[#allocation2 + $0x19c] sm:$0xf] }
 0x94c   : > { %6214 = vst.msk [vmem:[#allocation2 + $0x170] sm:$0xf] %vm370_vm0, %v6198_v5  ;;  %v5834_v7 = vpop.permute.xlu2 %5833  ;;  %v11466_v45 = vld [vmem:[#allocation2 + $0x1a0] sm:$0xf0]  ;;  %v10632_v42 = vld [vmem:[#allocation2 + $0x1a4] sm:$0xf0]  ;;  %v14049_v0 = vpop.permute.xlu0 %6221 }
 0x94d   : > { %6775 = vmatpush.bf16.msrb.mxu0 %v10587_v49  ;;  %6216 = vst.msk [vmem:[#allocation2 + $0x17c] sm:$0xf] %vm370_vm0, %v6200_v3  ;;  %v5842_v61 = vsel %vm382_vm11, %v13857_v13, %v5834_v7  ;;  %v10631_v57 = vor.u32 %v11466_v45, %v10630_v40  ;;  %v6108_v48 = vpop.permute.xlu1 %6107  ;;  %v10635_v54 = vor.u32 %v11465_v24, %v10632_v42  ;;  %v11412_v13 = vld [vmem:[%s15026_s4 + $0xe0] sm:$0xf0]  ;;  %v10548_v5 = vld [vmem:[#allocation2 + $0xfc] sm:$0xf0] }
 0x94e   : > { %v5855_v27 = vunpack.c.l.b16 %v5842_v61  ;;  %v5858_v51 = vunpack.c.h.b16 %v5842_v61  ;;  %v6230_v44 = vsel %vm588_vm2, %v13961_v63, %v14049_v0  ;;  %v6114_v59 = vsel %vm525_vm6, %v13976_v22, %v6108_v48  ;;  %v11458_v42 = vld [vmem:[#allocation2 + $0x160] sm:$0xf0]  ;;  %v10536_v48 = vld [vmem:[#allocation2 + $0xe4] sm:$0xf0] }
 0x94f   : > { %v6246_v9 = vunpack.c.l.b16 %v6230_v44  ;;  %v6249_v37 = vunpack.c.h.b16 %v6230_v44  ;;  %6723 = vmatpush.bf16.msrb.mxu2 %v10523_v35  ;;  %6741 = vmatpush.bf16.msra.mxu1 %v10631_v57  ;;  %v6125_v12 = vunpack.c.l.b16 %v6114_v59  ;;  %v6128_v31 = vunpack.c.h.b16 %v6114_v59 }
 0x950   : > { %v5866_v63 = vpack.c.b16 %v5855_v27, %v5855_v27  ;;  %v5868_v28 = vpack.c.b16 %v5858_v51, %v5858_v51  ;;  %v14062_v58 = vor.u32 %v11412_v13, %v10414_v38  ;;  %v10551_v24 = vor.u32 %v11444_v46, %v10548_v5  ;;  %v10524_v51 = vld [vmem:[#allocation2 + $0xcc] sm:$0xf0]  ;;  %v11441_v38 = vld [vmem:[#allocation2 + $0xdc] sm:$0xf]  ;;  %v10416_v13 = vld [vmem:[%s15026_s4 + $0xe4] sm:$0xf0] }
 0x951   : > { %6776 = vmatpush.bf16.msrb.mxu0 %v10575_v2  ;;  %v6257_v22 = vpack.c.b16 %v6246_v9, %v6245_v23  ;;  %v6259_v52 = vpack.c.b16 %v6249_v37, %v6248_v8  ;;  %v6134_v62 = vpack.c.b16 %v6125_v12, %v6125_v12  ;;  %v6136_v3 = vpack.c.b16 %v6128_v31, %v6128_v31  ;;  %v10602_v2 = vld [vmem:[#allocation2 + $0x158] sm:$0xf]  ;;  %v11438_v12 = vld [vmem:[#allocation2 + $0xc4] sm:$0xf]  ;;  %v10410_v31 = vld [vmem:[%s15026_s4 + $0xc8] sm:$0xf] }
 0x952   : > { %5882 = vst.msk [vmem:[#allocation2 + $0x38] sm:$0xf] %vm370_vm0, %v5866_v63  ;;  %6724 = vmatmul.bf16.vlgmr.msrb.gmra.mxu2 %v14044_v16  ;;  %v10539_v37 = vor.u32 %v11441_v38, %v10536_v48 }
 0x953   : > { %6798 = vmatpush.bf16.msra.mxu2 %v10635_v54  ;;  %5884 = vst.msk [vmem:[#allocation2 + $0x44] sm:$0xf] %vm370_vm0, %v5868_v28  ;;  %v10614_v21 = vld [vmem:[#allocation2 + $0x170] sm:$0xf] }
 0x954   : > { %6273 = vst [vmem:[#allocation2 + $0x180] sm:$0xff] %v6257_v22  ;;  %v6236_v49 = vpop.permute.xlu2 %6235  ;;  %v11461_v56 = vld [vmem:[#allocation2 + $0x178] sm:$0xf0]  ;;  %6710 = vmatmul.bf16.gmra.mxu0 %v14062_v58  ;;  %6767 = vmatmul.bf16.gmra.mxu3 %v14062_v58  ;;  %v5962_v55 = vpop.permute.xlu0 %5961 }
 0x955   : > { %6777 = vmatpush.bf16.msrb.mxu0 %v10563_v6  ;;  %6275 = vst [vmem:[#allocation2 + $0x18c] sm:$0xff] %v6259_v52  ;;  %v6242_v36 = vsel %vm593_vm13, %v13997_v19, %v6236_v49  ;;  %v10615_v17 = vor.u32 %v11461_v56, %v10614_v21  ;;  %v5968_v40 = vpop.permute.xlu1 %5967  ;;  %v5970_v35 = vsel %vm450_vm9, %v13841_v25, %v5962_v55 }
 0x956   : > { %6150 = vst.msk [vmem:[#allocation2 + $0x140] sm:$0xf] %vm370_vm0, %v6134_v62  ;;  %v6253_v23 = vunpack.c.l.b16 %v6242_v36  ;;  %v6256_v7 = vunpack.c.h.b16 %v6242_v36  ;;  %v5972_v45 = vsel %vm450_vm9, %v13873_v32, %v5968_v40  ;;  %v5983_v8 = vunpack.c.l.b16 %v5970_v35  ;;  %v11411_v32 = vld [vmem:[%s15026_s4 + $0xdc] sm:$0xf] }
 0x957   : > { %6152 = vst.msk [vmem:[#allocation2 + $0x14c] sm:$0xf] %vm370_vm0, %v6136_v3  ;;  %v5986_v19 = vunpack.c.h.b16 %v5970_v35  ;;  %6830 = vmatpush.bf16.msra.mxu3 %v10615_v17  ;;  %v5989_v61 = vunpack.c.l.b16 %v5972_v45  ;;  %v5992_v57 = vunpack.c.h.b16 %v5972_v45  ;;  %v10603_v25 = vor.u32 %v11458_v42, %v10602_v2 }
 0x958   : > { %v6262_v54 = vpack.c.b16 %v6253_v23, %v6253_v23  ;;  %v6264_v27 = vpack.c.b16 %v6256_v7, %v6256_v7  ;;  %v5994_v44 = vpack.c.b16 %v5983_v8, %v5983_v8  ;;  %v10527_v21 = vor.u32 %v11438_v12, %v10524_v51 }
 0x959   : > { %6778 = vmatpush.bf16.msrb.mxu0 %v10551_v24  ;;  %v5996_v59 = vpack.c.b16 %v5986_v19, %v5986_v19  ;;  %v5998_v9 = vpack.c.b16 %v5989_v61, %v5989_v61  ;;  %v6000_v14 = vpack.c.b16 %v5992_v57, %v5992_v57  ;;  %v14098_v55 = vor.u32 %v11411_v32, %v10416_v13 }
 0x95a   : > { %6278 = vst.msk [vmem:[#allocation2 + $0x1a0] sm:$0xf] %vm370_vm0, %v6262_v54  ;;  %v14100_v17 = vor.u32 %v11410_v1, %v10410_v31  ;;  %v10494_v1 = vld [vmem:[#allocation2 + $0x80] sm:$0xf] }
 0x95b   : > { %6280 = vst.msk [vmem:[#allocation2 + $0x1ac] sm:$0xf] %vm370_vm0, %v6264_v27  ;;  %6831 = vmatpush.bf16.msra.mxu3 %v10603_v25  ;;  %v10618_v63 = vld [vmem:[#allocation2 + $0x180] sm:$0xf]  ;;  %v11462_v28 = vld [vmem:[#allocation2 + $0x184] sm:$0xf] }
 0x95c   : > { %6010 = vst.msk [vmem:[#allocation2 + $0x98] sm:$0xf] %vm370_vm0, %v5994_v44  ;;  %v11463_v22 = vld [vmem:[#allocation2 + $0x188] sm:$0xf0]  ;;  %v10620_v52 = vld [vmem:[#allocation2 + $0x18c] sm:$0xf0]  ;;  %v6106_v62 = vpop.permute.xlu0 %6105 }
 0x95d   : > { %6779 = vmatpush.bf16.msrb.mxu0 %v10539_v37  ;;  %6012 = vst.msk [vmem:[#allocation2 + $0xa4] sm:$0xf] %vm370_vm0, %v5996_v59  ;;  %v10619_v6 = vor.u32 %v11463_v22, %v10618_v63  ;;  %v10623_v46 = vor.u32 %v11462_v28, %v10620_v52  ;;  %v10590_v5 = vld [vmem:[#allocation2 + $0x140] sm:$0xf]  ;;  %v5898_v3 = vpop.permute.xlu1 %5897  ;;  %v6111_v49 = vsel %vm525_vm6, %v13932_v4, %v6106_v62  ;;  %v11431_v63 = vld [vmem:[#allocation2 + $0x88] sm:$0xf0] }
 0x95e   : > { %6014 = vst.msk [vmem:[#allocation2 + $0xb0] sm:$0xf] %vm370_vm0, %v5998_v9  ;;  %v11455_v56 = vld [vmem:[#allocation2 + $0x148] sm:$0xf0]  ;;  %v5906_v36 = vsel %vm416_vm10, %v13849_v26, %v5898_v3  ;;  %v6119_v40 = vunpack.c.l.b16 %v6111_v49  ;;  %v6122_v24 = vunpack.c.h.b16 %v6111_v49  ;;  %v10422_v28 = vld [vmem:[%s15026_s4 + $0xe0] sm:$0xf] }
 0x95f   : > { %6016 = vst.msk [vmem:[#allocation2 + $0xbc] sm:$0xf] %vm370_vm0, %v6000_v14  ;;  %6742 = vmatpush.bf16.msra.mxu1 %v10619_v6  ;;  %6799 = vmatpush.bf16.msra.mxu2 %v10623_v46  ;;  %v10591_v23 = vor.u32 %v11455_v56, %v10590_v5  ;;  %v5919_v7 = vunpack.c.l.b16 %v5906_v36  ;;  %v5922_v35 = vunpack.c.h.b16 %v5906_v36  ;;  %v11413_v52 = vld [vmem:[%s15026_s4 + $0xe8] sm:$0xf0]  ;;  %v10495_v46 = vor.u32 %v11431_v63, %v10494_v1  ;;  %v10566_v56 = vld [vmem:[#allocation2 + $0x110] sm:$0xf] }
 0x960   : > { %v6130_v45 = vpack.c.b16 %v6119_v40, %v6119_v40  ;;  %v6132_v4 = vpack.c.b16 %v6122_v24, %v6122_v24  ;;  %v14129_v49 = vor.u32 %v11413_v52, %v10422_v28  ;;  %v11449_v36 = vld [vmem:[#allocation2 + $0x118] sm:$0xf0]  ;;  %v11440_v63 = vld [vmem:[#allocation2 + $0xd0] sm:$0xf0] }
 0x961   : > { %6780 = vmatpush.bf16.msrb.mxu0 %v10527_v21  ;;  %6832 = vmatpush.bf16.msra.mxu3 %v10591_v23  ;;  %v5930_v2 = vpack.c.b16 %v5919_v7, %v5919_v7  ;;  %v10638_v42 = vld [vmem:[#allocation2 + $0x1a0] sm:$0xf]  ;;  %v5932_v26 = vpack.c.b16 %v5922_v35, %v5922_v35 }
 0x962   : > { %6729 = vmatmul.bf16.gmra.mxu2 %v14098_v55  ;;  %10640 = vmatmul.msk.bf16.vlgmr.msra.gmra.mxu1 %vm1950_vm14, %v14100_v17  ;;  %v11467_v8 = vld [vmem:[#allocation2 + $0x1a8] sm:$0xf0]  ;;  %6146 = vst.msk [vmem:[#allocation2 + $0x128] sm:$0xf] %vm370_vm0, %v6130_v45 }
 0x963   : > { %v10639_v19 = vor.u32 %v11467_v8, %v10638_v42  ;;  %6148 = vst.msk [vmem:[#allocation2 + $0x134] sm:$0xf] %vm370_vm0, %v6132_v4  ;;  %v10506_v13 = vld [vmem:[#allocation2 + $0x98] sm:$0xf] }
 0x964   : > { %5946 = vst.msk [vmem:[#allocation2 + $0x68] sm:$0xf] %vm370_vm0, %v5930_v2  ;;  %6781 = vmatmul.bf16.vlgmr.msrb.gmra.mxu0 %v14044_v16  ;;  %v5840_v61 = vpop.permute.xlu0 %5839  ;;  %v11434_v9 = vld [vmem:[#allocation2 + $0xa0] sm:$0xf0] }
 0x965   : > { %v10518_v57 = vld [vmem:[#allocation2 + $0xb0] sm:$0xf]  ;;  %v6042_v48 = vpop.permute.xlu1 %6041  ;;  %5948 = vst.msk [vmem:[#allocation2 + $0x74] sm:$0xf] %vm370_vm0, %v5932_v26  ;;  %v5844_v54 = vsel %vm382_vm11, %v13893_v60, %v5840_v61  ;;  %6855 = vmatpush.bf16.msra.mxu0 %v10639_v19  ;;  %v10567_v26 = vor.u32 %v11449_v36, %v10566_v56 }
 0x966   : > { %v11437_v27 = vld [vmem:[#allocation2 + $0xb8] sm:$0xf0]  ;;  %v6047_v51 = vsel %vm491_vm7, %v13948_v10, %v6042_v48  ;;  %v5861_v44 = vunpack.c.l.b16 %v5844_v54  ;;  %v5864_v59 = vunpack.c.h.b16 %v5844_v54  ;;  %v10507_v10 = vor.u32 %v11434_v9, %v10506_v13 }
 0x967   : > { %v10519_v25 = vor.u32 %v11437_v27, %v10518_v57  ;;  %v6055_v38 = vunpack.c.l.b16 %v6047_v51  ;;  %v6058_v32 = vunpack.c.h.b16 %v6047_v51 }
 0x968   : > { %v5870_v37 = vpack.c.b16 %v5861_v44, %v5861_v44  ;;  %v5872_v12 = vpack.c.b16 %v5864_v59, %v5864_v59 }
 0x969   : > { %6811 = vmatpush.bf16.msrb.mxu1 %v10519_v25  ;;  %v6066_v31 = vpack.c.b16 %v6055_v38, %v6055_v38  ;;  %v6068_v14 = vpack.c.b16 %v6058_v32, %v6058_v32  ;;  %v10578_v60 = vld [vmem:[#allocation2 + $0x128] sm:$0xf]  ;;  %v11443_v25 = vld [vmem:[#allocation2 + $0xe8] sm:$0xf0]  ;;  %v10458_v38 = vld [vmem:[#allocation2 + $0x38] sm:$0xf] }
 0x96a   : > { %5886 = vst.msk [vmem:[#allocation2 + $0x50] sm:$0xf] %vm370_vm0, %v5870_v37  ;;  %v11452_v22 = vld [vmem:[#allocation2 + $0x130] sm:$0xf0]  ;;  %v11422_v32 = vld [vmem:[#allocation2 + $0x40] sm:$0xf0] }
 0x96b   : > { %5888 = vst.msk [vmem:[#allocation2 + $0x5c] sm:$0xf] %vm370_vm0, %v5872_v12  ;;  %v10579_v62 = vor.u32 %v11452_v22, %v10578_v60  ;;  %v10482_v35 = vld [vmem:[#allocation2 + $0x68] sm:$0xf]  ;;  %v10542_v37 = vld [vmem:[#allocation2 + $0xe0] sm:$0xf]  ;;  %v10459_v1 = vor.u32 %v11422_v32, %v10458_v38 }
 0x96c   : > { %6082 = vst.msk [vmem:[#allocation2 + $0xf8] sm:$0xf] %vm370_vm0, %v6066_v31  ;;  %v5776_v6 = vpop.permute.xlu0 %5775  ;;  %v11428_v45 = vld [vmem:[#allocation2 + $0x70] sm:$0xf0]  ;;  %v10543_v12 = vor.u32 %v11443_v25, %v10542_v37  ;;  %v10530_v60 = vld [vmem:[#allocation2 + $0xc8] sm:$0xf] }
 0x96d   : > { %6812 = vmatpush.bf16.msrb.mxu1 %v10507_v10  ;;  %v5770_v5 = vpop.permute.xlu1 %5769  ;;  %6084 = vst.msk [vmem:[#allocation2 + $0x104] sm:$0xf] %vm370_vm0, %v6068_v14  ;;  %v5780_v3 = vsel %vm347_vm12, %v13905_v11, %v5776_v6  ;;  %6833 = vmatpush.bf16.msra.mxu3 %v10579_v62  ;;  %v10483_v8 = vor.u32 %v11428_v45, %v10482_v35 }
 0x96e   : > { %v5778_v21 = vsel %vm347_vm12, %v13865_v41, %v5770_v5  ;;  %v5797_v40 = vunpack.c.l.b16 %v5780_v3  ;;  %v5800_v24 = vunpack.c.h.b16 %v5780_v3  ;;  %v10531_v28 = vor.u32 %v11440_v63, %v10530_v60 }
 0x96f   : > { %v5791_v23 = vunpack.c.l.b16 %v5778_v21  ;;  %v5794_v7 = vunpack.c.h.b16 %v5778_v21 }
 0x970   : > { %v5806_v4 = vpack.c.b16 %v5797_v40, %v5797_v40  ;;  %v5808_v2 = vpack.c.b16 %v5800_v24, %v5800_v24 }
 0x971   : > { %6813 = vmatpush.bf16.msrb.mxu1 %v10495_v46  ;;  %v5802_v42 = vpack.c.b16 %v5791_v23, %v5791_v23  ;;  %v5804_v11 = vpack.c.b16 %v5794_v7, %v5794_v7  ;;  %v10470_v41 = vld [vmem:[#allocation2 + $0x50] sm:$0xf]  ;;  %6834 = vmatpush.bf16.msra.mxu3 %v10567_v26 }
 0x972   : > { %10641 = vmatmul.msk.bf16.gmra.mxu1 %vm1950_vm14, %v14129_v49  ;;  %10642 = vmatmul.msk.bf16.vlgmr.msra.gmra.mxu2 %vm1950_vm14, %v14100_v17  ;;  %5822 = vst.msk [vmem:[#allocation2 + $0x20] sm:$0xf] %vm370_vm0, %v5806_v4  ;;  %v11425_v19 = vld [vmem:[#allocation2 + $0x58] sm:$0xf0] }
 0x973   : > { %5824 = vst.msk [vmem:[#allocation2 + $0x2c] sm:$0xf] %vm370_vm0, %v5808_v2  ;;  %v10554_v61 = vld [vmem:[#allocation2 + $0xf8] sm:$0xf]  ;;  %v10471_v48 = vor.u32 %v11425_v19, %v10470_v41 }
 0x974   : > { %5818 = vst.msk [vmem:[#allocation2 + $0x8] sm:$0xf] %vm370_vm0, %v5802_v42  ;;  %6786 = vmatmul.bf16.gmra.mxu0 %v14098_v55  ;;  %v6234_v57 = vpop.permute.xlu0 %6233  ;;  %v11446_v54 = vld [vmem:[#allocation2 + $0x100] sm:$0xf0] }
 0x975   : > { %6814 = vmatpush.bf16.msrb.mxu1 %v10483_v8  ;;  %5820 = vst.msk [vmem:[#allocation2 + $0x14] sm:$0xf] %vm370_vm0, %v5804_v11  ;;  %v6239_v27 = vsel %vm593_vm13, %v14049_v0, %v6234_v57  ;;  %v10555_v51 = vor.u32 %v11446_v54, %v10554_v61  ;;  %v14154_v45 = vpop.permute.xlu1 %6365 }
 0x976   : > { %v6247_v44 = vunpack.c.l.b16 %v6239_v27  ;;  %v6250_v59 = vunpack.c.h.b16 %v6239_v27 }
 0x977   : > { %6835 = vmatpush.bf16.msra.mxu3 %v10555_v51 }
 0x978   : > { %v6258_v13 = vpack.c.b16 %v6247_v44, %v6247_v44  ;;  %v6260_v9 = vpack.c.b16 %v6250_v59, %v6250_v59 }
 0x979   : > { %6815 = vmatpush.bf16.msrb.mxu1 %v10471_v48  ;;  %v10446_v31 = vld [vmem:[#allocation2 + $0x20] sm:$0xf] }
 0x97a   : > { %6274 = vst.msk [vmem:[#allocation2 + $0x188] sm:$0xf] %vm370_vm0, %v6258_v13  ;;  %v11419_v14 = vld [vmem:[#allocation2 + $0x28] sm:$0xf0] }
 0x97b   : > { %6276 = vst.msk [vmem:[#allocation2 + $0x194] sm:$0xf] %vm370_vm0, %v6260_v9  ;;  %6836 = vmatpush.bf16.msra.mxu3 %v10543_v12  ;;  %v10447_v0 = vor.u32 %v11419_v14, %v10446_v31  ;;  %v10434_v10 = vld [vmem:[#allocation2 + $0x8] sm:$0xf] }
 0x97c   : > { %v11416_v22 = vld [vmem:[#allocation2 + $0x10] sm:$0xf0] }
 0x97d   : > { %6816 = vmatpush.bf16.msrb.mxu1 %v10459_v1  ;;  %v10435_v62 = vor.u32 %v11416_v22, %v10434_v10  ;;  %v14156_v19 = vpop.permute.xlu1 %6360 }
 0x97f   : > { %6837 = vmatpush.bf16.msra.mxu3 %v10531_v28 }
 0x981   : > { %6817 = vmatpush.bf16.msrb.mxu1 %v10447_v0  ;;  %v10626_v52 = vld [vmem:[#allocation2 + $0x188] sm:$0xf] }
 0x982   : > { %10643 = vmatmul.msk.bf16.gmra.mxu2 %vm1950_vm14, %v14129_v49  ;;  %6838 = vmatmul.bf16.vlgmr.msra.gmra.mxu3 %v14044_v16  ;;  %v11464_v6 = vld [vmem:[#allocation2 + $0x190] sm:$0xf0] }
 0x983   : > { %v10627_v46 = vor.u32 %v11464_v6, %v10626_v52 }
 0x985   : > { %6818 = vmatpush.bf16.msrb.mxu1 %v10435_v62  ;;  %6856 = vmatpush.bf16.msra.mxu0 %v10627_v46  ;;  %v14166_v62 = vpop.permute.xlu2 %6370 }
 0x988   : > { %6819 = vmatmul.bf16.vlgmr.msrb.gmra.mxu1 %v14023_v47  ;;  %10644 = vmatmul.msk.bf16.vlgmr.msra.gmra.mxu0 %vm1950_vm14, %v14100_v17 }
 0x992   : > { %6843 = vmatmul.bf16.gmra.mxu3 %v14098_v55  ;;  %v6356_v55 = vpop.permute.xlu0 %6355 }
 0x998   : > { %6824 = vmatmul.bf16.gmra.mxu1 %v14062_v58  ;;  %10645 = vmatmul.msk.bf16.gmra.mxu0 %vm1950_vm14, %v14129_v49 }
 0x9c1   : > { %v6706_v5 = vpop.f32.mrf.mxu0 }
 0x9c2   : > { %v6707_v4 = vadd.f32 %v6706_v5, %v6356_v55 }
 0x9c7   : > { %v6763_v24 = vpop.f32.mrf.mxu3 }
 0x9c8   : > { %v6764_v49 = vadd.f32 %v6763_v24, %v6356_v55 }
 0x9c9   : > { %v6708_v3 = vpop.f32.mrf.mxu0 }
 0x9ca   : > { %v6709_v57 = vadd.f32 %v6708_v3, %v14156_v19 }
 0x9cf   : > { %v6765_v35 = vpop.f32.mrf.mxu3 }
 0x9d0   : > { %v6766_v44 = vadd.f32 %v6765_v35, %v14156_v19 }
 0x9d1   : > { %v6711_v16 = vpop.f32.mrf.mxu0 }
 0x9d2   : > { %v6712_v9 = vadd.f32 %v6711_v16, %v14154_v45 }
 0x9d5   : > { %v6725_v21 = vpop.f32.mrf.mxu2 }
 0x9d6   : > { %v6726_v2 = vadd.f32 %v6725_v21, %v6707_v4 }
 0x9d7   : > { %v6768_v11 = vpop.f32.mrf.mxu3 }
 0x9d8   : > { %v6769_v10 = vadd.f32 %v6768_v11, %v14154_v45 }
 0x9d9   : > { %v6713_v56 = vpop.f32.mrf.mxu0 }
 0x9dd   : > { %v6727_v36 = vpop.f32.mrf.mxu2 }
 0x9de   : > { %v6728_v27 = vadd.f32 %v6727_v36, %v6709_v57 }
 0x9df   : > { %v6744_v40 = vpop.f32.mrf.mxu1  ;;  %v6770_v31 = vpop.f32.mrf.mxu3 }
 0x9e0   : > { %v6745_v42 = vadd.f32 %v6744_v40, %v6726_v2 }
 0x9e1   : > { %v6782_v23 = vpop.f32.mrf.mxu0 }
 0x9e2   : > { %v6783_v41 = vadd.f32 %v6782_v23, %v6764_v49  ;;  %v6868_v48 = vmul.f32 %v6745_v42, %v11889_v18 }
 0x9e4   : > { %v6880_v59 = vmax.f32 %v6868_v48, 0.0 }
 0x9e5   : > { %v6730_v47 = vpop.f32.mrf.mxu2 }
 0x9e6   : > { %v6731_v0 = vadd.f32 %v6730_v47, %v6712_v9 }
 0x9e7   : > { %v6746_v7 = vpop.f32.mrf.mxu1 }
 0x9e8   : > { %v6747_v25 = vadd.f32 %v6746_v7, %v6728_v27 }
 0x9e9   : > { %v6784_v17 = vpop.f32.mrf.mxu0 }
 0x9ea   : > { %v6785_v32 = vadd.f32 %v6784_v17, %v6766_v44  ;;  %v6871_v1 = vmul.f32 %v6747_v25, %v11889_v18  ;;  %v6714_v17 = vadd.f32 %v6713_v56, %v14166_v62 }
 0x9ec   : > { %v6883_v22 = vmax.f32 %v6871_v1, 0.0 }
 0x9ed   : > { %v6732_v58 = vpop.f32.mrf.mxu2 }
 0x9ef   : > { %v6749_v26 = vpop.f32.mrf.mxu1 }
 0x9f0   : > { %v6750_v28 = vadd.f32 %v6749_v26, %v6731_v0  ;;  %v6733_v26 = vadd.f32 %v6732_v58, %v6714_v17 }
 0x9f1   : > { %v6787_v8 = vpop.f32.mrf.mxu0 }
 0x9f2   : > { %v6788_v6 = vadd.f32 %v6787_v8, %v6769_v10  ;;  %v6874_v5 = vmul.f32 %v6750_v28, %v11889_v18 }
 0x9f4   : > { %v6886_v11 = vmax.f32 %v6874_v5, 0.0 }
 0x9f5   : > { %v6801_v61 = vpop.f32.mrf.mxu2 }
 0x9f6   : > { %v6802_v54 = vadd.f32 %v6801_v61, %v6783_v41 }
 0x9f7   : > { %v6751_v37 = vpop.f32.mrf.mxu1 }
 0x9f8   : > { %v6869_v51 = vmul.f32 %v6802_v54, %v11891_v20  ;;  %v6752_v56 = vadd.f32 %v6751_v37, %v6733_v26 }
 0x9f9   : > { %v6789_v14 = vpop.f32.mrf.mxu0 }
 0x9fa   : > { %v6881_v38 = vmax.f32 %v6869_v51, 0.0  ;;  %v6877_v25 = vmul.f32 %v6752_v56, %v11889_v18 }
 0x9fc   : > { %v6892_v13 = vpack.c.bf16 %v6881_v38, %v6880_v59 }
 0x9fd   : > { %v6803_v12 = vpop.f32.mrf.mxu2 }
 0x9fe   : > { %7196 = vst [vmem:[#allocation2 + $0xc0] sm:$0xff] %v6892_v13  ;;  %v6804_v63 = vadd.f32 %v6803_v12, %v6785_v32  ;;  %v6932_v3 = vunpack.c.l.b16 %v6892_v13  ;;  %v6933_v16 = vunpack.c.h.b16 %v6892_v13  ;;  %v6889_v12 = vmax.f32 %v6877_v25, 0.0 }
 0xa00   : > { %v6872_v60 = vmul.f32 %v6804_v63, %v11891_v20 }
 0xa02   : > { %v6884_v52 = vmax.f32 %v6872_v60, 0.0 }
 0xa04   : > { %v6894_v46 = vpack.c.bf16 %v6884_v52, %v6883_v22 }
 0xa05   : > { %v6820_v21 = vpop.f32.mrf.mxu1  ;;  %v6806_v36 = vpop.f32.mrf.mxu2 }
 0xa06   : > { %v6934_v40 = vunpack.c.l.b16 %v6894_v46  ;;  %v6935_v24 = vunpack.c.h.b16 %v6894_v46  ;;  %7198 = vst [vmem:[#allocation2 + $0xcc] sm:$0xff] %v6894_v46  ;;  %v6821_v23 = vadd.f32 %v6820_v21, %v6356_v55  ;;  %v6807_v47 = vadd.f32 %v6806_v36, %v6788_v6  ;;  %v6839_v7 = vpop.f32.mrf.mxu3  ;;  %v6858_v35 = vpop.f32.mrf.mxu0 }
 0xa07   : > { %v6771_v55 = vadd.f32 %v6770_v31, %v14166_v62 }
 0xa08   : > { %v14170_v4 = vpack.c.b16 %v6934_v40, %v6932_v3  ;;  %v14172_v2 = vpack.c.b16 %v6935_v24, %v6933_v16  ;;  %v6875_v49 = vmul.f32 %v6807_v47, %v11891_v20  ;;  %v6840_v42 = vadd.f32 %v6839_v7, %v6821_v23 }
 0xa09   : > { %v6790_v48 = vadd.f32 %v6789_v14, %v6771_v55 }
 0xa0a   : > { %v6887_v41 = vmax.f32 %v6875_v49, 0.0  ;;  %v6859_v8 = vadd.f32 %v6858_v35, %v6840_v42  ;;  %7138 = vrot.lane.b32.xlu1 %v14172_v2, %s15088_s0  ;;  %7332 = vrot.lane.b32.xlu2 %v14170_v4, %s15089_s1 }
 0xa0b   : > { %7136 = vrot.lane.b32.xlu0 %v14170_v4, %s15088_s0 }
 0xa0c   : > { %v6896_v61 = vpack.c.bf16 %v6887_v41, %v6886_v11  ;;  %v6870_v57 = vmul.f32 %v6859_v8, %v11897_v33 }
 0xa0d   : > { %v6822_v58 = vpop.f32.mrf.mxu1  ;;  %v6808_v54 = vpop.f32.mrf.mxu2 }
 0xa0e   : > { %7200 = vst [vmem:[#allocation2 + $0xd8] sm:$0xff] %v6896_v61  ;;  %v6882_v27 = vmax.f32 %v6870_v57, 0.0  ;;  %v6823_v51 = vadd.f32 %v6822_v58, %v14156_v19  ;;  %v6841_v44 = vpop.f32.mrf.mxu3  ;;  %v6860_v59 = vpop.f32.mrf.mxu0  ;;  %v6809_v38 = vadd.f32 %v6808_v54, %v6790_v48  ;;  %v6936_v10 = vunpack.c.l.b16 %v6896_v61 }
 0xa10   : > { %v6893_v32 = vpack.c.bf16 %v6882_v27, %v6882_v27  ;;  %v6842_v13 = vadd.f32 %v6841_v44, %v6823_v51  ;;  %v6878_v9 = vmul.f32 %v6809_v38, %v11891_v20 }
 0xa12   : > { %7197 = vst.msk [vmem:[#allocation2 + $0xc8] sm:$0xf] %vm370_vm0, %v6893_v32  ;;  %v6861_v37 = vadd.f32 %v6860_v59, %v6842_v13  ;;  %7074 = vrot.lane.b32.xlu1 %v14172_v2, %s15085_s14  ;;  %7268 = vrot.lane.b32.xlu2 %v14170_v4, %s15086_s25  ;;  %v6890_v19 = vmax.f32 %v6878_v9, 0.0  ;;  %v6918_v11 = vunpack.c.l.b16 %v6893_v32 }
 0xa13   : > { %7072 = vrot.lane.b32.xlu0 %v14170_v4, %s15085_s14 }
 0xa14   : > { %v6873_v31 = vmul.f32 %v6861_v37, %v11897_v33  ;;  %v6898_v1 = vpack.c.bf16 %v6890_v19, %v6889_v12 }
 0xa15   : > { %v6825_v14 = vpop.f32.mrf.mxu1 }
 0xa16   : > { %v6885_v63 = vmax.f32 %v6873_v31, 0.0  ;;  %v6826_v0 = vadd.f32 %v6825_v14, %v14154_v45  ;;  %v6844_v60 = vpop.f32.mrf.mxu3  ;;  %v6863_v28 = vpop.f32.mrf.mxu0  ;;  %v6938_v22 = vunpack.c.l.b16 %v6898_v1  ;;  %7202 = vst [vmem:[#allocation2 + $0xe4] sm:$0xff] %v6898_v1  ;;  %v6939_v7 = vunpack.c.h.b16 %v6898_v1 }
 0xa18   : > { %v6895_v52 = vpack.c.bf16 %v6885_v63, %v6885_v63  ;;  %v6845_v6 = vadd.f32 %v6844_v60, %v6826_v0  ;;  %v14195_v46 = vpack.c.b16 %v6938_v22, %v6936_v10 }
 0xa1a   : > { %7199 = vst.msk [vmem:[#allocation2 + $0xd4] sm:$0xf] %vm370_vm0, %v6895_v52  ;;  %v6864_v5 = vadd.f32 %v6863_v28, %v6845_v6  ;;  %7010 = vrot.lane.b32.xlu1 %v14172_v2, %s15087_s23  ;;  %7338 = vrot.lane.b32.xlu2 %v14195_v46, %s15089_s1  ;;  %v6919_v26 = vunpack.c.l.b16 %v6895_v52 }
 0xa1b   : > { %7008 = vrot.lane.b32.xlu0 %v14170_v4, %s15087_s23 }
 0xa1c   : > { %v6876_v45 = vmul.f32 %v6864_v5, %v11897_v33  ;;  %v14220_v41 = vpack.c.b16 %v6919_v26, %v6918_v11 }
 0xa1d   : > { %v6827_v3 = vpop.f32.mrf.mxu1 }
 0xa1e   : > { %v6888_v16 = vmax.f32 %v6876_v45, 0.0  ;;  %v6828_v21 = vadd.f32 %v6827_v3, %v14166_v62  ;;  %v6846_v36 = vpop.f32.mrf.mxu3  ;;  %v6865_v40 = vpop.f32.mrf.mxu0  ;;  %v6937_v62 = vunpack.c.h.b16 %v6896_v61 }
 0xa20   : > { %v6897_v24 = vpack.c.bf16 %v6888_v16, %v6888_v16  ;;  %v6847_v23 = vadd.f32 %v6846_v36, %v6828_v21  ;;  %v6943_v49 = vpack.c.b16 %v6939_v7, %v6937_v62 }
 0xa22   : > { %7201 = vst.msk [vmem:[#allocation2 + $0xe0] sm:$0xf] %vm370_vm0, %v6897_v24  ;;  %v6866_v47 = vadd.f32 %v6865_v40, %v6847_v23  ;;  %6946 = vrot.lane.b32.xlu1 %v14172_v2, %s15082_s24  ;;  %7274 = vrot.lane.b32.xlu2 %v14195_v46, %s15086_s25  ;;  %v6920_v55 = vunpack.c.l.b16 %v6897_v24 }
 0xa23   : > { %6944 = vrot.lane.b32.xlu0 %v14170_v4, %s15082_s24 }
 0xa24   : > { %v6879_v35 = vmul.f32 %v6866_v47, %v11897_v33 }
 0xa26   : > { %v6891_v17 = vmax.f32 %v6879_v35, 0.0 }
 0xa28   : > { %v6899_v42 = vpack.c.bf16 %v6891_v17, %v6891_v17 }
 0xa2a   : > { %7203 = vst.msk [vmem:[#allocation2 + $0xec] sm:$0xf] %vm370_vm0, %v6899_v42  ;;  %7144 = vrot.lane.b32.xlu1 %v6943_v49, %s15088_s0  ;;  %7210 = vrot.lane.b32.xlu2 %v14195_v46, %s15083_s26  ;;  %v6921_v8 = vunpack.c.l.b16 %v6899_v42 }
 0xa2b   : > { %7334 = vrot.lane.b32.xlu0 %v14172_v2, %s15089_s1 }
 0xa2c   : > { %v14243_v56 = vpack.c.b16 %v6921_v8, %v6920_v55 }
 0xa32   : > { %7080 = vrot.lane.b32.xlu1 %v6943_v49, %s15085_s14  ;;  %7132 = vrot.lane.b32.xlu2 %v14220_v41, %s15084_s19 }
 0xa33   : > { %7270 = vrot.lane.b32.xlu0 %v14172_v2, %s15086_s25 }
 0xa3a   : > { %7016 = vrot.lane.b32.xlu1 %v6943_v49, %s15087_s23  ;;  %7068 = vrot.lane.b32.xlu2 %v14220_v41, %s15077_s21 }
 0xa3b   : > { %7142 = vrot.lane.b32.xlu0 %v14195_v46, %s15088_s0 }
 0xa42   : > { %6952 = vrot.lane.b32.xlu1 %v6943_v49, %s15082_s24  ;;  %7004 = vrot.lane.b32.xlu2 %v14220_v41, %s15078_s22 }
 0xa43   : > { %7078 = vrot.lane.b32.xlu0 %v14195_v46, %s15085_s14 }
 0xa4a   : > { %7336 = vrot.lane.b32.xlu1 %v14220_v41, %s15089_s1  ;;  %6924 = vrot.lane.b32.xlu2 %v14220_v41, %s15079_s30 }
 0xa4b   : > { %7014 = vrot.lane.b32.xlu0 %v14195_v46, %s15087_s23 }
 0xa52   : > { %7272 = vrot.lane.b32.xlu1 %v14220_v41, %s15086_s25  ;;  %7134 = vrot.lane.b32.xlu2 %v14243_v56, %s15084_s19 }
 0xa53   : > { %6950 = vrot.lane.b32.xlu0 %v14195_v46, %s15082_s24 }
 0xa5a   : > { %7208 = vrot.lane.b32.xlu1 %v14220_v41, %s15083_s26  ;;  %7070 = vrot.lane.b32.xlu2 %v14243_v56, %s15077_s21 }
 0xa5b   : > { %7340 = vrot.lane.b32.xlu0 %v6943_v49, %s15089_s1 }
 0xa62   : > { %7400 = vrot.lane.b32.xlu1 %v14220_v41, %s15080_s9  ;;  %7006 = vrot.lane.b32.xlu2 %v14243_v56, %s15078_s22 }
 0xa63   : > { %7276 = vrot.lane.b32.xlu0 %v6943_v49, %s15086_s25 }
 0xa64   : > { %v14261_v61 = vpop.permute.xlu2 %7332 }
 0xa6a   : > { %7342 = vrot.lane.b32.xlu1 %v14243_v56, %s15089_s1  ;;  %6926 = vrot.lane.b32.xlu2 %v14243_v56, %s15079_s30 }
 0xa6b   : > { %7212 = vrot.lane.b32.xlu0 %v6943_v49, %s15083_s26 }
 0xa6c   : > { %v14268_v57 = vpop.permute.xlu2 %7268 }
 0xa72   : > { %7278 = vrot.lane.b32.xlu1 %v14243_v56, %s15086_s25  ;;  %7204 = vrot.lane.b32.xlu2 %v14170_v4, %s15083_s26 }
 0xa73   : > { %7206 = vrot.lane.b32.xlu0 %v14172_v2, %s15083_s26 }
 0xa74   : > { %v14276_v48 = vpop.permute.xlu2 %7338 }
 0xa7a   : > { %7214 = vrot.lane.b32.xlu1 %v14243_v56, %s15083_s26  ;;  %7402 = vrot.lane.b32.xlu2 %v14195_v46, %s15080_s9 }
 0xa7b   : > { %7404 = vrot.lane.b32.xlu0 %v6943_v49, %s15080_s9 }
 0xa7c   : > { %v14283_v58 = vpop.permute.xlu1 %7138  ;;  %v14285_v54 = vpop.permute.xlu2 %7274 }
 0xa7d   : > { %v7137_v27 = vpop.permute.xlu0 %7136 }
 0xa7e   : > { %v7148_v25 = vsel %vm450_vm9, %v7137_v27, %v14283_v58 }
 0xa7f   : > { %v7161_v9 = vunpack.c.l.b16 %v7148_v25  ;;  %v7164_v37 = vunpack.c.h.b16 %v7148_v25 }
 0xa82   : > { %7406 = vrot.lane.b32.xlu1 %v14243_v56, %s15080_s9  ;;  %7396 = vrot.lane.b32.xlu2 %v14170_v4, %s15080_s9 }
 0xa83   : > { %7398 = vrot.lane.b32.xlu0 %v14172_v2, %s15080_s9 }
 0xa84   : > { %v14293_v51 = vpop.permute.xlu1 %7074  ;;  %v14295_v44 = vpop.permute.xlu2 %7210 }
 0xa85   : > { %v7073_v59 = vpop.permute.xlu0 %7072 }
 0xa86   : > { %v7084_v14 = vsel %vm416_vm10, %v7073_v59, %v14293_v51 }
 0xa87   : > { %v7097_v10 = vunpack.c.l.b16 %v7084_v14  ;;  %v7100_v22 = vunpack.c.h.b16 %v7084_v14 }
 0xa8a   : > { %7348 = vrot.lane.b32.xlu1 %v14170_v4, %s15081_s11  ;;  %7350 = vrot.lane.b32.xlu2 %v14195_v46, %s15081_s11 }
 0xa8b   : > { %7140 = vrot.lane.b32.xlu0 %v14220_v41, %s15088_s0 }
 0xa8c   : > { %v14305_v38 = vpop.permute.xlu1 %7010  ;;  %v7133_v2 = vpop.permute.xlu2 %7132 }
 0xa8d   : > { %v7009_v32 = vpop.permute.xlu0 %7008  ;;  %v7154_v13 = vsel %vm450_vm9, %v7133_v2, %v7137_v27 }
 0xa8e   : > { %v7160_v12 = vunpack.c.l.b16 %v7154_v13  ;;  %v7163_v19 = vunpack.c.h.b16 %v7154_v13  ;;  %v7020_v3 = vsel %vm382_vm11, %v7009_v32, %v14305_v38 }
 0xa8f   : > { %v7033_v24 = vunpack.c.l.b16 %v7020_v3  ;;  %v7036_v23 = vunpack.c.h.b16 %v7020_v3 }
 0xa90   : > { %v7172_v31 = vpack.c.b16 %v7161_v9, %v7160_v12  ;;  %v7174_v1 = vpack.c.b16 %v7164_v37, %v7163_v19 }
 0xa92   : > { %7082 = vrot.lane.b32.xlu1 %v14243_v56, %s15085_s14  ;;  %7188 = vst [vmem:[#allocation2 + $0x90] sm:$0xff] %v7172_v31  ;;  %7146 = vrot.lane.b32.xlu2 %v14243_v56, %s15088_s0 }
 0xa93   : > { %7076 = vrot.lane.b32.xlu0 %v14220_v41, %s15085_s14  ;;  %7190 = vst [vmem:[#allocation2 + $0x9c] sm:$0xff] %v7174_v1  ;;  %v10656_v1 = vld [vmem:[%s15027_s5 + $0xb0] sm:$0xff] }
 0xa94   : > { %v14316_v63 = vpop.permute.xlu1 %6946  ;;  %v7069_v0 = vpop.permute.xlu2 %7068 }
 0xa95   : > { %v6945_v60 = vpop.permute.xlu0 %6944  ;;  %v7090_v28 = vsel %vm416_vm10, %v7069_v0, %v7073_v59 }
 0xa96   : > { %v7096_v52 = vunpack.c.l.b16 %v7090_v28  ;;  %v7099_v6 = vunpack.c.h.b16 %v7090_v28  ;;  %v6956_v17 = vsel %vm347_vm12, %v6945_v60, %v14316_v63 }
 0xa97   : > { %v6969_v8 = vunpack.c.l.b16 %v6956_v17  ;;  %v6972_v55 = vunpack.c.h.b16 %v6956_v17 }
 0xa98   : > { %v7108_v5 = vpack.c.b16 %v7097_v10, %v7096_v52  ;;  %v7110_v45 = vpack.c.b16 %v7100_v22, %v7099_v6 }
 0xa9a   : > { %7012 = vrot.lane.b32.xlu1 %v14220_v41, %s15087_s23  ;;  %7124 = vst [vmem:[#allocation2 + $0x60] sm:$0xff] %v7108_v5  ;;  %7284 = vrot.lane.b32.xlu2 %v14170_v4, %s15074_s16 }
 0xa9b   : > { %7286 = vrot.lane.b32.xlu0 %v14195_v46, %s15074_s16  ;;  %7126 = vst [vmem:[#allocation2 + $0x6c] sm:$0xff] %v7110_v45 }
 0xa9c   : > { %v14327_v16 = vpop.permute.xlu1 %7144  ;;  %v7005_v21 = vpop.permute.xlu2 %7004 }
 0xa9d   : > { %v14329_v36 = vpop.permute.xlu0 %7334  ;;  %v7026_v40 = vsel %vm382_vm11, %v7005_v21, %v7009_v32  ;;  %v10654_v21 = vld [vmem:[%s15027_s5 + $0xa0] sm:$0xff] }
 0xa9e   : > { %v7032_v47 = vunpack.c.l.b16 %v7026_v40  ;;  %v7035_v7 = vunpack.c.h.b16 %v7026_v40 }
 0xaa0   : > { %v7044_v35 = vpack.c.b16 %v7033_v24, %v7032_v47  ;;  %v7046_v62 = vpack.c.b16 %v7036_v23, %v7035_v7  ;;  %v7344_v23 = vsel %vm554_vm1, %v14261_v61, %v14329_v36 }
 0xaa2   : > { %7222 = vrot.lane.b32.xlu1 %v14195_v46, %s15075_s17  ;;  %7060 = vst [vmem:[#allocation2 + $0x30] sm:$0xff] %v7044_v35  ;;  %7018 = vrot.lane.b32.xlu2 %v14243_v56, %s15087_s23 }
 0xaa3   : > { %6954 = vrot.lane.b32.xlu0 %v14243_v56, %s15082_s24  ;;  %7062 = vst [vmem:[#allocation2 + $0x3c] sm:$0xff] %v7046_v62 }
 0xaa4   : > { %v14340_v49 = vpop.permute.xlu1 %7080  ;;  %v6925_v42 = vpop.permute.xlu2 %6924 }
 0xaa5   : > { %v14342_v26 = vpop.permute.xlu0 %7270  ;;  %v6962_v11 = vsel %vm347_vm12, %v6925_v42, %v6945_v60 }
 0xaa6   : > { %v6968_v27 = vunpack.c.l.b16 %v6962_v11  ;;  %v6971_v59 = vunpack.c.h.b16 %v6962_v11 }
 0xaa8   : > { %v6980_v25 = vpack.c.b16 %v6969_v8, %v6968_v27  ;;  %v6982_v2 = vpack.c.b16 %v6972_v55, %v6971_v59  ;;  %v10756_v8 = vld [vmem:[#allocation2 + $0x90] sm:$0xf]  ;;  %v7360_v55 = vunpack.c.l.b16 %v7344_v23  ;;  %v7363_v27 = vunpack.c.h.b16 %v7344_v23  ;;  %v11486_v23 = vld [vmem:[#allocation2 + $0x64] sm:$0xf] }
 0xaaa   : > { %7414 = vrot.lane.b32.xlu1 %v14195_v46, %s15076_s29  ;;  %6996 = vst [vmem:[#allocation2] sm:$0xff] %v6980_v25  ;;  %6948 = vrot.lane.b32.xlu2 %v14220_v41, %s15082_s24  ;;  %v10657_v41 = vld [vmem:[%s15027_s5 + $0xb8] sm:$0xff] }
 0xaab   : > { %7220 = vrot.lane.b32.xlu0 %v14170_v4, %s15075_s17  ;;  %6998 = vst [vmem:[#allocation2 + $0xc] sm:$0xff] %v6982_v2  ;;  %v11493_v2 = vld [vmem:[#allocation2 + $0x98] sm:$0xf0] }
 0xaac   : > { %v14351_v56 = vpop.permute.xlu1 %7016  ;;  %v7135_v32 = vpop.permute.xlu2 %7134 }
 0xaad   : > { %v7143_v13 = vpop.permute.xlu0 %7142 }
 0xaae   : > { %v7150_v9 = vsel %vm450_vm9, %v7143_v13, %v14327_v16  ;;  %v7157_v37 = vsel %vm450_vm9, %v7135_v32, %v7143_v13  ;;  %v11492_v32 = vld [vmem:[#allocation2 + $0x94] sm:$0xf]  ;;  %v10758_v13 = vld [vmem:[#allocation2 + $0x9c] sm:$0xf0] }
 0xaaf   : > { %v7166_v12 = vunpack.c.l.b16 %v7157_v37  ;;  %v7167_v19 = vunpack.c.l.b16 %v7150_v9  ;;  %v7169_v46 = vunpack.c.h.b16 %v7157_v37  ;;  %v7170_v31 = vunpack.c.h.b16 %v7150_v9 }
 0xab1   : > { %v7176_v14 = vpack.c.b16 %v7167_v19, %v7166_v12  ;;  %v7178_v0 = vpack.c.b16 %v7170_v31, %v7169_v46 }
 0xab2   : > { %7549 = vperm.xlu1 %11613, %v10657_v41   ;;  %7412 = vrot.lane.b32.xlu2 %v14170_v4, %s15076_s29  ;;  %v10655_v4 = vld [vmem:[%s15027_s5 + $0xa8] sm:$0xff] }
 0xab3   : > { %7192 = vst [vmem:[#allocation2 + $0xa8] sm:$0xff] %v7176_v14  ;;  %7544 = vperm.xlu0 %11612, %v10656_v1  }
 0xab4   : > { %7194 = vst [vmem:[#allocation2 + $0xb4] sm:$0xff] %v7178_v0  ;;  %v14364_v60 = vpop.permute.xlu1 %6952  ;;  %v7071_v28 = vpop.permute.xlu2 %7070  ;;  %v10757_v0 = vor.u32 %v11493_v2, %v10756_v8 }
 0xab5   : > { %v7079_v10 = vpop.permute.xlu0 %7078 }
 0xab6   : > { %v7086_v22 = vsel %vm416_vm10, %v7079_v10, %v14340_v49  ;;  %v7093_v52 = vsel %vm416_vm10, %v7071_v28, %v7079_v10  ;;  %v10761_v28 = vor.u32 %v11492_v32, %v10758_v13 }
 0xab7   : > { %v7102_v6 = vunpack.c.l.b16 %v7093_v52  ;;  %v7103_v5 = vunpack.c.l.b16 %v7086_v22  ;;  %v7105_v45 = vunpack.c.h.b16 %v7093_v52  ;;  %v7106_v3 = vunpack.c.h.b16 %v7086_v22 }
 0xab8   : > { %v7280_v52 = vsel %vm520_vm3, %v14268_v57, %v14342_v26 }
 0xab9   : > { %v7112_v40 = vpack.c.b16 %v7103_v5, %v7102_v6  ;;  %v7114_v24 = vpack.c.b16 %v7106_v3, %v7105_v45 }
 0xaba   : > { %v10768_v47 = vld [vmem:[#allocation2 + $0xa8] sm:$0xf]  ;;  %v11495_v7 = vld [vmem:[#allocation2 + $0xac] sm:$0xf]  ;;  %7534 = vperm.xlu2 %11611, %v10654_v21  }
 0xabb   : > { %7128 = vst [vmem:[#allocation2 + $0x78] sm:$0xff] %v7112_v40  ;;  %7539 = vperm.xlu0 %11612, %v10655_v4   ;;  %v11496_v35 = vld [vmem:[#allocation2 + $0xb0] sm:$0xf0]  ;;  %v10770_v62 = vld [vmem:[#allocation2 + $0xb4] sm:$0xf0] }
 0xabc   : > { %7130 = vst [vmem:[#allocation2 + $0x84] sm:$0xff] %v7114_v24  ;;  %v14378_v17 = vpop.permute.xlu1 %7336  ;;  %v10769_v42 = vor.u32 %v11496_v35, %v10768_v47  ;;  %v10773_v11 = vor.u32 %v11495_v7, %v10770_v62  ;;  %v7007_v61 = vpop.permute.xlu2 %7006  ;;  %v10732_v24 = vld [vmem:[#allocation2 + $0x60] sm:$0xf]  ;;  %v7296_v47 = vunpack.c.l.b16 %v7280_v52  ;;  %v7299_v7 = vunpack.c.h.b16 %v7280_v52  ;;  %v11481_v52 = vld [vmem:[#allocation2 + $0x38] sm:$0xf0] }
 0xabd   : > { %v7345_v59 = vsel %vm554_vm1, %v14329_v36, %v14378_v17  ;;  %v7015_v25 = vpop.permute.xlu0 %7014 }
 0xabe   : > { %v7361_v9 = vunpack.c.l.b16 %v7345_v59  ;;  %v7364_v37 = vunpack.c.h.b16 %v7345_v59  ;;  %7876 = vmatpush.bf16.msrb.mxu2 %v10769_v42  ;;  %7933 = vmatpush.bf16.msrb.mxu0 %v10773_v11  ;;  %v7022_v12 = vsel %vm382_vm11, %v7015_v25, %v14351_v56  ;;  %v7029_v19 = vsel %vm382_vm11, %v7007_v61, %v7015_v25  ;;  %v11487_v42 = vld [vmem:[#allocation2 + $0x68] sm:$0xf0]  ;;  %v10734_v11 = vld [vmem:[#allocation2 + $0x6c] sm:$0xf0] }
 0xabf   : > { %v7038_v46 = vunpack.c.l.b16 %v7029_v19  ;;  %v7039_v31 = vunpack.c.l.b16 %v7022_v12  ;;  %v7041_v41 = vunpack.c.h.b16 %v7029_v19  ;;  %v7042_v1 = vunpack.c.h.b16 %v7022_v12 }
 0xac0   : > { %v7372_v14 = vpack.c.b16 %v7361_v9, %v7360_v55  ;;  %v7374_v36 = vpack.c.b16 %v7364_v37, %v7363_v27  ;;  %v10737_v37 = vor.u32 %v11486_v23, %v10734_v11  ;;  %v11475_v11 = vld [vmem:[#allocation2 + $0x8] sm:$0xf0] }
 0xac1   : > { %v7048_v10 = vpack.c.b16 %v7039_v31, %v7038_v46  ;;  %v7050_v22 = vpack.c.b16 %v7042_v1, %v7041_v41 }
 0xac2   : > { %7388 = vst [vmem:[#allocation2 + $0x150] sm:$0xff] %v7372_v14  ;;  %7877 = vmatpush.bf16.msrb.mxu2 %v10757_v0  ;;  %7934 = vmatpush.bf16.msrb.mxu0 %v10761_v28  ;;  %v10744_v6 = vld [vmem:[#allocation2 + $0x78] sm:$0xf]  ;;  %v11489_v5 = vld [vmem:[#allocation2 + $0x7c] sm:$0xf] }
 0xac3   : > { %7390 = vst [vmem:[#allocation2 + $0x15c] sm:$0xff] %v7374_v36  ;;  %v11490_v45 = vld [vmem:[#allocation2 + $0x80] sm:$0xf0]  ;;  %v10746_v3 = vld [vmem:[#allocation2 + $0x84] sm:$0xf0] }
 0xac4   : > { %7064 = vst [vmem:[#allocation2 + $0x48] sm:$0xff] %v7048_v10  ;;  %v14389_v21 = vpop.permute.xlu1 %7272  ;;  %v10745_v4 = vor.u32 %v11490_v45, %v10744_v6  ;;  %v10749_v40 = vor.u32 %v11489_v5, %v10746_v3  ;;  %v6927_v35 = vpop.permute.xlu2 %6926  ;;  %v11480_v6 = vld [vmem:[#allocation2 + $0x34] sm:$0xf]  ;;  %v10710_v5 = vld [vmem:[#allocation2 + $0x3c] sm:$0xf0] }
 0xac5   : > { %7066 = vst [vmem:[#allocation2 + $0x54] sm:$0xff] %v7050_v22  ;;  %v7281_v57 = vsel %vm520_vm3, %v14342_v26, %v14389_v21  ;;  %v6951_v62 = vpop.permute.xlu0 %6950  ;;  %v10733_v26 = vor.u32 %v11487_v42, %v10732_v24  ;;  %v10708_v22 = vld [vmem:[#allocation2 + $0x30] sm:$0xf]  ;;  %v10713_v3 = vor.u32 %v11480_v6, %v10710_v5  ;;  %v10684_v42 = vld [vmem:[#allocation2] sm:$0xf] }
 0xac6   : > { %v7297_v8 = vunpack.c.l.b16 %v7281_v57  ;;  %v7300_v55 = vunpack.c.h.b16 %v7281_v57  ;;  %7878 = vmatpush.bf16.msrb.mxu2 %v10745_v4  ;;  %7935 = vmatpush.bf16.msrb.mxu0 %v10749_v40  ;;  %v6958_v27 = vsel %vm347_vm12, %v6951_v62, %v14364_v60  ;;  %v6965_v59 = vsel %vm347_vm12, %v6927_v35, %v6951_v62 }
 0xac7   : > { %v6974_v61 = vunpack.c.l.b16 %v6965_v59  ;;  %v6975_v25 = vunpack.c.l.b16 %v6958_v27  ;;  %v6977_v2 = vunpack.c.h.b16 %v6965_v59  ;;  %v6978_v32 = vunpack.c.h.b16 %v6958_v27  ;;  %v10660_v27 = vld [vmem:[%s15026_s4 + $0xf0] sm:$0xf]  ;;  %v11469_v59 = vld [vmem:[%s15026_s4 + $0xf8] sm:$0xf0] }
 0xac8   : > { %v7308_v13 = vpack.c.b16 %v7297_v8, %v7296_v47  ;;  %v7310_v9 = vpack.c.b16 %v7300_v55, %v7299_v7  ;;  %v10709_v45 = vor.u32 %v11481_v52, %v10708_v22  ;;  %v11474_v8 = vld [vmem:[#allocation2 + $0x4] sm:$0xf]  ;;  %v10686_v55 = vld [vmem:[#allocation2 + $0xc] sm:$0xf0] }
 0xac9   : > { %v6984_v12 = vpack.c.b16 %v6975_v25, %v6974_v61  ;;  %v6986_v19 = vpack.c.b16 %v6978_v32, %v6977_v2  ;;  %v10685_v61 = vor.u32 %v11475_v11, %v10684_v42  ;;  %v10689_v25 = vor.u32 %v11474_v8, %v10686_v55 }
 0xaca   : > { %7324 = vst [vmem:[#allocation2 + $0x120] sm:$0xff] %v7308_v13  ;;  %7879 = vmatpush.bf16.msrb.mxu2 %v10733_v26  ;;  %7936 = vmatpush.bf16.msrb.mxu0 %v10737_v37  ;;  %v14409_v2 = vor.u32 %v11469_v59, %v10660_v27 }
 0xacb   : > { %7326 = vst [vmem:[#allocation2 + $0x12c] sm:$0xff] %v7310_v9  ;;  %v10720_v46 = vld [vmem:[#allocation2 + $0x48] sm:$0xf]  ;;  %v11483_v31 = vld [vmem:[#allocation2 + $0x4c] sm:$0xf] }
 0xacc   : > { %7000 = vst [vmem:[#allocation2 + $0x18] sm:$0xff] %v6984_v12  ;;  %v14397_v41 = vpop.permute.xlu1 %7208  ;;  %v11484_v1 = vld [vmem:[#allocation2 + $0x50] sm:$0xf0]  ;;  %v10722_v14 = vld [vmem:[#allocation2 + $0x54] sm:$0xf0]  ;;  %v7205_v36 = vpop.permute.xlu2 %7204 }
 0xacd   : > { %7002 = vst [vmem:[#allocation2 + $0x24] sm:$0xff] %v6986_v19  ;;  %v10721_v0 = vor.u32 %v11484_v1, %v10720_v46  ;;  %v10725_v28 = vor.u32 %v11483_v31, %v10722_v14  ;;  %v7341_v10 = vpop.permute.xlu0 %7340 }
 0xace   : > { %v7346_v32 = vsel %vm554_vm1, %v14276_v48, %v7341_v10 }
 0xacf   : > { %7880 = vmatpush.bf16.msrb.mxu2 %v10721_v0  ;;  %7937 = vmatpush.bf16.msrb.mxu0 %v10725_v28  ;;  %v7366_v12 = vunpack.c.l.b16 %v7346_v32  ;;  %v7369_v19 = vunpack.c.h.b16 %v7346_v32 }
 0xad3   : > { %7881 = vmatpush.bf16.msrb.mxu2 %v10709_v45  ;;  %7938 = vmatpush.bf16.msrb.mxu0 %v10713_v3  ;;  %v10696_v4 = vld [vmem:[#allocation2 + $0x18] sm:$0xf]  ;;  %v11477_v40 = vld [vmem:[#allocation2 + $0x1c] sm:$0xf] }
 0xad4   : > { %v14399_v24 = vpop.permute.xlu1 %7400  ;;  %v11478_v23 = vld [vmem:[#allocation2 + $0x20] sm:$0xf0]  ;;  %v10698_v47 = vld [vmem:[#allocation2 + $0x24] sm:$0xf0]  ;;  %v14401_v7 = vpop.permute.xlu2 %7402 }
 0xad5   : > { %v10697_v57 = vor.u32 %v11478_v23, %v10696_v4  ;;  %v10701_v35 = vor.u32 %v11477_v40, %v10698_v47  ;;  %v7277_v62 = vpop.permute.xlu0 %7276 }
 0xad6   : > { %v7282_v48 = vsel %vm520_vm3, %v14285_v54, %v7277_v62 }
 0xad7   : > { %7882 = vmatpush.bf16.msrb.mxu2 %v10697_v57  ;;  %7939 = vmatpush.bf16.msrb.mxu0 %v10701_v35  ;;  %v7302_v28 = vunpack.c.l.b16 %v7282_v48  ;;  %v10672_v57 = vld [vmem:[%s15026_s4 + $0x108] sm:$0xf]  ;;  %v11472_v35 = vld [vmem:[%s15026_s4 + $0x110] sm:$0xf0] }
 0xadb   : > { %7883 = vmatpush.bf16.msrb.mxu2 %v10685_v61  ;;  %7940 = vmatpush.bf16.msrb.mxu0 %v10689_v25 }
 0xadc   : > { %v7343_v13 = vpop.permute.xlu1 %7342  ;;  %v14414_v26 = vpop.permute.xlu2 %7396 }
 0xadd   : > { %v7347_v9 = vsel %vm554_vm1, %v7341_v10, %v7343_v13  ;;  %v7213_v37 = vpop.permute.xlu0 %7212  ;;  %v7305_v10 = vunpack.c.h.b16 %v7282_v48 }
 0xade   : > { %7884 = vmatmul.bf16.vlgmr.msrb.gmra.mxu2 %v14409_v2  ;;  %7941 = vmatmul.bf16.vlgmr.msrb.gmra.mxu0 %v14409_v2  ;;  %v7367_v46 = vunpack.c.l.b16 %v7347_v9  ;;  %v7370_v31 = vunpack.c.h.b16 %v7347_v9  ;;  %v7218_v25 = vsel %vm486_vm5, %v14295_v44, %v7213_v37 }
 0xae0   : > { %v7376_v1 = vpack.c.b16 %v7367_v46, %v7366_v12  ;;  %v7378_v14 = vpack.c.b16 %v7370_v31, %v7369_v19 }
 0xae2   : > { %7392 = vst [vmem:[#allocation2 + $0x168] sm:$0xff] %v7376_v1  ;;  %v10852_v1 = vld [vmem:[#allocation2 + $0x150] sm:$0xf] }
 0xae3   : > { %7394 = vst [vmem:[#allocation2 + $0x174] sm:$0xff] %v7378_v14  ;;  %v11516_v14 = vld [vmem:[#allocation2 + $0x154] sm:$0xf] }
 0xae4   : > { %v14420_v0 = vpop.permute.xlu1 %7278  ;;  %v7351_v52 = vpop.permute.xlu2 %7350 }
 0xae5   : > { %v7283_v22 = vsel %vm520_vm3, %v7277_v62, %v14420_v0  ;;  %v7207_v6 = vpop.permute.xlu0 %7206  ;;  %v7357_v3 = vsel %vm559_vm4, %v7343_v13, %v7351_v52  ;;  %v14436_v13 = vor.u32 %v11472_v35, %v10672_v57  ;;  %v10828_v35 = vld [vmem:[#allocation2 + $0x120] sm:$0xf] }
 0xae6   : > { %v7303_v5 = vunpack.c.l.b16 %v7283_v22  ;;  %v7306_v45 = vunpack.c.h.b16 %v7283_v22  ;;  %v7216_v4 = vsel %vm486_vm5, %v7205_v36, %v7207_v6  ;;  %v7368_v40 = vunpack.c.l.b16 %v7357_v3 }
 0xae7   : > { %v7371_v23 = vunpack.c.h.b16 %v7357_v3  ;;  %v7217_v54 = vsel %vm486_vm5, %v7207_v6, %v14397_v41  ;;  %v7232_v47 = vunpack.c.l.b16 %v7216_v4  ;;  %v7235_v8 = vunpack.c.h.b16 %v7216_v4 }
 0xae8   : > { %v7312_v62 = vpack.c.b16 %v7303_v5, %v7302_v28  ;;  %v7314_v42 = vpack.c.b16 %v7306_v45, %v7305_v10  ;;  %v7233_v11 = vunpack.c.l.b16 %v7217_v54  ;;  %v7377_v55 = vpack.c.b16 %v7368_v40, %v7368_v40  ;;  %v11517_v28 = vld [vmem:[#allocation2 + $0x158] sm:$0xf0]  ;;  %v10854_v10 = vld [vmem:[#allocation2 + $0x15c] sm:$0xf0] }
 0xae9   : > { %v7379_v36 = vpack.c.b16 %v7371_v23, %v7371_v23  ;;  %v7236_v27 = vunpack.c.h.b16 %v7217_v54  ;;  %v10864_v59 = vld [vmem:[#allocation2 + $0x168] sm:$0xf]  ;;  %v11519_v61 = vld [vmem:[#allocation2 + $0x16c] sm:$0xf]  ;;  %v7238_v22 = vunpack.c.l.b16 %v7218_v25  ;;  %v7241_v5 = vunpack.c.h.b16 %v7218_v25 }
 0xaea   : > { %7328 = vst [vmem:[#allocation2 + $0x138] sm:$0xff] %v7312_v62  ;;  %v7244_v32 = vpack.c.b16 %v7233_v11, %v7232_v47  ;;  %v11520_v9 = vld [vmem:[#allocation2 + $0x170] sm:$0xf0]  ;;  %v10866_v12 = vld [vmem:[#allocation2 + $0x174] sm:$0xf0]  ;;  %v10853_v54 = vor.u32 %v11517_v28, %v10852_v1 }
 0xaeb   : > { %7330 = vst [vmem:[#allocation2 + $0x144] sm:$0xff] %v7314_v42  ;;  %v7246_v19 = vpack.c.b16 %v7236_v27, %v7235_v8  ;;  %v10865_v46 = vor.u32 %v11520_v9, %v10864_v59  ;;  %v10869_v31 = vor.u32 %v11519_v61, %v10866_v12  ;;  %v11511_v62 = vld [vmem:[#allocation2 + $0x128] sm:$0xf0]  ;;  %v11510_v42 = vld [vmem:[#allocation2 + $0x124] sm:$0xf] }
 0xaec   : > { %7393 = vst.msk [vmem:[#allocation2 + $0x170] sm:$0xf] %vm370_vm0, %v7377_v55  ;;  %v14439_v48 = vpop.permute.xlu1 %7214  ;;  %v7147_v52 = vpop.permute.xlu2 %7146  ;;  %v10830_v27 = vld [vmem:[#allocation2 + $0x12c] sm:$0xf0] }
 0xaed   : > { %7395 = vst.msk [vmem:[#allocation2 + $0x17c] sm:$0xf] %vm370_vm0, %v7379_v36  ;;  %v7219_v44 = vsel %vm486_vm5, %v7213_v37, %v14439_v48  ;;  %7895 = vmatpush.bf16.msra.mxu1 %v10865_v46  ;;  %7952 = vmatpush.bf16.msra.mxu2 %v10869_v31  ;;  %v7405_v6 = vpop.permute.xlu0 %7404  ;;  %v7151_v4 = vsel %vm450_vm9, %v14327_v16, %v7147_v52 }
 0xaee   : > { %7260 = vst [vmem:[#allocation2 + $0xf0] sm:$0xff] %v7244_v32  ;;  %7889 = vmatmul.bf16.gmra.mxu2 %v14436_v13  ;;  %7946 = vmatmul.bf16.gmra.mxu0 %v14436_v13  ;;  %v7239_v45 = vunpack.c.l.b16 %v7219_v44  ;;  %v7242_v3 = vunpack.c.h.b16 %v7219_v44  ;;  %v7168_v40 = vunpack.c.l.b16 %v7151_v4  ;;  %v7171_v23 = vunpack.c.h.b16 %v7151_v4 }
 0xaef   : > { %7262 = vst [vmem:[#allocation2 + $0xfc] sm:$0xff] %v7246_v19  ;;  %v10857_v37 = vor.u32 %v11516_v14, %v10854_v10  ;;  %v7410_v16 = vsel %vm588_vm2, %v14401_v7, %v7405_v6  ;;  %v10829_v46 = vor.u32 %v11511_v62, %v10828_v35  ;;  %v10833_v31 = vor.u32 %v11510_v42, %v10830_v27 }
 0xaf0   : > { %v7248_v47 = vpack.c.b16 %v7239_v45, %v7238_v22  ;;  %v7250_v57 = vpack.c.b16 %v7242_v3, %v7241_v5  ;;  %v7177_v11 = vpack.c.b16 %v7168_v40, %v7168_v40  ;;  %v7179_v8 = vpack.c.b16 %v7171_v23, %v7171_v23 }
 0xaf1   : > { %7896 = vmatpush.bf16.msra.mxu1 %v10853_v54  ;;  %7953 = vmatpush.bf16.msra.mxu2 %v10857_v37  ;;  %v10840_v55 = vld [vmem:[#allocation2 + $0x138] sm:$0xf]  ;;  %v11513_v36 = vld [vmem:[#allocation2 + $0x13c] sm:$0xf]  ;;  %v7430_v1 = vunpack.c.l.b16 %v7410_v16  ;;  %v7433_v14 = vunpack.c.h.b16 %v7410_v16 }
 0xaf2   : > { %7264 = vst [vmem:[#allocation2 + $0x108] sm:$0xff] %v7248_v47  ;;  %v11514_v59 = vld [vmem:[#allocation2 + $0x140] sm:$0xf0]  ;;  %v10842_v61 = vld [vmem:[#allocation2 + $0x144] sm:$0xf0] }
 0xaf3   : > { %7266 = vst [vmem:[#allocation2 + $0x114] sm:$0xff] %v7250_v57  ;;  %v10841_v25 = vor.u32 %v11514_v59, %v10840_v55  ;;  %v10845_v32 = vor.u32 %v11513_v36, %v10842_v61  ;;  %v10872_v9 = vld [vmem:[#allocation2 + $0x170] sm:$0xf] }
 0xaf4   : > { %7193 = vst.msk [vmem:[#allocation2 + $0xb0] sm:$0xf] %vm370_vm0, %v7177_v11  ;;  %v14451_v12 = vpop.permute.xlu1 %7406  ;;  %v11521_v19 = vld [vmem:[#allocation2 + $0x178] sm:$0xf0]  ;;  %v7285_v28 = vpop.permute.xlu2 %7284 }
 0xaf5   : > { %7195 = vst.msk [vmem:[#allocation2 + $0xbc] sm:$0xf] %vm370_vm0, %v7179_v8  ;;  %v7411_v7 = vsel %vm588_vm2, %v7405_v6, %v14451_v12  ;;  %7897 = vmatpush.bf16.msra.mxu1 %v10841_v25  ;;  %7954 = vmatpush.bf16.msra.mxu2 %v10845_v32  ;;  %v10873_v10 = vor.u32 %v11521_v19, %v10872_v9  ;;  %v7399_v22 = vpop.permute.xlu0 %7398  ;;  %v10804_v57 = vld [vmem:[#allocation2 + $0xf0] sm:$0xf] }
 0xaf6   : > { %v7431_v44 = vunpack.c.l.b16 %v7411_v7  ;;  %v7434_v52 = vunpack.c.h.b16 %v7411_v7  ;;  %v7290_v5 = vsel %vm525_vm6, %v14389_v21, %v7285_v28  ;;  %v7408_v45 = vsel %vm588_vm2, %v14414_v26, %v7399_v22  ;;  %v11505_v26 = vld [vmem:[#allocation2 + $0xf8] sm:$0xf0] }
 0xaf7   : > { %v7298_v3 = vunpack.c.l.b16 %v7290_v5  ;;  %v7301_v4 = vunpack.c.h.b16 %v7290_v5  ;;  %8009 = vmatpush.bf16.msra.mxu0 %v10873_v10  ;;  %v7409_v40 = vsel %vm588_vm2, %v7399_v22, %v14399_v24  ;;  %v7424_v6 = vunpack.c.l.b16 %v7408_v45 }
 0xaf8   : > { %v7440_v23 = vpack.c.b16 %v7431_v44, %v7430_v1  ;;  %v7442_v54 = vpack.c.b16 %v7434_v52, %v7433_v14  ;;  %v7425_v37 = vunpack.c.l.b16 %v7409_v40  ;;  %v7427_v47 = vunpack.c.h.b16 %v7408_v45  ;;  %v11499_v52 = vld [vmem:[#allocation2 + $0xc8] sm:$0xf0] }
 0xaf9   : > { %v7309_v35 = vpack.c.b16 %v7298_v3, %v7298_v3  ;;  %v7311_v62 = vpack.c.b16 %v7301_v4, %v7301_v4  ;;  %v7428_v42 = vunpack.c.h.b16 %v7409_v40  ;;  %7898 = vmatpush.bf16.msra.mxu1 %v10829_v46  ;;  %7955 = vmatpush.bf16.msra.mxu2 %v10833_v31  ;;  %v10816_v21 = vld [vmem:[#allocation2 + $0x108] sm:$0xf]  ;;  %v11507_v11 = vld [vmem:[#allocation2 + $0x10c] sm:$0xf]  ;;  %v10805_v19 = vor.u32 %v11505_v26, %v10804_v57  ;;  %v11504_v46 = vld [vmem:[#allocation2 + $0xf4] sm:$0xf] }
 0xafa   : > { %7456 = vst [vmem:[#allocation2 + $0x198] sm:$0xff] %v7440_v23  ;;  %v7436_v8 = vpack.c.b16 %v7425_v37, %v7424_v6  ;;  %v11508_v55 = vld [vmem:[#allocation2 + $0x110] sm:$0xf0]  ;;  %v10818_v36 = vld [vmem:[#allocation2 + $0x114] sm:$0xf0] }
 0xafb   : > { %7458 = vst [vmem:[#allocation2 + $0x1a4] sm:$0xff] %v7442_v54  ;;  %v7438_v27 = vpack.c.b16 %v7428_v42, %v7427_v47  ;;  %v10817_v16 = vor.u32 %v11508_v55, %v10816_v21  ;;  %v10821_v59 = vor.u32 %v11507_v11, %v10818_v36  ;;  %v10806_v31 = vld [vmem:[#allocation2 + $0xfc] sm:$0xf0]  ;;  %v10792_v4 = vld [vmem:[#allocation2 + $0xd8] sm:$0xf] }
 0xafc   : > { %7325 = vst.msk [vmem:[#allocation2 + $0x128] sm:$0xf] %vm370_vm0, %v7309_v35  ;;  %v7349_v61 = vpop.permute.xlu1 %7348  ;;  %v7019_v32 = vpop.permute.xlu2 %7018  ;;  %v10809_v3 = vor.u32 %v11504_v46, %v10806_v31  ;;  %v11502_v40 = vld [vmem:[#allocation2 + $0xe0] sm:$0xf0]  ;;  %v14470_v6 = vld [vmem:[#allocation2 + $0xcc] sm:$0xf0] }
 0xafd   : > { %7327 = vst.msk [vmem:[#allocation2 + $0x134] sm:$0xf] %vm370_vm0, %v7311_v62  ;;  %v7354_v25 = vsel %vm559_vm4, %v14378_v17, %v7349_v61  ;;  %7899 = vmatpush.bf16.msra.mxu1 %v10817_v16  ;;  %7956 = vmatpush.bf16.msra.mxu2 %v10821_v59  ;;  %v7141_v9 = vpop.permute.xlu0 %7140  ;;  %v7023_v7 = vsel %vm382_vm11, %v14351_v56, %v7019_v32  ;;  %v11501_v37 = vld [vmem:[#allocation2 + $0xdc] sm:$0xf]  ;;  %v10794_v47 = vld [vmem:[#allocation2 + $0xe4] sm:$0xf0] }
 0xafe   : > { %7452 = vst [vmem:[#allocation2 + $0x180] sm:$0xff] %v7436_v8  ;;  %v7362_v1 = vunpack.c.l.b16 %v7354_v25  ;;  %v7365_v14 = vunpack.c.h.b16 %v7354_v25  ;;  %v7149_v28 = vsel %vm450_vm9, %v14283_v58, %v7141_v9  ;;  %v7040_v10 = vunpack.c.l.b16 %v7023_v7  ;;  %v10780_v58 = vld [vmem:[#allocation2 + $0xc0] sm:$0xf]  ;;  %v11468_v57 = vld [vmem:[%s15026_s4 + $0xf4] sm:$0xf] }
 0xaff   : > { %7454 = vst [vmem:[#allocation2 + $0x18c] sm:$0xff] %v7438_v27  ;;  %v7043_v22 = vunpack.c.h.b16 %v7023_v7  ;;  %v7162_v17 = vunpack.c.l.b16 %v7149_v28  ;;  %v7165_v44 = vunpack.c.h.b16 %v7149_v28  ;;  %v11498_v42 = vld [vmem:[#allocation2 + $0xc4] sm:$0xf]  ;;  %v10662_v21 = vld [vmem:[%s15026_s4 + $0xfc] sm:$0xf0]  ;;  %v10793_v26 = vor.u32 %v11502_v40, %v10792_v4 }
 0xb00   : > { %v7373_v5 = vpack.c.b16 %v7362_v1, %v7362_v1  ;;  %v7375_v45 = vpack.c.b16 %v7365_v14, %v7365_v14  ;;  %v7049_v23 = vpack.c.b16 %v7040_v10, %v7040_v10  ;;  %v10668_v55 = vld [vmem:[%s15026_s4 + $0xf8] sm:$0xf]  ;;  %v11470_v36 = vld [vmem:[%s15026_s4 + $0x100] sm:$0xf0]  ;;  %v10797_v16 = vor.u32 %v11501_v37, %v10794_v47  ;;  %v10776_v61 = vld [vmem:[#allocation2 + $0xb0] sm:$0xf] }
 0xb01   : > { %v7051_v54 = vpack.c.b16 %v7043_v22, %v7043_v22  ;;  %7900 = vmatpush.bf16.msra.mxu1 %v10805_v19  ;;  %v10888_v56 = vld [vmem:[#allocation2 + $0x198] sm:$0xf]  ;;  %v7173_v35 = vpack.c.b16 %v7162_v17, %v7162_v17  ;;  %7957 = vmatpush.bf16.msra.mxu2 %v10809_v3  ;;  %v7175_v11 = vpack.c.b16 %v7165_v44, %v7165_v44  ;;  %v11497_v25 = vld [vmem:[#allocation2 + $0xb8] sm:$0xf0] }
 0xb02   : > { %7389 = vst.msk [vmem:[#allocation2 + $0x158] sm:$0xf] %vm370_vm0, %v7373_v5  ;;  %v11526_v62 = vld [vmem:[#allocation2 + $0x1a0] sm:$0xf0]  ;;  %v10781_v59 = vor.u32 %v11499_v52, %v10780_v58  ;;  %v10785_v31 = vor.u32 %v11498_v42, %v14470_v6  ;;  %v11525_v1 = vld [vmem:[#allocation2 + $0x19c] sm:$0xf]  ;;  %v14491_v14 = vor.u32 %v11468_v57, %v10662_v21  ;;  %v14499_v6 = vor.u32 %v11470_v36, %v10668_v55 }
 0xb03   : > { %7391 = vst.msk [vmem:[#allocation2 + $0x164] sm:$0xf] %vm370_vm0, %v7375_v45  ;;  %v10889_v8 = vor.u32 %v11526_v62, %v10888_v56  ;;  %v10890_v17 = vld [vmem:[#allocation2 + $0x1a4] sm:$0xf0]  ;;  %v10777_v56 = vor.u32 %v11497_v25, %v10776_v61 }
 0xb04   : > { %7065 = vst.msk [vmem:[#allocation2 + $0x50] sm:$0xf] %vm370_vm0, %v7049_v23  ;;  %v7083_v27 = vpop.permute.xlu1 %7082  ;;  %v6949_v9 = vpop.permute.xlu2 %6948 }
 0xb05   : > { %7067 = vst.msk [vmem:[#allocation2 + $0x5c] sm:$0xf] %vm370_vm0, %v7051_v54  ;;  %v7087_v32 = vsel %vm416_vm10, %v14340_v49, %v7083_v27  ;;  %7901 = vmatpush.bf16.msra.mxu1 %v10793_v26  ;;  %7920 = vmatpush.bf16.msrb.mxu3 %v10889_v8  ;;  %v7077_v19 = vpop.permute.xlu0 %7076  ;;  %v10876_v46 = vld [vmem:[#allocation2 + $0x180] sm:$0xf]  ;;  %v6957_v10 = vsel %vm347_vm12, %v14316_v63, %v6949_v9 }
 0xb06   : > { %7189 = vst.msk [vmem:[#allocation2 + $0x98] sm:$0xf] %vm370_vm0, %v7173_v35  ;;  %v7104_v7 = vunpack.c.l.b16 %v7087_v32  ;;  %v7107_v28 = vunpack.c.h.b16 %v7087_v32  ;;  %7958 = vmatpush.bf16.msra.mxu2 %v10797_v16  ;;  %v7085_v49 = vsel %vm416_vm10, %v14293_v51, %v7077_v19  ;;  %v11523_v22 = vld [vmem:[#allocation2 + $0x188] sm:$0xf0]  ;;  %v6970_v44 = vunpack.c.l.b16 %v6957_v10  ;;  %v11522_v51 = vld [vmem:[#allocation2 + $0x184] sm:$0xf] }
 0xb07   : > { %7191 = vst.msk [vmem:[#allocation2 + $0xa4] sm:$0xf] %vm370_vm0, %v7175_v11  ;;  %v6973_v52 = vunpack.c.h.b16 %v6957_v10  ;;  %v7098_v5 = vunpack.c.l.b16 %v7085_v49  ;;  %v7101_v45 = vunpack.c.h.b16 %v7085_v49  ;;  %v10877_v40 = vor.u32 %v11523_v22, %v10876_v46  ;;  %v10878_v57 = vld [vmem:[#allocation2 + $0x18c] sm:$0xf0] }
 0xb08   : > { %v7113_v3 = vpack.c.b16 %v7104_v7, %v7104_v7  ;;  %v7115_v4 = vpack.c.b16 %v7107_v28, %v7107_v28  ;;  %v6981_v23 = vpack.c.b16 %v6970_v44, %v6970_v44  ;;  %v10893_v63 = vor.u32 %v11525_v1, %v10890_v17  ;;  %v11471_v17 = vld [vmem:[%s15026_s4 + $0x10c] sm:$0xf]  ;;  %v10674_v44 = vld [vmem:[%s15026_s4 + $0x114] sm:$0xf0] }
 0xb09   : > { %v6983_v54 = vpack.c.b16 %v6973_v52, %v6973_v52  ;;  %7902 = vmatpush.bf16.msra.mxu1 %v10781_v59  ;;  %v10860_v37 = vld [vmem:[#allocation2 + $0x158] sm:$0xf]  ;;  %v7109_v47 = vpack.c.b16 %v7098_v5, %v7098_v5  ;;  %7921 = vmatpush.bf16.msrb.mxu3 %v10877_v40  ;;  %v7111_v35 = vpack.c.b16 %v7101_v45, %v7101_v45 }
 0xb0a   : > { %7129 = vst.msk [vmem:[#allocation2 + $0x80] sm:$0xf] %vm370_vm0, %v7113_v3  ;;  %7959 = vmatpush.bf16.msra.mxu2 %v10785_v31  ;;  %v11518_v58 = vld [vmem:[#allocation2 + $0x160] sm:$0xf0]  ;;  %v10881_v8 = vor.u32 %v11522_v51, %v10878_v57  ;;  %v10680_v3 = vld [vmem:[%s15026_s4 + $0x110] sm:$0xf] }
 0xb0b   : > { %7131 = vst.msk [vmem:[#allocation2 + $0x8c] sm:$0xf] %vm370_vm0, %v7115_v4  ;;  %v10861_v62 = vor.u32 %v11518_v58, %v10860_v37  ;;  %v14539_v58 = vor.u32 %v11471_v17, %v10674_v44 }
 0xb0c   : > { %6997 = vst.msk [vmem:[#allocation2 + $0x8] sm:$0xf] %vm370_vm0, %v6981_v23  ;;  %7903 = vmatmul.bf16.vlgmr.msra.gmra.mxu1 %v14491_v14  ;;  %v7013_v42 = vpop.permute.xlu1 %7012  ;;  %10898 = vmatmul.msk.bf16.vlgmr.msrb.gmra.mxu3 %vm1950_vm14, %v14499_v6  ;;  %v7413_v11 = vpop.permute.xlu2 %7412 }
 0xb0d   : > { %7977 = vmatpush.bf16.msrb.mxu1 %v10893_v63  ;;  %7990 = vmatpush.bf16.msra.mxu3 %v10777_v56  ;;  %6999 = vst.msk [vmem:[#allocation2 + $0x14] sm:$0xf] %vm370_vm0, %v6983_v54  ;;  %v7021_v21 = vsel %vm382_vm11, %v14305_v38, %v7013_v42  ;;  %v7287_v26 = vpop.permute.xlu0 %7286  ;;  %v10764_v55 = vld [vmem:[#allocation2 + $0x98] sm:$0xf]  ;;  %v7418_v16 = vsel %vm593_vm13, %v14399_v24, %v7413_v11  ;;  %v11473_v63 = vld [vmem:[%s15026_s4 + $0x118] sm:$0xf0] }
 0xb0e   : > { %7960 = vmatmul.bf16.vlgmr.msra.gmra.mxu2 %v14491_v14  ;;  %7125 = vst.msk [vmem:[#allocation2 + $0x68] sm:$0xf] %vm370_vm0, %v7109_v47  ;;  %v7034_v36 = vunpack.c.l.b16 %v7021_v21  ;;  %v7037_v27 = vunpack.c.h.b16 %v7021_v21  ;;  %8010 = vmatpush.bf16.msra.mxu0 %v10861_v62  ;;  %v7293_v59 = vsel %vm525_vm6, %v14420_v0, %v7287_v26  ;;  %v11494_v61 = vld [vmem:[#allocation2 + $0xa0] sm:$0xf0]  ;;  %v7426_v25 = vunpack.c.l.b16 %v7418_v16  ;;  %v10728_v42 = vld [vmem:[#allocation2 + $0x50] sm:$0xf] }
 0xb0f   : > { %7127 = vst.msk [vmem:[#allocation2 + $0x74] sm:$0xf] %vm370_vm0, %v7111_v35  ;;  %v7429_v38 = vunpack.c.h.b16 %v7418_v16  ;;  %v7304_v32 = vunpack.c.l.b16 %v7293_v59  ;;  %v7307_v9 = vunpack.c.h.b16 %v7293_v59  ;;  %v10765_v31 = vor.u32 %v11494_v61, %v10764_v55 }
 0xb10   : > { %v7045_v19 = vpack.c.b16 %v7034_v36, %v7034_v36  ;;  %v7047_v46 = vpack.c.b16 %v7037_v27, %v7037_v27  ;;  %v7437_v1 = vpack.c.b16 %v7426_v25, %v7426_v25  ;;  %v14541_v62 = vor.u32 %v11473_v63, %v10680_v3 }
 0xb11   : > { %7978 = vmatpush.bf16.msrb.mxu1 %v10881_v8  ;;  %v7439_v7 = vpack.c.b16 %v7429_v38, %v7429_v38  ;;  %v10752_v28 = vld [vmem:[#allocation2 + $0x80] sm:$0xf]  ;;  %v7313_v24 = vpack.c.b16 %v7304_v32, %v7304_v32  ;;  %7991 = vmatpush.bf16.msra.mxu3 %v10765_v31  ;;  %v7315_v0 = vpack.c.b16 %v7307_v9, %v7307_v9 }
 0xb12   : > { %7061 = vst.msk [vmem:[#allocation2 + $0x38] sm:$0xf] %vm370_vm0, %v7045_v19  ;;  %v11491_v10 = vld [vmem:[#allocation2 + $0x88] sm:$0xf0] }
 0xb13   : > { %7063 = vst.msk [vmem:[#allocation2 + $0x44] sm:$0xf] %vm370_vm0, %v7047_v46  ;;  %v10753_v49 = vor.u32 %v11491_v10, %v10752_v28  ;;  %v10692_v44 = vld [vmem:[#allocation2 + $0x8] sm:$0xf] }
 0xb14   : > { %7453 = vst.msk [vmem:[#allocation2 + $0x188] sm:$0xf] %vm370_vm0, %v7437_v1  ;;  %v7223_v22 = vpop.permute.xlu1 %7222  ;;  %v10836_v1 = vld [vmem:[#allocation2 + $0x128] sm:$0xf] }
 0xb15   : > { %7455 = vst.msk [vmem:[#allocation2 + $0x194] sm:$0xf] %vm370_vm0, %v7439_v7  ;;  %v7229_v52 = vsel %vm491_vm7, %v14439_v48, %v7223_v22  ;;  %v6955_v5 = vpop.permute.xlu0 %6954  ;;  %v10740_v45 = vld [vmem:[#allocation2 + $0x68] sm:$0xf]  ;;  %7992 = vmatpush.bf16.msra.mxu3 %v10753_v49  ;;  %v11512_v7 = vld [vmem:[#allocation2 + $0x130] sm:$0xf0] }
 0xb16   : > { %7329 = vst.msk [vmem:[#allocation2 + $0x140] sm:$0xf] %vm370_vm0, %v7313_v24  ;;  %v7240_v4 = vunpack.c.l.b16 %v7229_v52  ;;  %v7243_v40 = vunpack.c.h.b16 %v7229_v52  ;;  %v6959_v23 = vsel %vm347_vm12, %v14364_v60, %v6955_v5  ;;  %v11488_v54 = vld [vmem:[#allocation2 + $0x70] sm:$0xf0]  ;;  %v11485_v60 = vld [vmem:[#allocation2 + $0x58] sm:$0xf0] }
 0xb17   : > { %7331 = vst.msk [vmem:[#allocation2 + $0x14c] sm:$0xf] %vm370_vm0, %v7315_v0  ;;  %v6976_v48 = vunpack.c.l.b16 %v6959_v23  ;;  %v6979_v56 = vunpack.c.h.b16 %v6959_v23  ;;  %v10741_v47 = vor.u32 %v11488_v54, %v10740_v45  ;;  %v10729_v11 = vor.u32 %v11485_v60, %v10728_v42  ;;  %v11476_v52 = vld [vmem:[#allocation2 + $0x10] sm:$0xf0] }
 0xb18   : > { %v7249_v37 = vpack.c.b16 %v7240_v4, %v7240_v4  ;;  %v7251_v51 = vpack.c.b16 %v7243_v40, %v7243_v40  ;;  %v10837_v0 = vor.u32 %v11512_v7, %v10836_v1  ;;  %v10693_v5 = vor.u32 %v11476_v52, %v10692_v44 }
 0xb19   : > { %v6985_v57 = vpack.c.b16 %v6976_v48, %v6976_v48  ;;  %v6987_v35 = vpack.c.b16 %v6979_v56, %v6979_v56  ;;  %7993 = vmatpush.bf16.msra.mxu3 %v10741_v47  ;;  %v10716_v26 = vld [vmem:[#allocation2 + $0x38] sm:$0xf]  ;;  %v11503_v56 = vld [vmem:[#allocation2 + $0xe8] sm:$0xf0] }
 0xb1a   : > { %7265 = vst.msk [vmem:[#allocation2 + $0x110] sm:$0xf] %vm370_vm0, %v7249_v37  ;;  %v11482_v27 = vld [vmem:[#allocation2 + $0x40] sm:$0xf0] }
 0xb1b   : > { %7267 = vst.msk [vmem:[#allocation2 + $0x11c] sm:$0xf] %vm370_vm0, %v7251_v51  ;;  %v10717_v31 = vor.u32 %v11482_v27, %v10716_v26  ;;  %v10884_v54 = vld [vmem:[#allocation2 + $0x188] sm:$0xf]  ;;  %v10800_v51 = vld [vmem:[#allocation2 + $0xe0] sm:$0xf] }
 0xb1c   : > { %7001 = vst.msk [vmem:[#allocation2 + $0x20] sm:$0xf] %vm370_vm0, %v6985_v57  ;;  %7908 = vmatmul.bf16.gmra.mxu1 %v14539_v58  ;;  %v7415_v21 = vpop.permute.xlu1 %7414  ;;  %10899 = vmatmul.msk.bf16.gmra.mxu3 %vm1950_vm14, %v14541_v62  ;;  %v11524_v63 = vld [vmem:[#allocation2 + $0x190] sm:$0xf0]  ;;  %v10801_v47 = vor.u32 %v11503_v56, %v10800_v51  ;;  %v8063_v51 = vunpack.c.h.bf16 %v13696_v34 }
 0xb1d   : > { %7003 = vst.msk [vmem:[#allocation2 + $0x2c] sm:$0xf] %vm370_vm0, %v6987_v35  ;;  %v7421_v8 = vsel %vm593_vm13, %v14451_v12, %v7415_v21  ;;  %v10848_v55 = vld [vmem:[#allocation2 + $0x140] sm:$0xf]  ;;  %v7221_v36 = vpop.permute.xlu0 %7220  ;;  %7994 = vmatpush.bf16.msra.mxu3 %v10729_v11  ;;  %v10885_v37 = vor.u32 %v11524_v63, %v10884_v54  ;;  %v11500_v57 = vld [vmem:[#allocation2 + $0xd0] sm:$0xf0] }
 0xb1e   : > { %7965 = vmatmul.bf16.gmra.mxu2 %v14539_v58  ;;  %v7432_v16 = vunpack.c.l.b16 %v7421_v8  ;;  %v7435_v59 = vunpack.c.h.b16 %v7421_v8  ;;  %v11515_v61 = vld [vmem:[#allocation2 + $0x148] sm:$0xf0]  ;;  %v7226_v25 = vsel %vm491_vm7, %v14397_v41, %v7221_v36  ;;  %v10788_v35 = vld [vmem:[#allocation2 + $0xc8] sm:$0xf] }
 0xb1f   : > { %v10849_v38 = vor.u32 %v11515_v61, %v10848_v55  ;;  %v7234_v32 = vunpack.c.l.b16 %v7226_v25  ;;  %v7237_v9 = vunpack.c.h.b16 %v7226_v25  ;;  %v10789_v42 = vor.u32 %v11500_v57, %v10788_v35  ;;  %v7535_v25 = vpop.permute.xlu2 %7534 }
 0xb20   : > { %v7441_v19 = vpack.c.b16 %v7432_v16, %v7432_v16  ;;  %v7443_v46 = vpack.c.b16 %v7435_v59, %v7435_v59 }
 0xb21   : > { %8011 = vmatpush.bf16.msra.mxu0 %v10849_v38  ;;  %v7245_v12 = vpack.c.b16 %v7234_v32, %v7234_v32  ;;  %v7247_v28 = vpack.c.b16 %v7237_v9, %v7237_v9  ;;  %7995 = vmatpush.bf16.msra.mxu3 %v10717_v31  ;;  %v10824_v24 = vld [vmem:[#allocation2 + $0x110] sm:$0xf] }
 0xb22   : > { %7457 = vst.msk [vmem:[#allocation2 + $0x1a0] sm:$0xf] %vm370_vm0, %v7441_v19  ;;  %v11509_v10 = vld [vmem:[#allocation2 + $0x118] sm:$0xf0] }
 0xb23   : > { %7459 = vst.msk [vmem:[#allocation2 + $0x1ac] sm:$0xf] %vm370_vm0, %v7443_v46  ;;  %v10704_v41 = vld [vmem:[#allocation2 + $0x20] sm:$0xf]  ;;  %v10825_v17 = vor.u32 %v11509_v10, %v10824_v24 }
 0xb24   : > { %7261 = vst.msk [vmem:[#allocation2 + $0xf8] sm:$0xf] %vm370_vm0, %v7245_v12  ;;  %v11479_v49 = vld [vmem:[#allocation2 + $0x28] sm:$0xf0] }
 0xb25   : > { %7263 = vst.msk [vmem:[#allocation2 + $0x104] sm:$0xf] %vm370_vm0, %v7247_v28  ;;  %8012 = vmatpush.bf16.msra.mxu0 %v10837_v0  ;;  %v10705_v22 = vor.u32 %v11479_v49, %v10704_v41  ;;  %v14571_v61 = vpop.permute.xlu0 %7544  ;;  %v8059_v0 = vunpack.c.l.bf16 %v13687_v43 }
 0xb27   : > { %7996 = vmatpush.bf16.msra.mxu3 %v10705_v22  ;;  %v8060_v22 = vunpack.c.h.bf16 %v13687_v43 }
 0xb29   : > { %8013 = vmatpush.bf16.msra.mxu0 %v10825_v17  ;;  %v10896_v45 = vld [vmem:[#allocation2 + $0x1a0] sm:$0xf] }
 0xb2a   : > { %v11527_v3 = vld [vmem:[#allocation2 + $0x1a8] sm:$0xf0] }
 0xb2b   : > { %7997 = vmatpush.bf16.msra.mxu3 %v10693_v5  ;;  %v10812_v4 = vld [vmem:[#allocation2 + $0xf8] sm:$0xf]  ;;  %v10897_v40 = vor.u32 %v11527_v3, %v10896_v45 }
 0xb2c   : > { %10900 = vmatmul.msk.bf16.vlgmr.msrb.gmra.mxu1 %vm1950_vm14, %v14499_v6  ;;  %v11506_v23 = vld [vmem:[#allocation2 + $0x100] sm:$0xf0] }
 0xb2d   : > { %v10813_v48 = vor.u32 %v11506_v23, %v10812_v4  ;;  %8034 = vmatpush.bf16.msrb.mxu2 %v10897_v40  ;;  %v7540_v7 = vpop.permute.xlu0 %7539 }
 0xb2e   : > { %7998 = vmatmul.bf16.vlgmr.msra.gmra.mxu3 %v14409_v2 }
 0xb2f   : > { %8014 = vmatpush.bf16.msra.mxu0 %v10813_v48 }
 0xb31   : > { %8035 = vmatpush.bf16.msrb.mxu2 %v10885_v37  ;;  %v8062_v37 = vunpack.c.l.bf16 %v13696_v34 }
 0xb33   : > { %8015 = vmatpush.bf16.msra.mxu0 %v10801_v47 }
 0xb34   : > { %10902 = vmatmul.msk.bf16.vlgmr.msrb.gmra.mxu2 %vm1950_vm14, %v14499_v6 }
 0xb37   : > { %8016 = vmatpush.bf16.msra.mxu0 %v10789_v42 }
 0xb3a   : > { %8017 = vmatmul.bf16.vlgmr.msra.gmra.mxu0 %v14491_v14 }
 0xb3c   : > { %10901 = vmatmul.msk.bf16.gmra.mxu1 %vm1950_vm14, %v14541_v62 }
 0xb3e   : > { %8003 = vmatmul.bf16.gmra.mxu3 %v14436_v13 }
 0xb44   : > { %10903 = vmatmul.msk.bf16.gmra.mxu2 %vm1950_vm14, %v14541_v62 }
 0xb4a   : > { %8022 = vmatmul.bf16.gmra.mxu0 %v14539_v58 }
 0xb5b   : > { %v7942_v26 = vpop.f32.mrf.mxu0 }
 0xb5c   : > { %v7943_v19 = vadd.f32 %v7942_v26, %v7535_v25 }
 0xb61   : > { %v7885_v2 = vpop.f32.mrf.mxu2 }
 0xb62   : > { %v7886_v38 = vadd.f32 %v7885_v2, %v7535_v25 }
 0xb63   : > { %v7944_v16 = vpop.f32.mrf.mxu0 }
 0xb64   : > { %v7945_v17 = vadd.f32 %v7944_v16, %v7540_v7 }
 0xb69   : > { %v7887_v60 = vpop.f32.mrf.mxu2 }
 0xb6a   : > { %v7888_v28 = vadd.f32 %v7887_v60, %v7540_v7 }
 0xb6b   : > { %v7947_v32 = vpop.f32.mrf.mxu0 }
 0xb6c   : > { %v7948_v2 = vadd.f32 %v7947_v32, %v14571_v61 }
 0xb71   : > { %v7890_v21 = vpop.f32.mrf.mxu2 }
 0xb72   : > { %v7891_v56 = vadd.f32 %v7890_v21, %v14571_v61 }
 0xb73   : > { %v7949_v45 = vpop.f32.mrf.mxu0 }
 0xb79   : > { %v7892_v11 = vpop.f32.mrf.mxu2 }
 0xb89   : > { %v7904_v6 = vpop.f32.mrf.mxu1 }
 0xb8a   : > { %v7905_v58 = vadd.f32 %v7904_v6, %v7886_v38 }
 0xb8f   : > { %v7923_v8 = vpop.f32.mrf.mxu3 }
 0xb90   : > { %v7924_v46 = vadd.f32 %v7923_v8, %v7905_v58  ;;  %v14583_v8 = vpop.permute.xlu1 %7549 }
 0xb91   : > { %v7961_v55 = vpop.f32.mrf.mxu2  ;;  %v7906_v36 = vpop.f32.mrf.mxu1  ;;  %v7893_v21 = vadd.f32 %v7892_v11, %v14583_v8  ;;  %v8061_v11 = vunpack.c.l.bf16 %v13729_v50 }
 0xb92   : > { %v7962_v31 = vadd.f32 %v7961_v55, %v7943_v19  ;;  %v8047_v24 = vmul.f32 %v7924_v46, %v11889_v18  ;;  %v7907_v41 = vadd.f32 %v7906_v36, %v7888_v28 }
 0xb94   : > { %v8071_v44 = vadd.f32 %v8059_v0, %v8047_v24  ;;  %v7950_v0 = vadd.f32 %v7949_v45, %v14583_v8 }
 0xb97   : > { %v7925_v14 = vpop.f32.mrf.mxu3 }
 0xb98   : > { %v7926_v52 = vadd.f32 %v7925_v14, %v7907_v41 }
 0xb99   : > { %v7909_v27 = vpop.f32.mrf.mxu1  ;;  %v7963_v59 = vpop.f32.mrf.mxu2 }
 0xb9a   : > { %v7964_v4 = vadd.f32 %v7963_v59, %v7945_v17  ;;  %v8050_v63 = vmul.f32 %v7926_v52, %v11889_v18  ;;  %v7910_v47 = vadd.f32 %v7909_v27, %v7891_v56 }
 0xb9c   : > { %v8074_v57 = vadd.f32 %v8062_v37, %v8050_v63  ;;  %v8064_v63 = vunpack.c.l.bf16 %v13752_v29 }
 0xb9f   : > { %v7928_v13 = vpop.f32.mrf.mxu3 }
 0xba0   : > { %v7929_v60 = vadd.f32 %v7928_v13, %v7910_v47 }
 0xba1   : > { %v7911_v62 = vpop.f32.mrf.mxu1  ;;  %v7966_v9 = vpop.f32.mrf.mxu2 }
 0xba2   : > { %v7967_v14 = vadd.f32 %v7966_v9, %v7948_v2  ;;  %v8053_v32 = vmul.f32 %v7929_v60, %v11889_v18  ;;  %v7912_v13 = vadd.f32 %v7911_v62, %v7893_v21  ;;  %v8065_v9 = vunpack.c.l.bf16 %v13722_v15 }
 0xba7   : > { %v7930_v1 = vpop.f32.mrf.mxu3 }
 0xba8   : > { %v7931_v28 = vadd.f32 %v7930_v1, %v7912_v13 }
 0xba9   : > { %v7980_v12 = vpop.f32.mrf.mxu1  ;;  %v7968_v3 = vpop.f32.mrf.mxu2 }
 0xbaa   : > { %v7981_v10 = vadd.f32 %v7980_v12, %v7962_v31  ;;  %v7969_v17 = vadd.f32 %v7968_v3, %v7950_v0  ;;  %v8056_v52 = vmul.f32 %v7931_v28, %v11889_v18 }
 0xbac   : > { %v8048_v49 = vmul.f32 %v7981_v10, %v11891_v20  ;;  %v8066_v10 = vunpack.c.h.bf16 %v13722_v15 }
 0xbae   : > { %v8072_v5 = vadd.f32 %v8060_v22, %v8048_v49  ;;  %v8077_v49 = vadd.f32 %v8065_v9, %v8053_v32 }
 0xbb0   : > { %v8083_v40 = vpack.c.bf16 %v8072_v5, %v8071_v44 }
 0xbb1   : > { %v7999_v23 = vpop.f32.mrf.mxu3  ;;  %v7982_v54 = vpop.f32.mrf.mxu1 }
 0xbb2   : > { %8379 = vst [vmem:[#allocation2 + $0xc0] sm:$0xff] %v8083_v40  ;;  %v7983_v48 = vadd.f32 %v7982_v54, %v7964_v4  ;;  %v8000_v35 = vadd.f32 %v7999_v23, %v7535_v25  ;;  %v8115_v16 = vunpack.c.l.b16 %v8083_v40  ;;  %v8116_v34 = vunpack.c.h.b16 %v8083_v40 }
 0xbb3   : > { %v8068_v23 = vunpack.c.l.bf16 %v13744_v53 }
 0xbb4   : > { %v8051_v43 = vmul.f32 %v7983_v48, %v11891_v20  ;;  %v8069_v48 = vunpack.c.h.bf16 %v13744_v53 }
 0xbb5   : > { %v8080_v56 = vadd.f32 %v8068_v23, %v8056_v52 }
 0xbb6   : > { %v8075_v42 = vadd.f32 %v8063_v51, %v8051_v43 }
 0xbb7   : > { %v8018_v6 = vpop.f32.mrf.mxu0  ;;  %v8037_v26 = vpop.f32.mrf.mxu2 }
 0xbb8   : > { %v8085_v55 = vpack.c.bf16 %v8075_v42, %v8074_v57  ;;  %v8019_v36 = vadd.f32 %v8018_v6, %v8000_v35 }
 0xbb9   : > { %v8001_v59 = vpop.f32.mrf.mxu3  ;;  %v7985_v38 = vpop.f32.mrf.mxu1 }
 0xbba   : > { %v8117_v27 = vunpack.c.l.b16 %v8085_v55  ;;  %v8118_v58 = vunpack.c.h.b16 %v8085_v55  ;;  %8381 = vst [vmem:[#allocation2 + $0xcc] sm:$0xff] %v8085_v55  ;;  %v8038_v25 = vadd.f32 %v8037_v26, %v8019_v36  ;;  %v7986_v19 = vadd.f32 %v7985_v38, %v7967_v14 }
 0xbbb   : > { %v8002_v41 = vadd.f32 %v8001_v59, %v7540_v7  ;;  %v8067_v38 = vunpack.c.l.bf16 %v13773_v30 }
 0xbbc   : > { %v14587_v46 = vpack.c.b16 %v8117_v27, %v8115_v16  ;;  %v14589_v31 = vpack.c.b16 %v8118_v58, %v8116_v34  ;;  %v8049_v12 = vmul.f32 %v8038_v25, %v11897_v33  ;;  %v8054_v24 = vmul.f32 %v7986_v19, %v11891_v20 }
 0xbbe   : > { %v8073_v62 = vadd.f32 %v8061_v11, %v8049_v12  ;;  %8321 = vrot.lane.b32.xlu0 %v14589_v31, %s15088_s0  ;;  %8517 = vrot.lane.b32.xlu2 %v14589_v31, %s15089_s1  ;;  %v8078_v22 = vadd.f32 %v8066_v10, %v8054_v24 }
 0xbbf   : > { %v8020_v50 = vpop.f32.mrf.mxu0  ;;  %8515 = vrot.lane.b32.xlu1 %v14587_v46, %s15089_s1  ;;  %v8039_v1 = vpop.f32.mrf.mxu2 }
 0xbc0   : > { %v8084_v44 = vpack.c.bf16 %v8073_v62, %v8073_v62  ;;  %v8021_v15 = vadd.f32 %v8020_v50, %v8002_v41  ;;  %v8087_v7 = vpack.c.bf16 %v8078_v22, %v8077_v49 }
 0xbc1   : > { %v8004_v5 = vpop.f32.mrf.mxu3  ;;  %v7987_v45 = vpop.f32.mrf.mxu1 }
 0xbc2   : > { %8380 = vst.msk [vmem:[#allocation2 + $0xc8] sm:$0xf] %vm370_vm0, %v8084_v44  ;;  %v8040_v4 = vadd.f32 %v8039_v1, %v8021_v15  ;;  %v7988_v40 = vadd.f32 %v7987_v45, %v7969_v17  ;;  %v8005_v37 = vadd.f32 %v8004_v5, %v14571_v61  ;;  %v8101_v53 = vunpack.c.l.b16 %v8084_v44 }
 0xbc3   : > { %8383 = vst [vmem:[#allocation2 + $0xd8] sm:$0xff] %v8087_v7  ;;  %v8119_v2 = vunpack.c.l.b16 %v8087_v7  ;;  %v8120_v60 = vunpack.c.h.b16 %v8087_v7 }
 0xbc4   : > { %v8052_v54 = vmul.f32 %v8040_v4, %v11897_v33  ;;  %v8057_v3 = vmul.f32 %v7988_v40, %v11891_v20 }
 0xbc6   : > { %v8076_v43 = vadd.f32 %v8064_v63, %v8052_v54  ;;  %v8081_v51 = vadd.f32 %v8069_v48, %v8057_v3  ;;  %8257 = vrot.lane.b32.xlu0 %v14589_v31, %s15085_s14  ;;  %8319 = vrot.lane.b32.xlu2 %v14587_v46, %s15088_s0 }
 0xbc7   : > { %v8023_v47 = vpop.f32.mrf.mxu0  ;;  %8451 = vrot.lane.b32.xlu1 %v14587_v46, %s15086_s25  ;;  %v8042_v29 = vpop.f32.mrf.mxu2 }
 0xbc8   : > { %v8086_v57 = vpack.c.bf16 %v8076_v43, %v8076_v43  ;;  %v8089_v35 = vpack.c.bf16 %v8081_v51, %v8080_v56  ;;  %v8024_v42 = vadd.f32 %v8023_v47, %v8005_v37  ;;  %v8096_v37 = vld [vmem:[%s15029_s7 + $0x8] sm:$0xff]  ;;  %v8095_v43 = vld [vmem:[%s15029_s7] sm:$0xff] }
 0xbc9   : > { %v8006_v55 = vpop.f32.mrf.mxu3 }
 0xbca   : > { %v8102_v61 = vunpack.c.l.b16 %v8086_v57  ;;  %8382 = vst.msk [vmem:[#allocation2 + $0xd4] sm:$0xf] %vm370_vm0, %v8086_v57  ;;  %v8121_v6 = vunpack.c.l.b16 %v8089_v35  ;;  %v8122_v26 = vunpack.c.h.b16 %v8089_v35  ;;  %v8043_v36 = vadd.f32 %v8042_v29, %v8024_v42 }
 0xbcb   : > { %8385 = vst [vmem:[#allocation2 + $0xe4] sm:$0xff] %v8089_v35  ;;  %v8007_v34 = vadd.f32 %v8006_v55, %v14583_v8  ;;  %v8070_v8 = vunpack.c.l.bf16 %v13785_v39 }
 0xbcc   : > { %v14618_v21 = vpack.c.b16 %v8102_v61, %v8101_v53  ;;  %v14620_v14 = vpack.c.b16 %v8121_v6, %v8119_v2  ;;  %v8126_v16 = vpack.c.b16 %v8122_v26, %v8120_v60  ;;  %v8055_v59 = vmul.f32 %v8043_v36, %v11897_v33 }
 0xbce   : > { %8193 = vrot.lane.b32.xlu0 %v14589_v31, %s15087_s23  ;;  %8453 = vrot.lane.b32.xlu2 %v14589_v31, %s15086_s25  ;;  %v8079_v27 = vadd.f32 %v8067_v38, %v8055_v59 }
 0xbcf   : > { %v8025_v58 = vpop.f32.mrf.mxu0  ;;  %8387 = vrot.lane.b32.xlu1 %v14587_v46, %s15083_s26  ;;  %v8044_v25 = vpop.f32.mrf.mxu2 }
 0xbd0   : > { %v8026_v32 = vadd.f32 %v8025_v58, %v8007_v34  ;;  %v8088_v13 = vpack.c.bf16 %v8079_v27, %v8079_v27 }
 0xbd2   : > { %v8045_v19 = vadd.f32 %v8044_v25, %v8026_v32  ;;  %8384 = vst.msk [vmem:[#allocation2 + $0xe0] sm:$0xf] %vm370_vm0, %v8088_v13  ;;  %v8103_v9 = vunpack.c.l.b16 %v8088_v13 }
 0xbd4   : > { %v8058_v30 = vmul.f32 %v8045_v19, %v11897_v33 }
 0xbd6   : > { %v8082_v12 = vadd.f32 %v8070_v8, %v8058_v30  ;;  %8129 = vrot.lane.b32.xlu0 %v14589_v31, %s15082_s24  ;;  %8255 = vrot.lane.b32.xlu2 %v14587_v46, %s15085_s14 }
 0xbd7   : > { %8521 = vrot.lane.b32.xlu1 %v14620_v14, %s15089_s1 }
 0xbd8   : > { %v8090_v11 = vpack.c.bf16 %v8082_v12, %v8082_v12 }
 0xbda   : > { %v8104_v28 = vunpack.c.l.b16 %v8090_v11  ;;  %8386 = vst.msk [vmem:[#allocation2 + $0xec] sm:$0xf] %vm370_vm0, %v8090_v11 }
 0xbdc   : > { %v14641_v24 = vpack.c.b16 %v8104_v28, %v8103_v9 }
 0xbde   : > { %8531 = vrot.lane.b32.xlu0 %v14587_v46, %s15081_s11  ;;  %8389 = vrot.lane.b32.xlu2 %v14589_v31, %s15083_s26 }
 0xbdf   : > { %8457 = vrot.lane.b32.xlu1 %v14620_v14, %s15086_s25 }
 0xbe6   : > { %8327 = vrot.lane.b32.xlu0 %v8126_v16, %s15088_s0  ;;  %8191 = vrot.lane.b32.xlu2 %v14587_v46, %s15087_s23 }
 0xbe7   : > { %8393 = vrot.lane.b32.xlu1 %v14620_v14, %s15083_s26 }
 0xbee   : > { %8263 = vrot.lane.b32.xlu0 %v8126_v16, %s15085_s14  ;;  %8127 = vrot.lane.b32.xlu2 %v14587_v46, %s15082_s24 }
 0xbef   : > { %8533 = vrot.lane.b32.xlu1 %v14620_v14, %s15081_s11 }
 0xbf6   : > { %8199 = vrot.lane.b32.xlu0 %v8126_v16, %s15087_s23  ;;  %8523 = vrot.lane.b32.xlu2 %v8126_v16, %s15089_s1 }
 0xbf7   : > { %8315 = vrot.lane.b32.xlu1 %v14618_v21, %s15084_s19 }
 0xbfe   : > { %8135 = vrot.lane.b32.xlu0 %v8126_v16, %s15082_s24  ;;  %8325 = vrot.lane.b32.xlu2 %v14620_v14, %s15088_s0 }
 0xbff   : > { %8251 = vrot.lane.b32.xlu1 %v14618_v21, %s15077_s21 }
 0xc06   : > { %8519 = vrot.lane.b32.xlu0 %v14618_v21, %s15089_s1  ;;  %8459 = vrot.lane.b32.xlu2 %v8126_v16, %s15086_s25 }
 0xc07   : > { %8187 = vrot.lane.b32.xlu1 %v14618_v21, %s15078_s22 }
 0xc0e   : > { %8455 = vrot.lane.b32.xlu0 %v14618_v21, %s15086_s25  ;;  %8261 = vrot.lane.b32.xlu2 %v14620_v14, %s15085_s14 }
 0xc0f   : > { %8107 = vrot.lane.b32.xlu1 %v14618_v21, %s15079_s30 }
 0xc16   : > { %8391 = vrot.lane.b32.xlu0 %v14618_v21, %s15083_s26  ;;  %8395 = vrot.lane.b32.xlu2 %v8126_v16, %s15083_s26 }
 0xc17   : > { %8323 = vrot.lane.b32.xlu1 %v14618_v21, %s15088_s0 }
 0xc18   : > { %v14684_v39 = vpop.permute.xlu2 %8517 }
 0xc1e   : > { %8525 = vrot.lane.b32.xlu0 %v14641_v24, %s15089_s1  ;;  %8197 = vrot.lane.b32.xlu2 %v14620_v14, %s15087_s23 }
 0xc1f   : > { %8317 = vrot.lane.b32.xlu1 %v14641_v24, %s15084_s19 }
 0xc20   : > { %v8320_v10 = vpop.permute.xlu2 %8319 }
 0xc26   : > { %8461 = vrot.lane.b32.xlu0 %v14641_v24, %s15086_s25  ;;  %8133 = vrot.lane.b32.xlu2 %v14620_v14, %s15082_s24 }
 0xc27   : > { %8253 = vrot.lane.b32.xlu1 %v14641_v24, %s15077_s21 }
 0xc28   : > { %v14698_v0 = vpop.permute.xlu2 %8453 }
 0xc2e   : > { %8397 = vrot.lane.b32.xlu0 %v14641_v24, %s15083_s26  ;;  %8469 = vrot.lane.b32.xlu2 %v14620_v14, %s15074_s16 }
 0xc2f   : > { %8587 = vrot.lane.b32.xlu1 %v8126_v16, %s15080_s9 }
 0xc30   : > { %v14705_v41 = vpop.permute.xlu0 %8321  ;;  %v8256_v62 = vpop.permute.xlu2 %8255 }
 0xc31   : > { %v14707_v49 = vpop.permute.xlu1 %8515  ;;  %v8331_v51 = vsel %vm450_vm9, %v8320_v10, %v14705_v41 }
 0xc32   : > { %v8344_v42 = vunpack.c.l.b16 %v8331_v51  ;;  %v8347_v53 = vunpack.c.h.b16 %v8331_v51  ;;  %v8527_v34 = vsel %vm554_vm1, %v14707_v49, %v14684_v39 }
 0xc33   : > { %v8543_v25 = vunpack.c.l.b16 %v8527_v34  ;;  %v8546_v19 = vunpack.c.h.b16 %v8527_v34 }
 0xc36   : > { %8585 = vrot.lane.b32.xlu0 %v14620_v14, %s15080_s9  ;;  %8579 = vrot.lane.b32.xlu2 %v14587_v46, %s15080_s9 }
 0xc37   : > { %8189 = vrot.lane.b32.xlu1 %v14641_v24, %s15078_s22 }
 0xc38   : > { %v14715_v22 = vpop.permute.xlu0 %8257  ;;  %v14717_v50 = vpop.permute.xlu2 %8389 }
 0xc39   : > { %v14719_v1 = vpop.permute.xlu1 %8451 }
 0xc3e   : > { %8581 = vrot.lane.b32.xlu0 %v14589_v31, %s15080_s9  ;;  %8329 = vrot.lane.b32.xlu2 %v14641_v24, %s15088_s0 }
 0xc3f   : > { %8109 = vrot.lane.b32.xlu1 %v14641_v24, %s15079_s30 }
 0xc40   : > { %v14727_v17 = vpop.permute.xlu0 %8193  ;;  %v14729_v44 = vpop.permute.xlu2 %8191 }
 0xc41   : > { %v14731_v15 = vpop.permute.xlu1 %8387  ;;  %v8203_v30 = vsel %vm382_vm11, %v14729_v44, %v14727_v17 }
 0xc42   : > { %v8216_v49 = vunpack.c.l.b16 %v8203_v30  ;;  %v8219_v51 = vunpack.c.h.b16 %v8203_v30 }
 0xc46   : > { %8265 = vrot.lane.b32.xlu0 %v14641_v24, %s15085_s14  ;;  %8589 = vrot.lane.b32.xlu2 %v14641_v24, %s15080_s9 }
 0xc47   : > { %8467 = vrot.lane.b32.xlu1 %v14587_v46, %s15074_s16 }
 0xc48   : > { %v14739_v31 = vpop.permute.xlu0 %8129  ;;  %v14741_v52 = vpop.permute.xlu2 %8127 }
 0xc49   : > { %v8522_v7 = vpop.permute.xlu1 %8521 }
 0xc4e   : > { %8405 = vrot.lane.b32.xlu0 %v14620_v14, %s15075_s17  ;;  %8259 = vrot.lane.b32.xlu2 %v14618_v21, %s15085_s14 }
 0xc4f   : > { %8583 = vrot.lane.b32.xlu1 %v14618_v21, %s15080_s9 }
 0xc50   : > { %v8532_v5 = vpop.permute.xlu0 %8531  ;;  %v14749_v45 = vpop.permute.xlu2 %8523 }
 0xc51   : > { %v14753_v4 = vsel %vm554_vm1, %v8522_v7, %v14749_v45  ;;  %v14755_v40 = vpop.permute.xlu1 %8457 }
 0xc56   : > { %8195 = vrot.lane.b32.xlu0 %v14618_v21, %s15087_s23  ;;  %8403 = vrot.lane.b32.xlu2 %v14587_v46, %s15075_s17 }
 0xc57   : > { %8201 = vrot.lane.b32.xlu1 %v14641_v24, %s15087_s23 }
 0xc58   : > { %v14763_v23 = vpop.permute.xlu0 %8327  ;;  %v14765_v54 = vpop.permute.xlu2 %8325 }
 0xc59   : > { %v14767_v63 = vpop.permute.xlu1 %8393 }
 0xc5e   : > { %8597 = vrot.lane.b32.xlu0 %v14620_v14, %s15076_s29  ;;  %8131 = vrot.lane.b32.xlu2 %v14618_v21, %s15082_s24 }
 0xc5f   : > { %8137 = vrot.lane.b32.xlu1 %v14641_v24, %s15082_s24 }
 0xc60   : > { %v14775_v3 = vpop.permute.xlu0 %8263  ;;  %v14777_v48 = vpop.permute.xlu2 %8459 }
 0xc61   : > { %v14779_v56 = vpop.permute.xlu1 %8533 }
 0xc66   : > { %8722 = vperm.xlu0 %11612, %v8096_v37   ;;  %8717 = vperm.xlu2 %11611, %v8095_v43  }
 0xc67   : > { %8595 = vrot.lane.b32.xlu1 %v14587_v46, %s15076_s29  ;;  %v8267_v46 = vsel %vm416_vm10, %v8256_v62, %v14715_v22 }
 0xc68   : > { %v14791_v47 = vpop.permute.xlu0 %8199  ;;  %v14793_v29 = vpop.permute.xlu2 %8261  ;;  %v8280_v14 = vunpack.c.l.b16 %v8267_v46  ;;  %v8283_v16 = vunpack.c.h.b16 %v8267_v46 }
 0xc69   : > { %v8316_v57 = vpop.permute.xlu1 %8315 }
 0xc6a   : > { %v8337_v35 = vsel %vm450_vm9, %v8316_v57, %v8320_v10 }
 0xc6b   : > { %v8343_v2 = vunpack.c.l.b16 %v8337_v35  ;;  %v8346_v60 = vunpack.c.h.b16 %v8337_v35 }
 0xc6d   : > { %v8355_v61 = vpack.c.b16 %v8344_v42, %v8343_v2  ;;  %v8357_v6 = vpack.c.b16 %v8347_v53, %v8346_v60 }
 0xc6f   : > { %8371 = vst [vmem:[#allocation2 + $0x90] sm:$0xff] %v8355_v61 }
 0xc70   : > { %8373 = vst [vmem:[#allocation2 + $0x9c] sm:$0xff] %v8357_v6  ;;  %v14798_v26 = vpop.permute.xlu0 %8135  ;;  %v14800_v55 = vpop.permute.xlu2 %8395 }
 0xc71   : > { %v8252_v36 = vpop.permute.xlu1 %8251 }
 0xc72   : > { %v8273_v21 = vsel %vm416_vm10, %v8252_v36, %v8256_v62 }
 0xc73   : > { %v8279_v59 = vunpack.c.l.b16 %v8273_v21  ;;  %v8282_v38 = vunpack.c.h.b16 %v8273_v21 }
 0xc75   : > { %v8291_v27 = vpack.c.b16 %v8280_v14, %v8279_v59  ;;  %v8293_v58 = vpack.c.b16 %v8283_v16, %v8282_v38 }
 0xc77   : > { %8307 = vst [vmem:[#allocation2 + $0x60] sm:$0xff] %v8291_v27 }
 0xc78   : > { %8309 = vst [vmem:[#allocation2 + $0x6c] sm:$0xff] %v8293_v58  ;;  %v8520_v32 = vpop.permute.xlu0 %8519  ;;  %v14806_v13 = vpop.permute.xlu2 %8197 }
 0xc79   : > { %v8528_v8 = vsel %vm554_vm1, %v14684_v39, %v8520_v32  ;;  %v8537_v12 = vsel %vm559_vm4, %v8520_v32, %v8532_v5  ;;  %v8188_v11 = vpop.permute.xlu1 %8187  ;;  %v8463_v39 = vsel %vm520_vm3, %v14719_v1, %v14698_v0 }
 0xc7a   : > { %v8544_v9 = vunpack.c.l.b16 %v8528_v8  ;;  %v8545_v28 = vunpack.c.l.b16 %v8537_v12  ;;  %v8547_v24 = vunpack.c.h.b16 %v8528_v8  ;;  %v8548_v10 = vunpack.c.h.b16 %v8537_v12 }
 0xc7b   : > { %v8209_v62 = vsel %vm382_vm11, %v8188_v11, %v14729_v44  ;;  %v8139_v44 = vsel %vm347_vm12, %v14741_v52, %v14739_v31  ;;  %v8479_v6 = vunpack.c.l.b16 %v8463_v39  ;;  %v8482_v46 = vunpack.c.h.b16 %v8463_v39 }
 0xc7c   : > { %v8555_v7 = vpack.c.b16 %v8544_v9, %v8543_v25  ;;  %v8556_v37 = vpack.c.b16 %v8545_v28, %v8545_v28  ;;  %v8557_v43 = vpack.c.b16 %v8547_v24, %v8546_v19  ;;  %v8558_v57 = vpack.c.b16 %v8548_v10, %v8548_v10 }
 0xc7d   : > { %v8215_v35 = vunpack.c.l.b16 %v8209_v62  ;;  %v8218_v42 = vunpack.c.h.b16 %v8209_v62  ;;  %v8152_v14 = vunpack.c.l.b16 %v8139_v44  ;;  %v8155_v16 = vunpack.c.h.b16 %v8139_v44 }
 0xc7e   : > { %8571 = vst [vmem:[#allocation2 + $0x150] sm:$0xff] %v8555_v7 }
 0xc7f   : > { %8572 = vst.msk [vmem:[#allocation2 + $0x158] sm:$0xf] %vm370_vm0, %v8556_v37  ;;  %v8227_v5 = vpack.c.b16 %v8216_v49, %v8215_v35  ;;  %v8229_v53 = vpack.c.b16 %v8219_v51, %v8218_v42 }
 0xc80   : > { %8573 = vst [vmem:[#allocation2 + $0x15c] sm:$0xff] %v8557_v43  ;;  %v14823_v2 = vpop.permute.xlu0 %8455  ;;  %v14825_v60 = vpop.permute.xlu2 %8133  ;;  %v8333_v43 = vsel %vm450_vm9, %v14765_v54, %v14763_v23 }
 0xc81   : > { %8574 = vst.msk [vmem:[#allocation2 + $0x164] sm:$0xf] %vm370_vm0, %v8558_v57  ;;  %v8464_v61 = vsel %vm520_vm3, %v14698_v0, %v14823_v2  ;;  %v8108_v1 = vpop.permute.xlu1 %8107  ;;  %v8399_v0 = vsel %vm486_vm5, %v14731_v15, %v14717_v50  ;;  %v8549_v57 = vunpack.c.l.b16 %v14753_v4 }
 0xc82   : > { %8243 = vst [vmem:[#allocation2 + $0x30] sm:$0xff] %v8227_v5  ;;  %v8480_v36 = vunpack.c.l.b16 %v8464_v61  ;;  %v8483_v21 = vunpack.c.h.b16 %v8464_v61  ;;  %v8145_v59 = vsel %vm347_vm12, %v8108_v1, %v14741_v52  ;;  %v8415_v8 = vunpack.c.l.b16 %v8399_v0 }
 0xc83   : > { %8245 = vst [vmem:[#allocation2 + $0x3c] sm:$0xff] %v8229_v53  ;;  %v8151_v27 = vunpack.c.l.b16 %v8145_v59  ;;  %v8154_v58 = vunpack.c.h.b16 %v8145_v59  ;;  %v8418_v11 = vunpack.c.h.b16 %v8399_v0  ;;  %v8350_v1 = vunpack.c.l.b16 %v8333_v43 }
 0xc84   : > { %v8491_v38 = vpack.c.b16 %v8480_v36, %v8479_v6  ;;  %v8493_v34 = vpack.c.b16 %v8483_v21, %v8482_v46  ;;  %v8353_v46 = vunpack.c.h.b16 %v8333_v43 }
 0xc85   : > { %v8163_v25 = vpack.c.b16 %v8152_v14, %v8151_v27  ;;  %v8165_v32 = vpack.c.b16 %v8155_v16, %v8154_v58 }
 0xc86   : > { %8507 = vst [vmem:[#allocation2 + $0x120] sm:$0xff] %v8491_v38 }
 0xc87   : > { %8509 = vst [vmem:[#allocation2 + $0x12c] sm:$0xff] %v8493_v34 }
 0xc88   : > { %8179 = vst [vmem:[#allocation2] sm:$0xff] %v8163_v25  ;;  %v14836_v19 = vpop.permute.xlu0 %8391  ;;  %v8470_v30 = vpop.permute.xlu2 %8469 }
 0xc89   : > { %8181 = vst [vmem:[#allocation2 + $0xc] sm:$0xff] %v8165_v32  ;;  %v8400_v52 = vsel %vm486_vm5, %v14717_v50, %v14836_v19  ;;  %v8324_v12 = vpop.permute.xlu1 %8323 }
 0xc8a   : > { %v8416_v9 = vunpack.c.l.b16 %v8400_v52  ;;  %v8419_v28 = vunpack.c.h.b16 %v8400_v52  ;;  %v8332_v15 = vsel %vm450_vm9, %v14705_v41, %v8324_v12  ;;  %v8552_v41 = vunpack.c.h.b16 %v14753_v4 }
 0xc8b   : > { %v8345_v24 = vunpack.c.l.b16 %v8332_v15  ;;  %v8348_v10 = vunpack.c.h.b16 %v8332_v15 }
 0xc8c   : > { %v8427_v62 = vpack.c.b16 %v8416_v9, %v8415_v8  ;;  %v8429_v49 = vpack.c.b16 %v8419_v28, %v8418_v11  ;;  %v8269_v9 = vsel %vm416_vm10, %v14793_v29, %v14775_v3 }
 0xc8d   : > { %v8356_v7 = vpack.c.b16 %v8345_v24, %v8345_v24  ;;  %v8358_v37 = vpack.c.b16 %v8348_v10, %v8348_v10  ;;  %v8286_v43 = vunpack.c.l.b16 %v8269_v9 }
 0xc8e   : > { %8443 = vst [vmem:[#allocation2 + $0xf0] sm:$0xff] %v8427_v62 }
 0xc8f   : > { %8445 = vst [vmem:[#allocation2 + $0xfc] sm:$0xff] %v8429_v49 }
 0xc90   : > { %8372 = vst.msk [vmem:[#allocation2 + $0x98] sm:$0xf] %vm370_vm0, %v8356_v7  ;;  %v8526_v50 = vpop.permute.xlu0 %8525  ;;  %v14847_v51 = vpop.permute.xlu2 %8579 }
 0xc91   : > { %8374 = vst.msk [vmem:[#allocation2 + $0xa4] sm:$0xf] %vm370_vm0, %v8358_v37  ;;  %v8530_v35 = vsel %vm554_vm1, %v14749_v45, %v8526_v50  ;;  %v8540_v42 = vsel %vm559_vm4, %v8526_v50, %v14779_v56  ;;  %v8318_v39 = vpop.permute.xlu1 %8317  ;;  %v8465_v45 = vsel %vm520_vm3, %v14755_v40, %v14777_v48 }
 0xc92   : > { %v8550_v5 = vunpack.c.l.b16 %v8530_v35  ;;  %v8551_v53 = vunpack.c.l.b16 %v8540_v42  ;;  %v8553_v44 = vunpack.c.h.b16 %v8530_v35  ;;  %v8554_v61 = vunpack.c.h.b16 %v8540_v42 }
 0xc93   : > { %v8340_v6 = vsel %vm450_vm9, %v8318_v39, %v14765_v54  ;;  %v8485_v34 = vunpack.c.l.b16 %v8465_v45  ;;  %v8488_v58 = vunpack.c.h.b16 %v8465_v45  ;;  %v11086_v39 = vld [vmem:[#allocation2 + $0x150] sm:$0xf] }
 0xc94   : > { %v8559_v36 = vpack.c.b16 %v8550_v5, %v8549_v57  ;;  %v8560_v4 = vpack.c.b16 %v8551_v53, %v8551_v53  ;;  %v8561_v21 = vpack.c.b16 %v8553_v44, %v8552_v41  ;;  %v8562_v14 = vpack.c.b16 %v8554_v61, %v8554_v61  ;;  %v11573_v5 = vld [vmem:[#allocation2 + $0x154] sm:$0xf] }
 0xc95   : > { %v8349_v16 = vunpack.c.l.b16 %v8340_v6  ;;  %v8352_v56 = vunpack.c.h.b16 %v8340_v6  ;;  %v8289_v57 = vunpack.c.h.b16 %v8269_v9  ;;  %v8401_v41 = vsel %vm486_vm5, %v14767_v63, %v14800_v55 }
 0xc96   : > { %8575 = vst [vmem:[#allocation2 + $0x168] sm:$0xff] %v8559_v36  ;;  %v11088_v36 = vld [vmem:[#allocation2 + $0x15c] sm:$0xf0] }
 0xc97   : > { %8576 = vst.msk [vmem:[#allocation2 + $0x170] sm:$0xf] %vm370_vm0, %v8560_v4  ;;  %v8359_v59 = vpack.c.b16 %v8350_v1, %v8349_v16  ;;  %v8361_v38 = vpack.c.b16 %v8353_v46, %v8352_v56  ;;  %v11574_v46 = vld [vmem:[#allocation2 + $0x158] sm:$0xf0]  ;;  %v8421_v16 = vunpack.c.l.b16 %v8401_v41  ;;  %v8424_v56 = vunpack.c.h.b16 %v8401_v41  ;;  %v11064_v41 = vld [vmem:[#allocation2 + $0x12c] sm:$0xf0] }
 0xc98   : > { %8577 = vst [vmem:[#allocation2 + $0x174] sm:$0xff] %v8561_v21  ;;  %v8462_v27 = vpop.permute.xlu0 %8461  ;;  %v8330_v54 = vpop.permute.xlu2 %8329 }
 0xc99   : > { %8578 = vst.msk [vmem:[#allocation2 + $0x17c] sm:$0xf] %vm370_vm0, %v8562_v14  ;;  %v8466_v0 = vsel %vm520_vm3, %v14777_v48, %v8462_v27  ;;  %v8476_v40 = vsel %vm525_vm6, %v8462_v27, %v8470_v30  ;;  %v8334_v25 = vsel %vm450_vm9, %v14763_v23, %v8330_v54  ;;  %v8254_v32 = vpop.permute.xlu1 %8253 }
 0xc9a   : > { %8375 = vst [vmem:[#allocation2 + $0xa8] sm:$0xff] %v8359_v59  ;;  %v8486_v8 = vunpack.c.l.b16 %v8466_v0  ;;  %v8487_v52 = vunpack.c.l.b16 %v8476_v40  ;;  %v8489_v12 = vunpack.c.h.b16 %v8466_v0  ;;  %v8490_v11 = vunpack.c.h.b16 %v8476_v40  ;;  %v10990_v0 = vld [vmem:[#allocation2 + $0x90] sm:$0xf]  ;;  %v11549_v40 = vld [vmem:[#allocation2 + $0x94] sm:$0xf] }
 0xc9b   : > { %8377 = vst [vmem:[#allocation2 + $0xb4] sm:$0xff] %v8361_v38  ;;  %v8351_v28 = vunpack.c.l.b16 %v8334_v25  ;;  %v8354_v15 = vunpack.c.h.b16 %v8334_v25  ;;  %v8276_v48 = vsel %vm416_vm10, %v8254_v32, %v14793_v29  ;;  %v11550_v32 = vld [vmem:[#allocation2 + $0x98] sm:$0xf0] }
 0xc9c   : > { %v8495_v30 = vpack.c.b16 %v8486_v8, %v8485_v34  ;;  %v8496_v24 = vpack.c.b16 %v8487_v52, %v8487_v52  ;;  %v8497_v10 = vpack.c.b16 %v8489_v12, %v8488_v58  ;;  %v8498_v23 = vpack.c.b16 %v8490_v11, %v8490_v11  ;;  %v10992_v52 = vld [vmem:[#allocation2 + $0x9c] sm:$0xf0] }
 0xc9d   : > { %v8285_v62 = vunpack.c.l.b16 %v8276_v48  ;;  %v8288_v49 = vunpack.c.h.b16 %v8276_v48  ;;  %v11098_v7 = vld [vmem:[#allocation2 + $0x168] sm:$0xf]  ;;  %v11576_v37 = vld [vmem:[#allocation2 + $0x16c] sm:$0xf]  ;;  %v8360_v50 = vpack.c.b16 %v8351_v28, %v8351_v28  ;;  %v8362_v35 = vpack.c.b16 %v8354_v15, %v8354_v15  ;;  %v11062_v48 = vld [vmem:[#allocation2 + $0x120] sm:$0xf] }
 0xc9e   : > { %8511 = vst [vmem:[#allocation2 + $0x138] sm:$0xff] %v8495_v30  ;;  %v11087_v8 = vor.u32 %v11574_v46, %v11086_v39  ;;  %v11091_v12 = vor.u32 %v11573_v5, %v11088_v36  ;;  %v14890_v11 = vsel %vm382_vm11, %v14806_v13, %v14791_v47  ;;  %v10991_v30 = vor.u32 %v11550_v32, %v10990_v0  ;;  %v10968_v32 = vld [vmem:[#allocation2 + $0x6c] sm:$0xf0] }
 0xc9f   : > { %8512 = vst.msk [vmem:[#allocation2 + $0x140] sm:$0xf] %vm370_vm0, %v8496_v24  ;;  %v11577_v29 = vld [vmem:[#allocation2 + $0x170] sm:$0xf0]  ;;  %v11100_v42 = vld [vmem:[#allocation2 + $0x174] sm:$0xf0]  ;;  %v8295_v53 = vpack.c.b16 %v8286_v43, %v8285_v62  ;;  %v8297_v63 = vpack.c.b16 %v8289_v57, %v8288_v49  ;;  %v10995_v24 = vor.u32 %v11549_v40, %v10992_v52  ;;  %v8222_v62 = vunpack.c.l.b16 %v14890_v11 }
 0xca0   : > { %8513 = vst [vmem:[#allocation2 + $0x144] sm:$0xff] %v8497_v10  ;;  %v14877_v44 = vpop.permute.xlu0 %8397  ;;  %v14879_v61 = vpop.permute.xlu2 %8589  ;;  %v11099_v1 = vor.u32 %v11577_v29, %v11098_v7  ;;  %v11103_v6 = vor.u32 %v11576_v37, %v11100_v42  ;;  %v11567_v57 = vld [vmem:[#allocation2 + $0x124] sm:$0xf]  ;;  %v8225_v36 = vunpack.c.h.b16 %v14890_v11 }
 0xca1   : > { %8514 = vst.msk [vmem:[#allocation2 + $0x14c] sm:$0xf] %vm370_vm0, %v8498_v23  ;;  %v8402_v4 = vsel %vm486_vm5, %v14800_v55, %v14877_v44  ;;  %v11002_v21 = vld [vmem:[#allocation2 + $0xa8] sm:$0xf]  ;;  %v11552_v45 = vld [vmem:[#allocation2 + $0xac] sm:$0xf]  ;;  %v8588_v14 = vpop.permute.xlu1 %8587 }
 0xca2   : > { %8376 = vst.msk [vmem:[#allocation2 + $0xb0] sm:$0xf] %vm370_vm0, %v8360_v50  ;;  %v8422_v59 = vunpack.c.l.b16 %v8402_v4  ;;  %v8425_v38 = vunpack.c.h.b16 %v8402_v4  ;;  %v11553_v34 = vld [vmem:[#allocation2 + $0xb0] sm:$0xf0]  ;;  %9045 = vmatpush.bf16.msrb.mxu3 %v11099_v1  ;;  %v11004_v27 = vld [vmem:[#allocation2 + $0xb4] sm:$0xf0]  ;;  %9087 = vmatpush.bf16.msra.mxu2 %v11103_v6  ;;  %v8594_v15 = vsel %vm588_vm2, %v8588_v14, %v14879_v61 }
 0xca3   : > { %8378 = vst.msk [vmem:[#allocation2 + $0xbc] sm:$0xf] %vm370_vm0, %v8362_v35  ;;  %v11003_v54 = vor.u32 %v11553_v34, %v11002_v21  ;;  %v11007_v58 = vor.u32 %v11552_v45, %v11004_v27  ;;  %v11568_v50 = vld [vmem:[#allocation2 + $0x128] sm:$0xf0]  ;;  %v8614_v35 = vunpack.c.l.b16 %v8594_v15  ;;  %v8617_v29 = vunpack.c.h.b16 %v8594_v15  ;;  %v10966_v27 = vld [vmem:[#allocation2 + $0x60] sm:$0xf] }
 0xca4   : > { %8311 = vst [vmem:[#allocation2 + $0x78] sm:$0xff] %v8295_v53  ;;  %v8431_v55 = vpack.c.b16 %v8422_v59, %v8421_v16  ;;  %v8433_v25 = vpack.c.b16 %v8425_v38, %v8424_v56  ;;  %v11063_v45 = vor.u32 %v11568_v50, %v11062_v48  ;;  %v11067_v16 = vor.u32 %v11567_v57, %v11064_v41  ;;  %v11038_v48 = vld [vmem:[#allocation2 + $0xf0] sm:$0xf] }
 0xca5   : > { %8313 = vst [vmem:[#allocation2 + $0x84] sm:$0xff] %v8297_v63  ;;  %9031 = vmatpush.bf16.msra.mxu1 %v11003_v54  ;;  %9073 = vmatpush.bf16.msrb.mxu0 %v11007_v58  ;;  %v11074_v9 = vld [vmem:[#allocation2 + $0x138] sm:$0xf]  ;;  %v11570_v28 = vld [vmem:[#allocation2 + $0x13c] sm:$0xf] }
 0xca6   : > { %8447 = vst [vmem:[#allocation2 + $0x108] sm:$0xff] %v8431_v55  ;;  %9046 = vmatpush.bf16.msrb.mxu3 %v11087_v8  ;;  %9088 = vmatpush.bf16.msra.mxu2 %v11091_v12  ;;  %v11544_v54 = vld [vmem:[#allocation2 + $0x68] sm:$0xf0]  ;;  %v11543_v58 = vld [vmem:[#allocation2 + $0x64] sm:$0xf] }
 0xca7   : > { %8449 = vst [vmem:[#allocation2 + $0x114] sm:$0xff] %v8433_v25  ;;  %v11571_v10 = vld [vmem:[#allocation2 + $0x140] sm:$0xf0]  ;;  %v11076_v23 = vld [vmem:[#allocation2 + $0x144] sm:$0xf0] }
 0xca8   : > { %v8586_v49 = vpop.permute.xlu0 %8585  ;;  %v8260_v7 = vpop.permute.xlu2 %8259  ;;  %v11075_v37 = vor.u32 %v11571_v10, %v11074_v9  ;;  %v11079_v43 = vor.u32 %v11570_v28, %v11076_v23 }
 0xca9   : > { %9032 = vmatpush.bf16.msra.mxu1 %v10991_v30  ;;  %9074 = vmatpush.bf16.msrb.mxu0 %v10995_v24  ;;  %v8593_v42 = vsel %vm588_vm2, %v8586_v49, %v8588_v14  ;;  %v8268_v39 = vsel %vm416_vm10, %v14715_v22, %v8260_v7  ;;  %v8190_v5 = vpop.permute.xlu1 %8189  ;;  %v11561_v30 = vld [vmem:[#allocation2 + $0xf4] sm:$0xf]  ;;  %v11562_v49 = vld [vmem:[#allocation2 + $0xf8] sm:$0xf0]  ;;  %v11040_v7 = vld [vmem:[#allocation2 + $0xfc] sm:$0xf0] }
 0xcaa   : > { %v8613_v53 = vunpack.c.l.b16 %v8593_v42  ;;  %v8616_v1 = vunpack.c.h.b16 %v8593_v42  ;;  %v8281_v6 = vunpack.c.l.b16 %v8268_v39  ;;  %v8284_v46 = vunpack.c.h.b16 %v8268_v39  ;;  %9047 = vmatpush.bf16.msrb.mxu3 %v11075_v37  ;;  %9089 = vmatpush.bf16.msra.mxu2 %v11079_v43 }
 0xcab   : > { %v10978_v63 = vld [vmem:[#allocation2 + $0x78] sm:$0xf]  ;;  %v11546_v4 = vld [vmem:[#allocation2 + $0x7c] sm:$0xf]  ;;  %v8212_v21 = vsel %vm382_vm11, %v8190_v5, %v14806_v13  ;;  %v8141_v13 = vsel %vm347_vm12, %v14825_v60, %v14798_v26  ;;  %v10967_v37 = vor.u32 %v11544_v54, %v10966_v27  ;;  %v10971_v43 = vor.u32 %v11543_v58, %v10968_v32 }
 0xcac   : > { %v8623_v14 = vpack.c.b16 %v8614_v35, %v8613_v53  ;;  %v8625_v56 = vpack.c.b16 %v8617_v29, %v8616_v1  ;;  %v8292_v59 = vpack.c.b16 %v8281_v6, %v8281_v6  ;;  %v8294_v22 = vpack.c.b16 %v8284_v46, %v8284_v46  ;;  %v11547_v38 = vld [vmem:[#allocation2 + $0x80] sm:$0xf0]  ;;  %v10980_v34 = vld [vmem:[#allocation2 + $0x84] sm:$0xf0] }
 0xcad   : > { %v10979_v0 = vor.u32 %v11547_v38, %v10978_v63  ;;  %v10983_v40 = vor.u32 %v11546_v4, %v10980_v34  ;;  %v8221_v55 = vunpack.c.l.b16 %v8212_v21  ;;  %v8224_v25 = vunpack.c.h.b16 %v8212_v21  ;;  %v11050_v8 = vld [vmem:[#allocation2 + $0x108] sm:$0xf]  ;;  %v11564_v52 = vld [vmem:[#allocation2 + $0x10c] sm:$0xf]  ;;  %v11559_v46 = vld [vmem:[#allocation2 + $0xe0] sm:$0xf0] }
 0xcae   : > { %8639 = vst [vmem:[#allocation2 + $0x198] sm:$0xff] %v8623_v14  ;;  %9048 = vmatpush.bf16.msrb.mxu3 %v11063_v45  ;;  %9090 = vmatpush.bf16.msra.mxu2 %v11067_v16  ;;  %v11565_v12 = vld [vmem:[#allocation2 + $0x110] sm:$0xf0]  ;;  %v11052_v11 = vld [vmem:[#allocation2 + $0x114] sm:$0xf0]  ;;  %v8158_v57 = vunpack.c.l.b16 %v8141_v13  ;;  %v8161_v41 = vunpack.c.h.b16 %v8141_v13  ;;  %v11039_v39 = vor.u32 %v11562_v49, %v11038_v48  ;;  %v11043_v5 = vor.u32 %v11561_v30, %v11040_v7 }
 0xcaf   : > { %8641 = vst [vmem:[#allocation2 + $0x1a4] sm:$0xff] %v8625_v56  ;;  %9033 = vmatpush.bf16.msra.mxu1 %v10979_v0  ;;  %9075 = vmatpush.bf16.msrb.mxu0 %v10983_v40  ;;  %v8231_v9 = vpack.c.b16 %v8222_v62, %v8221_v55  ;;  %v8233_v28 = vpack.c.b16 %v8225_v36, %v8224_v25  ;;  %v11028_v36 = vld [vmem:[#allocation2 + $0xe4] sm:$0xf0]  ;;  %v11556_v21 = vld [vmem:[#allocation2 + $0xc8] sm:$0xf0] }
 0xcb0   : > { %v11051_v15 = vor.u32 %v11565_v12, %v11050_v8  ;;  %8308 = vst.msk [vmem:[#allocation2 + $0x68] sm:$0xf] %vm370_vm0, %v8292_v59  ;;  %v14905_v24 = vpop.permute.xlu0 %8581  ;;  %v8404_v10 = vpop.permute.xlu2 %8403  ;;  %v11055_v23 = vor.u32 %v11564_v52, %v11052_v11  ;;  %v11026_v45 = vld [vmem:[#allocation2 + $0xd8] sm:$0xf]  ;;  %v11558_v16 = vld [vmem:[#allocation2 + $0xdc] sm:$0xf] }
 0xcb1   : > { %8310 = vst.msk [vmem:[#allocation2 + $0x74] sm:$0xf] %vm370_vm0, %v8294_v22  ;;  %v8409_v50 = vsel %vm491_vm7, %v14836_v19, %v8404_v10  ;;  %v8110_v62 = vpop.permute.xlu1 %8109  ;;  %v11027_v56 = vor.u32 %v11559_v46, %v11026_v45  ;;  %v11031_v59 = vor.u32 %v11558_v16, %v11028_v36  ;;  %v11014_v22 = vld [vmem:[#allocation2 + $0xc0] sm:$0xf]  ;;  %v11016_v38 = vld [vmem:[#allocation2 + $0xcc] sm:$0xf0] }
 0xcb2   : > { %8247 = vst [vmem:[#allocation2 + $0x48] sm:$0xff] %v8231_v9  ;;  %v8417_v35 = vunpack.c.l.b16 %v8409_v50  ;;  %v8420_v29 = vunpack.c.h.b16 %v8409_v50  ;;  %9049 = vmatpush.bf16.msrb.mxu3 %v11051_v15  ;;  %9091 = vmatpush.bf16.msra.mxu2 %v11055_v23  ;;  %v8148_v42 = vsel %vm347_vm12, %v8110_v62, %v14825_v60  ;;  %v10942_v55 = vld [vmem:[#allocation2 + $0x30] sm:$0xf]  ;;  %v11555_v25 = vld [vmem:[#allocation2 + $0xc4] sm:$0xf]  ;;  %v11015_v48 = vor.u32 %v11556_v21, %v11014_v22 }
 0xcb3   : > { %8249 = vst [vmem:[#allocation2 + $0x54] sm:$0xff] %v8233_v28  ;;  %9034 = vmatpush.bf16.msra.mxu1 %v10967_v37  ;;  %9076 = vmatpush.bf16.msrb.mxu0 %v10971_v43  ;;  %v8157_v6 = vunpack.c.l.b16 %v8148_v42  ;;  %v8160_v19 = vunpack.c.h.b16 %v8148_v42  ;;  %v11528_v30 = vld [vmem:[%s15028_s6 + $0x4] sm:$0xf]  ;;  %v10908_v10 = vld [vmem:[%s15028_s6 + $0xc] sm:$0xf0]  ;;  %v11019_v50 = vor.u32 %v11555_v25, %v11016_v38 }
 0xcb4   : > { %v8428_v53 = vpack.c.b16 %v8417_v35, %v8417_v35  ;;  %v8430_v1 = vpack.c.b16 %v8420_v29, %v8420_v29  ;;  %v11537_v37 = vld [vmem:[#allocation2 + $0x34] sm:$0xf]  ;;  %v10944_v43 = vld [vmem:[#allocation2 + $0x3c] sm:$0xf0]  ;;  %v14927_v29 = vor.u32 %v11528_v30, %v10908_v10  ;;  %v11531_v38 = vld [vmem:[#allocation2 + $0x4] sm:$0xf] }
 0xcb5   : > { %v8167_v63 = vpack.c.b16 %v8158_v57, %v8157_v6  ;;  %v8169_v4 = vpack.c.b16 %v8161_v41, %v8160_v19  ;;  %v11582_v34 = vld [vmem:[#allocation2 + $0x19c] sm:$0xf]  ;;  %v8591_v6 = vsel %vm588_vm2, %v14847_v51, %v14905_v24  ;;  %v10918_v22 = vld [vmem:[#allocation2] sm:$0xf] }
 0xcb6   : > { %8444 = vst.msk [vmem:[#allocation2 + $0xf8] sm:$0xf] %vm370_vm0, %v8428_v53  ;;  %9050 = vmatpush.bf16.msrb.mxu3 %v11039_v39  ;;  %9092 = vmatpush.bf16.msra.mxu2 %v11043_v5  ;;  %v11124_v9 = vld [vmem:[#allocation2 + $0x1a4] sm:$0xf0]  ;;  %v10947_v5 = vor.u32 %v11537_v37, %v10944_v43  ;;  %v11583_v25 = vld [vmem:[#allocation2 + $0x1a0] sm:$0xf0] }
 0xcb7   : > { %8446 = vst.msk [vmem:[#allocation2 + $0x104] sm:$0xf] %vm370_vm0, %v8430_v1  ;;  %v11127_v41 = vor.u32 %v11582_v34, %v11124_v9  ;;  %v11010_v43 = vld [vmem:[#allocation2 + $0xb0] sm:$0xf] }
 0xcb8   : > { %8183 = vst [vmem:[#allocation2 + $0x18] sm:$0xff] %v8167_v63  ;;  %v8266_v60 = vpop.permute.xlu0 %8265  ;;  %v8132_v14 = vpop.permute.xlu2 %8131 }
 0xcb9   : > { %8185 = vst [vmem:[#allocation2 + $0x24] sm:$0xff] %v8169_v4  ;;  %v8270_v27 = vsel %vm416_vm10, %v14775_v3, %v8266_v60  ;;  %v8140_v54 = vsel %vm347_vm12, %v14739_v31, %v8132_v14  ;;  %v10954_v58 = vld [vmem:[#allocation2 + $0x48] sm:$0xf]  ;;  %v11540_v0 = vld [vmem:[#allocation2 + $0x4c] sm:$0xf]  ;;  %v8468_v40 = vpop.permute.xlu1 %8467  ;;  %v8607_v14 = vunpack.c.l.b16 %v8591_v6 }
 0xcba   : > { %v8287_v32 = vunpack.c.l.b16 %v8270_v27  ;;  %v8290_v8 = vunpack.c.h.b16 %v8270_v27  ;;  %v8153_v52 = vunpack.c.l.b16 %v8140_v54  ;;  %v8156_v13 = vunpack.c.h.b16 %v8140_v54  ;;  %v11541_v12 = vld [vmem:[#allocation2 + $0x50] sm:$0xf0]  ;;  %9051 = vmatpush.bf16.msrb.mxu3 %v11027_v56  ;;  %v10956_v11 = vld [vmem:[#allocation2 + $0x54] sm:$0xf0]  ;;  %9093 = vmatpush.bf16.msra.mxu2 %v11031_v59  ;;  %v11538_v31 = vld [vmem:[#allocation2 + $0x38] sm:$0xf0] }
 0xcbb   : > { %v10955_v28 = vor.u32 %v11541_v12, %v10954_v58  ;;  %v10959_v15 = vor.u32 %v11540_v0, %v10956_v11  ;;  %v8473_v3 = vsel %vm525_vm6, %v14823_v2, %v8468_v40  ;;  %v10943_v35 = vor.u32 %v11538_v31, %v10942_v55  ;;  %v11532_v54 = vld [vmem:[#allocation2 + $0x8] sm:$0xf0]  ;;  %v10920_v58 = vld [vmem:[#allocation2 + $0xc] sm:$0xf0]  ;;  %v11122_v55 = vld [vmem:[#allocation2 + $0x198] sm:$0xf] }
 0xcbc   : > { %v8296_v23 = vpack.c.b16 %v8287_v32, %v8287_v32  ;;  %v8298_v49 = vpack.c.b16 %v8290_v8, %v8290_v8  ;;  %v8164_v7 = vpack.c.b16 %v8153_v52, %v8153_v52  ;;  %v8166_v62 = vpack.c.b16 %v8156_v13, %v8156_v13  ;;  %v11529_v32 = vld [vmem:[%s15028_s6 + $0x8] sm:$0xf0] }
 0xcbd   : > { %9035 = vmatpush.bf16.msra.mxu1 %v10955_v28  ;;  %9077 = vmatpush.bf16.msrb.mxu0 %v10959_v15  ;;  %v8481_v2 = vunpack.c.l.b16 %v8473_v3  ;;  %v8484_v57 = vunpack.c.h.b16 %v8473_v3  ;;  %v8610_v56 = vunpack.c.h.b16 %v8591_v6  ;;  %v10919_v8 = vor.u32 %v11532_v54, %v10918_v22 }
 0xcbe   : > { %8312 = vst.msk [vmem:[#allocation2 + $0x80] sm:$0xf] %vm370_vm0, %v8296_v23  ;;  %9052 = vmatpush.bf16.msrb.mxu3 %v11015_v48  ;;  %9094 = vmatpush.bf16.msra.mxu2 %v11019_v50  ;;  %v10923_v52 = vor.u32 %v11531_v38, %v10920_v58  ;;  %v11123_v13 = vor.u32 %v11583_v25, %v11122_v55  ;;  %v11578_v50 = vld [vmem:[#allocation2 + $0x178] sm:$0xf0] }
 0xcbf   : > { %8314 = vst.msk [vmem:[#allocation2 + $0x8c] sm:$0xf] %vm370_vm0, %v8298_v49  ;;  %v8492_v42 = vpack.c.b16 %v8481_v2, %v8481_v2  ;;  %v8494_v39 = vpack.c.b16 %v8484_v57, %v8484_v57  ;;  %v10930_v53 = vld [vmem:[#allocation2 + $0x18] sm:$0xf]  ;;  %v11534_v1 = vld [vmem:[#allocation2 + $0x1c] sm:$0xf] }
 0xcc0   : > { %8180 = vst.msk [vmem:[#allocation2 + $0x8] sm:$0xf] %vm370_vm0, %v8164_v7  ;;  %v8406_v19 = vpop.permute.xlu0 %8405  ;;  %v11535_v46 = vld [vmem:[#allocation2 + $0x20] sm:$0xf0]  ;;  %v10932_v36 = vld [vmem:[#allocation2 + $0x24] sm:$0xf0] }
 0xcc1   : > { %8182 = vst.msk [vmem:[#allocation2 + $0x14] sm:$0xf] %vm370_vm0, %v8166_v62  ;;  %9036 = vmatpush.bf16.msra.mxu1 %v10943_v35  ;;  %9078 = vmatpush.bf16.msrb.mxu0 %v10947_v5  ;;  %v8412_v63 = vsel %vm491_vm7, %v14877_v44, %v8406_v19  ;;  %v10931_v4 = vor.u32 %v11535_v46, %v10930_v53  ;;  %v14937_v45 = vpop.permute.xlu1 %8583  ;;  %v11106_v49 = vld [vmem:[#allocation2 + $0x170] sm:$0xf]  ;;  %v11530_v62 = vld [vmem:[%s15028_s6 + $0x10] sm:$0xf0] }
 0xcc2   : > { %9107 = vmatpush.bf16.msra.mxu3 %v11127_v41  ;;  %v10935_v21 = vor.u32 %v11534_v1, %v10932_v36  ;;  %8508 = vst.msk [vmem:[#allocation2 + $0x128] sm:$0xf] %vm370_vm0, %v8492_v42  ;;  %v8423_v16 = vunpack.c.l.b16 %v8412_v63  ;;  %v8426_v51 = vunpack.c.h.b16 %v8412_v63  ;;  %v8592_v60 = vsel %vm588_vm2, %v14905_v24, %v14937_v45  ;;  %9095 = vmatmul.bf16.vlgmr.msra.gmra.mxu2 %v14927_v29  ;;  %v10906_v24 = vld [vmem:[%s15028_s6] sm:$0xf] }
 0xcc3   : > { %9053 = vmatmul.bf16.vlgmr.msrb.gmra.mxu3 %v14927_v29  ;;  %8510 = vst.msk [vmem:[#allocation2 + $0x134] sm:$0xf] %vm370_vm0, %v8494_v39  ;;  %v8608_v44 = vunpack.c.l.b16 %v8592_v60  ;;  %v8611_v59 = vunpack.c.h.b16 %v8592_v60  ;;  %v14954_v12 = vor.u32 %v11529_v32, %v10906_v24  ;;  %v11107_v39 = vor.u32 %v11578_v50, %v11106_v49  ;;  %v10998_v60 = vld [vmem:[#allocation2 + $0x98] sm:$0xf] }
 0xcc4   : > { %v8432_v34 = vpack.c.b16 %v8423_v16, %v8423_v16  ;;  %v8434_v27 = vpack.c.b16 %v8426_v51, %v8426_v51 }
 0xcc5   : > { %9037 = vmatpush.bf16.msra.mxu1 %v10931_v4  ;;  %9079 = vmatpush.bf16.msrb.mxu0 %v10935_v21  ;;  %v8619_v0 = vpack.c.b16 %v8608_v44, %v8607_v14  ;;  %v8621_v40 = vpack.c.b16 %v8611_v59, %v8610_v56  ;;  %v11094_v21 = vld [vmem:[#allocation2 + $0x158] sm:$0xf]  ;;  %v11551_v14 = vld [vmem:[#allocation2 + $0xa0] sm:$0xf0]  ;;  %v10986_v54 = vld [vmem:[#allocation2 + $0x80] sm:$0xf] }
 0xcc6   : > { %8448 = vst.msk [vmem:[#allocation2 + $0x110] sm:$0xf] %vm370_vm0, %v8432_v34  ;;  %v11575_v56 = vld [vmem:[#allocation2 + $0x160] sm:$0xf0]  ;;  %v11082_v34 = vld [vmem:[#allocation2 + $0x140] sm:$0xf] }
 0xcc7   : > { %8450 = vst.msk [vmem:[#allocation2 + $0x11c] sm:$0xf] %vm370_vm0, %v8434_v27  ;;  %v11095_v38 = vor.u32 %v11575_v56, %v11094_v21  ;;  %v11572_v27 = vld [vmem:[#allocation2 + $0x148] sm:$0xf0] }
 0xcc8   : > { %8635 = vst [vmem:[#allocation2 + $0x180] sm:$0xff] %v8619_v0  ;;  %v8196_v11 = vpop.permute.xlu0 %8195  ;;  %v11548_v58 = vld [vmem:[#allocation2 + $0x88] sm:$0xf0] }
 0xcc9   : > { %8637 = vst [vmem:[#allocation2 + $0x18c] sm:$0xff] %v8621_v40  ;;  %9038 = vmatpush.bf16.msra.mxu1 %v10919_v8  ;;  %9080 = vmatpush.bf16.msrb.mxu0 %v10923_v52  ;;  %v8204_v9 = vsel %vm382_vm11, %v14727_v17, %v8196_v11  ;;  %v8202_v28 = vpop.permute.xlu1 %8201  ;;  %v11554_v17 = vld [vmem:[#allocation2 + $0xb8] sm:$0xf0]  ;;  %v11083_v40 = vor.u32 %v11572_v27, %v11082_v34  ;;  %v11070_v8 = vld [vmem:[#allocation2 + $0x128] sm:$0xf] }
 0xcca   : > { %v8217_v15 = vunpack.c.l.b16 %v8204_v9  ;;  %v8220_v3 = vunpack.c.h.b16 %v8204_v9  ;;  %v8206_v31 = vsel %vm382_vm11, %v14791_v47, %v8202_v28  ;;  %v10914_v47 = vld [vmem:[%s15028_s6 + $0x8] sm:$0xf]  ;;  %v11011_v19 = vor.u32 %v11554_v17, %v11010_v43  ;;  %v11569_v52 = vld [vmem:[#allocation2 + $0x130] sm:$0xf0]  ;;  %v11046_v43 = vld [vmem:[#allocation2 + $0xf8] sm:$0xf] }
 0xccb   : > { %v8223_v48 = vunpack.c.l.b16 %v8206_v31  ;;  %v8226_v30 = vunpack.c.h.b16 %v8206_v31  ;;  %v14976_v4 = vor.u32 %v11530_v62, %v10914_v47  ;;  %v10987_v32 = vor.u32 %v11548_v58, %v10986_v54  ;;  %v11545_v11 = vld [vmem:[#allocation2 + $0x70] sm:$0xf0]  ;;  %v11563_v17 = vld [vmem:[#allocation2 + $0x100] sm:$0xf0] }
 0xccc   : > { %9039 = vmatmul.bf16.vlgmr.msra.gmra.mxu1 %v14954_v12  ;;  %9081 = vmatmul.bf16.vlgmr.msrb.gmra.mxu0 %v14954_v12  ;;  %v8228_v10 = vpack.c.b16 %v8217_v15, %v8217_v15  ;;  %v8230_v23 = vpack.c.b16 %v8220_v3, %v8220_v3  ;;  %v11071_v3 = vor.u32 %v11569_v52, %v11070_v8  ;;  %v11615_v52 = vld [vmem:[%s11706_s10 + $0x8] sm:$0xff] }
 0xccd   : > { %9065 = vmatpush.bf16.msrb.mxu1 %v11123_v13  ;;  %v8232_v7 = vpack.c.b16 %v8223_v48, %v8223_v48  ;;  %v8234_v37 = vpack.c.b16 %v8226_v30, %v8226_v30  ;;  %v10974_v13 = vld [vmem:[#allocation2 + $0x68] sm:$0xf]  ;;  %v11058_v30 = vld [vmem:[#allocation2 + $0x110] sm:$0xf]  ;;  %v11047_v62 = vor.u32 %v11563_v17, %v11046_v43 }
 0xcce   : > { %8244 = vst.msk [vmem:[#allocation2 + $0x38] sm:$0xf] %vm370_vm0, %v8228_v10  ;;  %v11566_v10 = vld [vmem:[#allocation2 + $0x118] sm:$0xf0] }
 0xccf   : > { %8246 = vst.msk [vmem:[#allocation2 + $0x44] sm:$0xf] %vm370_vm0, %v8230_v23  ;;  %v11110_v2 = vld [vmem:[#allocation2 + $0x180] sm:$0xf]  ;;  %v11579_v57 = vld [vmem:[#allocation2 + $0x184] sm:$0xf] }
 0xcd0   : > { %8248 = vst.msk [vmem:[#allocation2 + $0x50] sm:$0xf] %vm370_vm0, %v8232_v7  ;;  %v8598_v41 = vpop.permute.xlu0 %8597  ;;  %v11580_v35 = vld [vmem:[#allocation2 + $0x188] sm:$0xf0]  ;;  %v11112_v42 = vld [vmem:[#allocation2 + $0x18c] sm:$0xf0]  ;;  %v11059_v7 = vor.u32 %v11566_v10, %v11058_v30 }
 0xcd1   : > { %8250 = vst.msk [vmem:[#allocation2 + $0x5c] sm:$0xf] %vm370_vm0, %v8234_v37  ;;  %v8604_v5 = vsel %vm593_vm13, %v14879_v61, %v8598_v41  ;;  %v11111_v53 = vor.u32 %v11580_v35, %v11110_v2  ;;  %v11115_v1 = vor.u32 %v11579_v57, %v11112_v42  ;;  %v8138_v6 = vpop.permute.xlu1 %8137  ;;  %v11560_v35 = vld [vmem:[#allocation2 + $0xe8] sm:$0xf0]  ;;  %v11616_v30 = vld [vmem:[%s11706_s10 + $0x18] sm:$0xff] }
 0xcd2   : > { %v8615_v46 = vunpack.c.l.b16 %v8604_v5  ;;  %v8618_v36 = vunpack.c.h.b16 %v8604_v5  ;;  %v8142_v63 = vsel %vm347_vm12, %v14798_v26, %v8138_v6  ;;  %v10999_v26 = vor.u32 %v11551_v14, %v10998_v60 }
 0xcd3   : > { %9066 = vmatpush.bf16.msrb.mxu1 %v11111_v53  ;;  %9108 = vmatpush.bf16.msra.mxu3 %v11115_v1  ;;  %v8159_v16 = vunpack.c.l.b16 %v8142_v63  ;;  %v8162_v51 = vunpack.c.h.b16 %v8142_v63  ;;  %v11034_v53 = vld [vmem:[#allocation2 + $0xe0] sm:$0xf]  ;;  %v11022_v63 = vld [vmem:[#allocation2 + $0xc8] sm:$0xf] }
 0xcd4   : > { %v8624_v61 = vpack.c.b16 %v8615_v46, %v8615_v46  ;;  %v8626_v44 = vpack.c.b16 %v8618_v36, %v8618_v36  ;;  %v11035_v1 = vor.u32 %v11560_v35, %v11034_v53  ;;  %v10926_v46 = vld [vmem:[#allocation2 + $0x8] sm:$0xf]  ;;  %v11533_v36 = vld [vmem:[#allocation2 + $0x10] sm:$0xf0] }
 0xcd5   : > { %v8168_v59 = vpack.c.b16 %v8159_v16, %v8159_v16  ;;  %v8170_v22 = vpack.c.b16 %v8162_v51, %v8162_v51  ;;  %v10950_v50 = vld [vmem:[#allocation2 + $0x38] sm:$0xf]  ;;  %v10927_v16 = vor.u32 %v11533_v36, %v10926_v46  ;;  %v11619_v53 = vld [vmem:[%s11706_s10 + $0x28] sm:$0xff] }
 0xcd6   : > { %8640 = vst.msk [vmem:[#allocation2 + $0x1a0] sm:$0xf] %vm370_vm0, %v8624_v61  ;;  %11133 = vmatmul.msk.bf16.vlgmr.msra.gmra.mxu3 %vm1950_vm14, %v14976_v4  ;;  %v11539_v47 = vld [vmem:[#allocation2 + $0x40] sm:$0xf0] }
 0xcd7   : > { %9115 = vmatpush.bf16.msra.mxu1 %v11011_v19  ;;  %9129 = vmatpush.bf16.msrb.mxu3 %v11107_v39  ;;  %8642 = vst.msk [vmem:[#allocation2 + $0x1ac] sm:$0xf] %vm370_vm0, %v8626_v44  ;;  %v10962_v23 = vld [vmem:[#allocation2 + $0x50] sm:$0xf]  ;;  %v10951_v57 = vor.u32 %v11539_v47, %v10950_v50  ;;  %v11557_v19 = vld [vmem:[#allocation2 + $0xd0] sm:$0xf0]  ;;  %v8718_v44 = vpop.permute.xlu2 %8717 }
 0xcd8   : > { %8184 = vst.msk [vmem:[#allocation2 + $0x20] sm:$0xf] %vm370_vm0, %v8168_v59  ;;  %v11542_v49 = vld [vmem:[#allocation2 + $0x58] sm:$0xf0]  ;;  %v11023_v21 = vor.u32 %v11557_v19, %v11022_v63 }
 0xcd9   : > { %8186 = vst.msk [vmem:[#allocation2 + $0x2c] sm:$0xf] %vm370_vm0, %v8170_v22  ;;  %v8596_v24 = vpop.permute.xlu1 %8595  ;;  %v10963_v37 = vor.u32 %v11542_v49, %v10962_v23  ;;  %v11617_v23 = vld [vmem:[%s11706_s10 + $0x20] sm:$0xff] }
 0xcda   : > { %v8601_v0 = vsel %vm593_vm13, %v14937_v45, %v8596_v24  ;;  %v10975_v45 = vor.u32 %v11545_v11, %v10974_v13 }
 0xcdb   : > { %9116 = vmatpush.bf16.msra.mxu1 %v10999_v26  ;;  %9130 = vmatpush.bf16.msrb.mxu3 %v11095_v38  ;;  %v8609_v55 = vunpack.c.l.b16 %v8601_v0  ;;  %v8612_v25 = vunpack.c.h.b16 %v8601_v0 }
 0xcdc   : > { %11132 = vmatmul.msk.bf16.vlgmr.msrb.gmra.mxu1 %vm1950_vm14, %v14976_v4 }
 0xcdd   : > { %v8620_v9 = vpack.c.b16 %v8609_v55, %v8609_v55  ;;  %v8622_v28 = vpack.c.b16 %v8612_v25, %v8612_v25  ;;  %v11130_v15 = vld [vmem:[#allocation2 + $0x1a0] sm:$0xf] }
 0xcde   : > { %v11584_v31 = vld [vmem:[#allocation2 + $0x1a8] sm:$0xf0] }
 0xcdf   : > { %9131 = vmatpush.bf16.msrb.mxu3 %v11083_v40  ;;  %9117 = vmatpush.bf16.msra.mxu1 %v10987_v32  ;;  %8636 = vst.msk [vmem:[#allocation2 + $0x188] sm:$0xf] %vm370_vm0, %v8620_v9  ;;  %v11131_v48 = vor.u32 %v11584_v31, %v11130_v15  ;;  %v10938_v39 = vld [vmem:[#allocation2 + $0x20] sm:$0xf] }
 0xce0   : > { %8638 = vst.msk [vmem:[#allocation2 + $0x194] sm:$0xf] %vm370_vm0, %v8622_v28  ;;  %v11536_v5 = vld [vmem:[#allocation2 + $0x28] sm:$0xf0]  ;;  %v11614_v32 = vld [vmem:[%s11706_s10] sm:$0xff] }
 0xce1   : > { %9149 = vmatpush.bf16.msra.mxu0 %v11131_v48  ;;  %v10939_v6 = vor.u32 %v11536_v5, %v10938_v39 }
 0xce3   : > { %9132 = vmatpush.bf16.msrb.mxu3 %v11071_v3  ;;  %9118 = vmatpush.bf16.msra.mxu1 %v10975_v45 }
 0xce6   : > { %v11118_v2 = vld [vmem:[#allocation2 + $0x188] sm:$0xf] }
 0xce7   : > { %9133 = vmatpush.bf16.msrb.mxu3 %v11059_v7  ;;  %9119 = vmatpush.bf16.msra.mxu1 %v10963_v37  ;;  %v11581_v41 = vld [vmem:[#allocation2 + $0x190] sm:$0xf0] }
 0xce8   : > { %v11119_v42 = vor.u32 %v11581_v41, %v11118_v2  ;;  %v11618_v2 = vld [vmem:[%s11706_s10 + $0x10] sm:$0xff] }
 0xcea   : > { %9150 = vmatpush.bf16.msra.mxu0 %v11119_v42 }
 0xceb   : > { %9134 = vmatpush.bf16.msrb.mxu3 %v11047_v62  ;;  %9120 = vmatpush.bf16.msra.mxu1 %v10951_v57 }
 0xced   : > { %11134 = vmatmul.msk.bf16.vlgmr.msra.gmra.mxu0 %vm1950_vm14, %v14976_v4 }
 0xcef   : > { %9135 = vmatpush.bf16.msrb.mxu3 %v11035_v1  ;;  %9121 = vmatpush.bf16.msra.mxu1 %v10939_v6 }
 0xcf3   : > { %9136 = vmatpush.bf16.msrb.mxu3 %v11023_v21  ;;  %9122 = vmatpush.bf16.msra.mxu1 %v10927_v16 }
 0xcf6   : > { %9137 = vmatmul.bf16.vlgmr.msrb.gmra.mxu3 %v14927_v29  ;;  %9123 = vmatmul.bf16.vlgmr.msra.gmra.mxu1 %v14954_v12  ;;  %v8723_v12 = vpop.permute.xlu0 %8722 }
 0xd45   : > { %v9096_v59 = vpop.f32.mrf.mxu2 }
 0xd46   : > { %v9054_v51 = vpop.f32.mrf.mxu3 }
 0xd49   : > { %v9040_v60 = vpop.f32.mrf.mxu1  ;;  %v9082_v14 = vpop.f32.mrf.mxu0 }
 0xd4a   : > { %v9041_v22 = vadd.f32 %v9040_v60, %v8718_v44  ;;  %v9083_v26 = vadd.f32 %v9082_v14, %v8718_v44 }
 0xd4c   : > { %v9055_v4 = vadd.f32 %v9054_v51, %v9041_v22  ;;  %v9097_v38 = vadd.f32 %v9096_v59, %v9083_v26 }
 0xd4d   : > { %v9098_v25 = vpop.f32.mrf.mxu2 }
 0xd4e   : > { %v9056_v56 = vpop.f32.mrf.mxu3 }
 0xd51   : > { %v9042_v61 = vpop.f32.mrf.mxu1  ;;  %v9084_v34 = vpop.f32.mrf.mxu0 }
 0xd52   : > { %v9043_v24 = vadd.f32 %v9042_v61, %v8723_v12  ;;  %v9085_v0 = vadd.f32 %v9084_v34, %v8723_v12 }
 0xd54   : > { %v9057_v11 = vadd.f32 %v9056_v56, %v9043_v24  ;;  %v9099_v9 = vadd.f32 %v9098_v25, %v9085_v0 }
 0xd59   : > { %v9068_v27 = vpop.f32.mrf.mxu1  ;;  %v9110_v54 = vpop.f32.mrf.mxu3 }
 0xd5a   : > { %v9069_v29 = vadd.f32 %v9068_v27, %v9055_v4  ;;  %v9111_v58 = vadd.f32 %v9110_v54, %v9097_v38 }
 0xd5c   : > { %v9157_v40 = vmul.f32 %v9069_v29, %v11889_v18  ;;  %v9158_v55 = vmul.f32 %v9111_v58, %v11891_v20 }
 0xd5e   : > { %v9163_v8 = vadd.f32 %v11614_v32, %v9157_v40  ;;  %v9164_v13 = vadd.f32 %v11615_v52, %v9158_v55 }
 0xd60   : > { %9169 = vst [vmem:[%s15001_s18] sm:$0xff] %v9163_v8 }
 0xd61   : > { %9170 = vst [vmem:[%s15001_s18 + $0x8] sm:$0xff] %v9164_v13  ;;  %v9070_v28 = vpop.f32.mrf.mxu1  ;;  %v9112_v15 = vpop.f32.mrf.mxu3 }
 0xd62   : > { %v9071_v3 = vadd.f32 %v9070_v28, %v9057_v11  ;;  %v9113_v31 = vadd.f32 %v9112_v15, %v9099_v9 }
 0xd64   : > { %v9160_v45 = vmul.f32 %v9071_v3, %v11889_v18  ;;  %v9161_v48 = vmul.f32 %v9113_v31, %v11891_v20 }
 0xd66   : > { %v9166_v10 = vadd.f32 %v11616_v30, %v9160_v45  ;;  %v9167_v49 = vadd.f32 %v11617_v23, %v9161_v48 }
 0xd68   : > { %9173 = vst [vmem:[%s15001_s18 + $0x18] sm:$0xff] %v9166_v10 }
 0xd69   : > { %9174 = vst [vmem:[%s15001_s18 + $0x20] sm:$0xff] %v9167_v49 }
 0xd6a   : > { %v9152_v17 = vpop.f32.mrf.mxu0 }
 0xd72   : > { %v9154_v42 = vpop.f32.mrf.mxu0 }
 0xd73   : > { %v9124_v7 = vpop.f32.mrf.mxu1 }
 0xd74   : > { %v9125_v37 = vadd.f32 %v9124_v7, %v8718_v44 }
 0xd79   : > { %v9138_v43 = vpop.f32.mrf.mxu3 }
 0xd7a   : > { %v9139_v50 = vadd.f32 %v9138_v43, %v9125_v37 }
 0xd7b   : > { %v9126_v62 = vpop.f32.mrf.mxu1 }
 0xd7c   : > { %v9153_v47 = vadd.f32 %v9152_v17, %v9139_v50  ;;  %v9127_v20 = vadd.f32 %v9126_v62, %v8723_v12 }
 0xd7e   : > { %v9159_v18 = vmul.f32 %v9153_v47, %v11897_v33 }
 0xd80   : > { %v9165_v57 = vadd.f32 %v11618_v2, %v9159_v18 }
 0xd81   : > { %v9140_v41 = vpop.f32.mrf.mxu3 }
 0xd82   : > { %9172 = vst.msk [vmem:[%s15001_s18 + $0x10] sm:$0xff] %vm9171_vm15, %v9165_v57  ;;  %v9141_v35 = vadd.f32 %v9140_v41, %v9127_v20 }
 0xd84   : > { %v9155_v39 = vadd.f32 %v9154_v42, %v9141_v35 }
 0xd86   : > { %v9162_v5 = vmul.f32 %v9155_v39, %v11897_v33 }
 0xd88   : > { %v9168_v1 = vadd.f32 %v11619_v53, %v9162_v5 }
 0xd8a   : > { %9175 = vst.msk [vmem:[%s15001_s18 + $0x28] sm:$0xff] %vm9171_vm15, %v9168_v1 }
 0xd8b PF: > { %s15091_s28 = sld [smem:[#allocation3_spill]] }
 0xd91   : > { %s18_s27 = sadd.s32 1, %s15091_s28  }
 0xd92   : > { %p15_p4 = scmp.ge.s32.totalorder %s18_s27, 4  }
 0xd94   :  { %17 = sbr.rel (!%p15_p4) target bundleno = 5 (0x5), region = 92 }

</bundles_post_ra>
